<compile_context>
chip_gen: v7x
topology: tpu7x:2x2x1
jax: 0.10.0
libtpu: 0.0.40
codegen_flags: <defaults>
</compile_context>

<pallas_src>
import math

import jax
import jax.numpy as jnp
import numpy as np
from jax.experimental import pallas as pl
from jax.experimental.pallas import tpu as pltpu


_LOG_CLAMP = math.log(1e-10)  # log of the 1e-10 probability clamp in the reference


def _log_sigmoid(x):
    # stable log(sigmoid(x)) = min(x, 0) - log(1 + exp(-|x|))
    # (log1p would be marginally better near 0, but the 1e-10 clamp dominates)
    return jnp.minimum(x, 0.0) - jnp.log(1.0 + jnp.exp(-jnp.abs(x)))


def _round128(n):
    return max(128, -(-n // 128) * 128)


def _has_two_tensorcores():
    """True for chips with 2 TensorCores per device (v4/v5p megacore, v7x)."""
    try:
        kind = jax.devices()[0].device_kind.lower()
    except Exception:
        return False
    return any(t in kind for t in ("v4", "v5p", "v7"))


def _edge_tiles(num_edges, tile_e):
    """Number of edge tiles (and padded edge count). Only bump to an even tile
    count when the chip actually has 2 TensorCores to balance across."""
    n = max(1, -(-num_edges // tile_e))
    if n > 1 and n % 2 and _has_two_tensorcores():
        n += 1
    return n, n * tile_e


def _vmem_limit_bytes(tile_e, dims, cbytes):
    """Generous VMEM request: double-buffered edge tiles + single-buffered weights
    + f32/compute-dtype intermediates, with 2x + 8 MiB margin, capped at 48 MiB
    (~75% of v7x's 64 MiB physical VMEM per TensorCore)."""
    Dp, H1, H2, H3, H4 = dims
    edge_in = 2 * 2 * tile_e * Dp * cbytes            # src/dst tiles, double-buffered
    out = 2 * 2 * tile_e * 4                          # (2, TE) f32, double-buffered
    weights = (3 * Dp * H1 + H1 * H2 + H2 * H3 + H3 * H4 + H4) * cbytes
    biases = 4 * (H1 + H2 + H3 + H4 + 1)
    inter = tile_e * (3 * Dp + H1 + H2 + H3 + H4) * (4 + cbytes)
    est = edge_in + out + weights + biases + inter
    return int(min(max(2 * est + (8 << 20), 32 << 20), 48 << 20))


# ----------------------------------------------------------------------------
# Pallas kernel: fused LinkRepresentation + LinkClassifierMLP + log-prob epilogue
# ----------------------------------------------------------------------------
def _slgnn_head_kernel(
    src_ref, dst_ref,                         # (TE, Dp) edge endpoint embeddings
    wf1_ref, bf1_ref,                         # fusion Linear, concat folded: (3Dp,H1)
    wf2_ref, bf2_ref,                         # fusion Linear(H1 -> H2)
    wm1_ref, bm1_ref,                         # mlp Linear(H2 -> H3)
    wm2_ref, bm2_ref,                         # mlp Linear(H3 -> H4)
    wm3_ref, bm3_ref,                         # mlp Linear(H4 -> 1), weight as (1, H4)
    out_ref,                                  # (2, TE) [log(1-p); log(p)], lane-dense
):
    cdt = wf1_ref.dtype                       # MXU compute dtype (bf16 or f32)

    src = src_ref[...]
    dst = dst_ref[...]

    # LinkRepresentation fusion Linear(4D -> 2D):
    #   [src, dst, src-dst, src*dst] @ Wf1 == [src, dst, src*dst] @ [Ws+Wd'; Wd-Wd'; Wp]
    # (diff block folded in the wrapper). The concat is 128-lane aligned, so this is
    # a single K = 3*Dp MXU matmul with internal accumulation (no f32 VPU adds).
    x3 = jnp.concatenate([src, dst, src * dst], axis=-1)            # (TE, 3*Dp)
    h = jnp.dot(x3, wf1_ref[...], preferred_element_type=jnp.float32)
    h = jnp.maximum(h + bf1_ref[...], 0.0).astype(cdt)              # ReLU (Dropout=id)

    link = jnp.dot(h, wf2_ref[...], preferred_element_type=jnp.float32)
    link = jnp.maximum(link + bf2_ref[...], 0.0).astype(cdt)        # ReLU

    # LinkClassifierMLP.layers
    m1 = jnp.dot(link, wm1_ref[...], preferred_element_type=jnp.float32)
    m1 = jnp.maximum(m1 + bm1_ref[...], 0.0).astype(cdt)
    m2 = jnp.dot(m1, wm2_ref[...], preferred_element_type=jnp.float32)
    m2 = jnp.maximum(m2 + bm2_ref[...], 0.0).astype(cdt)

    # final Linear(D -> 1) as (1, H4) x (TE, H4)^T -> logits laid out lane-dense (1,TE)
    # (the implicit m2 transpose rides the otherwise-idle XLU slot)
    logit = jax.lax.dot_general(
        wm3_ref[...], m2,
        dimension_numbers=(((1,), (1,)), ((), ())),
        preferred_element_type=jnp.float32,
    ) + bm3_ref[...]

    # clamp(logit, +/-1e10) -> sigmoid -> clamp(prob, 1e-10, 1) -> log, in stable form:
    # log(clamp(sigmoid(x), 1e-10, 1)) == max(log_sigmoid(x), log(1e-10))
    out_ref[0:1, :] = jnp.maximum(_log_sigmoid(-logit), _LOG_CLAMP)  # log(1-p)
    out_ref[1:2, :] = jnp.maximum(_log_sigmoid(logit), _LOG_CLAMP)   # log(p)


# ----------------------------------------------------------------------------
# Wrapper: weight prep + pallas_call
# ----------------------------------------------------------------------------
def prepare_kernel_operands(params, compute_dtype):
    """Fold wf1's diff block into the src/dst blocks, stack [src;dst;prod] blocks along
    K, zero-pad every feature dim to a multiple of 128 (lane density) and cast matmul
    weights to the MXU compute dtype. Biases stay f32. Padding is exact zeros, so the
    padded network computes identical values on the original coordinates."""
    wf1 = params["wf1"]                       # (4D, 2D), rows = [src, dst, diff, prod]
    D = wf1.shape[0] // 4
    H1 = wf1.shape[1]
    w_src, w_dst, w_diff, w_prod = wf1[:D], wf1[D:2 * D], wf1[2 * D:3 * D], wf1[3 * D:]
    w_src = w_src + w_diff                    # W_src' = W_src + W_diff
    w_dst = w_dst - w_diff                    # W_dst' = W_dst - W_diff

    Dp = _round128(D)
    H1p = _round128(H1)
    H2p = _round128(params["wf2"].shape[1])
    H3p = _round128(params["wm1"].shape[1])
    H4p = _round128(params["wm2"].shape[1])

    def padw(w, rp, cp):
        r, c = w.shape
        return jnp.pad(w, ((0, rp - r), (0, cp - c)))

    def padb(b, cp):
        return jnp.pad(b, ((0, 0), (0, cp - b.shape[1]))).astype(jnp.float32)

    cd = compute_dtype
    w_fused = jnp.concatenate(
        [padw(w_src, Dp, H1p), padw(w_dst, Dp, H1p), padw(w_prod, Dp, H1p)], axis=0
    ).astype(cd)                              # (3*Dp, H1p)

    ops = (
        w_fused, padb(params["bf1"], H1p),
        padw(params["wf2"], H1p, H2p).astype(cd), padb(params["bf2"], H2p),
        padw(params["wm1"], H2p, H3p).astype(cd), padb(params["bm1"], H3p),
        padw(params["wm2"], H3p, H4p).astype(cd), padb(params["bm2"], H4p),
        padw(params["wm3"], 1, H4p).astype(cd),   # (1, H4p) row
        params["bm3"].astype(jnp.float32),        # (1, 1)
    )
    dims = (Dp, H1p, H2p, H3p, H4p)
    return ops, dims


def slgnn_head_pallas(src_emb, dst_emb, params, *, tile_e=1024,
                      compute_dtype=jnp.bfloat16):
    """Fused link-prediction head on TPU. Returns (E, 2) = [log(1-p), log(p)]."""
    E, _ = src_emb.shape
    ops, dims = prepare_kernel_operands(params, compute_dtype)
    Dp = dims[0]

    n_tiles, e_pad = _edge_tiles(E, tile_e)

    def prep_edges(x):
        if x.dtype != compute_dtype:
            x = x.astype(compute_dtype)
        pr, pc = e_pad - x.shape[0], Dp - x.shape[1]
        if pr or pc:
            x = jnp.pad(x, ((0, pr), (0, pc)))
        return x

    src_p = prep_edges(src_emb)
    dst_p = prep_edges(dst_emb)

    edge_spec = pl.BlockSpec((tile_e, Dp), lambda i: (i, 0))
    # weights/biases: single full block, grid-invariant -> single-buffered (no wasted
    # double-buffer VMEM)
    weight_specs = [
        pl.BlockSpec(w.shape, lambda i: (0, 0), pipeline_mode=pl.Buffered(1))
        for w in ops
    ]
    out_spec = pl.BlockSpec((2, tile_e), lambda i: (0, i))          # lane-dense output

    cbytes = jnp.dtype(compute_dtype).itemsize
    vmem_limit = _vmem_limit_bytes(tile_e, dims, cbytes)

    out = pl.pallas_call(
        _slgnn_head_kernel,
        out_shape=jax.ShapeDtypeStruct((2, e_pad), jnp.float32),
        grid_spec=pltpu.PrefetchScalarGridSpec(
            num_scalar_prefetch=0,
            grid=(n_tiles,),
            in_specs=[edge_spec, edge_spec] + weight_specs,
            out_specs=out_spec,
        ),
        compiler_params=pltpu.CompilerParams(
            dimension_semantics=("parallel",),
            vmem_limit_bytes=vmem_limit,
        ),
    )(src_p, dst_p, *ops)

    # (2, E_pad) with edges on lanes -> (E, 2) [log(1-p), log(p)]
    return out[:, :E].T


# ----------------------------------------------------------------------------
# Parameter construction (deterministic, mirrors the nn.Module __init__ shapes)
# ----------------------------------------------------------------------------
def init_params(key, dim_hidden):
    """dim_hidden == dim_out_final == embed_dim of LinkRepresentation.

    fusion: Linear(4*D, 2*D), Linear(2*D, 4*D)
    mlp   : dim = 4*D -> Linear(4*D, 2*D), Linear(2*D, D), Linear(D, 1)

    NOTE on layout: weights are stored (in_features, out_features) for direct x @ W;
    biases as (1, out); the final weight wm3 is stored as a (1, D) row. Callers porting
    raw PyTorch Linear weights (out, in) MUST transpose them first.
    """
    D = dim_hidden
    ks = jax.random.split(key, 10)

    def lin(kw, kb, fin, fout):
        scale = 1.0 / jnp.sqrt(fin)
        w = jax.random.uniform(kw, (fin, fout), jnp.float32, -scale, scale)
        b = jax.random.uniform(kb, (1, fout), jnp.float32, -scale, scale)
        return w, b

    wf1, bf1 = lin(ks[0], ks[1], 4 * D, 2 * D)
    wf2, bf2 = lin(ks[2], ks[3], 2 * D, 4 * D)
    wm1, bm1 = lin(ks[4], ks[5], 4 * D, 2 * D)
    wm2, bm2 = lin(ks[6], ks[7], 2 * D, D)
    wm3_full, bm3 = lin(ks[8], ks[9], D, 1)
    wm3 = wm3_full.T                       # (1, D) row for the final layer

    return dict(wf1=wf1, bf1=bf1, wf2=wf2, bf2=bf2,
                wm1=wm1, bm1=bm1, wm2=wm2, bm2=bm2,
                wm3=wm3, bm3=bm3)


# ----------------------------------------------------------------------------
# Plain-JAX glue mirroring SLGNN.train_prediction (post-aggregation)
# ----------------------------------------------------------------------------
def slgnn_train_prediction(node_reps, adj_pos, adj_neg, params, *,
                           tile_e=1024, compute_dtype=jnp.bfloat16):
    # TODO(synk): agg1/agg2 (LayerAggregator) not provided -> node_reps used as-is.
    # TODO(synk): the row gather stays in XLA (jnp.take); a per-row in-kernel DMA
    # gather (scalar-prefetched indices) loses to XLA's batched gather at these sizes.
    E = adj_pos.shape[1] + adj_neg.shape[1]
    D = node_reps.shape[1]
    Dp = _round128(D)
    _, e_pad = _edge_tiles(E, tile_e)

    # Cast + lane-pad node features ONCE, then gather directly in the compute dtype;
    # pad the indices (filler rows gather node 0) so the (E, D) edge tensors are never
    # re-padded/re-copied through HBM by the wrapper.
    node_c = node_reps.astype(compute_dtype)
    if Dp != D:
        node_c = jnp.pad(node_c, ((0, 0), (0, Dp - D)))
    src_idx = jnp.concatenate([adj_pos[0], adj_neg[0]], axis=0).astype(jnp.int32)
    dst_idx = jnp.concatenate([adj_pos[1], adj_neg[1]], axis=0).astype(jnp.int32)
    pad = e_pad - E
    if pad:
        src_idx = jnp.pad(src_idx, (0, pad))
        dst_idx = jnp.pad(dst_idx, (0, pad))
    src_emb = jnp.take(node_c, src_idx, axis=0)
    dst_emb = jnp.take(node_c, dst_idx, axis=0)

    out = slgnn_head_pallas(src_emb, dst_emb, params,
                            tile_e=tile_e, compute_dtype=compute_dtype)
    return out[:E]


# Pure-JAX reference (literal translation of the PyTorch forward) for validation
def reference_head(src, dst, p):
    combined = jnp.concatenate([src, dst, src - dst, src * dst], axis=1)
    h = jnp.maximum(combined @ p["wf1"] + p["bf1"], 0.0)
    link = jnp.maximum(h @ p["wf2"] + p["bf2"], 0.0)
    m1 = jnp.maximum(link @ p["wm1"] + p["bm1"], 0.0)
    m2 = jnp.maximum(m1 @ p["wm2"] + p["bm2"], 0.0)
    logit = jnp.clip(m2 @ p["wm3"].T + p["bm3"], -1e10, 1e10)
    pp = jax.nn.sigmoid(logit)
    probs = jnp.clip(jnp.concatenate([1.0 - pp, pp], axis=1), 1e-10, 1.0)
    return jnp.log(probs)


if __name__ == "__main__":
    key = jax.random.PRNGKey(0)
    k_reps, k_pos, k_neg, k_params = jax.random.split(key, 4)

    num_nodes = 32
    dim_hidden = 32          # dim_out_final of SLGNN (small for the example)
    n_pos = 8
    n_neg = 8

    node_reps = jax.random.normal(k_reps, (num_nodes, dim_hidden), jnp.float32)
    adj_pos = jax.random.randint(k_pos, (2, n_pos), 0, num_nodes, jnp.int32)
    adj_neg = jax.random.randint(k_neg, (2, n_neg), 0, num_nodes, jnp.int32)

    params = init_params(k_params, dim_hidden)

    # pure-JAX reference (highest matmul precision so it is truly f32-accurate)
    src_idx = jnp.concatenate([adj_pos[0], adj_neg[0]], axis=0)
    dst_idx = jnp.concatenate([adj_pos[1], adj_neg[1]], axis=0)
    src_emb = jnp.take(node_reps, src_idx, axis=0)
    dst_emb = jnp.take(node_reps, dst_idx, axis=0)
    with jax.default_matmul_precision("highest"):
        ref = jax.block_until_ready(reference_head(src_emb, dst_emb, params))

    # f32 compute path: tight check
    out_f32 = jax.block_until_ready(
        slgnn_train_prediction(node_reps, adj_pos, adj_neg, params,
                               compute_dtype=jnp.float32))
    np.testing.assert_allclose(np.asarray(out_f32), np.asarray(ref),
                               rtol=1e-4, atol=1e-4)

    # bf16 compute path (default / fast MXU path): loose check
    out_bf16 = jax.block_until_ready(
        slgnn_train_prediction(node_reps, adj_pos, adj_neg, params))
    np.testing.assert_allclose(np.asarray(out_bf16), np.asarray(ref),
                               rtol=1e-1, atol=5e-2)

    print("KERNEL_OK")
</pallas_src>

<mosaic_0001>
module attributes {stable_mosaic.version = 11 : i64} {
  func.func @_slgnn_head_kernel(%arg0: i32, %arg1: memref<1024x128xf32, #tpu.memory_space<vmem>>, %arg2: memref<1024x128xf32, #tpu.memory_space<vmem>>, %arg3: memref<384x128xf32, #tpu.memory_space<vmem>>, %arg4: memref<1x128xf32, #tpu.memory_space<vmem>>, %arg5: memref<128x128xf32, #tpu.memory_space<vmem>>, %arg6: memref<1x128xf32, #tpu.memory_space<vmem>>, %arg7: memref<128x128xf32, #tpu.memory_space<vmem>>, %arg8: memref<1x128xf32, #tpu.memory_space<vmem>>, %arg9: memref<128x128xf32, #tpu.memory_space<vmem>>, %arg10: memref<1x128xf32, #tpu.memory_space<vmem>>, %arg11: memref<1x128xf32, #tpu.memory_space<vmem>>, %arg12: memref<1x1xf32, #tpu.memory_space<vmem>>, %arg13: memref<2x1024xf32, #tpu.memory_space<vmem>>) attributes {dimension_semantics = [#tpu.dimension_semantics<parallel>], iteration_bounds = array<i64: 1>, scalar_prefetch = 0 : i64, scratch_operands = 0 : i64, tpu.core_type = #tpu.core_type<tc>, window_params = [{transform_indices = @transform_0, window_bounds = array<i64: 1024, 128>}, {transform_indices = @transform_1, window_bounds = array<i64: 1024, 128>}, {pipeline_mode = #tpu.pipeline_mode<synchronous>, transform_indices = @transform_2, window_bounds = array<i64: 384, 128>}, {pipeline_mode = #tpu.pipeline_mode<synchronous>, transform_indices = @transform_3, window_bounds = array<i64: 1, 128>}, {pipeline_mode = #tpu.pipeline_mode<synchronous>, transform_indices = @transform_4, window_bounds = array<i64: 128, 128>}, {pipeline_mode = #tpu.pipeline_mode<synchronous>, transform_indices = @transform_5, window_bounds = array<i64: 1, 128>}, {pipeline_mode = #tpu.pipeline_mode<synchronous>, transform_indices = @transform_6, window_bounds = array<i64: 128, 128>}, {pipeline_mode = #tpu.pipeline_mode<synchronous>, transform_indices = @transform_7, window_bounds = array<i64: 1, 128>}, {pipeline_mode = #tpu.pipeline_mode<synchronous>, transform_indices = @transform_8, window_bounds = array<i64: 128, 128>}, {pipeline_mode = #tpu.pipeline_mode<synchronous>, transform_indices = @transform_9, window_bounds = array<i64: 1, 128>}, {pipeline_mode = #tpu.pipeline_mode<synchronous>, transform_indices = @transform_10, window_bounds = array<i64: 1, 128>}, {pipeline_mode = #tpu.pipeline_mode<synchronous>, transform_indices = @transform_11, window_bounds = array<i64: 1, 1>}, {transform_indices = @transform_12, window_bounds = array<i64: 2, 1024>}]} {
    %c0 = arith.constant 0 : index
    %c0_0 = arith.constant 0 : index
    %0 = vector.load %arg1[%c0, %c0_0] : memref<1024x128xf32, #tpu.memory_space<vmem>>, vector<1024x128xf32>
    %c0_1 = arith.constant 0 : index
    %c0_2 = arith.constant 0 : index
    %1 = vector.load %arg2[%c0_1, %c0_2] : memref<1024x128xf32, #tpu.memory_space<vmem>>, vector<1024x128xf32>
    %2 = arith.mulf %0, %1 : vector<1024x128xf32>
    %3 = tpu.concatenate %0, %1, %2 in 1 : vector<1024x128xf32>, vector<1024x128xf32>, vector<1024x128xf32> -> vector<1024x384xf32>
    %c0_3 = arith.constant 0 : index
    %c0_4 = arith.constant 0 : index
    %4 = vector.load %arg3[%c0_3, %c0_4] : memref<384x128xf32, #tpu.memory_space<vmem>>, vector<384x128xf32>
    %cst = arith.constant dense<0.000000e+00> : vector<1024x128xf32>
    %5 = tpu.matmul %3, %4, %cst {dimension_numbers = #tpu.dot_dimension_numbers<[1], [0], [0], [1], [0, 0, 1, 1], [], []>} : vector<1024x384xf32>, vector<384x128xf32>, vector<1024x128xf32> -> vector<1024x128xf32>
    %c0_5 = arith.constant 0 : index
    %c0_6 = arith.constant 0 : index
    %6 = vector.load %arg4[%c0_5, %c0_6] : memref<1x128xf32, #tpu.memory_space<vmem>>, vector<1x128xf32>
    %7 = vector.broadcast %6 : vector<1x128xf32> to vector<1024x128xf32>
    %8 = arith.addf %5, %7 : vector<1024x128xf32>
    %cst_7 = arith.constant 0.000000e+00 : f32
    %9 = vector.broadcast %cst_7 : f32 to vector<1024x128xf32>
    %10 = arith.maximumf %8, %9 : vector<1024x128xf32>
    %c0_8 = arith.constant 0 : index
    %c0_9 = arith.constant 0 : index
    %11 = vector.load %arg5[%c0_8, %c0_9] : memref<128x128xf32, #tpu.memory_space<vmem>>, vector<128x128xf32>
    %cst_10 = arith.constant dense<0.000000e+00> : vector<1024x128xf32>
    %12 = tpu.matmul %10, %11, %cst_10 {dimension_numbers = #tpu.dot_dimension_numbers<[1], [0], [0], [1], [0, 0, 1, 1], [], []>} : vector<1024x128xf32>, vector<128x128xf32>, vector<1024x128xf32> -> vector<1024x128xf32>
    %c0_11 = arith.constant 0 : index
    %c0_12 = arith.constant 0 : index
    %13 = vector.load %arg6[%c0_11, %c0_12] : memref<1x128xf32, #tpu.memory_space<vmem>>, vector<1x128xf32>
    %14 = vector.broadcast %13 : vector<1x128xf32> to vector<1024x128xf32>
    %15 = arith.addf %12, %14 : vector<1024x128xf32>
    %cst_13 = arith.constant 0.000000e+00 : f32
    %16 = vector.broadcast %cst_13 : f32 to vector<1024x128xf32>
    %17 = arith.maximumf %15, %16 : vector<1024x128xf32>
    %c0_14 = arith.constant 0 : index
    %c0_15 = arith.constant 0 : index
    %18 = vector.load %arg7[%c0_14, %c0_15] : memref<128x128xf32, #tpu.memory_space<vmem>>, vector<128x128xf32>
    %cst_16 = arith.constant dense<0.000000e+00> : vector<1024x128xf32>
    %19 = tpu.matmul %17, %18, %cst_16 {dimension_numbers = #tpu.dot_dimension_numbers<[1], [0], [0], [1], [0, 0, 1, 1], [], []>} : vector<1024x128xf32>, vector<128x128xf32>, vector<1024x128xf32> -> vector<1024x128xf32>
    %c0_17 = arith.constant 0 : index
    %c0_18 = arith.constant 0 : index
    %20 = vector.load %arg8[%c0_17, %c0_18] : memref<1x128xf32, #tpu.memory_space<vmem>>, vector<1x128xf32>
    %21 = vector.broadcast %20 : vector<1x128xf32> to vector<1024x128xf32>
    %22 = arith.addf %19, %21 : vector<1024x128xf32>
    %cst_19 = arith.constant 0.000000e+00 : f32
    %23 = vector.broadcast %cst_19 : f32 to vector<1024x128xf32>
    %24 = arith.maximumf %22, %23 : vector<1024x128xf32>
    %c0_20 = arith.constant 0 : index
    %c0_21 = arith.constant 0 : index
    %25 = vector.load %arg9[%c0_20, %c0_21] : memref<128x128xf32, #tpu.memory_space<vmem>>, vector<128x128xf32>
    %cst_22 = arith.constant dense<0.000000e+00> : vector<1024x128xf32>
    %26 = tpu.matmul %24, %25, %cst_22 {dimension_numbers = #tpu.dot_dimension_numbers<[1], [0], [0], [1], [0, 0, 1, 1], [], []>} : vector<1024x128xf32>, vector<128x128xf32>, vector<1024x128xf32> -> vector<1024x128xf32>
    %c0_23 = arith.constant 0 : index
    %c0_24 = arith.constant 0 : index
    %27 = vector.load %arg10[%c0_23, %c0_24] : memref<1x128xf32, #tpu.memory_space<vmem>>, vector<1x128xf32>
    %28 = vector.broadcast %27 : vector<1x128xf32> to vector<1024x128xf32>
    %29 = arith.addf %26, %28 : vector<1024x128xf32>
    %cst_25 = arith.constant 0.000000e+00 : f32
    %30 = vector.broadcast %cst_25 : f32 to vector<1024x128xf32>
    %31 = arith.maximumf %29, %30 : vector<1024x128xf32>
    %c0_26 = arith.constant 0 : index
    %c0_27 = arith.constant 0 : index
    %32 = vector.load %arg11[%c0_26, %c0_27] : memref<1x128xf32, #tpu.memory_space<vmem>>, vector<1x128xf32>
    %cst_28 = arith.constant dense<0.000000e+00> : vector<1x1024xf32>
    %33 = tpu.matmul %32, %31, %cst_28 {dimension_numbers = #tpu.dot_dimension_numbers<[1], [1], [0], [0], [0, 0, 1, 0], [], []>} : vector<1x128xf32>, vector<1024x128xf32>, vector<1x1024xf32> -> vector<1x1024xf32>
    %c0_29 = arith.constant 0 : index
    %c0_30 = arith.constant 0 : index
    %34 = vector.load %arg12[%c0_29, %c0_30] : memref<1x1xf32, #tpu.memory_space<vmem>>, vector<1x1xf32>
    %35 = vector.broadcast %34 : vector<1x1xf32> to vector<1x1024xf32>
    %36 = arith.addf %33, %35 : vector<1x1024xf32>
    %cst_31 = arith.constant 0.000000e+00 : f32
    %37 = vector.broadcast %cst_31 : f32 to vector<1x1024xf32>
    %38 = arith.subf %37, %36 : vector<1x1024xf32>
    %cst_32 = arith.constant 0.000000e+00 : f32
    %39 = vector.broadcast %cst_32 : f32 to vector<1x1024xf32>
    %40 = arith.minimumf %38, %39 : vector<1x1024xf32>
    %41 = math.absf %38 : vector<1x1024xf32>
    %cst_33 = arith.constant 0.000000e+00 : f32
    %42 = vector.broadcast %cst_33 : f32 to vector<1x1024xf32>
    %43 = arith.subf %42, %41 : vector<1x1024xf32>
    %44 = math.exp %43 : vector<1x1024xf32>
    %cst_34 = arith.constant 1.000000e+00 : f32
    %45 = vector.broadcast %cst_34 : f32 to vector<1x1024xf32>
    %46 = arith.addf %45, %44 : vector<1x1024xf32>
    %47 = math.log %46 : vector<1x1024xf32>
    %48 = arith.subf %40, %47 : vector<1x1024xf32>
    %cst_35 = arith.constant -23.0258503 : f32
    %49 = vector.broadcast %cst_35 : f32 to vector<1x1024xf32>
    %50 = arith.maximumf %48, %49 : vector<1x1024xf32>
    %c0_36 = arith.constant 0 : index
    %c0_37 = arith.constant 0 : index
    %51 = vector.load %arg13[%c0_36, %c0_37] : memref<2x1024xf32, #tpu.memory_space<vmem>>, vector<1x1024xf32>
    tpu.vector_store %arg13[%c0_36, %c0_37], %50 {strides = array<i32>} : memref<2x1024xf32, #tpu.memory_space<vmem>>, vector<1x1024xf32>,
    %cst_38 = arith.constant 0.000000e+00 : f32
    %52 = vector.broadcast %cst_38 : f32 to vector<1x1024xf32>
    %53 = arith.minimumf %36, %52 : vector<1x1024xf32>
    %54 = math.absf %36 : vector<1x1024xf32>
    %cst_39 = arith.constant 0.000000e+00 : f32
    %55 = vector.broadcast %cst_39 : f32 to vector<1x1024xf32>
    %56 = arith.subf %55, %54 : vector<1x1024xf32>
    %57 = math.exp %56 : vector<1x1024xf32>
    %cst_40 = arith.constant 1.000000e+00 : f32
    %58 = vector.broadcast %cst_40 : f32 to vector<1x1024xf32>
    %59 = arith.addf %58, %57 : vector<1x1024xf32>
    %60 = math.log %59 : vector<1x1024xf32>
    %61 = arith.subf %53, %60 : vector<1x1024xf32>
    %cst_41 = arith.constant -23.0258503 : f32
    %62 = vector.broadcast %cst_41 : f32 to vector<1x1024xf32>
    %63 = arith.maximumf %61, %62 : vector<1x1024xf32>
    %c1 = arith.constant 1 : index
    %c0_42 = arith.constant 0 : index
    %64 = vector.load %arg13[%c1, %c0_42] : memref<2x1024xf32, #tpu.memory_space<vmem>>, vector<1x1024xf32>
    tpu.vector_store %arg13[%c1, %c0_42], %63 {strides = array<i32>} : memref<2x1024xf32, #tpu.memory_space<vmem>>, vector<1x1024xf32>,
    return
  }
  func.func @transform_0(%arg0: i32) -> (i32, i32) {
    %c0_i32 = arith.constant 0 : i32
    %c0_i32_0 = arith.constant 0 : i32
    return %arg0, %c0_i32 : i32, i32
  }
  func.func @transform_1(%arg0: i32) -> (i32, i32) {
    %c0_i32 = arith.constant 0 : i32
    %c0_i32_0 = arith.constant 0 : i32
    return %arg0, %c0_i32 : i32, i32
  }
  func.func @transform_2(%arg0: i32) -> (i32, i32) {
    %c0_i32 = arith.constant 0 : i32
    %c0_i32_0 = arith.constant 0 : i32
    %c0_i32_1 = arith.constant 0 : i32
    return %c0_i32, %c0_i32_0 : i32, i32
  }
  func.func @transform_3(%arg0: i32) -> (i32, i32) {
    %c0_i32 = arith.constant 0 : i32
    %c0_i32_0 = arith.constant 0 : i32
    %c0_i32_1 = arith.constant 0 : i32
    return %c0_i32, %c0_i32_0 : i32, i32
  }
  func.func @transform_4(%arg0: i32) -> (i32, i32) {
    %c0_i32 = arith.constant 0 : i32
    %c0_i32_0 = arith.constant 0 : i32
    %c0_i32_1 = arith.constant 0 : i32
    return %c0_i32, %c0_i32_0 : i32, i32
  }
  func.func @transform_5(%arg0: i32) -> (i32, i32) {
    %c0_i32 = arith.constant 0 : i32
    %c0_i32_0 = arith.constant 0 : i32
    %c0_i32_1 = arith.constant 0 : i32
    return %c0_i32, %c0_i32_0 : i32, i32
  }
  func.func @transform_6(%arg0: i32) -> (i32, i32) {
    %c0_i32 = arith.constant 0 : i32
    %c0_i32_0 = arith.constant 0 : i32
    %c0_i32_1 = arith.constant 0 : i32
    return %c0_i32, %c0_i32_0 : i32, i32
  }
  func.func @transform_7(%arg0: i32) -> (i32, i32) {
    %c0_i32 = arith.constant 0 : i32
    %c0_i32_0 = arith.constant 0 : i32
    %c0_i32_1 = arith.constant 0 : i32
    return %c0_i32, %c0_i32_0 : i32, i32
  }
  func.func @transform_8(%arg0: i32) -> (i32, i32) {
    %c0_i32 = arith.constant 0 : i32
    %c0_i32_0 = arith.constant 0 : i32
    %c0_i32_1 = arith.constant 0 : i32
    return %c0_i32, %c0_i32_0 : i32, i32
  }
  func.func @transform_9(%arg0: i32) -> (i32, i32) {
    %c0_i32 = arith.constant 0 : i32
    %c0_i32_0 = arith.constant 0 : i32
    %c0_i32_1 = arith.constant 0 : i32
    return %c0_i32, %c0_i32_0 : i32, i32
  }
  func.func @transform_10(%arg0: i32) -> (i32, i32) {
    %c0_i32 = arith.constant 0 : i32
    %c0_i32_0 = arith.constant 0 : i32
    %c0_i32_1 = arith.constant 0 : i32
    return %c0_i32, %c0_i32_0 : i32, i32
  }
  func.func @transform_11(%arg0: i32) -> (i32, i32) {
    %c0_i32 = arith.constant 0 : i32
    %c0_i32_0 = arith.constant 0 : i32
    %c0_i32_1 = arith.constant 0 : i32
    return %c0_i32, %c0_i32_0 : i32, i32
  }
  func.func @transform_12(%arg0: i32) -> (i32, i32) {
    %c0_i32 = arith.constant 0 : i32
    %c0_i32_0 = arith.constant 0 : i32
    return %c0_i32, %arg0 : i32, i32
  }
}

</mosaic_0001>

<bundles_post_ra>
// kernel: tpu_custom_call.1
= control target key start
LH: loop header
LB: loop body
LE: loop exit
PB: predicated region body
PF: predicated region fallthrough
CT: control target
= control target key end

     0   :  { %s9856_s0 = inlined_call_operand.hbm [shape: f32[1024,128], index: 0, kind: input, shape index: {}]   ;;  %s9857_s1 = inlined_call_operand.hbm [shape: f32[1024,128], index: 1, kind: input, shape index: {}]   ;;  %s9858_s2 = inlined_call_operand.hbm [shape: f32[384,128], index: 2, kind: input, shape index: {}]   ;;  %s9859_s3 = inlined_call_operand.vmem [shape: f32[1,128], index: 3, kind: input, shape index: {}]   ;;  %s9860_s4 = inlined_call_operand.hbm [shape: f32[128,128], index: 4, kind: input, shape index: {}]   ;;  %s9861_s5 = inlined_call_operand.vmem [shape: f32[1,128], index: 5, kind: input, shape index: {}]   ;;  %s9862_s6 = inlined_call_operand.hbm [shape: f32[128,128], index: 6, kind: input, shape index: {}]   ;;  %s9863_s7 = inlined_call_operand.vmem [shape: f32[1,128], index: 7, kind: input, shape index: {}]   ;;  %s9864_s8 = inlined_call_operand.hbm [shape: f32[128,128], index: 8, kind: input, shape index: {}]   ;;  %s9865_s9 = inlined_call_operand.vmem [shape: f32[1,128], index: 9, kind: input, shape index: {}]   ;;  %s9866_s10 = inlined_call_operand.vmem [shape: f32[1,128], index: 10, kind: input, shape index: {}]   ;;  %s9867_s11 = inlined_call_operand.<no memory space> [shape: f32[1,1], index: 11, kind: input, shape index: {}]   ;;  %s9868_s12 = inlined_call_operand.hbm [shape: f32[2,1024], index: 12, kind: output, shape index: {}]  }
   0x1   :  { %v17_v0 = vstv %s9867_s11 }
   0x2   :  { %18 = vst [vmem:[#allocation2] sm:$0x1] %v17_v0 }
   0x3   :  { %19 = vsyncpa [#allocation4], 0 }
   0x4   :  { %20 = vsyncpa [#allocation7], 0 }
   0x5   :  { %21 = vsyncpa [#allocation10], 0 }
   0x6   :  { %22 = vsyncpa [#allocation13], 0 }
   0x7   :  { %23 = vsyncpa [#allocation5], 0  ;;  %s7533_s23 = smov [#allocation6]   ;;  %s7534_s25 = smov [#allocation9]  }
   0x8   :  { %s41_s24 = sshll.u32 %s7533_s23, 4  ;;  %s67_s26 = sshll.u32 %s7534_s25, 4  ;;  %s42_s24 = int_to_ptr.vmem [resolvable:$true] %s41_s24  ;;  %s7613_s26 = int_to_ptr.vmem [resolvable:$true] %s67_s26 }
   0x9   :  { %s7369_s29 = scalar_lea.hbm %s9857_s1, 16384 }
   0xa   :  { %p7370_p0 = scmp.ne.s32.totalorder %s9857_s1, %s7369_s29  ;;  %p7373_p1 = scmp.lt.u32.totalorder %s7369_s29, %s9857_s1 }
   0xc   :  { %p7375_p2 = pnand %p7373_p1, %p7370_p0 }
   0xe   :  { %7378 = shalt.err (!%p7375_p2)
}
   0xf   :  { %s7379_s15 = scalar_lea.vmem %s42_s24, 16384  ;;  %p7384_p4 = scmp.lt.s32.totalorder %s42_s24, %s42_s24 }
  0x10   :  { %p7380_p3 = scmp.ne.s32.totalorder %s42_s24, %s7379_s15  ;;  %p7385_p5 = scmp.lt.s32.totalorder %s7379_s15, %s7379_s15 }
  0x12   :  { %p7386_p6 = por %p7385_p5, %p7384_p4 }
  0x14   :  { %p7387_p7 = pnand %p7386_p6, %p7380_p3 }
  0x16   :  { %7390 = shalt.err (!%p7387_p7)
}
  0x17   :  { %s7535_s16 = smov 128   ;;  %s7536_s17 = smov 8  }
  0x18   :  { %47 = dma.hbm_to_vmem [thread:$0]  %s9857_s1, 16384, %s42_s24, [#allocation7], %s7535_s16, %s7535_s16, %s7536_s17  }
  0x19   :  { %s7391_s22 = scalar_lea.hbm %s9860_s4, 2048 }
  0x1a   :  { %p7392_p8 = scmp.ne.s32.totalorder %s9860_s4, %s7391_s22  ;;  %p7395_p9 = scmp.lt.u32.totalorder %s7391_s22, %s9860_s4 }
  0x1c   :  { %p7397_p10 = pnand %p7395_p9, %p7392_p8 }
  0x1e   :  { %7400 = shalt.err (!%p7397_p10)
}
  0x1f   :  { %s7401_s29 = scalar_lea.vmem %s7613_s26, 2048  ;;  %p7406_p12 = scmp.lt.s32.totalorder %s7613_s26, %s7613_s26 }
  0x20   :  { %p7402_p11 = scmp.ne.s32.totalorder %s7613_s26, %s7401_s29  ;;  %p7407_p13 = scmp.lt.s32.totalorder %s7401_s29, %s7401_s29 }
  0x22   :  { %p7408_p0 = por %p7407_p13, %p7406_p12 }
  0x24   :  { %p7409_p1 = pnand %p7408_p0, %p7402_p11 }
  0x26   :  { %7412 = shalt.err (!%p7409_p1)
}
  0x27   :  { %73 = dma.hbm_to_vmem [thread:$0]  %s9860_s4, 2048, %s7613_s26, [#allocation10], %s7535_s16, %s7535_s16, %s7536_s17  }
  0x28   :  { %s7537_s30 = smov [#allocation3]   ;;  %s7538_s11 = smov [#allocation8]  }
  0x29   :  { %s29_s13 = sshll.u32 %s7537_s30, 4  ;;  %s53_s14 = sshll.u32 %s7538_s11, 4  ;;  %s30_s13 = int_to_ptr.vmem [resolvable:$true] %s29_s13  ;;  %s7650_s14 = int_to_ptr.vmem [resolvable:$true] %s53_s14 }
  0x2a   :  { %s7413_s19 = scalar_lea.hbm %s9856_s0, 16384 }
  0x2b   :  { %p7414_p2 = scmp.ne.s32.totalorder %s9856_s0, %s7413_s19  ;;  %p7417_p3 = scmp.lt.u32.totalorder %s7413_s19, %s9856_s0 }
  0x2d   :  { %p7419_p4 = pnand %p7417_p3, %p7414_p2 }
  0x2f   :  { %7422 = shalt.err (!%p7419_p4)
}
  0x30   :  { %s7423_s4 = scalar_lea.vmem %s30_s13, 16384  ;;  %p7428_p6 = scmp.lt.s32.totalorder %s30_s13, %s30_s13 }
  0x31   :  { %p7424_p5 = scmp.ne.s32.totalorder %s30_s13, %s7423_s4  ;;  %p7429_p7 = scmp.lt.s32.totalorder %s7423_s4, %s7423_s4 }
  0x33   :  { %p7430_p8 = por %p7429_p7, %p7428_p6 }
  0x35   :  { %p7431_p9 = pnand %p7430_p8, %p7424_p5 }
  0x37   :  { %7434 = shalt.err (!%p7431_p9)
}
  0x38   :  { %35 = dma.hbm_to_vmem [thread:$0]  %s9856_s0, 16384, %s30_s13, [#allocation4], %s7535_s16, %s7535_s16, %s7536_s17  }
  0x39   :  { %s7435_s29 = scalar_lea.hbm %s9858_s2, 6144 }
  0x3a   :  { %p7436_p10 = scmp.ne.s32.totalorder %s9858_s2, %s7435_s29  ;;  %p7439_p11 = scmp.lt.u32.totalorder %s7435_s29, %s9858_s2 }
  0x3c   :  { %p7441_p12 = pnand %p7439_p11, %p7436_p10 }
  0x3e   :  { %7444 = shalt.err (!%p7441_p12)
}
  0x3f   :  { %s7445_s15 = scalar_lea.vmem %s7650_s14, 6144  ;;  %p7450_p0 = scmp.lt.s32.totalorder %s7650_s14, %s7650_s14 }
  0x40   :  { %p7446_p13 = scmp.ne.s32.totalorder %s7650_s14, %s7445_s15  ;;  %p7451_p1 = scmp.lt.s32.totalorder %s7445_s15, %s7445_s15 }
  0x42   :  { %p7452_p2 = por %p7451_p1, %p7450_p0 }
  0x44   :  { %p7453_p3 = pnand %p7452_p2, %p7446_p13 }
  0x46   :  { %7456 = shalt.err (!%p7453_p3)
}
  0x47   :  { %59 = dma.hbm_to_vmem [thread:$0]  %s9858_s2, 6144, %s7650_s14, [#allocation7], %s7535_s16, %s7535_s16, %s7536_s17  }
  0x48   :  { %s7539_s18 = smov [#allocation11]   ;;  %s7540_s20 = smov [#allocation12]  }
  0x49   :  { %s81_s19 = sshll.u32 %s7539_s18, 4  ;;  %s95_s21 = sshll.u32 %s7540_s20, 4  ;;  %s82_s19 = int_to_ptr.vmem [resolvable:$true] %s81_s19  ;;  %s7687_s21 = int_to_ptr.vmem [resolvable:$true] %s95_s21 }
  0x4a   :  { %s7457_s4 = scalar_lea.hbm %s9862_s6, 2048 }
  0x4b   :  { %p7458_p4 = scmp.ne.s32.totalorder %s9862_s6, %s7457_s4  ;;  %p7461_p5 = scmp.lt.u32.totalorder %s7457_s4, %s9862_s6 }
  0x4d   :  { %p7463_p6 = pnand %p7461_p5, %p7458_p4 }
  0x4f   :  { %7466 = shalt.err (!%p7463_p6)
}
  0x50   :  { %s7467_s2 = scalar_lea.vmem %s82_s19, 2048  ;;  %p7472_p8 = scmp.lt.s32.totalorder %s82_s19, %s82_s19 }
  0x51   :  { %p7468_p7 = scmp.ne.s32.totalorder %s82_s19, %s7467_s2  ;;  %p7473_p9 = scmp.lt.s32.totalorder %s7467_s2, %s7467_s2 }
  0x53   :  { %p7474_p10 = por %p7473_p9, %p7472_p8 }
  0x55   :  { %p7475_p11 = pnand %p7474_p10, %p7468_p7 }
  0x57   :  { %7478 = shalt.err (!%p7475_p11)
}
  0x58   :  { %87 = dma.hbm_to_vmem [thread:$0]  %s9862_s6, 2048, %s82_s19, [#allocation10], %s7535_s16, %s7535_s16, %s7536_s17  }
  0x59   :  { %s7479_s30 = scalar_lea.hbm %s9864_s8, 2048 }
  0x5a   :  { %p7480_p12 = scmp.ne.s32.totalorder %s9864_s8, %s7479_s30  ;;  %p7483_p13 = scmp.lt.u32.totalorder %s7479_s30, %s9864_s8 }
  0x5c   :  { %p7485_p0 = pnand %p7483_p13, %p7480_p12 }
  0x5e   :  { %7488 = shalt.err (!%p7485_p0)
}
  0x5f   :  { %s7489_s18 = scalar_lea.vmem %s7687_s21, 2048  ;;  %p7494_p2 = scmp.lt.s32.totalorder %s7687_s21, %s7687_s21 }
  0x60   :  { %p7490_p1 = scmp.ne.s32.totalorder %s7687_s21, %s7489_s18  ;;  %p7495_p3 = scmp.lt.s32.totalorder %s7489_s18, %s7489_s18 }
  0x62   :  { %p7496_p4 = por %p7495_p3, %p7494_p2 }
  0x64   :  { %p7497_p5 = pnand %p7496_p4, %p7490_p1 }
  0x66   :  { %7500 = shalt.err (!%p7497_p5)
}
  0x67   :  { %101 = dma.hbm_to_vmem [thread:$0]  %s9864_s8, 2048, %s7687_s21, [#allocation13], %s7535_s16, %s7535_s16, %s7536_s17  }
  0x68   :  { %7523 = dma.done.wait [#allocation4], 16384  }
  0x69   :  { %7524 = vsyncadd [#allocation4], 4294950912 }
  0x6a   :  { %7525 = dma.done.wait [#allocation7], 22528  }
  0x6b   :  { %7526 = vsyncadd [#allocation7], 4294944768 }
  0x6c   :  { %7527 = dma.done.wait [#allocation10], 4096  }
  0x6d   :  { %7528 = vsyncadd [#allocation10], 4294963200 }
  0x6e   :  { %7529 = dma.done.wait [#allocation13], 2048  }
  0x6f   :  { %7530 = vsyncadd [#allocation13], 4294965248  ;;  %v7541_v1 = vmov 0.0|0.0   ;;  %v510_v2 = vld [vmem:[#allocation8] sm:$0xff]  ;;  %v511_v3 = vld [vmem:[#allocation8 + $0x8] sm:$0xff] }
  0x70   :  { %6883 = vmatprep.subr.bf16.mxu0 %v7541_v1  ;;  %v542_v4 = vld [vmem:[#allocation8 + $0x100] sm:$0xff]  ;;  %v6884_v5 = vpack.c.bf16 %v511_v3, %v510_v2  ;;  %v543_v6 = vld [vmem:[#allocation8 + $0x108] sm:$0xff]  ;;  %v512_v7 = vld [vmem:[#allocation8 + $0x10] sm:$0xff] }
  0x71   :  { %v513_v8 = vld [vmem:[#allocation8 + $0x18] sm:$0xff]  ;;  %v6931_v9 = vpack.c.bf16 %v543_v6, %v542_v4  ;;  %v544_v10 = vld [vmem:[#allocation8 + $0x110] sm:$0xff]  ;;  %v546_v14 = vld [vmem:[#allocation8 + $0x120] sm:$0xff] }
  0x72   :  { %v545_v11 = vld [vmem:[#allocation8 + $0x118] sm:$0xff]  ;;  %6885 = vmatpush1.bf16.msra.mxu0 %v6884_v5  ;;  %v6887_v12 = vpack.c.bf16 %v513_v8, %v512_v7  ;;  %v547_v15 = vld [vmem:[#allocation8 + $0x128] sm:$0xff]  ;;  %v514_v16 = vld [vmem:[#allocation8 + $0x20] sm:$0xff] }
  0x73   :  { %v6935_v13 = vpack.c.bf16 %v545_v11, %v544_v10  ;;  %6932 = vmatprep.subr.bf16.mxu1 %v6931_v9  ;;  %6886 = vmatprep.subr.bf16.mxu0 %v7541_v1  ;;  %v515_v17 = vld [vmem:[#allocation8 + $0x28] sm:$0xff]  ;;  %v6939_v18 = vpack.c.bf16 %v547_v15, %v546_v14  ;;  %v548_v20 = vld [vmem:[#allocation8 + $0x130] sm:$0xff]  ;;  %v549_v21 = vld [vmem:[#allocation8 + $0x138] sm:$0xff] }
  0x74   :  { %6934 = vmatpush3.bf16.msra.mxu1 %v6931_v9  ;;  %v6890_v19 = vpack.c.bf16 %v515_v17, %v514_v16  ;;  %v516_v22 = vld [vmem:[#allocation8 + $0x30] sm:$0xff]  ;;  %v517_v23 = vld [vmem:[#allocation8 + $0x38] sm:$0xff]  ;;  %v6943_v24 = vpack.c.bf16 %v549_v21, %v548_v20  ;;  %v7727_v25 = vld [vmem:[#allocation3] sm:$0xff] }
  0x75   :  { %6936 = vmatprep.subr.bf16.mxu1 %v6935_v13  ;;  %v6893_v26 = vpack.c.bf16 %v517_v23, %v516_v22  ;;  %v550_v27 = vld [vmem:[#allocation8 + $0x140] sm:$0xff]  ;;  %v551_v28 = vld [vmem:[#allocation8 + $0x148] sm:$0xff]  ;;  %v552_v35 = vld [vmem:[#allocation8 + $0x150] sm:$0xff] }
  0x76   :  { %6888 = vmatpush1.bf16.msra.mxu0 %v6887_v12  ;;  %v254_v29 = vld [vmem:[#allocation6] sm:$0xff]  ;;  %v519_v31 = vld [vmem:[#allocation8 + $0x48] sm:$0xff]  ;;  %v6947_v33 = vpack.c.bf16 %v551_v28, %v550_v27  ;;  %v553_v36 = vld [vmem:[#allocation8 + $0x158] sm:$0xff] }
  0x77   :  { %6889 = vmatprep.subr.bf16.mxu0 %v7541_v1  ;;  %v518_v30 = vld [vmem:[#allocation8 + $0x40] sm:$0xff]  ;;  %v382_v32 = vmul.f32 %v254_v29, %v7727_v25  ;;  %629 = vmatprep.mubr.f32.mxu0 %v254_v29  ;;  %v520_v37 = vld [vmem:[#allocation8 + $0x50] sm:$0xff]  ;;  %v521_v38 = vld [vmem:[#allocation8 + $0x58] sm:$0xff]  ;;  %v6951_v39 = vpack.c.bf16 %v553_v36, %v552_v35 }
  0x78   :  { %6938 = vmatpush3.bf16.msra.mxu1 %v6935_v13  ;;  %v6896_v34 = vpack.c.bf16 %v519_v31, %v518_v30  ;;  %v6899_v40 = vpack.c.bf16 %v521_v38, %v520_v37  ;;  %v554_v41 = vld [vmem:[#allocation8 + $0x160] sm:$0xff]  ;;  %v555_v42 = vld [vmem:[#allocation8 + $0x168] sm:$0xff]  ;;  %v556_v47 = vld [vmem:[#allocation8 + $0x170] sm:$0xff] }
  0x79   :  { %6940 = vmatprep.subr.bf16.mxu1 %v6939_v18  ;;  %6019 = vmatprep.mubr.f32.mxu1 %v382_v32  ;;  %v522_v43 = vld [vmem:[#allocation8 + $0x60] sm:$0xff]  ;;  %v523_v44 = vld [vmem:[#allocation8 + $0x68] sm:$0xff]  ;;  %v6955_v45 = vpack.c.bf16 %v555_v42, %v554_v41  ;;  %v557_v48 = vld [vmem:[#allocation8 + $0x178] sm:$0xff] }
  0x7a   :  { %6891 = vmatpush1.bf16.msra.mxu0 %v6890_v19  ;;  %v6902_v46 = vpack.c.bf16 %v523_v44, %v522_v43  ;;  %v524_v49 = vld [vmem:[#allocation8 + $0x70] sm:$0xff]  ;;  %v525_v50 = vld [vmem:[#allocation8 + $0x78] sm:$0xff]  ;;  %v6959_v51 = vpack.c.bf16 %v557_v48, %v556_v47  ;;  %v526_v53 = vld [vmem:[#allocation8 + $0x80] sm:$0xff] }
  0x7b   :  { %6892 = vmatprep.subr.bf16.mxu0 %v7541_v1  ;;  %v6905_v52 = vpack.c.bf16 %v525_v50, %v524_v49  ;;  %v527_v54 = vld [vmem:[#allocation8 + $0x88] sm:$0xff]  ;;  %v7739_v57 = vld [vmem:[#allocation3 + $0x10] sm:$0xff]  ;;  %v529_v62 = vld [vmem:[#allocation8 + $0x98] sm:$0xff] }
  0x7c   :  { %6942 = vmatpush3.bf16.msra.mxu1 %v6939_v18  ;;  %v7735_v55 = vld [vmem:[#allocation3 + $0x8] sm:$0xff]  ;;  %v7741_v58 = vld [vmem:[#allocation6 + $0x10] sm:$0xff]  ;;  %v6908_v59 = vpack.c.bf16 %v527_v54, %v526_v53  ;;  %v7748_v0 = vld [vmem:[#allocation3 + $0x18] sm:$0xff] }
  0x7d   :  { %6944 = vmatprep.subr.bf16.mxu1 %v6943_v24  ;;  %v7737_v56 = vld [vmem:[#allocation6 + $0x8] sm:$0xff]  ;;  %v528_v61 = vld [vmem:[#allocation8 + $0x90] sm:$0xff]  ;;  %v384_v63 = vmul.f32 %v7741_v58, %v7739_v57  ;;  %v7750_v2 = vld [vmem:[#allocation6 + $0x18] sm:$0xff] }
  0x7e   :  { %6894 = vmatpush1.bf16.msra.mxu0 %v6893_v26  ;;  %v383_v60 = vmul.f32 %v7737_v56, %v7735_v55  ;;  %v7752_v3 = vld [vmem:[#allocation3 + $0x20] sm:$0xff]  ;;  %v6911_v5 = vpack.c.bf16 %v529_v62, %v528_v61  ;;  %v385_v6 = vmul.f32 %v7750_v2, %v7748_v0  ;;  %v531_v8 = vld [vmem:[#allocation8 + $0xa8] sm:$0xff]  ;;  %v7765_v12 = vld [vmem:[#allocation3 + $0x30] sm:$0xff] }
  0x7f   :  { %6895 = vmatprep.subr.bf16.mxu0 %v7541_v1  ;;  %v7754_v4 = vld [vmem:[#allocation6 + $0x20] sm:$0xff]  ;;  %v7761_v10 = vld [vmem:[#allocation3 + $0x28] sm:$0xff]  ;;  %v7767_v13 = vld [vmem:[#allocation6 + $0x30] sm:$0xff] }
  0x80   :  { %6946 = vmatpush3.bf16.msra.mxu1 %v6943_v24  ;;  %v530_v7 = vld [vmem:[#allocation8 + $0xa0] sm:$0xff]  ;;  %v386_v9 = vmul.f32 %v7754_v4, %v7752_v3  ;;  %v7763_v11 = vld [vmem:[#allocation6 + $0x28] sm:$0xff]  ;;  %v532_v16 = vld [vmem:[#allocation8 + $0xb0] sm:$0xff]  ;;  %v388_v18 = vmul.f32 %v7767_v13, %v7765_v12 }
  0x81   :  { %6948 = vmatprep.subr.bf16.mxu1 %v6947_v33  ;;  %v6914_v14 = vpack.c.bf16 %v531_v8, %v530_v7  ;;  %v387_v15 = vmul.f32 %v7763_v11, %v7761_v10  ;;  %v533_v17 = vld [vmem:[#allocation8 + $0xb8] sm:$0xff]  ;;  %v7778_v21 = vld [vmem:[#allocation3 + $0x40] sm:$0xff]  ;;  %v535_v27 = vld [vmem:[#allocation8 + $0xc8] sm:$0xff] }
  0x82   :  { %6897 = vmatpush1.bf16.msra.mxu0 %v6896_v34  ;;  %v7774_v19 = vld [vmem:[#allocation3 + $0x38] sm:$0xff]  ;;  %v7780_v22 = vld [vmem:[#allocation6 + $0x40] sm:$0xff]  ;;  %v6917_v23 = vpack.c.bf16 %v533_v17, %v532_v16  ;;  %v7787_v29 = vld [vmem:[#allocation3 + $0x48] sm:$0xff] }
  0x83   :  { %6898 = vmatprep.subr.bf16.mxu0 %v7541_v1  ;;  %v7776_v20 = vld [vmem:[#allocation6 + $0x38] sm:$0xff]  ;;  %v534_v26 = vld [vmem:[#allocation8 + $0xc0] sm:$0xff]  ;;  %v390_v28 = vmul.f32 %v7780_v22, %v7778_v21  ;;  %v7789_v30 = vld [vmem:[#allocation6 + $0x48] sm:$0xff] }
  0x84   :  { %6950 = vmatpush3.bf16.msra.mxu1 %v6947_v33  ;;  %v389_v24 = vmul.f32 %v7776_v20, %v7774_v19  ;;  %v7791_v31 = vld [vmem:[#allocation3 + $0x50] sm:$0xff]  ;;  %v6920_v33 = vpack.c.bf16 %v535_v27, %v534_v26  ;;  %v391_v34 = vmul.f32 %v7789_v30, %v7787_v29  ;;  %v537_v36 = vld [vmem:[#allocation8 + $0xd8] sm:$0xff]  ;;  %v7806_v41 = vld [vmem:[#allocation6 + $0x60] sm:$0xff] }
  0x85   :  { %6952 = vmatprep.subr.bf16.mxu1 %v6951_v39  ;;  %v7793_v32 = vld [vmem:[#allocation6 + $0x50] sm:$0xff]  ;;  %v7800_v38 = vld [vmem:[#allocation3 + $0x58] sm:$0xff]  ;;  %v538_v44 = vld [vmem:[#allocation8 + $0xe0] sm:$0xff] }
  0x86   :  { %6900 = vmatpush1.bf16.msra.mxu0 %v6899_v40  ;;  %v536_v35 = vld [vmem:[#allocation8 + $0xd0] sm:$0xff]  ;;  %v392_v37 = vmul.f32 %v7793_v32, %v7791_v31  ;;  %v7804_v40 = vld [vmem:[#allocation3 + $0x60] sm:$0xff]  ;;  %v7813_v47 = vld [vmem:[#allocation3 + $0x68] sm:$0xff] }
  0x87   :  { %6901 = vmatprep.subr.bf16.mxu0 %v7541_v1  ;;  %v6923_v42 = vpack.c.bf16 %v537_v36, %v536_v35  ;;  %v7815_v48 = vld [vmem:[#allocation6 + $0x68] sm:$0xff]  ;;  %v7817_v49 = vld [vmem:[#allocation3 + $0x70] sm:$0xff]  ;;  %v541_v54 = vld [vmem:[#allocation8 + $0xf8] sm:$0xff] }
  0x88   :  { %6954 = vmatpush3.bf16.msra.mxu1 %v6951_v39  ;;  %v7802_v39 = vld [vmem:[#allocation6 + $0x58] sm:$0xff]  ;;  %v7819_v50 = vld [vmem:[#allocation6 + $0x70] sm:$0xff]  ;;  %v7830_v62 = vld [vmem:[#allocation3 + $0x80] sm:$0xff] }
  0x89   :  { %6956 = vmatprep.subr.bf16.mxu1 %v6955_v45  ;;  %v393_v43 = vmul.f32 %v7802_v39, %v7800_v38  ;;  %v540_v53 = vld [vmem:[#allocation8 + $0xf0] sm:$0xff]  ;;  %v7828_v61 = vld [vmem:[#allocation6 + $0x78] sm:$0xff]  ;;  %v7839_v8 = vld [vmem:[#allocation3 + $0x88] sm:$0xff] }
  0x8a   :  { %6903 = vmatpush1.bf16.msra.mxu0 %v6902_v46  ;;  %v394_v46 = vmul.f32 %v7806_v41, %v7804_v40  ;;  %v7851_v17 = vld [vmem:[#allocation3 + $0x98] sm:$0xff] }
  0x8b   :  { %6904 = vmatprep.subr.bf16.mxu0 %v7541_v1  ;;  %v7879_v36 = vld [vmem:[#allocation3 + $0xb8] sm:$0xff] }
  0x8c   :  { %6958 = vmatpush3.bf16.msra.mxu1 %v6955_v45  ;;  %v539_v45 = vld [vmem:[#allocation8 + $0xe8] sm:$0xff] }
  0x8d   :  { %6960 = vmatprep.subr.bf16.mxu1 %v6959_v51 }
  0x8e   :  { %6906 = vmatpush1.bf16.msra.mxu0 %v6905_v52  ;;  %v395_v52 = vmul.f32 %v7815_v48, %v7813_v47 }
  0x8f   :  { %6907 = vmatprep.subr.bf16.mxu0 %v7541_v1 }
  0x90   :  { %6962 = vmatpush3.bf16.msra.mxu1 %v6959_v51  ;;  %v6926_v51 = vpack.c.bf16 %v539_v45, %v538_v44  ;;  %v7893_v44 = vld [vmem:[#allocation3 + $0xc8] sm:$0xff] }
  0x91   :  { %v7895_v45 = vld [vmem:[#allocation6 + $0xc8] sm:$0xff] }
  0x92   :  { %6909 = vmatpush1.bf16.msra.mxu0 %v6908_v59  ;;  %v396_v59 = vmul.f32 %v7819_v50, %v7817_v49 }
  0x93   :  { %6020 = vmatmul.mubr.f32.vlgmr.msra.gmra.mrb[0].mxu1 %v383_v60  ;;  %6910 = vmatprep.subr.bf16.mxu0 %v7541_v1  ;;  %v7826_v60 = vld [vmem:[#allocation3 + $0x78] sm:$0xff] }
  0x94   :  { %6022 = vmatprep.mubr.f32.mxu1 %v384_v63  ;;  %v7832_v63 = vld [vmem:[#allocation6 + $0x80] sm:$0xff] }
  0x95   :  { %v398_v7 = vmul.f32 %v7832_v63, %v7830_v62 }
  0x96   :  { %6912 = vmatpush1.bf16.msra.mxu0 %v6911_v5  ;;  %v6929_v5 = vpack.c.bf16 %v541_v54, %v540_v53  ;;  %v7909_v53 = vld [vmem:[#allocation6 + $0xd8] sm:$0xff]  ;;  %v7914_v54 = vld [vmem:[#allocation6 + $0xe0] sm:$0xff] }
  0x97   :  { %6023 = vmatmul.mubr.f32.gmra.mrb[2].mxu1 %v385_v6  ;;  %6913 = vmatprep.subr.bf16.mxu0 %v7541_v1  ;;  %v397_v6 = vmul.f32 %v7828_v61, %v7826_v60 }
  0x98   :  { %6025 = vmatprep.mubr.f32.mxu1 %v386_v9  ;;  %v7841_v9 = vld [vmem:[#allocation6 + $0x88] sm:$0xff] }
  0x9a   :  { %6915 = vmatpush1.bf16.msra.mxu0 %v6914_v14  ;;  %v7843_v14 = vld [vmem:[#allocation3 + $0x90] sm:$0xff] }
  0x9b   :  { %6026 = vmatmul.mubr.f32.gmra.mrb[4].mxu1 %v387_v15  ;;  %6916 = vmatprep.subr.bf16.mxu0 %v7541_v1  ;;  %v7845_v15 = vld [vmem:[#allocation6 + $0x90] sm:$0xff] }
  0x9c   :  { %6028 = vmatprep.mubr.f32.mxu1 %v388_v18  ;;  %v400_v16 = vmul.f32 %v7845_v15, %v7843_v14  ;;  %v7853_v18 = vld [vmem:[#allocation6 + $0x98] sm:$0xff] }
  0x9d   :  { %v401_v26 = vmul.f32 %v7853_v18, %v7851_v17 }
  0x9e   :  { %6918 = vmatpush1.bf16.msra.mxu0 %v6917_v23  ;;  %v7856_v23 = vld [vmem:[#allocation3 + $0xa0] sm:$0xff] }
  0x9f   :  { %6029 = vmatmul.mubr.f32.gmra.mrb[6].mxu1 %v389_v24  ;;  %6919 = vmatprep.subr.bf16.mxu0 %v7541_v1  ;;  %v7858_v24 = vld [vmem:[#allocation6 + $0xa0] sm:$0xff] }
  0xa0   :  { %6031 = vmatprep.mubr.f32.mxu1 %v390_v28  ;;  %v402_v27 = vmul.f32 %v7858_v24, %v7856_v23  ;;  %v7865_v28 = vld [vmem:[#allocation3 + $0xa8] sm:$0xff] }
  0xa2   :  { %6921 = vmatpush1.bf16.msra.mxu0 %v6920_v33  ;;  %v7867_v33 = vld [vmem:[#allocation6 + $0xa8] sm:$0xff] }
  0xa3   :  { %6032 = vmatmul.mubr.f32.gmra.mrb[8].mxu1 %v391_v34  ;;  %6922 = vmatprep.subr.bf16.mxu0 %v7541_v1  ;;  %v7872_v34 = vld [vmem:[#allocation6 + $0xb0] sm:$0xff] }
  0xa4   :  { %6034 = vmatprep.mubr.f32.mxu1 %v392_v37  ;;  %v7881_v37 = vld [vmem:[#allocation6 + $0xb8] sm:$0xff] }
  0xa6   :  { %6924 = vmatpush1.bf16.msra.mxu0 %v6923_v42  ;;  %v7886_v42 = vld [vmem:[#allocation6 + $0xc0] sm:$0xff] }
  0xa7   :  { %6035 = vmatmul.mubr.f32.gmra.mrb[10].mxu1 %v393_v43  ;;  %6925 = vmatprep.subr.bf16.mxu0 %v7541_v1 }
  0xa8   :  { %6037 = vmatprep.mubr.f32.mxu1 %v394_v46  ;;  %v7900_v46 = vld [vmem:[#allocation6 + $0xd0] sm:$0xff] }
  0xaa   :  { %6927 = vmatpush1.bf16.msra.mxu0 %v6926_v51 }
  0xab   :  { %6038 = vmatmul.mubr.f32.gmra.mrb[12].mxu1 %v395_v52  ;;  %6928 = vmatprep.subr.bf16.mxu0 %v7541_v1  ;;  %v399_v1 = vmul.f32 %v7841_v9, %v7839_v8  ;;  %v7907_v52 = vld [vmem:[#allocation3 + $0xd8] sm:$0xff] }
  0xac   :  { %6040 = vmatprep.mubr.f32.mxu1 %v396_v59 }
  0xae   :  { %6930 = vmatpush1.bf16.msra.mxu0 %v6929_v5  ;;  %v7921_v5 = vld [vmem:[#allocation3 + $0xe8] sm:$0xff] }
  0xaf   :  { %6041 = vmatmul.mubr.f32.gmra.mrb[14].mxu1 %v397_v6  ;;  %v7923_v6 = vld [vmem:[#allocation6 + $0xe8] sm:$0xff] }
  0xb0   :  { %6043 = vmatprep.mubr.f32.mxu1 %v398_v7  ;;  %v7928_v7 = vld [vmem:[#allocation6 + $0xf0] sm:$0xff] }
  0xb1   :  { %630 = vmatmul.mubr.f32.vlgmr.msra.gmra.mrb[0].mxu0 %v7727_v25  ;;  %v7870_v25 = vld [vmem:[#allocation3 + $0xb0] sm:$0xff] }
  0xb2   :  { %634 = vmatprep.mubr.f32.mxu0 %v7737_v56  ;;  %v403_v56 = vmul.f32 %v7867_v33, %v7865_v28  ;;  %v404_v35 = vmul.f32 %v7872_v34, %v7870_v25 }
  0xb3   :  { %6044 = vmatmul.mubr.f32.gmra.mrb[16].mxu1 %v399_v1 }
  0xb4   :  { %6046 = vmatprep.mubr.f32.mxu1 %v400_v16  ;;  %v7935_v16 = vld [vmem:[#allocation3 + $0xf8] sm:$0xff] }
  0xb5   :  { %635 = vmatmul.mubr.f32.gmra.mrb[2].mxu0 %v7735_v55  ;;  %v7884_v55 = vld [vmem:[#allocation3 + $0xc0] sm:$0xff] }
  0xb6   :  { %639 = vmatprep.mubr.f32.mxu0 %v7741_v58  ;;  %v405_v58 = vmul.f32 %v7881_v37, %v7879_v36  ;;  %v406_v43 = vmul.f32 %v7886_v42, %v7884_v55 }
  0xb7   :  { %6047 = vmatmul.mubr.f32.gmra.mrb[18].mxu1 %v401_v26  ;;  %v7937_v26 = vld [vmem:[#allocation6 + $0xf8] sm:$0xff] }
  0xb8   :  { %6049 = vmatprep.mubr.f32.mxu1 %v402_v27  ;;  %v7942_v27 = vld [vmem:[#allocation6 + $0x100] sm:$0xff] }
  0xb9   :  { %640 = vmatmul.mubr.f32.gmra.mrb[4].mxu0 %v7739_v57  ;;  %v7898_v57 = vld [vmem:[#allocation3 + $0xd0] sm:$0xff] }
  0xba   :  { %644 = vmatprep.mubr.f32.mxu0 %v7750_v2  ;;  %v407_v2 = vmul.f32 %v7895_v45, %v7893_v44  ;;  %v408_v51 = vmul.f32 %v7900_v46, %v7898_v57 }
  0xbb   :  { %6050 = vmatmul.mubr.f32.gmra.mrb[20].mxu1 %v403_v56 }
  0xbc   :  { %6052 = vmatprep.mubr.f32.mxu1 %v404_v35  ;;  %v7949_v35 = vld [vmem:[#allocation3 + $0x108] sm:$0xff] }
  0xbd   :  { %645 = vmatmul.mubr.f32.gmra.mrb[6].mxu0 %v7748_v0  ;;  %v7912_v0 = vld [vmem:[#allocation3 + $0xe0] sm:$0xff] }
  0xbe   :  { %649 = vmatprep.mubr.f32.mxu0 %v7754_v4  ;;  %v409_v4 = vmul.f32 %v7909_v53, %v7907_v52  ;;  %v410_v59 = vmul.f32 %v7914_v54, %v7912_v0 }
  0xbf   :  { %6053 = vmatmul.mubr.f32.gmra.mrb[22].mxu1 %v405_v58  ;;  %v7951_v58 = vld [vmem:[#allocation6 + $0x108] sm:$0xff] }
  0xc0   :  { %6055 = vmatprep.mubr.f32.mxu1 %v406_v43  ;;  %v7956_v43 = vld [vmem:[#allocation6 + $0x110] sm:$0xff] }
  0xc1   :  { %650 = vmatmul.mubr.f32.gmra.mrb[8].mxu0 %v7752_v3  ;;  %v7926_v3 = vld [vmem:[#allocation3 + $0xf0] sm:$0xff] }
  0xc2   :  { %654 = vmatprep.mubr.f32.mxu0 %v7763_v11  ;;  %v411_v11 = vmul.f32 %v7923_v6, %v7921_v5  ;;  %v412_v1 = vmul.f32 %v7928_v7, %v7926_v3 }
  0xc3   :  { %6056 = vmatmul.mubr.f32.gmra.mrb[24].mxu1 %v407_v2 }
  0xc4   :  { %6058 = vmatprep.mubr.f32.mxu1 %v408_v51  ;;  %v7963_v51 = vld [vmem:[#allocation3 + $0x118] sm:$0xff] }
  0xc5   :  { %655 = vmatmul.mubr.f32.gmra.mrb[10].mxu0 %v7761_v10  ;;  %v7940_v10 = vld [vmem:[#allocation3 + $0x100] sm:$0xff] }
  0xc6   :  { %659 = vmatprep.mubr.f32.mxu0 %v7767_v13  ;;  %v413_v13 = vmul.f32 %v7937_v26, %v7935_v16  ;;  %v414_v56 = vmul.f32 %v7942_v27, %v7940_v10 }
  0xc7   :  { %6059 = vmatmul.mubr.f32.gmra.mrb[26].mxu1 %v409_v4  ;;  %v7965_v4 = vld [vmem:[#allocation6 + $0x118] sm:$0xff] }
  0xc8   :  { %6061 = vmatprep.mubr.f32.mxu1 %v410_v59  ;;  %v7970_v59 = vld [vmem:[#allocation6 + $0x120] sm:$0xff] }
  0xc9   :  { %660 = vmatmul.mubr.f32.gmra.mrb[12].mxu0 %v7765_v12  ;;  %v7954_v12 = vld [vmem:[#allocation3 + $0x110] sm:$0xff]  ;;  %9916 = vst [vmem:[#allocation21_spill] sm:$0xff] %v7970_v59 }
  0xca   :  { %664 = vmatprep.mubr.f32.mxu0 %v7776_v20  ;;  %v415_v20 = vmul.f32 %v7951_v58, %v7949_v35  ;;  %v416_v2 = vmul.f32 %v7956_v43, %v7954_v12 }
  0xcb   :  { %6062 = vmatmul.mubr.f32.gmra.mrb[28].mxu1 %v411_v11 }
  0xcc   :  { %6064 = vmatprep.mubr.f32.mxu1 %v412_v1  ;;  %v7977_v1 = vld [vmem:[#allocation3 + $0x128] sm:$0xff] }
  0xcd   :  { %665 = vmatmul.mubr.f32.gmra.mrb[14].mxu0 %v7774_v19  ;;  %v7968_v19 = vld [vmem:[#allocation3 + $0x120] sm:$0xff] }
  0xce   :  { %669 = vmatprep.mubr.f32.mxu0 %v7780_v22  ;;  %9915 = vst [vmem:[#allocation20_spill] sm:$0xff] %v7968_v19  ;;  %v417_v22 = vmul.f32 %v7965_v4, %v7963_v51  ;;  %v418_v11 = vmul.f32 %v7970_v59, %v7968_v19  ;;  %v7993_v19 = vld [vmem:[#allocation6 + $0x138] sm:$0xff]  ;;  %v7998_v59 = vld [vmem:[#allocation6 + $0x140] sm:$0xff] }
  0xcf   :  { %6065 = vmatmul.mubr.f32.gmra.mrb[30].mxu1 %v413_v13  ;;  %v7979_v13 = vld [vmem:[#allocation6 + $0x128] sm:$0xff]  ;;  %9920 = vst [vmem:[#allocation25_spill] sm:$0xff] %v7998_v59 }
  0xd0   :  { %6067 = vmatprep.mubr.f32.mxu1 %v414_v56  ;;  %v7984_v56 = vld [vmem:[#allocation6 + $0x130] sm:$0xff] }
  0xd1   :  { %670 = vmatmul.mubr.f32.gmra.mrb[16].mxu0 %v7778_v21  ;;  %v7982_v21 = vld [vmem:[#allocation3 + $0x130] sm:$0xff]  ;;  %9918 = vst [vmem:[#allocation23_spill] sm:$0xff] %v7984_v56 }
  0xd2   :  { %674 = vmatprep.mubr.f32.mxu0 %v7789_v30  ;;  %9917 = vst [vmem:[#allocation22_spill] sm:$0xff] %v7982_v21  ;;  %v419_v30 = vmul.f32 %v7979_v13, %v7977_v1 }
  0xd3   :  { %6068 = vmatmul.mubr.f32.gmra.mrb[32].mxu1 %v415_v20  ;;  %v420_v20 = vmul.f32 %v7984_v56, %v7982_v21  ;;  %v8007_v21 = vld [vmem:[#allocation6 + $0x148] sm:$0xff]  ;;  %v8012_v56 = vld [vmem:[#allocation6 + $0x150] sm:$0xff] }
  0xd4   :  { %6070 = vmatprep.mubr.f32.mxu1 %v416_v2  ;;  %v7991_v2 = vld [vmem:[#allocation3 + $0x138] sm:$0xff]  ;;  %9922 = vst [vmem:[#allocation27_spill] sm:$0xff] %v8012_v56 }
  0xd5   :  { %675 = vmatmul.mubr.f32.gmra.mrb[18].mxu0 %v7787_v29  ;;  %v7996_v29 = vld [vmem:[#allocation3 + $0x140] sm:$0xff] }
  0xd6   :  { %679 = vmatprep.mubr.f32.mxu0 %v7793_v32  ;;  %9919 = vst [vmem:[#allocation24_spill] sm:$0xff] %v7996_v29  ;;  %v421_v32 = vmul.f32 %v7993_v19, %v7991_v2 }
  0xd7   :  { %6071 = vmatmul.mubr.f32.gmra.mrb[34].mxu1 %v417_v22  ;;  %v422_v22 = vmul.f32 %v7998_v59, %v7996_v29  ;;  %v8021_v29 = vld [vmem:[#allocation6 + $0x158] sm:$0xff]  ;;  %v8026_v59 = vld [vmem:[#allocation6 + $0x160] sm:$0xff] }
  0xd8   :  { %6073 = vmatprep.mubr.f32.mxu1 %v418_v11  ;;  %v8005_v11 = vld [vmem:[#allocation3 + $0x148] sm:$0xff]  ;;  %9924 = vst [vmem:[#allocation29_spill] sm:$0xff] %v8026_v59 }
  0xd9   :  { %680 = vmatmul.mubr.f32.gmra.mrb[20].mxu0 %v7791_v31  ;;  %v8010_v31 = vld [vmem:[#allocation3 + $0x150] sm:$0xff] }
  0xda   :  { %684 = vmatprep.mubr.f32.mxu0 %v7802_v39  ;;  %9921 = vst [vmem:[#allocation26_spill] sm:$0xff] %v8010_v31  ;;  %v423_v39 = vmul.f32 %v8007_v21, %v8005_v11 }
  0xdb   :  { %6074 = vmatmul.mubr.f32.gmra.mrb[36].mxu1 %v419_v30  ;;  %v424_v30 = vmul.f32 %v8012_v56, %v8010_v31  ;;  %v8035_v31 = vld [vmem:[#allocation6 + $0x168] sm:$0xff]  ;;  %v8040_v56 = vld [vmem:[#allocation6 + $0x170] sm:$0xff] }
  0xdc   :  { %6076 = vmatprep.mubr.f32.mxu1 %v420_v20  ;;  %v8019_v20 = vld [vmem:[#allocation3 + $0x158] sm:$0xff]  ;;  %9926 = vst [vmem:[#allocation31_spill] sm:$0xff] %v8040_v56 }
  0xdd   :  { %685 = vmatmul.mubr.f32.gmra.mrb[22].mxu0 %v7800_v38  ;;  %v8024_v38 = vld [vmem:[#allocation3 + $0x160] sm:$0xff] }
  0xde   :  { %689 = vmatprep.mubr.f32.mxu0 %v7806_v41  ;;  %9923 = vst [vmem:[#allocation28_spill] sm:$0xff] %v8024_v38  ;;  %v425_v41 = vmul.f32 %v8021_v29, %v8019_v20 }
  0xdf   :  { %6077 = vmatmul.mubr.f32.gmra.mrb[38].mxu1 %v421_v32  ;;  %v426_v32 = vmul.f32 %v8026_v59, %v8024_v38  ;;  %v8049_v38 = vld [vmem:[#allocation6 + $0x178] sm:$0xff]  ;;  %v8054_v59 = vld [vmem:[#allocation6 + $0x180] sm:$0xff] }
  0xe0   :  { %6079 = vmatprep.mubr.f32.mxu1 %v422_v22  ;;  %v8033_v22 = vld [vmem:[#allocation3 + $0x168] sm:$0xff]  ;;  %9929 = vst [vmem:[#allocation34_spill] sm:$0xff] %v8054_v59 }
  0xe1   :  { %690 = vmatmul.mubr.f32.gmra.mrb[24].mxu0 %v7804_v40  ;;  %v8038_v40 = vld [vmem:[#allocation3 + $0x170] sm:$0xff] }
  0xe2   :  { %694 = vmatprep.mubr.f32.mxu0 %v7815_v48  ;;  %9925 = vst [vmem:[#allocation30_spill] sm:$0xff] %v8038_v40  ;;  %v427_v48 = vmul.f32 %v8035_v31, %v8033_v22 }
  0xe3   :  { %6080 = vmatmul.mubr.f32.gmra.mrb[40].mxu1 %v423_v39  ;;  %v428_v39 = vmul.f32 %v8040_v56, %v8038_v40  ;;  %v8063_v40 = vld [vmem:[#allocation6 + $0x188] sm:$0xff]  ;;  %v8068_v56 = vld [vmem:[#allocation6 + $0x190] sm:$0xff] }
  0xe4   :  { %6082 = vmatprep.mubr.f32.mxu1 %v424_v30  ;;  %v8047_v30 = vld [vmem:[#allocation3 + $0x178] sm:$0xff]  ;;  %9931 = vst [vmem:[#allocation36_spill] sm:$0xff] %v8063_v40  ;;  %9933 = vst [vmem:[#allocation38_spill] sm:$0xff] %v8068_v56 }
  0xe5   :  { %695 = vmatmul.mubr.f32.gmra.mrb[26].mxu0 %v7813_v47  ;;  %9927 = vst [vmem:[#allocation32_spill] sm:$0xff] %v8047_v30  ;;  %v8052_v47 = vld [vmem:[#allocation3 + $0x180] sm:$0xff] }
  0xe6   :  { %699 = vmatprep.mubr.f32.mxu0 %v7819_v50  ;;  %9928 = vst [vmem:[#allocation33_spill] sm:$0xff] %v8052_v47  ;;  %v429_v50 = vmul.f32 %v8049_v38, %v8047_v30  ;;  %v8082_v30 = vld [vmem:[#allocation6 + $0x1a0] sm:$0xff] }
  0xe7   :  { %6083 = vmatmul.mubr.f32.gmra.mrb[42].mxu1 %v425_v41  ;;  %v430_v41 = vmul.f32 %v8054_v59, %v8052_v47  ;;  %v8077_v47 = vld [vmem:[#allocation6 + $0x198] sm:$0xff]  ;;  %v2103_v59 = vld [vmem:[#allocation9] sm:$0xff]  ;;  %9935 = vst [vmem:[#allocation40_spill] sm:$0xff] %v8082_v30 }
  0xe8   :  { %6085 = vmatprep.mubr.f32.mxu1 %v426_v32  ;;  %v8061_v32 = vld [vmem:[#allocation3 + $0x188] sm:$0xff] }
  0xe9   :  { %700 = vmatmul.mubr.f32.gmra.mrb[28].mxu0 %v7817_v49  ;;  %9930 = vst [vmem:[#allocation35_spill] sm:$0xff] %v8061_v32  ;;  %v8066_v49 = vld [vmem:[#allocation3 + $0x190] sm:$0xff] }
  0xea   :  { %704 = vmatprep.mubr.f32.mxu0 %v7828_v61  ;;  %9932 = vst [vmem:[#allocation37_spill] sm:$0xff] %v8066_v49  ;;  %v431_v61 = vmul.f32 %v8063_v40, %v8061_v32  ;;  %v8091_v32 = vld [vmem:[#allocation6 + $0x1a8] sm:$0xff]  ;;  %v8094_v40 = vld [vmem:[#allocation3 + $0x1b0] sm:$0xff] }
  0xeb   :  { %6086 = vmatmul.mubr.f32.gmra.mrb[44].mxu1 %v427_v48  ;;  %v432_v48 = vmul.f32 %v8068_v56, %v8066_v49  ;;  %v8089_v56 = vld [vmem:[#allocation3 + $0x1a8] sm:$0xff]  ;;  %9936 = vst [vmem:[#allocation41_spill] sm:$0xff] %v8094_v40 }
  0xec   :  { %6088 = vmatprep.mubr.f32.mxu1 %v428_v39  ;;  %v8075_v39 = vld [vmem:[#allocation3 + $0x198] sm:$0xff] }
  0xed   :  { %705 = vmatmul.mubr.f32.gmra.mrb[30].mxu0 %v7826_v60  ;;  %v8080_v60 = vld [vmem:[#allocation3 + $0x1a0] sm:$0xff] }
  0xee   :  { %709 = vmatprep.mubr.f32.mxu0 %v7832_v63  ;;  %9934 = vst [vmem:[#allocation39_spill] sm:$0xff] %v8080_v60  ;;  %v2104_v63 = vld [vmem:[#allocation9 + $0x8] sm:$0xff]  ;;  %v434_v49 = vmul.f32 %v8082_v30, %v8080_v60  ;;  %v8103_v60 = vld [vmem:[#allocation3 + $0x1b8] sm:$0xff]  ;;  %v2107_v30 = vld [vmem:[#allocation9 + $0x20] sm:$0xff] }
  0xef   :  { %6089 = vmatmul.mubr.f32.gmra.mrb[46].mxu1 %v429_v50  ;;  %v6963_v50 = vpack.c.bf16 %v2104_v63, %v2103_v59  ;;  %v2106_v59 = vld [vmem:[#allocation9 + $0x18] sm:$0xff] }
  0xf0   :  { %6091 = vmatprep.mubr.f32.mxu1 %v430_v41  ;;  %v433_v41 = vmul.f32 %v8077_v47, %v8075_v39 }
  0xf1   :  { %710 = vmatmul.mubr.f32.gmra.mrb[32].mxu0 %v7830_v62  ;;  %6964 = vmatprep.subr.bf16.mxu1 %v6963_v50  ;;  %v2105_v62 = vld [vmem:[#allocation9 + $0x10] sm:$0xff] }
  0xf2   :  { %714 = vmatprep.mubr.f32.mxu0 %v7841_v9  ;;  %v8096_v9 = vld [vmem:[#allocation6 + $0x1b0] sm:$0xff]  ;;  %6966 = vmatpush3.bf16.msra.mxu1 %v6963_v50  ;;  %v8108_v50 = vld [vmem:[#allocation3 + $0x1c0] sm:$0xff] }
  0xf3   :  { %6092 = vmatmul.mubr.f32.gmra.mrb[48].mxu1 %v431_v61  ;;  %9937 = vst [vmem:[#allocation42_spill] sm:$0xff] %v8096_v9  ;;  %v6967_v61 = vpack.c.bf16 %v2106_v59, %v2105_v62  ;;  %v436_v63 = vmul.f32 %v8096_v9, %v8094_v40  ;;  %9938 = vst [vmem:[#allocation43_spill] sm:$0xff] %v8108_v50  ;;  %v8117_v40 = vld [vmem:[#allocation3 + $0x1c8] sm:$0xff]  ;;  %v2109_v9 = vld [vmem:[#allocation9 + $0x30] sm:$0xff] }
  0xf4   :  { %6094 = vmatprep.mubr.f32.mxu1 %v432_v48  ;;  %v435_v48 = vmul.f32 %v8091_v32, %v8089_v56 }
  0xf5   :  { %715 = vmatmul.mubr.f32.gmra.mrb[34].mxu0 %v7839_v8  ;;  %v8105_v8 = vld [vmem:[#allocation6 + $0x1b8] sm:$0xff]  ;;  %6968 = vmatprep.subr.bf16.mxu1 %v6967_v61 }
  0xf6   :  { %719 = vmatprep.mubr.f32.mxu0 %v7845_v15  ;;  %v8110_v15 = vld [vmem:[#allocation6 + $0x1c0] sm:$0xff]  ;;  %6970 = vmatpush3.bf16.msra.mxu1 %v6967_v61  ;;  %v437_v62 = vmul.f32 %v8105_v8, %v8103_v60  ;;  %v8122_v61 = vld [vmem:[#allocation3 + $0x1d0] sm:$0xff] }
  0xf7   :  { %6095 = vmatmul.mubr.f32.gmra.mrb[50].mxu1 %v433_v41  ;;  %9939 = vst [vmem:[#allocation44_spill] sm:$0xff] %v8110_v15  ;;  %v2108_v41 = vld [vmem:[#allocation9 + $0x28] sm:$0xff]  ;;  %v438_v59 = vmul.f32 %v8110_v15, %v8108_v50  ;;  %9940 = vst [vmem:[#allocation45_spill] sm:$0xff] %v8122_v61  ;;  %v8131_v50 = vld [vmem:[#allocation3 + $0x1d8] sm:$0xff] }
  0xf8   :  { %6097 = vmatprep.mubr.f32.mxu1 %v434_v49  ;;  %v6971_v49 = vpack.c.bf16 %v2108_v41, %v2107_v30  ;;  %v2110_v30 = vld [vmem:[#allocation9 + $0x38] sm:$0xff]  ;;  %v2111_v15 = vld [vmem:[#allocation9 + $0x40] sm:$0xff] }
  0xf9   :  { %720 = vmatmul.mubr.f32.gmra.mrb[36].mxu0 %v7843_v14  ;;  %v8119_v14 = vld [vmem:[#allocation6 + $0x1c8] sm:$0xff] }
  0xfa   :  { %724 = vmatprep.mubr.f32.mxu0 %v7853_v18  ;;  %6972 = vmatprep.subr.bf16.mxu1 %v6971_v49  ;;  %v8124_v18 = vld [vmem:[#allocation6 + $0x1d0] sm:$0xff] }
  0xfb   :  { %6098 = vmatmul.mubr.f32.gmra.mrb[52].mxu1 %v435_v48  ;;  %9941 = vst [vmem:[#allocation46_spill] sm:$0xff] %v8124_v18  ;;  %v6975_v48 = vpack.c.bf16 %v2110_v30, %v2109_v9  ;;  %v440_v41 = vmul.f32 %v8124_v18, %v8122_v61  ;;  %v2112_v9 = vld [vmem:[#allocation9 + $0x48] sm:$0xff]  ;;  %v2113_v18 = vld [vmem:[#allocation9 + $0x50] sm:$0xff] }
  0xfc   :  { %6100 = vmatprep.mubr.f32.mxu1 %v436_v63  ;;  %6974 = vmatpush3.bf16.msra.mxu1 %v6971_v49  ;;  %v439_v63 = vmul.f32 %v8119_v14, %v8117_v40  ;;  %v8136_v49 = vld [vmem:[#allocation3 + $0x1e0] sm:$0xff]  ;;  %v8145_v61 = vld [vmem:[#allocation3 + $0x1e8] sm:$0xff] }
  0xfd   :  { %725 = vmatmul.mubr.f32.gmra.mrb[38].mxu0 %v7851_v17  ;;  %v8133_v17 = vld [vmem:[#allocation6 + $0x1d8] sm:$0xff]  ;;  %6976 = vmatprep.subr.bf16.mxu1 %v6975_v48  ;;  %9942 = vst [vmem:[#allocation47_spill] sm:$0xff] %v8136_v49 }
  0xfe   :  { %729 = vmatprep.mubr.f32.mxu0 %v7858_v24  ;;  %v8138_v24 = vld [vmem:[#allocation6 + $0x1e0] sm:$0xff] }
  0xff   :  { %6101 = vmatmul.mubr.f32.gmra.mrb[54].mxu1 %v437_v62  ;;  %9943 = vst [vmem:[#allocation48_spill] sm:$0xff] %v8138_v24  ;;  %v6979_v62 = vpack.c.bf16 %v2112_v9, %v2111_v15  ;;  %v442_v30 = vmul.f32 %v8138_v24, %v8136_v49  ;;  %v2114_v15 = vld [vmem:[#allocation9 + $0x58] sm:$0xff]  ;;  %v2115_v24 = vld [vmem:[#allocation9 + $0x60] sm:$0xff] }
 0x100   :  { %6103 = vmatprep.mubr.f32.mxu1 %v438_v59  ;;  %6978 = vmatpush3.bf16.msra.mxu1 %v6975_v48  ;;  %v441_v59 = vmul.f32 %v8133_v17, %v8131_v50  ;;  %v8150_v48 = vld [vmem:[#allocation3 + $0x1f0] sm:$0xff]  ;;  %v8159_v49 = vld [vmem:[#allocation3 + $0x1f8] sm:$0xff] }
 0x101   :  { %730 = vmatmul.mubr.f32.gmra.mrb[40].mxu0 %v7856_v23  ;;  %v8147_v23 = vld [vmem:[#allocation6 + $0x1e8] sm:$0xff]  ;;  %6980 = vmatprep.subr.bf16.mxu1 %v6979_v62  ;;  %9944 = vst [vmem:[#allocation49_spill] sm:$0xff] %v8150_v48 }
 0x102   :  { %734 = vmatprep.mubr.f32.mxu0 %v7867_v33  ;;  %v8152_v33 = vld [vmem:[#allocation6 + $0x1f0] sm:$0xff] }
 0x103   :  { %6104 = vmatmul.mubr.f32.gmra.mrb[56].mxu1 %v439_v63  ;;  %9945 = vst [vmem:[#allocation50_spill] sm:$0xff] %v8152_v33  ;;  %v6983_v63 = vpack.c.bf16 %v2114_v15, %v2113_v18  ;;  %v444_v9 = vmul.f32 %v8152_v33, %v8150_v48  ;;  %v2116_v18 = vld [vmem:[#allocation9 + $0x68] sm:$0xff]  ;;  %v2117_v33 = vld [vmem:[#allocation9 + $0x70] sm:$0xff] }
 0x104   :  { %6106 = vmatprep.mubr.f32.mxu1 %v440_v41  ;;  %6982 = vmatpush3.bf16.msra.mxu1 %v6979_v62  ;;  %v443_v41 = vmul.f32 %v8147_v23, %v8145_v61  ;;  %v8164_v62 = vld [vmem:[#allocation3 + $0x200] sm:$0xff]  ;;  %v8173_v48 = vld [vmem:[#allocation3 + $0x208] sm:$0xff] }
 0x105   :  { %735 = vmatmul.mubr.f32.gmra.mrb[42].mxu0 %v7865_v28  ;;  %v8161_v28 = vld [vmem:[#allocation6 + $0x1f8] sm:$0xff]  ;;  %6984 = vmatprep.subr.bf16.mxu1 %v6983_v63  ;;  %9946 = vst [vmem:[#allocation51_spill] sm:$0xff] %v8164_v62 }
 0x106   :  { %739 = vmatprep.mubr.f32.mxu0 %v7872_v34  ;;  %v8166_v34 = vld [vmem:[#allocation6 + $0x200] sm:$0xff] }
 0x107   :  { %6107 = vmatmul.mubr.f32.gmra.mrb[58].mxu1 %v441_v59  ;;  %9947 = vst [vmem:[#allocation52_spill] sm:$0xff] %v8166_v34  ;;  %v6987_v59 = vpack.c.bf16 %v2116_v18, %v2115_v24  ;;  %v446_v15 = vmul.f32 %v8166_v34, %v8164_v62  ;;  %v2118_v24 = vld [vmem:[#allocation9 + $0x78] sm:$0xff]  ;;  %v8194_v34 = vld [vmem:[#allocation6 + $0x220] sm:$0xff] }
 0x108   :  { %6109 = vmatprep.mubr.f32.mxu1 %v442_v30  ;;  %6986 = vmatpush3.bf16.msra.mxu1 %v6983_v63  ;;  %v445_v30 = vmul.f32 %v8161_v28, %v8159_v49  ;;  %v8178_v63 = vld [vmem:[#allocation3 + $0x210] sm:$0xff]  ;;  %v8187_v62 = vld [vmem:[#allocation3 + $0x218] sm:$0xff] }
 0x109   :  { %740 = vmatmul.mubr.f32.gmra.mrb[44].mxu0 %v7870_v25  ;;  %v8175_v25 = vld [vmem:[#allocation6 + $0x208] sm:$0xff]  ;;  %6988 = vmatprep.subr.bf16.mxu1 %v6987_v59 }
 0x10a   :  { %744 = vmatprep.mubr.f32.mxu0 %v7881_v37  ;;  %v8180_v37 = vld [vmem:[#allocation6 + $0x210] sm:$0xff] }
 0x10b   :  { %6110 = vmatmul.mubr.f32.gmra.mrb[60].mxu1 %v443_v41  ;;  %v6991_v41 = vpack.c.bf16 %v2118_v24, %v2117_v33  ;;  %v448_v18 = vmul.f32 %v8180_v37, %v8178_v63  ;;  %v8208_v24 = vld [vmem:[#allocation6 + $0x230] sm:$0xff] }
 0x10c   :  { %6112 = vmatprep.mubr.f32.mxu1 %v444_v9  ;;  %6990 = vmatpush3.bf16.msra.mxu1 %v6987_v59  ;;  %v447_v9 = vmul.f32 %v8175_v25, %v8173_v48  ;;  %v8192_v59 = vld [vmem:[#allocation3 + $0x220] sm:$0xff]  ;;  %9950 = vst [vmem:[#allocation55_spill] sm:$0xff] %v8208_v24 }
 0x10d   :  { %745 = vmatmul.mubr.f32.gmra.mrb[46].mxu0 %v7879_v36  ;;  %v8189_v36 = vld [vmem:[#allocation6 + $0x218] sm:$0xff]  ;;  %6992 = vmatprep.subr.bf16.mxu1 %v6991_v41  ;;  %9948 = vst [vmem:[#allocation53_spill] sm:$0xff] %v8192_v59  ;;  %v450_v33 = vmul.f32 %v8194_v34, %v8192_v59  ;;  %v8222_v59 = vld [vmem:[#allocation6 + $0x240] sm:$0xff] }
 0x10e   :  { %749 = vmatprep.mubr.f32.mxu0 %v7886_v42  ;;  %v449_v42 = vmul.f32 %v8189_v36, %v8187_v62  ;;  %9952 = vst [vmem:[#allocation57_spill] sm:$0xff] %v8222_v59 }
 0x10f   :  { %6113 = vmatmul.mubr.f32.gmra.mrb[62].mxu1 %v445_v30  ;;  %v8201_v30 = vld [vmem:[#allocation3 + $0x228] sm:$0xff] }
 0x110   :  { %6115 = vmatprep.mubr.f32.mxu1 %v446_v15  ;;  %6994 = vmatpush3.bf16.msra.mxu1 %v6991_v41  ;;  %v8203_v15 = vld [vmem:[#allocation6 + $0x228] sm:$0xff] }
 0x111   :  { %750 = vmatmul.mubr.f32.gmra.mrb[48].mxu0 %v7884_v55  ;;  %v8206_v55 = vld [vmem:[#allocation3 + $0x230] sm:$0xff] }
 0x112   :  { %754 = vmatprep.mubr.f32.mxu0 %v7895_v45  ;;  %9949 = vst [vmem:[#allocation54_spill] sm:$0xff] %v8206_v55  ;;  %v451_v45 = vmul.f32 %v8203_v15, %v8201_v30  ;;  %v452_v41 = vmul.f32 %v8208_v24, %v8206_v55  ;;  %v8231_v55 = vld [vmem:[#allocation6 + $0x248] sm:$0xff]  ;;  %v8236_v24 = vld [vmem:[#allocation6 + $0x250] sm:$0xff] }
 0x113   :  { %6116 = vmatmul.mubr.f32.gmra.mrb[64].mxu1 %v447_v9  ;;  %v8215_v9 = vld [vmem:[#allocation3 + $0x238] sm:$0xff]  ;;  %9955 = vst [vmem:[#allocation60_spill] sm:$0xff] %v8236_v24 }
 0x114   :  { %6118 = vmatprep.mubr.f32.mxu1 %v448_v18  ;;  %v8217_v18 = vld [vmem:[#allocation6 + $0x238] sm:$0xff] }
 0x115   :  { %755 = vmatmul.mubr.f32.gmra.mrb[50].mxu0 %v7893_v44  ;;  %v8220_v44 = vld [vmem:[#allocation3 + $0x240] sm:$0xff] }
 0x116   :  { %759 = vmatprep.mubr.f32.mxu0 %v7900_v46  ;;  %9951 = vst [vmem:[#allocation56_spill] sm:$0xff] %v8220_v44  ;;  %v453_v46 = vmul.f32 %v8217_v18, %v8215_v9 }
 0x117   :  { %6119 = vmatmul.mubr.f32.gmra.mrb[66].mxu1 %v449_v42  ;;  %v454_v42 = vmul.f32 %v8222_v59, %v8220_v44  ;;  %v8245_v44 = vld [vmem:[#allocation6 + $0x258] sm:$0xff]  ;;  %v8250_v59 = vld [vmem:[#allocation6 + $0x260] sm:$0xff] }
 0x118   :  { %6121 = vmatprep.mubr.f32.mxu1 %v450_v33  ;;  %v8229_v33 = vld [vmem:[#allocation3 + $0x248] sm:$0xff]  ;;  %9957 = vst [vmem:[#allocation62_spill] sm:$0xff] %v8245_v44  ;;  %9959 = vst [vmem:[#allocation64_spill] sm:$0xff] %v8250_v59 }
 0x119   :  { %760 = vmatmul.mubr.f32.gmra.mrb[52].mxu0 %v7898_v57  ;;  %9953 = vst [vmem:[#allocation58_spill] sm:$0xff] %v8229_v33  ;;  %v8234_v57 = vld [vmem:[#allocation3 + $0x250] sm:$0xff] }
 0x11a   :  { %764 = vmatprep.mubr.f32.mxu0 %v7909_v53  ;;  %9954 = vst [vmem:[#allocation59_spill] sm:$0xff] %v8234_v57  ;;  %v455_v53 = vmul.f32 %v8231_v55, %v8229_v33  ;;  %v207_v33 = vld [vmem:[#allocation3 + $0x288] sm:$0xff] }
 0x11b   :  { %6122 = vmatmul.mubr.f32.gmra.mrb[68].mxu1 %v451_v45  ;;  %v456_v45 = vmul.f32 %v8236_v24, %v8234_v57  ;;  %v8257_v57 = vld [vmem:[#allocation6 + $0x268] sm:$0xff]  ;;  %v8260_v24 = vld [vmem:[#allocation6 + $0x270] sm:$0xff] }
 0x11c   :  { %6124 = vmatprep.mubr.f32.mxu1 %v452_v41  ;;  %v8243_v41 = vld [vmem:[#allocation3 + $0x258] sm:$0xff]  ;;  %9960 = vst [vmem:[#allocation65_spill] sm:$0xff] %v8260_v24 }
 0x11d   :  { %765 = vmatmul.mubr.f32.gmra.mrb[54].mxu0 %v7907_v52  ;;  %9956 = vst [vmem:[#allocation61_spill] sm:$0xff] %v8243_v41  ;;  %v8248_v52 = vld [vmem:[#allocation3 + $0x260] sm:$0xff] }
 0x11e   :  { %769 = vmatprep.mubr.f32.mxu0 %v7914_v54  ;;  %9958 = vst [vmem:[#allocation63_spill] sm:$0xff] %v8248_v52  ;;  %v457_v54 = vmul.f32 %v8245_v44, %v8243_v41  ;;  %v333_v41 = vld [vmem:[#allocation6 + $0x278] sm:$0xff] }
 0x11f   :  { %6125 = vmatmul.mubr.f32.gmra.mrb[70].mxu1 %v453_v46  ;;  %v458_v46 = vmul.f32 %v8250_v59, %v8248_v52  ;;  %v206_v52 = vld [vmem:[#allocation3 + $0x280] sm:$0xff] }
 0x120   :  { %6127 = vmatprep.mubr.f32.mxu1 %v454_v42  ;;  %v203_v42 = vld [vmem:[#allocation3 + $0x268] sm:$0xff]  ;;  %v334_v59 = vld [vmem:[#allocation6 + $0x280] sm:$0xff] }
 0x121   :  { %770 = vmatmul.mubr.f32.gmra.mrb[56].mxu0 %v7912_v0  ;;  %v204_v0 = vld [vmem:[#allocation3 + $0x270] sm:$0xff]  ;;  %v462_v44 = vmul.f32 %v334_v59, %v206_v52  ;;  %v211_v52 = vld [vmem:[#allocation3 + $0x2a8] sm:$0xff] }
 0x122   :  { %774 = vmatprep.mubr.f32.mxu0 %v7923_v6  ;;  %v459_v6 = vmul.f32 %v8257_v57, %v203_v42 }
 0x123   :  { %6128 = vmatmul.mubr.f32.gmra.mrb[72].mxu1 %v455_v53  ;;  %v460_v53 = vmul.f32 %v8260_v24, %v204_v0  ;;  %v209_v0 = vld [vmem:[#allocation3 + $0x298] sm:$0xff] }
 0x124   :  { %6130 = vmatprep.mubr.f32.mxu1 %v456_v45  ;;  %v205_v45 = vld [vmem:[#allocation3 + $0x278] sm:$0xff] }
 0x125   :  { %775 = vmatmul.mubr.f32.gmra.mrb[58].mxu0 %v7921_v5  ;;  %v461_v5 = vmul.f32 %v333_v41, %v205_v45  ;;  %v337_v24 = vld [vmem:[#allocation6 + $0x298] sm:$0xff]  ;;  %v338_v41 = vld [vmem:[#allocation6 + $0x2a0] sm:$0xff] }
 0x126   :  { %779 = vmatprep.mubr.f32.mxu0 %v7928_v7  ;;  %v335_v7 = vld [vmem:[#allocation6 + $0x288] sm:$0xff]  ;;  %v465_v59 = vmul.f32 %v337_v24, %v209_v0  ;;  %v341_v45 = vld [vmem:[#allocation6 + $0x2b8] sm:$0xff]  ;;  %v342_v24 = vld [vmem:[#allocation6 + $0x2c0] sm:$0xff] }
 0x127   :  { %6131 = vmatmul.mubr.f32.gmra.mrb[74].mxu1 %v457_v54  ;;  %v208_v54 = vld [vmem:[#allocation3 + $0x290] sm:$0xff]  ;;  %v463_v42 = vmul.f32 %v335_v7, %v207_v33  ;;  %v215_v7 = vld [vmem:[#allocation3 + $0x2c8] sm:$0xff]  ;;  %v217_v0 = vld [vmem:[#allocation3 + $0x2d8] sm:$0xff] }
 0x128   :  { %6133 = vmatprep.mubr.f32.mxu1 %v458_v46  ;;  %v336_v46 = vld [vmem:[#allocation6 + $0x290] sm:$0xff] }
 0x129   :  { %780 = vmatmul.mubr.f32.gmra.mrb[60].mxu0 %v7926_v3  ;;  %v464_v3 = vmul.f32 %v336_v46, %v208_v54  ;;  %v340_v33 = vld [vmem:[#allocation6 + $0x2b0] sm:$0xff]  ;;  %v343_v54 = vld [vmem:[#allocation6 + $0x2c8] sm:$0xff] }
 0x12a   :  { %784 = vmatprep.mubr.f32.mxu0 %v7937_v26  ;;  %v210_v26 = vld [vmem:[#allocation3 + $0x2a0] sm:$0xff]  ;;  %v344_v46 = vld [vmem:[#allocation6 + $0x2d0] sm:$0xff] }
 0x12b   :  { %6134 = vmatmul.mubr.f32.gmra.mrb[76].mxu1 %v459_v6  ;;  %v339_v6 = vld [vmem:[#allocation6 + $0x2a8] sm:$0xff] }
 0x12c   :  { %6136 = vmatprep.mubr.f32.mxu1 %v460_v53  ;;  %v213_v53 = vld [vmem:[#allocation3 + $0x2b8] sm:$0xff] }
 0x12d   :  { %785 = vmatmul.mubr.f32.gmra.mrb[62].mxu0 %v7935_v16  ;;  %v466_v16 = vmul.f32 %v338_v41, %v210_v26  ;;  %v345_v26 = vld [vmem:[#allocation6 + $0x2d8] sm:$0xff]  ;;  %v9962_v41 = vld [vmem:[#allocation20_spill] sm:$0xff] }
 0x12e   :  { %789 = vmatprep.mubr.f32.mxu0 %v7942_v27  ;;  %v212_v27 = vld [vmem:[#allocation3 + $0x2b0] sm:$0xff] }
 0x12f   :  { %6137 = vmatmul.mubr.f32.gmra.mrb[78].mxu1 %v461_v5  ;;  %v469_v5 = vmul.f32 %v341_v45, %v213_v53  ;;  %v221_v45 = vld [vmem:[#allocation3 + $0x2f8] sm:$0xff] }
 0x130   :  { %6139 = vmatprep.mubr.f32.mxu1 %v462_v44  ;;  %v467_v44 = vmul.f32 %v339_v6, %v211_v52  ;;  %v219_v52 = vld [vmem:[#allocation3 + $0x2e8] sm:$0xff] }
 0x131   :  { %790 = vmatmul.mubr.f32.gmra.mrb[64].mxu0 %v7940_v10  ;;  %v468_v10 = vmul.f32 %v340_v33, %v212_v27  ;;  %v347_v6 = vld [vmem:[#allocation6 + $0x2e8] sm:$0xff]  ;;  %v220_v27 = vld [vmem:[#allocation3 + $0x2f0] sm:$0xff] }
 0x132   :  { %794 = vmatprep.mubr.f32.mxu0 %v7951_v58  ;;  %v214_v58 = vld [vmem:[#allocation3 + $0x2c0] sm:$0xff]  ;;  %v348_v33 = vld [vmem:[#allocation6 + $0x2f0] sm:$0xff] }
 0x133   :  { %6140 = vmatmul.mubr.f32.gmra.mrb[80].mxu1 %v463_v42  ;;  %v9961_v42 = vld [vmem:[#allocation21_spill] sm:$0xff]  ;;  %v476_v53 = vmul.f32 %v348_v33, %v220_v27  ;;  %v9967_v27 = vld [vmem:[#allocation27_spill] sm:$0xff] }
 0x134   :  { %6142 = vmatprep.mubr.f32.mxu1 %v464_v3  ;;  %v471_v3 = vmul.f32 %v343_v54, %v215_v7  ;;  %v223_v7 = vld [vmem:[#allocation3 + $0x308] sm:$0xff] }
 0x135   :  { %795 = vmatmul.mubr.f32.gmra.mrb[66].mxu0 %v7949_v35  ;;  %v470_v35 = vmul.f32 %v342_v24, %v214_v58  ;;  %v349_v58 = vld [vmem:[#allocation6 + $0x2f8] sm:$0xff]  ;;  %v9964_v24 = vld [vmem:[#allocation22_spill] sm:$0xff]  ;;  %v351_v54 = vld [vmem:[#allocation6 + $0x308] sm:$0xff] }
 0x136   :  { %799 = vmatprep.mubr.f32.mxu0 %v7956_v43  ;;  %v216_v43 = vld [vmem:[#allocation3 + $0x2d0] sm:$0xff] }
 0x137   :  { %6143 = vmatmul.mubr.f32.gmra.mrb[82].mxu1 %v465_v59  ;;  %v346_v59 = vld [vmem:[#allocation6 + $0x2e0] sm:$0xff] }
 0x138   :  { %6145 = vmatprep.mubr.f32.mxu1 %v466_v16  ;;  %v473_v16 = vmul.f32 %v345_v26, %v217_v0  ;;  %v225_v0 = vld [vmem:[#allocation3 + $0x318] sm:$0xff] }
 0x139   :  { %800 = vmatmul.mubr.f32.gmra.mrb[68].mxu0 %v7954_v12  ;;  %v472_v12 = vmul.f32 %v344_v46, %v216_v43  ;;  %v224_v43 = vld [vmem:[#allocation3 + $0x310] sm:$0xff]  ;;  %v353_v26 = vld [vmem:[#allocation6 + $0x318] sm:$0xff] }
 0x13a   :  { %804 = vmatprep.mubr.f32.mxu0 %v7965_v4  ;;  %v218_v4 = vld [vmem:[#allocation3 + $0x2e0] sm:$0xff]  ;;  %v352_v46 = vld [vmem:[#allocation6 + $0x310] sm:$0xff] }
 0x13b   :  { %6146 = vmatmul.mubr.f32.gmra.mrb[84].mxu1 %v467_v44  ;;  %v9963_v44 = vld [vmem:[#allocation23_spill] sm:$0xff] }
 0x13c   :  { %6148 = vmatprep.mubr.f32.mxu1 %v468_v10  ;;  %v475_v10 = vmul.f32 %v347_v6, %v219_v52  ;;  %v228_v52 = vld [vmem:[#allocation3 + $0x330] sm:$0xff] }
 0x13d   :  { %805 = vmatmul.mubr.f32.gmra.mrb[70].mxu0 %v7963_v51  ;;  %v474_v51 = vmul.f32 %v346_v59, %v218_v4  ;;  %v354_v4 = vld [vmem:[#allocation6 + $0x320] sm:$0xff]  ;;  %v481_v59 = vmul.f32 %v353_v26, %v225_v0  ;;  %v356_v6 = vld [vmem:[#allocation6 + $0x330] sm:$0xff]  ;;  %v235_v26 = vld [vmem:[#allocation3 + $0x368] sm:$0xff] }
 0x13e   :  { %809 = vmatprep.mubr.f32.mxu0 %v9961_v42  ;;  %v9965_v42 = vld [vmem:[#allocation25_spill] sm:$0xff] }
 0x13f   :  { %6149 = vmatmul.mubr.f32.gmra.mrb[86].mxu1 %v469_v5  ;;  %v350_v5 = vld [vmem:[#allocation6 + $0x300] sm:$0xff] }
 0x140   :  { %6151 = vmatprep.mubr.f32.mxu1 %v470_v35  ;;  %v477_v35 = vmul.f32 %v349_v58, %v221_v45  ;;  %v9968_v45 = vld [vmem:[#allocation26_spill] sm:$0xff] }
 0x141   :  { %810 = vmatmul.mubr.f32.gmra.mrb[72].mxu0 %v9962_v41  ;;  %v9966_v41 = vld [vmem:[#allocation24_spill] sm:$0xff]  ;;  %v358_v58 = vld [vmem:[#allocation6 + $0x340] sm:$0xff] }
 0x142   :  { %814 = vmatprep.mubr.f32.mxu0 %v7979_v13  ;;  %v222_v13 = vld [vmem:[#allocation3 + $0x300] sm:$0xff] }
 0x143   :  { %6152 = vmatmul.mubr.f32.gmra.mrb[88].mxu1 %v471_v3  ;;  %v479_v3 = vmul.f32 %v351_v54, %v223_v7  ;;  %v9969_v7 = vld [vmem:[#allocation29_spill] sm:$0xff] }
 0x144   :  { %6154 = vmatprep.mubr.f32.mxu1 %v472_v12  ;;  %v480_v12 = vmul.f32 %v352_v46, %v224_v43  ;;  %v233_v46 = vld [vmem:[#allocation3 + $0x358] sm:$0xff] }
 0x145   :  { %815 = vmatmul.mubr.f32.gmra.mrb[74].mxu0 %v7977_v1  ;;  %v478_v1 = vmul.f32 %v350_v5, %v222_v13  ;;  %v231_v13 = vld [vmem:[#allocation3 + $0x348] sm:$0xff] }
 0x146   :  { %819 = vmatprep.mubr.f32.mxu0 %v9963_v44  ;;  %v484_v44 = vmul.f32 %v356_v6, %v228_v52  ;;  %v359_v5 = vld [vmem:[#allocation6 + $0x348] sm:$0xff]  ;;  %v237_v52 = vld [vmem:[#allocation3 + $0x378] sm:$0xff] }
 0x147   :  { %6155 = vmatmul.mubr.f32.gmra.mrb[90].mxu1 %v473_v16  ;;  %v227_v16 = vld [vmem:[#allocation3 + $0x328] sm:$0xff]  ;;  %v487_v54 = vmul.f32 %v359_v5, %v231_v13  ;;  %v365_v6 = vld [vmem:[#allocation6 + $0x378] sm:$0xff]  ;;  %v368_v13 = vld [vmem:[#allocation6 + $0x390] sm:$0xff] }
 0x148   :  { %6157 = vmatprep.mubr.f32.mxu1 %v474_v51  ;;  %v355_v51 = vld [vmem:[#allocation6 + $0x328] sm:$0xff]  ;;  %v9974_v5 = vld [vmem:[#allocation34_spill] sm:$0xff] }
 0x149   :  { %820 = vmatmul.mubr.f32.gmra.mrb[76].mxu0 %v9964_v24  ;;  %v483_v33 = vmul.f32 %v355_v51, %v227_v16 }
 0x14a   :  { %824 = vmatprep.mubr.f32.mxu0 %v7993_v19  ;;  %v226_v19 = vld [vmem:[#allocation3 + $0x320] sm:$0xff] }
 0x14b   :  { %6158 = vmatmul.mubr.f32.gmra.mrb[92].mxu1 %v475_v10  ;;  %v229_v10 = vld [vmem:[#allocation3 + $0x338] sm:$0xff] }
 0x14c   :  { %6160 = vmatprep.mubr.f32.mxu1 %v476_v53  ;;  %v357_v53 = vld [vmem:[#allocation6 + $0x338] sm:$0xff] }
 0x14d   :  { %825 = vmatmul.mubr.f32.gmra.mrb[78].mxu0 %v7991_v2  ;;  %v482_v2 = vmul.f32 %v354_v4, %v226_v19  ;;  %v485_v24 = vmul.f32 %v357_v53, %v229_v10  ;;  %v236_v19 = vld [vmem:[#allocation3 + $0x370] sm:$0xff]  ;;  %v493_v10 = vmul.f32 %v365_v6, %v237_v52 }
 0x14e   :  { %829 = vmatprep.mubr.f32.mxu0 %v9965_v42  ;;  %v361_v42 = vld [vmem:[#allocation6 + $0x358] sm:$0xff]  ;;  %v364_v4 = vld [vmem:[#allocation6 + $0x370] sm:$0xff] }
 0x14f   :  { %6161 = vmatmul.mubr.f32.gmra.mrb[94].mxu1 %v477_v35  ;;  %v232_v35 = vld [vmem:[#allocation3 + $0x350] sm:$0xff]  ;;  %v489_v0 = vmul.f32 %v361_v42, %v233_v46  ;;  %v9975_v46 = vld [vmem:[#allocation33_spill] sm:$0xff]  ;;  %v242_v42 = vld [vmem:[#allocation3 + $0x3a0] sm:$0xff] }
 0x150   :  { %6163 = vmatprep.mubr.f32.mxu1 %v478_v1  ;;  %v360_v1 = vld [vmem:[#allocation6 + $0x350] sm:$0xff] }
 0x151   :  { %830 = vmatmul.mubr.f32.gmra.mrb[80].mxu0 %v9966_v41  ;;  %v488_v43 = vmul.f32 %v360_v1, %v232_v35  ;;  %v363_v41 = vld [vmem:[#allocation6 + $0x368] sm:$0xff] }
 0x152   :  { %834 = vmatprep.mubr.f32.mxu0 %v8007_v21  ;;  %v230_v21 = vld [vmem:[#allocation3 + $0x340] sm:$0xff]  ;;  %v491_v16 = vmul.f32 %v363_v41, %v235_v26  ;;  %v243_v41 = vld [vmem:[#allocation3 + $0x3a8] sm:$0xff] }
 0x153   :  { %6164 = vmatmul.mubr.f32.gmra.mrb[96].mxu1 %v479_v3  ;;  %v9970_v3 = vld [vmem:[#allocation28_spill] sm:$0xff] }
 0x154   :  { %6166 = vmatprep.mubr.f32.mxu1 %v480_v12  ;;  %v362_v12 = vld [vmem:[#allocation6 + $0x360] sm:$0xff] }
 0x155   :  { %835 = vmatmul.mubr.f32.gmra.mrb[82].mxu0 %v8005_v11  ;;  %v486_v11 = vmul.f32 %v358_v58, %v230_v21  ;;  %v239_v21 = vld [vmem:[#allocation3 + $0x388] sm:$0xff] }
 0x156   :  { %839 = vmatprep.mubr.f32.mxu0 %v9967_v27  ;;  %v9972_v27 = vld [vmem:[#allocation30_spill] sm:$0xff]  ;;  %v367_v58 = vld [vmem:[#allocation6 + $0x388] sm:$0xff] }
 0x157   :  { %6167 = vmatmul.mubr.f32.gmra.mrb[98].mxu1 %v481_v59  ;;  %v9971_v59 = vld [vmem:[#allocation31_spill] sm:$0xff] }
 0x158   :  { %6169 = vmatprep.mubr.f32.mxu1 %v482_v2 }
 0x159   :  { %840 = vmatmul.mubr.f32.gmra.mrb[84].mxu0 %v9968_v45 }
 0x15a   :  { %844 = vmatprep.mubr.f32.mxu0 %v8021_v29  ;;  %v234_v29 = vld [vmem:[#allocation3 + $0x360] sm:$0xff] }
 0x15b   :  { %6170 = vmatmul.mubr.f32.gmra.mrb[100].mxu1 %v483_v33  ;;  %v238_v33 = vld [vmem:[#allocation3 + $0x380] sm:$0xff] }
 0x15c   :  { %6172 = vmatprep.mubr.f32.mxu1 %v484_v44  ;;  %v366_v44 = vld [vmem:[#allocation6 + $0x380] sm:$0xff] }
 0x15d   :  { %845 = vmatmul.mubr.f32.gmra.mrb[86].mxu0 %v8019_v20  ;;  %v490_v20 = vmul.f32 %v362_v12, %v234_v29  ;;  %v494_v45 = vmul.f32 %v366_v44, %v238_v33  ;;  %v9976_v29 = vld [vmem:[#allocation36_spill] sm:$0xff]  ;;  %v245_v44 = vld [vmem:[#allocation3 + $0x3b8] sm:$0xff] }
 0x15e   :  { %849 = vmatprep.mubr.f32.mxu0 %v9969_v7 }
 0x15f   :  { %6173 = vmatmul.mubr.f32.gmra.mrb[102].mxu1 %v485_v24  ;;  %v9973_v24 = vld [vmem:[#allocation32_spill] sm:$0xff] }
 0x160   :  { %6175 = vmatprep.mubr.f32.mxu1 %v486_v11  ;;  %v240_v11 = vld [vmem:[#allocation3 + $0x390] sm:$0xff] }
 0x161   :  { %850 = vmatmul.mubr.f32.gmra.mrb[88].mxu0 %v9970_v3  ;;  %v496_v7 = vmul.f32 %v368_v13, %v240_v11  ;;  %v370_v3 = vld [vmem:[#allocation6 + $0x3a0] sm:$0xff] }
 0x162   :  { %854 = vmatprep.mubr.f32.mxu0 %v8035_v31  ;;  %v492_v31 = vmul.f32 %v364_v4, %v236_v19  ;;  %v498_v26 = vmul.f32 %v370_v3, %v242_v42  ;;  %v371_v19 = vld [vmem:[#allocation6 + $0x3a8] sm:$0xff] }
 0x163   :  { %6176 = vmatmul.mubr.f32.gmra.mrb[104].mxu1 %v487_v54  ;;  %v241_v54 = vld [vmem:[#allocation3 + $0x398] sm:$0xff]  ;;  %v9977_v4 = vld [vmem:[#allocation35_spill] sm:$0xff]  ;;  %v499_v6 = vmul.f32 %v371_v19, %v243_v41  ;;  %v250_v19 = vld [vmem:[#allocation3 + $0x3e0] sm:$0xff] }
 0x164   :  { %6178 = vmatprep.mubr.f32.mxu1 %v488_v43  ;;  %v369_v43 = vld [vmem:[#allocation6 + $0x398] sm:$0xff]  ;;  %v9981_v41 = vld [vmem:[#allocation39_spill] sm:$0xff] }
 0x165   :  { %855 = vmatmul.mubr.f32.gmra.mrb[90].mxu0 %v8033_v22 }
 0x166   :  { %859 = vmatprep.mubr.f32.mxu0 %v9971_v59  ;;  %v8297_v2 = vpop.f32.mrb[0].mxu1  ;;  %v244_v59 = vld [vmem:[#allocation3 + $0x3b0] sm:$0xff] }
 0x167   :  { %6179 = vmatmul.mubr.f32.gmra.mrb[106].mxu1 %v489_v0  ;;  %v8299_v51 = vpop.f32.mrb[1].mxu1  ;;  %v497_v0 = vmul.f32 %v369_v43, %v241_v54  ;;  %v248_v54 = vld [vmem:[#allocation3 + $0x3d0] sm:$0xff] }
 0x168   :  { %6181 = vmatprep.mubr.f32.mxu1 %v490_v20  ;;  %v376_v43 = vld [vmem:[#allocation6 + $0x3d0] sm:$0xff] }
 0x169   :  { %860 = vmatmul.mubr.f32.gmra.mrb[92].mxu0 %v9972_v27 }
 0x16a   :  { %864 = vmatprep.mubr.f32.mxu0 %v8049_v38  ;;  %v8303_v22 = vpop.f32.mrb[2].mxu1  ;;  %v495_v38 = vmul.f32 %v367_v58, %v239_v21  ;;  %v246_v21 = vld [vmem:[#allocation3 + $0x3c0] sm:$0xff] }
 0x16b   :  { %6182 = vmatmul.mubr.f32.gmra.mrb[108].mxu1 %v491_v16  ;;  %v8305_v53 = vpop.f32.mrb[3].mxu1  ;;  %v372_v16 = vld [vmem:[#allocation6 + $0x3b0] sm:$0xff]  ;;  %v374_v58 = vld [vmem:[#allocation6 + $0x3c0] sm:$0xff] }
 0x16c   :  { %6184 = vmatprep.mubr.f32.mxu1 %v492_v31  ;;  %v9978_v31 = vld [vmem:[#allocation38_spill] sm:$0xff]  ;;  %v500_v33 = vmul.f32 %v372_v16, %v244_v59 }
 0x16d   :  { %865 = vmatmul.mubr.f32.gmra.mrb[94].mxu0 %v9973_v24 }
 0x16e   :  { %869 = vmatprep.mubr.f32.mxu0 %v9974_v5  ;;  %v8309_v35 = vpop.f32.mrb[4].mxu1  ;;  %v502_v5 = vmul.f32 %v374_v58, %v246_v21  ;;  %v252_v58 = vld [vmem:[#allocation3 + $0x3f0] sm:$0xff] }
 0x16f   :  { %6185 = vmatmul.mubr.f32.gmra.mrb[110].mxu1 %v493_v10  ;;  %v8311_v1 = vpop.f32.mrb[5].mxu1  ;;  %v373_v10 = vld [vmem:[#allocation6 + $0x3b8] sm:$0xff] }
 0x170   :  { %6187 = vmatprep.mubr.f32.mxu1 %v494_v45  ;;  %v9979_v45 = vld [vmem:[#allocation37_spill] sm:$0xff]  ;;  %v501_v11 = vmul.f32 %v373_v10, %v245_v44  ;;  %v251_v44 = vld [vmem:[#allocation3 + $0x3e8] sm:$0xff] }
 0x171   :  { %870 = vmatmul.mubr.f32.gmra.mrb[96].mxu0 %v9975_v46  ;;  %v9980_v46 = vld [vmem:[#allocation40_spill] sm:$0xff]  ;;  %v379_v10 = vld [vmem:[#allocation6 + $0x3e8] sm:$0xff] }
 0x172   :  { %874 = vmatprep.mubr.f32.mxu0 %v9976_v29  ;;  %v8315_v12 = vpop.f32.mrb[6].mxu1  ;;  %v504_v29 = vmul.f32 %v376_v43, %v248_v54 }
 0x173   :  { %6188 = vmatmul.mubr.f32.gmra.mrb[112].mxu1 %v495_v38  ;;  %v8317_v20 = vpop.f32.mrb[7].mxu1  ;;  %v247_v38 = vld [vmem:[#allocation3 + $0x3c8] sm:$0xff] }
 0x174   :  { %6190 = vmatprep.mubr.f32.mxu1 %v496_v7  ;;  %v375_v7 = vld [vmem:[#allocation6 + $0x3c8] sm:$0xff] }
 0x175   :  { %875 = vmatmul.mubr.f32.gmra.mrb[98].mxu0 %v9977_v4  ;;  %v378_v4 = vld [vmem:[#allocation6 + $0x3e0] sm:$0xff] }
 0x176   :  { %879 = vmatprep.mubr.f32.mxu0 %v9978_v31  ;;  %v8321_v52 = vpop.f32.mrb[8].mxu1 }
 0x177   :  { %6191 = vmatmul.mubr.f32.gmra.mrb[114].mxu1 %v497_v0  ;;  %v8323_v27 = vpop.f32.mrb[9].mxu1  ;;  %v249_v0 = vld [vmem:[#allocation3 + $0x3d8] sm:$0xff] }
 0x178   :  { %6193 = vmatprep.mubr.f32.mxu1 %v498_v26  ;;  %v377_v26 = vld [vmem:[#allocation6 + $0x3d8] sm:$0xff] }
 0x179   :  { %880 = vmatmul.mubr.f32.gmra.mrb[100].mxu0 %v9979_v45  ;;  %v505_v16 = vmul.f32 %v377_v26, %v249_v0  ;;  %v9983_v26 = vld [vmem:[#allocation41_spill] sm:$0xff] }
 0x17a   :  { %884 = vmatprep.mubr.f32.mxu0 %v8077_v47  ;;  %v8327_v24 = vpop.f32.mrb[10].mxu1  ;;  %v503_v47 = vmul.f32 %v375_v7, %v247_v38  ;;  %v507_v7 = vmul.f32 %v379_v10, %v251_v44  ;;  %v9984_v10 = vld [vmem:[#allocation44_spill] sm:$0xff] }
 0x17b   :  { %6194 = vmatmul.mubr.f32.gmra.mrb[116].mxu1 %v499_v6  ;;  %v8329_v13 = vpop.f32.mrb[11].mxu1 }
 0x17c   :  { %6196 = vmatprep.mubr.f32.mxu1 %v500_v33  ;;  %v506_v33 = vmul.f32 %v378_v4, %v250_v19 }
 0x17d   :  { %885 = vmatmul.mubr.f32.gmra.mrb[102].mxu0 %v8075_v39  ;;  %v8341_v39 = vld [vmem:[%s9859_s3] ss:$0 sm:$0xff] }
 0x17e   :  { %889 = vmatprep.mubr.f32.mxu0 %v9980_v46  ;;  %v8333_v42 = vpop.f32.mrb[12].mxu1 }
 0x17f   :  { %6197 = vmatmul.mubr.f32.gmra.mrb[118].mxu1 %v501_v11  ;;  %v8335_v3 = vpop.f32.mrb[13].mxu1  ;;  %v380_v11 = vld [vmem:[#allocation6 + $0x3f0] sm:$0xff] }
 0x180   :  { %6199 = vmatprep.mubr.f32.mxu1 %v502_v5  ;;  %v9982_v5 = vld [vmem:[#allocation42_spill] sm:$0xff]  ;;  %v508_v46 = vmul.f32 %v380_v11, %v252_v58 }
 0x181   :  { %890 = vmatmul.mubr.f32.gmra.mrb[104].mxu0 %v9981_v41 }
 0x182   :  { %894 = vmatprep.mubr.f32.mxu0 %v8091_v32  ;;  %v8344_v59 = vpop.f32.mrb[14].mxu1 }
 0x183   :  { %6200 = vmatmul.mubr.f32.gmra.mrb[120].mxu1 %v503_v47  ;;  %v8346_v31 = vpop.f32.mrb[15].mxu1  ;;  %v253_v47 = vld [vmem:[#allocation3 + $0x3f8] sm:$0xff] }
 0x184   :  { %v631_v6 = vpop.f32.mrb[0].mxu0  ;;  %6202 = vmatprep.mubr.f32.mxu1 %v504_v29  ;;  %v381_v29 = vld [vmem:[#allocation6 + $0x3f8] sm:$0xff] }
 0x185   :  { %v632_v45 = vadd.f32 %v8341_v39, %v631_v6  ;;  %v633_v21 = vpop.f32.mrb[1].mxu0  ;;  %895 = vmatmul.mubr.f32.gmra.mrb[106].mxu0 %v8089_v56  ;;  %v509_v19 = vmul.f32 %v381_v29, %v253_v47 }
 0x186   :  { %899 = vmatprep.mubr.f32.mxu0 %v9982_v5  ;;  %v8351_v32 = vpop.f32.mrb[16].mxu1 }
 0x187   :  { %v1337_v38 = vadd.f32 %v8299_v51, %v632_v45  ;;  %6203 = vmatmul.mubr.f32.gmra.mrb[122].mxu1 %v505_v16  ;;  %v8354_v54 = vpop.f32.mrb[17].mxu1 }
 0x188   :  { %v636_v43 = vpop.f32.mrb[2].mxu0  ;;  %6205 = vmatprep.mubr.f32.mxu1 %v506_v33 }
 0x189   :  { %v637_v0 = vadd.f32 %v8341_v39, %v636_v43  ;;  %v638_v56 = vpop.f32.mrb[3].mxu0  ;;  %900 = vmatmul.mubr.f32.gmra.mrb[108].mxu0 %v9983_v26  ;;  %v1975_v44 = vmax.f32 %v1337_v38, 0.0 }
 0x18a   :  { %904 = vmatprep.mubr.f32.mxu0 %v8105_v8  ;;  %v8359_v41 = vpop.f32.mrb[18].mxu1  ;;  %v9986_v56 = vld [vmem:[#allocation46_spill] sm:$0xff] }
 0x18b   :  { %v1342_v51 = vadd.f32 %v8297_v2, %v637_v0  ;;  %6206 = vmatmul.mubr.f32.gmra.mrb[124].mxu1 %v507_v7  ;;  %v8362_v4 = vpop.f32.mrb[19].mxu1  ;;  %v9985_v7 = vld [vmem:[#allocation43_spill] sm:$0xff] }
 0x18c   :  { %v641_v16 = vpop.f32.mrb[4].mxu0  ;;  %6208 = vmatprep.mubr.f32.mxu1 %v508_v46 }
 0x18d   :  { %v642_v6 = vadd.f32 %v8341_v39, %v641_v16  ;;  %v643_v33 = vpop.f32.mrb[5].mxu0  ;;  %905 = vmatmul.mubr.f32.gmra.mrb[110].mxu0 %v8103_v60  ;;  %v1976_v58 = vmax.f32 %v1342_v51, 0.0 }
 0x18e   :  { %909 = vmatprep.mubr.f32.mxu0 %v9984_v10  ;;  %v8367_v45 = vpop.f32.mrb[20].mxu1 }
 0x18f   :  { %v1347_v8 = vadd.f32 %v8305_v53, %v642_v6  ;;  %6209 = vmatmul.mubr.f32.gmra.mrb[126].mxu1 %v509_v19  ;;  %v8370_v2 = vpop.f32.mrb[21].mxu1  ;;  %v9987_v6 = vld [vmem:[#allocation45_spill] sm:$0xff] }
 0x190   :  { %6243 = vmatprep.mubr.f32.mxu1 %v1975_v44  ;;  %v646_v21 = vpop.f32.mrb[6].mxu0 }
 0x191   :  { %v647_v11 = vadd.f32 %v8341_v39, %v646_v21  ;;  %v648_v5 = vpop.f32.mrb[7].mxu0  ;;  %910 = vmatmul.mubr.f32.gmra.mrb[112].mxu0 %v9985_v7  ;;  %v1977_v43 = vmax.f32 %v1347_v8, 0.0 }
 0x192   :  { %914 = vmatprep.mubr.f32.mxu0 %v8119_v14  ;;  %v8375_v60 = vpop.f32.mrb[22].mxu1 }
 0x193   :  { %6244 = vmatmul.mubr.f32.vlgmr.msra.gmra.mrb[128].mxu1 %v1976_v58  ;;  %v1352_v38 = vadd.f32 %v8303_v22, %v647_v11  ;;  %v8378_v53 = vpop.f32.mrb[23].mxu1  ;;  %v9988_v11 = vld [vmem:[#allocation48_spill] sm:$0xff] }
 0x194   :  { %6246 = vmatprep.mubr.f32.mxu1 %v1977_v43  ;;  %v651_v46 = vpop.f32.mrb[8].mxu0 }
 0x195   :  { %v652_v47 = vadd.f32 %v8341_v39, %v651_v46  ;;  %v653_v29 = vpop.f32.mrb[9].mxu0  ;;  %915 = vmatmul.mubr.f32.gmra.mrb[114].mxu0 %v8117_v40  ;;  %v1978_v0 = vmax.f32 %v1352_v38, 0.0  ;;  %v9989_v46 = vld [vmem:[#allocation47_spill] sm:$0xff] }
 0x196   :  { %919 = vmatprep.mubr.f32.mxu0 %v9986_v56  ;;  %v8383_v26 = vpop.f32.mrb[24].mxu1 }
 0x197   :  { %v1357_v14 = vadd.f32 %v8311_v1, %v652_v47  ;;  %6247 = vmatmul.mubr.f32.gmra.mrb[130].mxu1 %v1978_v0  ;;  %v8386_v51 = vpop.f32.mrb[25].mxu1 }
 0x198   :  { %v656_v22 = vpop.f32.mrb[10].mxu0 }
 0x199   :  { %v657_v19 = vadd.f32 %v8341_v39, %v656_v22  ;;  %v658_v16 = vpop.f32.mrb[11].mxu0  ;;  %920 = vmatmul.mubr.f32.gmra.mrb[116].mxu0 %v9987_v6  ;;  %v1979_v33 = vmax.f32 %v1357_v14, 0.0 }
 0x19a   :  { %924 = vmatprep.mubr.f32.mxu0 %v8133_v17  ;;  %v8391_v40 = vpop.f32.mrb[26].mxu1 }
 0x19b   :  { %6249 = vmatprep.mubr.f32.mxu1 %v1979_v33  ;;  %v1362_v44 = vadd.f32 %v8309_v35, %v657_v19  ;;  %v8394_v10 = vpop.f32.mrb[27].mxu1  ;;  %v9990_v19 = vld [vmem:[#allocation50_spill] sm:$0xff] }
 0x19c   :  { %v661_v1 = vpop.f32.mrb[12].mxu0 }
 0x19d   :  { %v662_v8 = vadd.f32 %v8341_v39, %v661_v1  ;;  %v663_v21 = vpop.f32.mrb[13].mxu0  ;;  %925 = vmatmul.mubr.f32.gmra.mrb[118].mxu0 %v8131_v50  ;;  %v1980_v58 = vmax.f32 %v1362_v44, 0.0  ;;  %v9991_v1 = vld [vmem:[#allocation49_spill] sm:$0xff] }
 0x19e   :  { %929 = vmatprep.mubr.f32.mxu0 %v9988_v11  ;;  %v8399_v5 = vpop.f32.mrb[28].mxu1 }
 0x19f   :  { %v1367_v17 = vadd.f32 %v8317_v20, %v662_v8  ;;  %6250 = vmatmul.mubr.f32.gmra.mrb[132].mxu1 %v1980_v58  ;;  %v8402_v7 = vpop.f32.mrb[29].mxu1 }
 0x1a0   :  { %v666_v43 = vpop.f32.mrb[14].mxu0 }
 0x1a1   :  { %v667_v35 = vadd.f32 %v8341_v39, %v666_v43  ;;  %v668_v38 = vpop.f32.mrb[15].mxu0  ;;  %930 = vmatmul.mubr.f32.gmra.mrb[120].mxu0 %v9989_v46  ;;  %v1981_v47 = vmax.f32 %v1367_v17, 0.0 }
 0x1a2   :  { %934 = vmatprep.mubr.f32.mxu0 %v8147_v23  ;;  %v8407_v50 = vpop.f32.mrb[30].mxu1 }
 0x1a3   :  { %6252 = vmatprep.mubr.f32.mxu1 %v1981_v47  ;;  %v1372_v29 = vadd.f32 %v8315_v12, %v667_v35  ;;  %v8410_v0 = vpop.f32.mrb[31].mxu1  ;;  %v9992_v35 = vld [vmem:[#allocation52_spill] sm:$0xff] }
 0x1a4   :  { %v671_v20 = vpop.f32.mrb[16].mxu0 }
 0x1a5   :  { %v672_v56 = vadd.f32 %v8341_v39, %v671_v20  ;;  %v673_v14 = vpop.f32.mrb[17].mxu0  ;;  %935 = vmatmul.mubr.f32.gmra.mrb[122].mxu0 %v8145_v61  ;;  %v1982_v22 = vmax.f32 %v1372_v29, 0.0  ;;  %v9993_v20 = vld [vmem:[#allocation51_spill] sm:$0xff] }
 0x1a6   :  { %939 = vmatprep.mubr.f32.mxu0 %v9990_v19  ;;  %v8415_v16 = vpop.f32.mrb[32].mxu1 }
 0x1a7   :  { %v1377_v23 = vadd.f32 %v8323_v27, %v672_v56  ;;  %6253 = vmatmul.mubr.f32.gmra.mrb[134].mxu1 %v1982_v22  ;;  %v8418_v6 = vpop.f32.mrb[33].mxu1 }
 0x1a8   :  { %v676_v33 = vpop.f32.mrb[18].mxu0 }
 0x1a9   :  { %v677_v12 = vadd.f32 %v8341_v39, %v676_v33  ;;  %v678_v44 = vpop.f32.mrb[19].mxu0  ;;  %940 = vmatmul.mubr.f32.gmra.mrb[124].mxu0 %v9991_v1  ;;  %v1983_v8 = vmax.f32 %v1377_v23, 0.0 }
 0x1aa   :  { %944 = vmatprep.mubr.f32.mxu0 %v8161_v28  ;;  %v8423_v61 = vpop.f32.mrb[34].mxu1 }
 0x1ab   :  { %6255 = vmatprep.mubr.f32.mxu1 %v1983_v8  ;;  %v1382_v21 = vadd.f32 %v8321_v52, %v677_v12  ;;  %v8426_v58 = vpop.f32.mrb[35].mxu1 }
 0x1ac   :  { %v681_v27 = vpop.f32.mrb[20].mxu0 }
 0x1ad   :  { %v682_v11 = vadd.f32 %v8341_v39, %v681_v27  ;;  %v683_v17 = vpop.f32.mrb[21].mxu0  ;;  %945 = vmatmul.mubr.f32.gmra.mrb[126].mxu0 %v8159_v49  ;;  %v1984_v43 = vmax.f32 %v1382_v21, 0.0 }
 0x1ae   :  { %949 = vmatprep.mubr.f32.mxu0 %v9992_v35  ;;  %v8431_v38 = vpop.f32.mrb[36].mxu1 }
 0x1af   :  { %v1387_v28 = vadd.f32 %v8329_v13, %v682_v11  ;;  %6256 = vmatmul.mubr.f32.gmra.mrb[136].mxu1 %v1984_v43  ;;  %v8434_v46 = vpop.f32.mrb[37].mxu1 }
 0x1b0   :  { %v686_v47 = vpop.f32.mrb[22].mxu0 }
 0x1b1   :  { %v687_v52 = vadd.f32 %v8341_v39, %v686_v47  ;;  %v688_v29 = vpop.f32.mrb[23].mxu0  ;;  %950 = vmatmul.mubr.f32.gmra.mrb[128].mxu0 %v9993_v20  ;;  %v1985_v56 = vmax.f32 %v1387_v28, 0.0 }
 0x1b2   :  { %954 = vmatprep.mubr.f32.mxu0 %v8175_v25  ;;  %v8439_v49 = vpop.f32.mrb[38].mxu1 }
 0x1b3   :  { %6258 = vmatprep.mubr.f32.mxu1 %v1985_v56  ;;  %v1392_v14 = vadd.f32 %v8327_v24, %v687_v52  ;;  %v8442_v22 = vpop.f32.mrb[39].mxu1  ;;  %v9994_v52 = vld [vmem:[#allocation53_spill] sm:$0xff] }
 0x1b4   :  { %v691_v13 = vpop.f32.mrb[24].mxu0 }
 0x1b5   :  { %v692_v19 = vadd.f32 %v8341_v39, %v691_v13  ;;  %v693_v23 = vpop.f32.mrb[25].mxu0  ;;  %955 = vmatmul.mubr.f32.gmra.mrb[130].mxu0 %v8173_v48  ;;  %v1986_v33 = vmax.f32 %v1392_v14, 0.0 }
 0x1b6   :  { %959 = vmatprep.mubr.f32.mxu0 %v8180_v37  ;;  %v8447_v12 = vpop.f32.mrb[40].mxu1 }
 0x1b7   :  { %v1397_v25 = vadd.f32 %v8335_v3, %v692_v19  ;;  %6259 = vmatmul.mubr.f32.gmra.mrb[138].mxu1 %v1986_v33  ;;  %v8450_v44 = vpop.f32.mrb[41].mxu1  ;;  %v9995_v19 = vld [vmem:[#allocation55_spill] sm:$0xff] }
 0x1b8   :  { %v696_v1 = vpop.f32.mrb[26].mxu0 }
 0x1b9   :  { %v697_v24 = vadd.f32 %v8341_v39, %v696_v1  ;;  %v698_v8 = vpop.f32.mrb[27].mxu0  ;;  %960 = vmatmul.mubr.f32.gmra.mrb[132].mxu0 %v8178_v63  ;;  %v1987_v21 = vmax.f32 %v1397_v25, 0.0 }
 0x1ba   :  { %964 = vmatprep.mubr.f32.mxu0 %v8189_v36  ;;  %v8455_v48 = vpop.f32.mrb[42].mxu1 }
 0x1bb   :  { %6261 = vmatprep.mubr.f32.mxu1 %v1987_v21  ;;  %v1402_v37 = vadd.f32 %v8333_v42, %v697_v24  ;;  %v8458_v27 = vpop.f32.mrb[43].mxu1  ;;  %v9996_v24 = vld [vmem:[#allocation54_spill] sm:$0xff] }
 0x1bc   :  { %v701_v3 = vpop.f32.mrb[28].mxu0 }
 0x1bd   :  { %v702_v11 = vadd.f32 %v8341_v39, %v701_v3  ;;  %v703_v17 = vpop.f32.mrb[29].mxu0  ;;  %965 = vmatmul.mubr.f32.gmra.mrb[134].mxu0 %v8187_v62  ;;  %v1988_v43 = vmax.f32 %v1402_v37, 0.0 }
 0x1be   :  { %969 = vmatprep.mubr.f32.mxu0 %v8194_v34  ;;  %v8463_v63 = vpop.f32.mrb[44].mxu1 }
 0x1bf   :  { %v1407_v36 = vadd.f32 %v8346_v31, %v702_v11  ;;  %6262 = vmatmul.mubr.f32.gmra.mrb[140].mxu1 %v1988_v43  ;;  %v8466_v35 = vpop.f32.mrb[45].mxu1  ;;  %v9997_v43 = vld [vmem:[#allocation57_spill] sm:$0xff] }
 0x1c0   :  { %v706_v28 = vpop.f32.mrb[30].mxu0 }
 0x1c1   :  { %v707_v42 = vadd.f32 %v8341_v39, %v706_v28  ;;  %v708_v47 = vpop.f32.mrb[31].mxu0  ;;  %970 = vmatmul.mubr.f32.gmra.mrb[136].mxu0 %v9994_v52  ;;  %v1989_v29 = vmax.f32 %v1407_v36, 0.0  ;;  %v9998_v52 = vld [vmem:[#allocation56_spill] sm:$0xff] }
 0x1c2   :  { %974 = vmatprep.mubr.f32.mxu0 %v8203_v15  ;;  %v8471_v62 = vpop.f32.mrb[46].mxu1 }
 0x1c3   :  { %6264 = vmatprep.mubr.f32.mxu1 %v1989_v29  ;;  %v1412_v34 = vadd.f32 %v8344_v59, %v707_v42  ;;  %v8474_v20 = vpop.f32.mrb[47].mxu1 }
 0x1c4   :  { %v711_v31 = vpop.f32.mrb[32].mxu0 }
 0x1c5   :  { %v712_v56 = vadd.f32 %v8341_v39, %v711_v31  ;;  %v713_v14 = vpop.f32.mrb[33].mxu0  ;;  %975 = vmatmul.mubr.f32.gmra.mrb[138].mxu0 %v8201_v30  ;;  %v1990_v13 = vmax.f32 %v1412_v34, 0.0 }
 0x1c6   :  { %979 = vmatprep.mubr.f32.mxu0 %v9995_v19  ;;  %v8479_v23 = vpop.f32.mrb[48].mxu1 }
 0x1c7   :  { %v1417_v15 = vadd.f32 %v8354_v54, %v712_v56  ;;  %6265 = vmatmul.mubr.f32.gmra.mrb[142].mxu1 %v1990_v13  ;;  %v8482_v33 = vpop.f32.mrb[49].mxu1  ;;  %v9999_v13 = vld [vmem:[#allocation58_spill] sm:$0xff] }
 0x1c8   :  { %v716_v25 = vpop.f32.mrb[34].mxu0 }
 0x1c9   :  { %v717_v59 = vadd.f32 %v8341_v39, %v716_v25  ;;  %v718_v1 = vpop.f32.mrb[35].mxu0  ;;  %980 = vmatmul.mubr.f32.gmra.mrb[140].mxu0 %v9996_v24  ;;  %v1991_v8 = vmax.f32 %v1417_v15, 0.0  ;;  %v10000_v15 = vld [vmem:[#allocation60_spill] sm:$0xff] }
 0x1ca   :  { %984 = vmatprep.mubr.f32.mxu0 %v8217_v18  ;;  %v8487_v30 = vpop.f32.mrb[50].mxu1 }
 0x1cb   :  { %6267 = vmatprep.mubr.f32.mxu1 %v1991_v8  ;;  %v1422_v21 = vadd.f32 %v8351_v32, %v717_v59  ;;  %v8490_v37 = vpop.f32.mrb[51].mxu1  ;;  %v10001_v8 = vld [vmem:[#allocation59_spill] sm:$0xff] }
 0x1cc   :  { %v721_v54 = vpop.f32.mrb[36].mxu0 }
 0x1cd   :  { %v722_v3 = vadd.f32 %v8341_v39, %v721_v54  ;;  %v723_v11 = vpop.f32.mrb[37].mxu0  ;;  %985 = vmatmul.mubr.f32.gmra.mrb[142].mxu0 %v8215_v9  ;;  %v1992_v17 = vmax.f32 %v1422_v21, 0.0  ;;  %v10002_v54 = vld [vmem:[#allocation62_spill] sm:$0xff] }
 0x1ce   :  { %989 = vmatprep.mubr.f32.mxu0 %v9997_v43  ;;  %v8495_v36 = vpop.f32.mrb[52].mxu1 }
 0x1cf   :  { %v1427_v18 = vadd.f32 %v8362_v4, %v722_v3  ;;  %6268 = vmatmul.mubr.f32.gmra.mrb[144].mxu1 %v1992_v17  ;;  %v8498_v28 = vpop.f32.mrb[53].mxu1 }
 0x1d0   :  { %v726_v42 = vpop.f32.mrb[38].mxu0 }
 0x1d1   :  { %v727_v32 = vadd.f32 %v8341_v39, %v726_v42  ;;  %v728_v47 = vpop.f32.mrb[39].mxu0  ;;  %990 = vmatmul.mubr.f32.gmra.mrb[144].mxu0 %v9998_v52  ;;  %v1993_v29 = vmax.f32 %v1427_v18, 0.0  ;;  %v10003_v42 = vld [vmem:[#allocation61_spill] sm:$0xff] }
 0x1d2   :  { %994 = vmatprep.mubr.f32.mxu0 %v8231_v55  ;;  %v8503_v9 = vpop.f32.mrb[54].mxu1  ;;  %v10004_v47 = vld [vmem:[#allocation64_spill] sm:$0xff] }
 0x1d3   :  { %6270 = vmatprep.mubr.f32.mxu1 %v1993_v29  ;;  %v1432_v34 = vadd.f32 %v8359_v41, %v727_v32  ;;  %v8506_v31 = vpop.f32.mrb[55].mxu1 }
 0x1d4   :  { %v731_v4 = vpop.f32.mrb[40].mxu0 }
 0x1d5   :  { %v732_v56 = vadd.f32 %v8341_v39, %v731_v4  ;;  %v733_v14 = vpop.f32.mrb[41].mxu0  ;;  %995 = vmatmul.mubr.f32.gmra.mrb[146].mxu0 %v9999_v13  ;;  %v1994_v19 = vmax.f32 %v1432_v34, 0.0 }
 0x1d6   :  { %999 = vmatprep.mubr.f32.mxu0 %v10000_v15  ;;  %v8511_v25 = vpop.f32.mrb[56].mxu1  ;;  %v10005_v14 = vld [vmem:[#allocation63_spill] sm:$0xff] }
 0x1d7   :  { %v1437_v55 = vadd.f32 %v8370_v2, %v732_v56  ;;  %6271 = vmatmul.mubr.f32.gmra.mrb[146].mxu1 %v1994_v19  ;;  %v8514_v59 = vpop.f32.mrb[57].mxu1 }
 0x1d8   :  { %v736_v1 = vpop.f32.mrb[42].mxu0 }
 0x1d9   :  { %v737_v41 = vadd.f32 %v8341_v39, %v736_v1  ;;  %v738_v24 = vpop.f32.mrb[43].mxu0  ;;  %1000 = vmatmul.mubr.f32.gmra.mrb[148].mxu0 %v10001_v8  ;;  %v1995_v21 = vmax.f32 %v1437_v55, 0.0 }
 0x1da   :  { %1004 = vmatprep.mubr.f32.mxu0 %v10002_v54  ;;  %v8519_v3 = vpop.f32.mrb[58].mxu1  ;;  %v7264_v24 = vld [vmem:[#allocation3 + $0x268] sm:$0xff] }
 0x1db   :  { %6273 = vmatprep.mubr.f32.mxu1 %v1995_v21  ;;  %v1442_v11 = vadd.f32 %v8367_v45, %v737_v41  ;;  %v8522_v17 = vpop.f32.mrb[59].mxu1  ;;  %v10006_v21 = vld [vmem:[#allocation65_spill] sm:$0xff] }
 0x1dc   :  { %v741_v2 = vpop.f32.mrb[44].mxu0 }
 0x1dd   :  { %v742_v43 = vadd.f32 %v8341_v39, %v741_v2  ;;  %v743_v18 = vpop.f32.mrb[45].mxu0  ;;  %1005 = vmatmul.mubr.f32.gmra.mrb[150].mxu0 %v10003_v42  ;;  %v1996_v32 = vmax.f32 %v1442_v11, 0.0 }
 0x1de   :  { %1009 = vmatprep.mubr.f32.mxu0 %v10004_v47  ;;  %v8527_v52 = vpop.f32.mrb[60].mxu1  ;;  %v7265_v18 = vld [vmem:[#allocation3 + $0x270] sm:$0xff] }
 0x1df   :  { %v1447_v29 = vadd.f32 %v8378_v53, %v742_v43  ;;  %6274 = vmatmul.mubr.f32.gmra.mrb[148].mxu1 %v1996_v32  ;;  %v8530_v34 = vpop.f32.mrb[61].mxu1  ;;  %v7266_v32 = vld [vmem:[#allocation6 + $0x278] sm:$0xff] }
 0x1e0   :  { %v746_v4 = vpop.f32.mrb[46].mxu0 }
 0x1e1   :  { %v747_v45 = vadd.f32 %v8341_v39, %v746_v4  ;;  %v748_v56 = vpop.f32.mrb[47].mxu0  ;;  %1010 = vmatmul.mubr.f32.gmra.mrb[152].mxu0 %v10005_v14  ;;  %v1997_v13 = vmax.f32 %v1447_v29, 0.0  ;;  %v7267_v14 = vld [vmem:[#allocation3 + $0x278] sm:$0xff] }
 0x1e2   :  { %1014 = vmatprep.mubr.f32.mxu0 %v8257_v57  ;;  %v8535_v19 = vpop.f32.mrb[62].mxu1 }
 0x1e3   :  { %6276 = vmatprep.mubr.f32.mxu1 %v1997_v13  ;;  %v1452_v15 = vadd.f32 %v8375_v60, %v747_v45  ;;  %v8538_v55 = vpop.f32.mrb[63].mxu1 }
 0x1e4   :  { %v751_v53 = vpop.f32.mrb[48].mxu0 }
 0x1e5   :  { %v752_v1 = vadd.f32 %v8341_v39, %v751_v53  ;;  %v753_v41 = vpop.f32.mrb[49].mxu0  ;;  %1015 = vmatmul.mubr.f32.gmra.mrb[154].mxu0 %v7264_v24  ;;  %v1998_v8 = vmax.f32 %v1452_v15, 0.0  ;;  %v7268_v15 = vld [vmem:[#allocation6 + $0x280] sm:$0xff] }
 0x1e6   :  { %1019 = vmatprep.mubr.f32.mxu0 %v10006_v21  ;;  %v8542_v54 = vpop.f32.mrb[64].mxu1  ;;  %v7269_v21 = vld [vmem:[#allocation3 + $0x280] sm:$0xff] }
 0x1e7   :  { %v1457_v57 = vadd.f32 %v8386_v51, %v752_v1  ;;  %6277 = vmatmul.mubr.f32.gmra.mrb[150].mxu1 %v1998_v8  ;;  %v8545_v11 = vpop.f32.mrb[65].mxu1 }
 0x1e8   :  { %v756_v2 = vpop.f32.mrb[50].mxu0 }
 0x1e9   :  { %v757_v60 = vadd.f32 %v8341_v39, %v756_v2  ;;  %v758_v43 = vpop.f32.mrb[51].mxu0  ;;  %1020 = vmatmul.mubr.f32.gmra.mrb[156].mxu0 %v7265_v18  ;;  %v1999_v42 = vmax.f32 %v1457_v57, 0.0  ;;  %v7270_v2 = vld [vmem:[#allocation6 + $0x288] sm:$0xff] }
 0x1ea   :  { %1024 = vmatprep.mubr.f32.mxu0 %v7266_v32  ;;  %v8548_v47 = vpop.f32.mrb[66].mxu1 }
 0x1eb   :  { %6279 = vmatprep.mubr.f32.mxu1 %v1999_v42  ;;  %v1462_v29 = vadd.f32 %v8383_v26, %v757_v60  ;;  %v8551_v4 = vpop.f32.mrb[67].mxu1 }
 0x1ec   :  { %v761_v51 = vpop.f32.mrb[52].mxu0 }
 0x1ed   :  { %v762_v45 = vadd.f32 %v8341_v39, %v761_v51  ;;  %v763_v56 = vpop.f32.mrb[53].mxu0  ;;  %1025 = vmatmul.mubr.f32.gmra.mrb[158].mxu0 %v7267_v14  ;;  %v2000_v13 = vmax.f32 %v1462_v29, 0.0  ;;  %v7271_v29 = vld [vmem:[#allocation3 + $0x288] sm:$0xff] }
 0x1ee   :  { %1029 = vmatprep.mubr.f32.mxu0 %v7268_v15  ;;  %v8554_v53 = vpop.f32.mrb[68].mxu1 }
 0x1ef   :  { %v1467_v1 = vadd.f32 %v8394_v10, %v762_v45  ;;  %6280 = vmatmul.mubr.f32.gmra.mrb[152].mxu1 %v2000_v13  ;;  %v8557_v41 = vpop.f32.mrb[69].mxu1  ;;  %v7272_v45 = vld [vmem:[#allocation6 + $0x290] sm:$0xff] }
 0x1f0   :  { %v766_v24 = vpop.f32.mrb[54].mxu0 }
 0x1f1   :  { %v767_v26 = vadd.f32 %v8341_v39, %v766_v24  ;;  %v768_v8 = vpop.f32.mrb[55].mxu0  ;;  %1030 = vmatmul.mubr.f32.gmra.mrb[160].mxu0 %v7269_v21  ;;  %v2001_v57 = vmax.f32 %v1467_v1, 0.0  ;;  %v7273_v24 = vld [vmem:[#allocation3 + $0x290] sm:$0xff] }
 0x1f2   :  { %1034 = vmatprep.mubr.f32.mxu0 %v7270_v2  ;;  %v8560_v60 = vpop.f32.mrb[70].mxu1  ;;  %v7274_v8 = vld [vmem:[#allocation6 + $0x298] sm:$0xff] }
 0x1f3   :  { %6282 = vmatprep.mubr.f32.mxu1 %v2001_v57  ;;  %v1472_v43 = vadd.f32 %v8391_v40, %v767_v26  ;;  %v8563_v18 = vpop.f32.mrb[71].mxu1 }
 0x1f4   :  { %v771_v10 = vpop.f32.mrb[56].mxu0 }
 0x1f5   :  { %v772_v42 = vadd.f32 %v8341_v39, %v771_v10  ;;  %v773_v32 = vpop.f32.mrb[57].mxu0  ;;  %1035 = vmatmul.mubr.f32.gmra.mrb[162].mxu0 %v7271_v29  ;;  %v2002_v51 = vmax.f32 %v1472_v43, 0.0  ;;  %v7276_v29 = vld [vmem:[#allocation6 + $0x2a0] sm:$0xff] }
 0x1f6   :  { %1039 = vmatprep.mubr.f32.mxu0 %v7272_v45  ;;  %v8566_v56 = vpop.f32.mrb[72].mxu1 }
 0x1f7   :  { %v1477_v14 = vadd.f32 %v8402_v7, %v772_v42  ;;  %6283 = vmatmul.mubr.f32.gmra.mrb[154].mxu1 %v2002_v51  ;;  %v8569_v13 = vpop.f32.mrb[73].mxu1  ;;  %v7275_v42 = vld [vmem:[#allocation3 + $0x298] sm:$0xff] }
 0x1f8   :  { %v776_v15 = vpop.f32.mrb[58].mxu0 }
 0x1f9   :  { %v777_v40 = vadd.f32 %v8341_v39, %v776_v15  ;;  %v778_v1 = vpop.f32.mrb[59].mxu0  ;;  %1040 = vmatmul.mubr.f32.gmra.mrb[164].mxu0 %v7273_v24  ;;  %v2003_v26 = vmax.f32 %v1477_v14, 0.0 }
 0x1fa   :  { %1044 = vmatprep.mubr.f32.mxu0 %v7274_v8  ;;  %v8572_v21 = vpop.f32.mrb[74].mxu1  ;;  %v7277_v1 = vld [vmem:[#allocation3 + $0x2a0] sm:$0xff] }
 0x1fb   :  { %6285 = vmatprep.mubr.f32.mxu1 %v2003_v26  ;;  %v1482_v57 = vadd.f32 %v8399_v5, %v777_v40  ;;  %v8575_v2 = vpop.f32.mrb[75].mxu1  ;;  %v7278_v26 = vld [vmem:[#allocation6 + $0x2a8] sm:$0xff] }
 0x1fc   :  { %v781_v7 = vpop.f32.mrb[60].mxu0 }
 0x1fd   :  { %v782_v43 = vadd.f32 %v8341_v39, %v781_v7  ;;  %v783_v10 = vpop.f32.mrb[61].mxu0  ;;  %1045 = vmatmul.mubr.f32.gmra.mrb[166].mxu0 %v7275_v42  ;;  %v2004_v32 = vmax.f32 %v1482_v57, 0.0  ;;  %v7279_v42 = vld [vmem:[#allocation3 + $0x2a8] sm:$0xff] }
 0x1fe   :  { %1049 = vmatprep.mubr.f32.mxu0 %v7276_v29  ;;  %v8578_v51 = vpop.f32.mrb[76].mxu1  ;;  %v7280_v29 = vld [vmem:[#allocation6 + $0x2b0] sm:$0xff] }
 0x1ff   :  { %v1487_v45 = vadd.f32 %v8410_v0, %v782_v43  ;;  %6286 = vmatmul.mubr.f32.gmra.mrb[156].mxu1 %v2004_v32  ;;  %v8581_v14 = vpop.f32.mrb[77].mxu1 }
 0x200   :  { %v786_v15 = vpop.f32.mrb[62].mxu0 }
 0x201   :  { %v787_v5 = vadd.f32 %v8341_v39, %v786_v15  ;;  %v788_v40 = vpop.f32.mrb[63].mxu0  ;;  %1050 = vmatmul.mubr.f32.gmra.mrb[168].mxu0 %v7277_v1  ;;  %v2005_v24 = vmax.f32 %v1487_v45, 0.0 }
 0x202   :  { %1054 = vmatprep.mubr.f32.mxu0 %v7278_v26  ;;  %v8584_v8 = vpop.f32.mrb[78].mxu1 }
 0x203   :  { %6288 = vmatprep.mubr.f32.mxu1 %v2005_v24  ;;  %v1492_v57 = vadd.f32 %v8407_v50, %v787_v5  ;;  %v8587_v7 = vpop.f32.mrb[79].mxu1  ;;  %v7281_v24 = vld [vmem:[#allocation3 + $0x2b0] sm:$0xff] }
 0x204   :  { %v791_v0 = vpop.f32.mrb[64].mxu0 }
 0x205   :  { %v792_v43 = vadd.f32 %v8341_v39, %v791_v0  ;;  %v793_v10 = vpop.f32.mrb[65].mxu0  ;;  %1055 = vmatmul.mubr.f32.gmra.mrb[170].mxu0 %v7279_v42  ;;  %v2006_v32 = vmax.f32 %v1492_v57, 0.0  ;;  %v7282_v0 = vld [vmem:[#allocation6 + $0x2b8] sm:$0xff] }
 0x206   :  { %1059 = vmatprep.mubr.f32.mxu0 %v7280_v29  ;;  %v8590_v15 = vpop.f32.mrb[80].mxu1  ;;  %v7283_v29 = vld [vmem:[#allocation3 + $0x2b8] sm:$0xff] }
 0x207   :  { %v1497_v45 = vadd.f32 %v8418_v6, %v792_v43  ;;  %6289 = vmatmul.mubr.f32.gmra.mrb[158].mxu1 %v2006_v32  ;;  %v8593_v40 = vpop.f32.mrb[81].mxu1 }
 0x208   :  { %v796_v1 = vpop.f32.mrb[66].mxu0 }
 0x209   :  { %v797_v50 = vadd.f32 %v8341_v39, %v796_v1  ;;  %v798_v5 = vpop.f32.mrb[67].mxu0  ;;  %1060 = vmatmul.mubr.f32.gmra.mrb[172].mxu0 %v7281_v24  ;;  %v2007_v26 = vmax.f32 %v1497_v45, 0.0 }
 0x20a   :  { %1064 = vmatprep.mubr.f32.mxu0 %v7282_v0  ;;  %v8596_v10 = vpop.f32.mrb[82].mxu1  ;;  %v7284_v5 = vld [vmem:[#allocation6 + $0x2c0] sm:$0xff] }
 0x20b   :  { %10007 = vst [vmem:[#allocation21_spill] sm:$0xff] %v8596_v10  ;;  %6291 = vmatprep.mubr.f32.mxu1 %v2007_v26  ;;  %v1502_v57 = vadd.f32 %v8415_v16, %v797_v50  ;;  %v8599_v42 = vpop.f32.mrb[83].mxu1  ;;  %v7285_v10 = vld [vmem:[#allocation3 + $0x2c0] sm:$0xff] }
 0x20c   :  { %v801_v6 = vpop.f32.mrb[68].mxu0 }
 0x20d   :  { %v802_v43 = vadd.f32 %v8341_v39, %v801_v6  ;;  %v803_v32 = vpop.f32.mrb[69].mxu0  ;;  %1065 = vmatmul.mubr.f32.gmra.mrb[174].mxu0 %v7283_v29  ;;  %v2008_v1 = vmax.f32 %v1502_v57, 0.0 }
 0x20e   :  { %1069 = vmatprep.mubr.f32.mxu0 %v7284_v5  ;;  %v8602_v24 = vpop.f32.mrb[84].mxu1  ;;  %v7286_v32 = vld [vmem:[#allocation6 + $0x2c8] sm:$0xff] }
 0x20f   :  { %10008 = vst [vmem:[#allocation20_spill] sm:$0xff] %v8602_v24  ;;  %6292 = vmatmul.mubr.f32.gmra.mrb[160].mxu1 %v2008_v1  ;;  %v1507_v45 = vadd.f32 %v8426_v58, %v802_v43  ;;  %v8605_v0 = vpop.f32.mrb[85].mxu1  ;;  %v7287_v24 = vld [vmem:[#allocation3 + $0x2c8] sm:$0xff] }
 0x210   :  { %v806_v26 = vpop.f32.mrb[70].mxu0 }
 0x211   :  { %v807_v16 = vadd.f32 %v8341_v39, %v806_v26  ;;  %v808_v50 = vpop.f32.mrb[71].mxu0  ;;  %1070 = vmatmul.mubr.f32.gmra.mrb[176].mxu0 %v7285_v10  ;;  %v2009_v6 = vmax.f32 %v1507_v45, 0.0 }
 0x212   :  { %1074 = vmatprep.mubr.f32.mxu0 %v7286_v32  ;;  %v8608_v29 = vpop.f32.mrb[86].mxu1  ;;  %v7288_v50 = vld [vmem:[#allocation6 + $0x2d0] sm:$0xff] }
 0x213   :  { %10009 = vst [vmem:[#allocation23_spill] sm:$0xff] %v8608_v29  ;;  %6294 = vmatprep.mubr.f32.mxu1 %v2009_v6  ;;  %v1512_v57 = vadd.f32 %v8423_v61, %v807_v16  ;;  %v8611_v5 = vpop.f32.mrb[87].mxu1  ;;  %v7289_v29 = vld [vmem:[#allocation3 + $0x2d0] sm:$0xff] }
 0x214   :  { %v811_v1 = vpop.f32.mrb[72].mxu0 }
 0x215   :  { %v812_v58 = vadd.f32 %v8341_v39, %v811_v1  ;;  %v813_v43 = vpop.f32.mrb[73].mxu0  ;;  %1075 = vmatmul.mubr.f32.gmra.mrb[178].mxu0 %v7287_v24  ;;  %v2010_v26 = vmax.f32 %v1512_v57, 0.0 }
 0x216   :  { %1079 = vmatprep.mubr.f32.mxu0 %v7288_v50  ;;  %v8614_v10 = vpop.f32.mrb[88].mxu1  ;;  %v7290_v43 = vld [vmem:[#allocation6 + $0x2d8] sm:$0xff] }
 0x217   :  { %10010 = vst [vmem:[#allocation22_spill] sm:$0xff] %v8614_v10  ;;  %6295 = vmatmul.mubr.f32.gmra.mrb[162].mxu1 %v2010_v26  ;;  %v1517_v45 = vadd.f32 %v8434_v46, %v812_v58  ;;  %v8617_v32 = vpop.f32.mrb[89].mxu1  ;;  %v7291_v10 = vld [vmem:[#allocation3 + $0x2d8] sm:$0xff] }
 0x218   :  { %v816_v6 = vpop.f32.mrb[74].mxu0 }
 0x219   :  { %v817_v61 = vadd.f32 %v8341_v39, %v816_v6  ;;  %v818_v16 = vpop.f32.mrb[75].mxu0  ;;  %1080 = vmatmul.mubr.f32.gmra.mrb[180].mxu0 %v7289_v29  ;;  %v2011_v1 = vmax.f32 %v1517_v45, 0.0 }
 0x21a   :  { %1084 = vmatprep.mubr.f32.mxu0 %v7290_v43  ;;  %v8620_v24 = vpop.f32.mrb[90].mxu1  ;;  %v7292_v16 = vld [vmem:[#allocation6 + $0x2e0] sm:$0xff] }
 0x21b   :  { %10011 = vst [vmem:[#allocation25_spill] sm:$0xff] %v8620_v24  ;;  %6297 = vmatprep.mubr.f32.mxu1 %v2011_v1  ;;  %v1522_v57 = vadd.f32 %v8431_v38, %v817_v61  ;;  %v8623_v50 = vpop.f32.mrb[91].mxu1  ;;  %v7293_v24 = vld [vmem:[#allocation3 + $0x2e0] sm:$0xff] }
 0x21c   :  { %v821_v26 = vpop.f32.mrb[76].mxu0 }
 0x21d   :  { %v822_v46 = vadd.f32 %v8341_v39, %v821_v26  ;;  %v823_v58 = vpop.f32.mrb[77].mxu0  ;;  %1085 = vmatmul.mubr.f32.gmra.mrb[182].mxu0 %v7291_v10  ;;  %v2012_v6 = vmax.f32 %v1522_v57, 0.0 }
 0x21e   :  { %1089 = vmatprep.mubr.f32.mxu0 %v7292_v16  ;;  %v8626_v29 = vpop.f32.mrb[92].mxu1  ;;  %v7294_v58 = vld [vmem:[#allocation6 + $0x2e8] sm:$0xff] }
 0x21f   :  { %10012 = vst [vmem:[#allocation24_spill] sm:$0xff] %v8626_v29  ;;  %6298 = vmatmul.mubr.f32.gmra.mrb[164].mxu1 %v2012_v6  ;;  %v1527_v45 = vadd.f32 %v8442_v22, %v822_v46  ;;  %v8629_v43 = vpop.f32.mrb[93].mxu1  ;;  %v7295_v29 = vld [vmem:[#allocation3 + $0x2e8] sm:$0xff] }
 0x220   :  { %v826_v1 = vpop.f32.mrb[78].mxu0 }
 0x221   :  { %v827_v38 = vadd.f32 %v8341_v39, %v826_v1  ;;  %v828_v61 = vpop.f32.mrb[79].mxu0  ;;  %1090 = vmatmul.mubr.f32.gmra.mrb[184].mxu0 %v7293_v24  ;;  %v2013_v26 = vmax.f32 %v1527_v45, 0.0 }
 0x222   :  { %1094 = vmatprep.mubr.f32.mxu0 %v7294_v58  ;;  %v8632_v10 = vpop.f32.mrb[94].mxu1  ;;  %v7296_v61 = vld [vmem:[#allocation6 + $0x2f0] sm:$0xff] }
 0x223   :  { %10013 = vst [vmem:[#allocation27_spill] sm:$0xff] %v8632_v10  ;;  %6300 = vmatprep.mubr.f32.mxu1 %v2013_v26  ;;  %v1532_v57 = vadd.f32 %v8439_v49, %v827_v38  ;;  %v8635_v16 = vpop.f32.mrb[95].mxu1  ;;  %v7297_v10 = vld [vmem:[#allocation3 + $0x2f0] sm:$0xff] }
 0x224   :  { %v831_v6 = vpop.f32.mrb[80].mxu0 }
 0x225   :  { %v832_v22 = vadd.f32 %v8341_v39, %v831_v6  ;;  %v833_v46 = vpop.f32.mrb[81].mxu0  ;;  %1095 = vmatmul.mubr.f32.gmra.mrb[186].mxu0 %v7295_v29  ;;  %v2014_v1 = vmax.f32 %v1532_v57, 0.0 }
 0x226   :  { %1099 = vmatprep.mubr.f32.mxu0 %v7296_v61  ;;  %v8638_v24 = vpop.f32.mrb[96].mxu1  ;;  %v7298_v46 = vld [vmem:[#allocation6 + $0x2f8] sm:$0xff] }
 0x227   :  { %10014 = vst [vmem:[#allocation26_spill] sm:$0xff] %v8638_v24  ;;  %6301 = vmatmul.mubr.f32.gmra.mrb[166].mxu1 %v2014_v1  ;;  %v1537_v45 = vadd.f32 %v8450_v44, %v832_v22  ;;  %v8641_v58 = vpop.f32.mrb[97].mxu1  ;;  %v7299_v24 = vld [vmem:[#allocation3 + $0x2f8] sm:$0xff] }
 0x228   :  { %v836_v26 = vpop.f32.mrb[82].mxu0 }
 0x229   :  { %v837_v49 = vadd.f32 %v8341_v39, %v836_v26  ;;  %v838_v38 = vpop.f32.mrb[83].mxu0  ;;  %1100 = vmatmul.mubr.f32.gmra.mrb[188].mxu0 %v7297_v10  ;;  %v2015_v6 = vmax.f32 %v1537_v45, 0.0 }
 0x22a   :  { %1104 = vmatprep.mubr.f32.mxu0 %v7298_v46  ;;  %v8644_v29 = vpop.f32.mrb[98].mxu1  ;;  %v7300_v38 = vld [vmem:[#allocation6 + $0x300] sm:$0xff] }
 0x22b   :  { %10015 = vst [vmem:[#allocation29_spill] sm:$0xff] %v8644_v29  ;;  %6303 = vmatprep.mubr.f32.mxu1 %v2015_v6  ;;  %v1542_v57 = vadd.f32 %v8447_v12, %v837_v49  ;;  %v8647_v61 = vpop.f32.mrb[99].mxu1  ;;  %v7301_v29 = vld [vmem:[#allocation3 + $0x300] sm:$0xff] }
 0x22c   :  { %v841_v1 = vpop.f32.mrb[84].mxu0 }
 0x22d   :  { %v842_v44 = vadd.f32 %v8341_v39, %v841_v1  ;;  %v843_v22 = vpop.f32.mrb[85].mxu0  ;;  %1105 = vmatmul.mubr.f32.gmra.mrb[190].mxu0 %v7299_v24  ;;  %v2016_v26 = vmax.f32 %v1542_v57, 0.0 }
 0x22e   :  { %1109 = vmatprep.mubr.f32.mxu0 %v7300_v38  ;;  %v8650_v10 = vpop.f32.mrb[100].mxu1  ;;  %v7302_v22 = vld [vmem:[#allocation6 + $0x308] sm:$0xff] }
 0x22f   :  { %10016 = vst [vmem:[#allocation28_spill] sm:$0xff] %v8650_v10  ;;  %6304 = vmatmul.mubr.f32.gmra.mrb[168].mxu1 %v2016_v26  ;;  %v1547_v45 = vadd.f32 %v8458_v27, %v842_v44  ;;  %v8653_v46 = vpop.f32.mrb[101].mxu1  ;;  %v7303_v10 = vld [vmem:[#allocation3 + $0x308] sm:$0xff] }
 0x230   :  { %v846_v6 = vpop.f32.mrb[86].mxu0 }
 0x231   :  { %v847_v12 = vadd.f32 %v8341_v39, %v846_v6  ;;  %v848_v49 = vpop.f32.mrb[87].mxu0  ;;  %1110 = vmatmul.mubr.f32.gmra.mrb[192].mxu0 %v7301_v29  ;;  %v2017_v1 = vmax.f32 %v1547_v45, 0.0 }
 0x232   :  { %1114 = vmatprep.mubr.f32.mxu0 %v7302_v22  ;;  %v8656_v24 = vpop.f32.mrb[102].mxu1  ;;  %v7304_v49 = vld [vmem:[#allocation6 + $0x310] sm:$0xff] }
 0x233   :  { %10017 = vst [vmem:[#allocation31_spill] sm:$0xff] %v8656_v24  ;;  %6306 = vmatprep.mubr.f32.mxu1 %v2017_v1  ;;  %v1552_v57 = vadd.f32 %v8455_v48, %v847_v12  ;;  %v8659_v38 = vpop.f32.mrb[103].mxu1  ;;  %v7305_v24 = vld [vmem:[#allocation3 + $0x310] sm:$0xff] }
 0x234   :  { %v851_v26 = vpop.f32.mrb[88].mxu0 }
 0x235   :  { %v852_v27 = vadd.f32 %v8341_v39, %v851_v26  ;;  %v853_v44 = vpop.f32.mrb[89].mxu0  ;;  %1115 = vmatmul.mubr.f32.gmra.mrb[194].mxu0 %v7303_v10  ;;  %v2018_v6 = vmax.f32 %v1552_v57, 0.0 }
 0x236   :  { %1119 = vmatprep.mubr.f32.mxu0 %v7304_v49  ;;  %v8662_v29 = vpop.f32.mrb[104].mxu1  ;;  %v7306_v44 = vld [vmem:[#allocation6 + $0x318] sm:$0xff] }
 0x237   :  { %10018 = vst [vmem:[#allocation30_spill] sm:$0xff] %v8662_v29  ;;  %6307 = vmatmul.mubr.f32.gmra.mrb[170].mxu1 %v2018_v6  ;;  %v1557_v45 = vadd.f32 %v8466_v35, %v852_v27  ;;  %v8665_v22 = vpop.f32.mrb[105].mxu1  ;;  %v7307_v29 = vld [vmem:[#allocation3 + $0x318] sm:$0xff] }
 0x238   :  { %v856_v1 = vpop.f32.mrb[90].mxu0 }
 0x239   :  { %v857_v48 = vadd.f32 %v8341_v39, %v856_v1  ;;  %v858_v12 = vpop.f32.mrb[91].mxu0  ;;  %1120 = vmatmul.mubr.f32.gmra.mrb[196].mxu0 %v7305_v24  ;;  %v2019_v26 = vmax.f32 %v1557_v45, 0.0 }
 0x23a   :  { %1124 = vmatprep.mubr.f32.mxu0 %v7306_v44  ;;  %v8668_v10 = vpop.f32.mrb[106].mxu1  ;;  %v7308_v12 = vld [vmem:[#allocation6 + $0x320] sm:$0xff] }
 0x23b   :  { %10019 = vst [vmem:[#allocation32_spill] sm:$0xff] %v8668_v10  ;;  %6309 = vmatprep.mubr.f32.mxu1 %v2019_v26  ;;  %v1562_v57 = vadd.f32 %v8463_v63, %v857_v48  ;;  %v8671_v49 = vpop.f32.mrb[107].mxu1  ;;  %v7309_v10 = vld [vmem:[#allocation3 + $0x320] sm:$0xff] }
 0x23c   :  { %v861_v6 = vpop.f32.mrb[92].mxu0 }
 0x23d   :  { %v862_v35 = vadd.f32 %v8341_v39, %v861_v6  ;;  %v863_v27 = vpop.f32.mrb[93].mxu0  ;;  %1125 = vmatmul.mubr.f32.gmra.mrb[198].mxu0 %v7307_v29  ;;  %v2020_v1 = vmax.f32 %v1562_v57, 0.0 }
 0x23e   :  { %1129 = vmatprep.mubr.f32.mxu0 %v7308_v12  ;;  %v8674_v24 = vpop.f32.mrb[108].mxu1  ;;  %v7310_v27 = vld [vmem:[#allocation6 + $0x328] sm:$0xff] }
 0x23f   :  { %10020 = vst [vmem:[#allocation34_spill] sm:$0xff] %v8674_v24  ;;  %6310 = vmatmul.mubr.f32.gmra.mrb[172].mxu1 %v2020_v1  ;;  %v1567_v45 = vadd.f32 %v8474_v20, %v862_v35  ;;  %v8677_v44 = vpop.f32.mrb[109].mxu1  ;;  %v7311_v24 = vld [vmem:[#allocation3 + $0x328] sm:$0xff] }
 0x240   :  { %v866_v26 = vpop.f32.mrb[94].mxu0 }
 0x241   :  { %v867_v63 = vadd.f32 %v8341_v39, %v866_v26  ;;  %v868_v48 = vpop.f32.mrb[95].mxu0  ;;  %1130 = vmatmul.mubr.f32.gmra.mrb[200].mxu0 %v7309_v10  ;;  %v2021_v6 = vmax.f32 %v1567_v45, 0.0 }
 0x242   :  { %1134 = vmatprep.mubr.f32.mxu0 %v7310_v27  ;;  %v8680_v29 = vpop.f32.mrb[110].mxu1  ;;  %v7312_v48 = vld [vmem:[#allocation6 + $0x330] sm:$0xff] }
 0x243   :  { %10021 = vst [vmem:[#allocation33_spill] sm:$0xff] %v8680_v29  ;;  %6312 = vmatprep.mubr.f32.mxu1 %v2021_v6  ;;  %v1572_v57 = vadd.f32 %v8471_v62, %v867_v63  ;;  %v8683_v12 = vpop.f32.mrb[111].mxu1  ;;  %v7313_v29 = vld [vmem:[#allocation3 + $0x330] sm:$0xff] }
 0x244   :  { %v871_v1 = vpop.f32.mrb[96].mxu0 }
 0x245   :  { %v872_v20 = vadd.f32 %v8341_v39, %v871_v1  ;;  %v873_v35 = vpop.f32.mrb[97].mxu0  ;;  %1135 = vmatmul.mubr.f32.gmra.mrb[202].mxu0 %v7311_v24  ;;  %v2022_v26 = vmax.f32 %v1572_v57, 0.0 }
 0x246   :  { %1139 = vmatprep.mubr.f32.mxu0 %v7312_v48  ;;  %v8686_v10 = vpop.f32.mrb[112].mxu1  ;;  %v7314_v35 = vld [vmem:[#allocation6 + $0x338] sm:$0xff] }
 0x247   :  { %6313 = vmatmul.mubr.f32.gmra.mrb[174].mxu1 %v2022_v26  ;;  %v1577_v45 = vadd.f32 %v8482_v33, %v872_v20  ;;  %v8689_v27 = vpop.f32.mrb[113].mxu1  ;;  %v8700_v33 = vld [vmem:[%s9859_s3] ss:$0 sm:$0xff] }
 0x248   :  { %v876_v6 = vpop.f32.mrb[98].mxu0 }
 0x249   :  { %v877_v62 = vadd.f32 %v8341_v39, %v876_v6  ;;  %v878_v63 = vpop.f32.mrb[99].mxu0  ;;  %1140 = vmatmul.mubr.f32.gmra.mrb[204].mxu0 %v7313_v29  ;;  %v2023_v1 = vmax.f32 %v1577_v45, 0.0  ;;  %v7316_v29 = vld [vmem:[#allocation3 + $0x338] sm:$0xff]  ;;  %v7317_v6 = vld [vmem:[#allocation6 + $0x340] sm:$0xff] }
 0x24a   :  { %1144 = vmatprep.mubr.f32.mxu0 %v7314_v35  ;;  %v8692_v24 = vpop.f32.mrb[114].mxu1 }
 0x24b   :  { %10022 = vst [vmem:[#allocation36_spill] sm:$0xff] %v8692_v24  ;;  %6315 = vmatprep.mubr.f32.mxu1 %v2023_v1  ;;  %v1582_v57 = vadd.f32 %v8479_v23, %v877_v62  ;;  %v8695_v48 = vpop.f32.mrb[115].mxu1 }
 0x24c   :  { %10023 = vst [vmem:[#allocation35_spill] sm:$0xff] %v8695_v48  ;;  %v881_v26 = vpop.f32.mrb[100].mxu0  ;;  %v7318_v48 = vld [vmem:[#allocation3 + $0x340] sm:$0xff] }
 0x24d   :  { %v882_v39 = vadd.f32 %v8700_v33, %v881_v26  ;;  %v883_v20 = vpop.f32.mrb[101].mxu0  ;;  %1145 = vmatmul.mubr.f32.gmra.mrb[206].mxu0 %v7316_v29  ;;  %v2024_v45 = vmax.f32 %v1582_v57, 0.0 }
 0x24e   :  { %1149 = vmatprep.mubr.f32.mxu0 %v7317_v6  ;;  %v8703_v63 = vpop.f32.mrb[116].mxu1  ;;  %v7319_v20 = vld [vmem:[#allocation6 + $0x348] sm:$0xff] }
 0x24f   :  { %10024 = vst [vmem:[#allocation38_spill] sm:$0xff] %v8703_v63  ;;  %6316 = vmatmul.mubr.f32.gmra.mrb[176].mxu1 %v2024_v45  ;;  %v1587_v23 = vadd.f32 %v8490_v37, %v882_v39  ;;  %v8706_v62 = vpop.f32.mrb[117].mxu1  ;;  %v7320_v63 = vld [vmem:[#allocation3 + $0x348] sm:$0xff] }
 0x250   :  { %v886_v1 = vpop.f32.mrb[102].mxu0 }
 0x251   :  { %v887_v35 = vadd.f32 %v8700_v33, %v886_v1  ;;  %v888_v24 = vpop.f32.mrb[103].mxu0  ;;  %1150 = vmatmul.mubr.f32.gmra.mrb[208].mxu0 %v7318_v48  ;;  %v2025_v26 = vmax.f32 %v1587_v23, 0.0 }
 0x252   :  { %1154 = vmatprep.mubr.f32.mxu0 %v7319_v20  ;;  %v8709_v29 = vpop.f32.mrb[118].mxu1  ;;  %v7321_v24 = vld [vmem:[#allocation6 + $0x350] sm:$0xff] }
 0x253   :  { %10025 = vst [vmem:[#allocation37_spill] sm:$0xff] %v8709_v29  ;;  %6318 = vmatprep.mubr.f32.mxu1 %v2025_v26  ;;  %v1592_v57 = vadd.f32 %v8487_v30, %v887_v35  ;;  %v8712_v6 = vpop.f32.mrb[119].mxu1  ;;  %v7322_v29 = vld [vmem:[#allocation3 + $0x350] sm:$0xff] }
 0x254   :  { %v891_v45 = vpop.f32.mrb[104].mxu0 }
 0x255   :  { %v892_v37 = vadd.f32 %v8700_v33, %v891_v45  ;;  %v893_v39 = vpop.f32.mrb[105].mxu0  ;;  %1155 = vmatmul.mubr.f32.gmra.mrb[210].mxu0 %v7320_v63  ;;  %v2026_v1 = vmax.f32 %v1592_v57, 0.0 }
 0x256   :  { %1159 = vmatprep.mubr.f32.mxu0 %v7321_v24  ;;  %v8715_v48 = vpop.f32.mrb[120].mxu1  ;;  %v7323_v39 = vld [vmem:[#allocation6 + $0x358] sm:$0xff] }
 0x257   :  { %10026 = vst [vmem:[#allocation40_spill] sm:$0xff] %v8715_v48  ;;  %6319 = vmatmul.mubr.f32.gmra.mrb[178].mxu1 %v2026_v1  ;;  %v1597_v23 = vadd.f32 %v8498_v28, %v892_v37  ;;  %v8718_v20 = vpop.f32.mrb[121].mxu1  ;;  %v7324_v48 = vld [vmem:[#allocation3 + $0x358] sm:$0xff] }
 0x258   :  { %v896_v26 = vpop.f32.mrb[106].mxu0 }
 0x259   :  { %v897_v30 = vadd.f32 %v8700_v33, %v896_v26  ;;  %v898_v35 = vpop.f32.mrb[107].mxu0  ;;  %1160 = vmatmul.mubr.f32.gmra.mrb[212].mxu0 %v7322_v29  ;;  %v2027_v45 = vmax.f32 %v1597_v23, 0.0 }
 0x25a   :  { %1164 = vmatprep.mubr.f32.mxu0 %v7323_v39  ;;  %v8721_v63 = vpop.f32.mrb[122].mxu1  ;;  %v7325_v35 = vld [vmem:[#allocation6 + $0x360] sm:$0xff] }
 0x25b   :  { %10027 = vst [vmem:[#allocation39_spill] sm:$0xff] %v8721_v63  ;;  %6321 = vmatprep.mubr.f32.mxu1 %v2027_v45  ;;  %v1602_v57 = vadd.f32 %v8495_v36, %v897_v30  ;;  %v8724_v24 = vpop.f32.mrb[123].mxu1  ;;  %v7326_v63 = vld [vmem:[#allocation3 + $0x360] sm:$0xff] }
 0x25c   :  { %v901_v1 = vpop.f32.mrb[108].mxu0 }
 0x25d   :  { %v902_v28 = vadd.f32 %v8700_v33, %v901_v1  ;;  %v903_v37 = vpop.f32.mrb[109].mxu0  ;;  %1165 = vmatmul.mubr.f32.gmra.mrb[214].mxu0 %v7324_v48  ;;  %v2028_v26 = vmax.f32 %v1602_v57, 0.0  ;;  %v7327_v48 = vld [vmem:[#allocation6 + $0x368] sm:$0xff] }
 0x25e   :  { %1169 = vmatprep.mubr.f32.mxu0 %v7325_v35  ;;  %v8727_v29 = vpop.f32.mrb[124].mxu1 }
 0x25f   :  { %10028 = vst [vmem:[#allocation42_spill] sm:$0xff] %v8727_v29  ;;  %6322 = vmatmul.mubr.f32.gmra.mrb[180].mxu1 %v2028_v26  ;;  %v8729_v23 = vpop.f32.mrb[125].mxu1  ;;  %v1607_v45 = vadd.f32 %v8506_v31, %v902_v28  ;;  %v7328_v28 = vld [vmem:[#allocation3 + $0x368] sm:$0xff] }
 0x260   :  { %v906_v39 = vpop.f32.mrb[110].mxu0 }
 0x261   :  { %v907_v36 = vadd.f32 %v8700_v33, %v906_v39  ;;  %v908_v30 = vpop.f32.mrb[111].mxu0  ;;  %1170 = vmatmul.mubr.f32.gmra.mrb[216].mxu0 %v7326_v63  ;;  %v2029_v1 = vmax.f32 %v1607_v45, 0.0  ;;  %v7329_v63 = vld [vmem:[#allocation6 + $0x370] sm:$0xff] }
 0x262   :  { %v8733_v37 = vpop.f32.mrb[126].mxu1  ;;  %1174 = vmatprep.mubr.f32.mxu0 %v7327_v48 }
 0x263   :  { %10029 = vst [vmem:[#allocation41_spill] sm:$0xff] %v8733_v37  ;;  %6324 = vmatprep.mubr.f32.mxu1 %v2029_v1  ;;  %v8735_v57 = vpop.f32.mrb[127].mxu1  ;;  %v1612_v26 = vadd.f32 %v8503_v9, %v907_v36  ;;  %v7330_v36 = vld [vmem:[#allocation3 + $0x370] sm:$0xff] }
 0x264   :  { %10030 = vst [vmem:[#allocation44_spill] sm:$0xff] %v8735_v57  ;;  %v911_v35 = vpop.f32.mrb[112].mxu0  ;;  %v3816_v57 = vld [vmem:[#allocation12 + $0x8] sm:$0xff] }
 0x265   :  { %v912_v29 = vadd.f32 %v8700_v33, %v911_v35  ;;  %v913_v31 = vpop.f32.mrb[113].mxu0  ;;  %1175 = vmatmul.mubr.f32.gmra.mrb[218].mxu0 %v7328_v28  ;;  %v2030_v39 = vmax.f32 %v1612_v26, 0.0  ;;  %v7331_v26 = vld [vmem:[#allocation6 + $0x378] sm:$0xff] }
 0x266   :  { %v8739_v30 = vpop.f32.mrb[128].mxu1  ;;  %1179 = vmatprep.mubr.f32.mxu0 %v7329_v63  ;;  %v3815_v31 = vld [vmem:[#allocation12] sm:$0xff] }
 0x267   :  { %10031 = vst [vmem:[#allocation43_spill] sm:$0xff] %v8739_v30  ;;  %v8741_v45 = vpop.f32.mrb[129].mxu1  ;;  %6325 = vmatmul.mubr.f32.gmra.mrb[182].mxu1 %v2030_v39  ;;  %v1617_v1 = vadd.f32 %v8514_v59, %v912_v29  ;;  %v7027_v30 = vpack.c.bf16 %v3816_v57, %v3815_v31 }
 0x268   :  { %v916_v48 = vpop.f32.mrb[114].mxu0 }
 0x269   :  { %v917_v37 = vadd.f32 %v8700_v33, %v916_v48  ;;  %v918_v9 = vpop.f32.mrb[115].mxu0  ;;  %1180 = vmatmul.mubr.f32.gmra.mrb[220].mxu0 %v7330_v36  ;;  %v2031_v35 = vmax.f32 %v1617_v1, 0.0  ;;  %7028 = vmatprep.subr.bf16.mxu0 %v7027_v30  ;;  %v7333_v36 = vld [vmem:[#allocation6 + $0x380] sm:$0xff] }
 0x26a   :  { %v8745_v28 = vpop.f32.mrb[130].mxu1  ;;  %1184 = vmatprep.mubr.f32.mxu0 %v7331_v26  ;;  %v7332_v9 = vld [vmem:[#allocation3 + $0x378] sm:$0xff]  ;;  %7030 = vmatpush3.bf16.msra.mxu0 %v7027_v30 }
 0x26b   :  { %10032 = vst [vmem:[#allocation46_spill] sm:$0xff] %v8745_v28  ;;  %v8747_v63 = vpop.f32.mrb[131].mxu1  ;;  %6327 = vmatprep.mubr.f32.mxu1 %v2031_v35  ;;  %v1622_v39 = vadd.f32 %v8511_v25, %v917_v37  ;;  %v7334_v28 = vld [vmem:[#allocation3 + $0x380] sm:$0xff] }
 0x26c   :  { %v921_v59 = vpop.f32.mrb[116].mxu0 }
 0x26d   :  { %v922_v29 = vadd.f32 %v8700_v33, %v921_v59  ;;  %v923_v48 = vpop.f32.mrb[117].mxu0  ;;  %1185 = vmatmul.mubr.f32.gmra.mrb[222].mxu0 %v7332_v9  ;;  %v2032_v1 = vmax.f32 %v1622_v39, 0.0  ;;  %v7335_v59 = vld [vmem:[#allocation6 + $0x388] sm:$0xff] }
 0x26e   :  { %1189 = vmatprep.mubr.f32.mxu0 %v7333_v36  ;;  %v7337_v36 = vld [vmem:[#allocation6 + $0x390] sm:$0xff] }
 0x26f   :  { %6328 = vmatmul.mubr.f32.gmra.mrb[184].mxu1 %v2032_v1  ;;  %v1627_v26 = vadd.f32 %v8522_v17, %v922_v29  ;;  %v7336_v29 = vld [vmem:[#allocation3 + $0x388] sm:$0xff] }
 0x270   :  { %v926_v57 = vpop.f32.mrb[118].mxu0 }
 0x271   :  { %v927_v31 = vadd.f32 %v8700_v33, %v926_v57  ;;  %v928_v35 = vpop.f32.mrb[119].mxu0  ;;  %1190 = vmatmul.mubr.f32.gmra.mrb[224].mxu0 %v7334_v28  ;;  %v2033_v25 = vmax.f32 %v1627_v26, 0.0 }
 0x272   :  { %v8753_v37 = vpop.f32.mrb[132].mxu1  ;;  %1194 = vmatprep.mubr.f32.mxu0 %v7335_v59  ;;  %v7338_v59 = vld [vmem:[#allocation3 + $0x390] sm:$0xff] }
 0x273   :  { %v8755_v48 = vpop.f32.mrb[133].mxu1  ;;  %6330 = vmatprep.mubr.f32.mxu1 %v2033_v25  ;;  %v1632_v39 = vadd.f32 %v8519_v3, %v927_v31  ;;  %v7339_v31 = vld [vmem:[#allocation6 + $0x398] sm:$0xff] }
 0x274   :  { %v931_v30 = vpop.f32.mrb[120].mxu0 }
 0x275   :  { %v932_v9 = vadd.f32 %v8700_v33, %v931_v30  ;;  %v933_v17 = vpop.f32.mrb[121].mxu0  ;;  %1195 = vmatmul.mubr.f32.gmra.mrb[226].mxu0 %v7336_v29  ;;  %v2034_v1 = vmax.f32 %v1632_v39, 0.0 }
 0x276   :  { %1199 = vmatprep.mubr.f32.mxu0 %v7337_v36  ;;  %v7341_v36 = vld [vmem:[#allocation6 + $0x3a0] sm:$0xff] }
 0x277   :  { %6331 = vmatmul.mubr.f32.gmra.mrb[186].mxu1 %v2034_v1  ;;  %v1637_v28 = vadd.f32 %v8530_v34, %v932_v9  ;;  %v7340_v9 = vld [vmem:[#allocation3 + $0x398] sm:$0xff] }
 0x278   :  { %v936_v26 = vpop.f32.mrb[122].mxu0 }
 0x279   :  { %v937_v57 = vadd.f32 %v8700_v33, %v936_v26  ;;  %v938_v35 = vpop.f32.mrb[123].mxu0  ;;  %1200 = vmatmul.mubr.f32.gmra.mrb[228].mxu0 %v7338_v59  ;;  %v2035_v25 = vmax.f32 %v1637_v28, 0.0 }
 0x27a   :  { %v8761_v3 = vpop.f32.mrb[134].mxu1  ;;  %1204 = vmatprep.mubr.f32.mxu0 %v7339_v31  ;;  %v7342_v31 = vld [vmem:[#allocation3 + $0x3a0] sm:$0xff] }
 0x27b   :  { %v8763_v30 = vpop.f32.mrb[135].mxu1  ;;  %6333 = vmatprep.mubr.f32.mxu1 %v2035_v25  ;;  %v1642_v39 = vadd.f32 %v8527_v52, %v937_v57  ;;  %v7343_v57 = vld [vmem:[#allocation6 + $0x3a8] sm:$0xff] }
 0x27c   :  { %v941_v17 = vpop.f32.mrb[124].mxu0 }
 0x27d   :  { %v942_v29 = vadd.f32 %v8700_v33, %v941_v17  ;;  %v943_v34 = vpop.f32.mrb[125].mxu0  ;;  %1205 = vmatmul.mubr.f32.gmra.mrb[230].mxu0 %v7340_v9  ;;  %v2036_v1 = vmax.f32 %v1642_v39, 0.0 }
 0x27e   :  { %1209 = vmatprep.mubr.f32.mxu0 %v7341_v36  ;;  %v7345_v36 = vld [vmem:[#allocation6 + $0x3b0] sm:$0xff] }
 0x27f   :  { %6334 = vmatmul.mubr.f32.gmra.mrb[188].mxu1 %v2036_v1  ;;  %v1647_v28 = vadd.f32 %v8538_v55, %v942_v29  ;;  %v7344_v29 = vld [vmem:[#allocation3 + $0x3a8] sm:$0xff] }
 0x280   :  { %v946_v26 = vpop.f32.mrb[126].mxu0 }
 0x281   :  { %v947_v35 = vadd.f32 %v8700_v33, %v946_v26  ;;  %v948_v59 = vpop.f32.mrb[127].mxu0  ;;  %1210 = vmatmul.mubr.f32.gmra.mrb[232].mxu0 %v7342_v31  ;;  %v2037_v25 = vmax.f32 %v1647_v28, 0.0 }
 0x282   :  { %v8769_v52 = vpop.f32.mrb[136].mxu1  ;;  %1214 = vmatprep.mubr.f32.mxu0 %v7343_v57  ;;  %v7346_v57 = vld [vmem:[#allocation3 + $0x3b0] sm:$0xff] }
 0x283   :  { %v8771_v17 = vpop.f32.mrb[137].mxu1  ;;  %6336 = vmatprep.mubr.f32.mxu1 %v2037_v25  ;;  %v1652_v39 = vadd.f32 %v8535_v19, %v947_v35  ;;  %v7347_v35 = vld [vmem:[#allocation6 + $0x3b8] sm:$0xff] }
 0x284   :  { %v951_v34 = vpop.f32.mrb[128].mxu0 }
 0x285   :  { %v952_v9 = vadd.f32 %v8700_v33, %v951_v34  ;;  %v953_v55 = vpop.f32.mrb[129].mxu0  ;;  %1215 = vmatmul.mubr.f32.gmra.mrb[234].mxu0 %v7344_v29  ;;  %v2038_v1 = vmax.f32 %v1652_v39, 0.0 }
 0x286   :  { %1219 = vmatprep.mubr.f32.mxu0 %v7345_v36  ;;  %v2959_v36 = vld [vmem:[#allocation11] sm:$0xff] }
 0x287   :  { %6337 = vmatmul.mubr.f32.gmra.mrb[190].mxu1 %v2038_v1  ;;  %v1657_v28 = vadd.f32 %v8545_v11, %v952_v9  ;;  %v7348_v9 = vld [vmem:[#allocation3 + $0x3b8] sm:$0xff] }
 0x288   :  { %v956_v26 = vpop.f32.mrb[130].mxu0 }
 0x289   :  { %v957_v59 = vadd.f32 %v8700_v33, %v956_v26  ;;  %v958_v31 = vpop.f32.mrb[131].mxu0  ;;  %1220 = vmatmul.mubr.f32.gmra.mrb[236].mxu0 %v7346_v57  ;;  %v2039_v25 = vmax.f32 %v1657_v28, 0.0  ;;  %v2960_v26 = vld [vmem:[#allocation11 + $0x8] sm:$0xff] }
 0x28a   :  { %v8777_v19 = vpop.f32.mrb[138].mxu1  ;;  %1224 = vmatprep.mubr.f32.mxu0 %v7347_v35  ;;  %v7349_v31 = vld [vmem:[#allocation6 + $0x3c0] sm:$0xff]  ;;  %v6995_v28 = vpack.c.bf16 %v2960_v26, %v2959_v36  ;;  %v7352_v26 = vld [vmem:[#allocation3 + $0x3c8] sm:$0xff] }
 0x28b   :  { %10033 = vst [vmem:[#allocation45_spill] sm:$0xff] %v8777_v19  ;;  %v8779_v34 = vpop.f32.mrb[139].mxu1  ;;  %6339 = vmatprep.mubr.f32.mxu1 %v2039_v25  ;;  %v1662_v39 = vadd.f32 %v8542_v54, %v957_v59  ;;  %v7350_v19 = vld [vmem:[#allocation3 + $0x3c0] sm:$0xff] }
 0x28c   :  { %v961_v55 = vpop.f32.mrb[132].mxu0  ;;  %6996 = vmatprep.subr.bf16.mxu1 %v6995_v28 }
 0x28d   :  { %v962_v29 = vadd.f32 %v8700_v33, %v961_v55  ;;  %v963_v11 = vpop.f32.mrb[133].mxu0  ;;  %1225 = vmatmul.mubr.f32.gmra.mrb[238].mxu0 %v7348_v9  ;;  %v2040_v1 = vmax.f32 %v1662_v39, 0.0  ;;  %6998 = vmatpush3.bf16.msra.mxu1 %v6995_v28  ;;  %v7351_v39 = vld [vmem:[#allocation6 + $0x3c8] sm:$0xff] }
 0x28e   :  { %1229 = vmatprep.mubr.f32.mxu0 %v7349_v31  ;;  %v7353_v31 = vld [vmem:[#allocation6 + $0x3d0] sm:$0xff] }
 0x28f   :  { %v1667_v57 = vadd.f32 %v8551_v4, %v962_v29  ;;  %6340 = vmatmul.mubr.f32.gmra.mrb[192].mxu1 %v2040_v1 }
 0x290   :  { %v966_v35 = vpop.f32.mrb[134].mxu0 }
 0x291   :  { %v2041_v25 = vmax.f32 %v1667_v57, 0.0  ;;  %v967_v54 = vadd.f32 %v8700_v33, %v966_v35  ;;  %v968_v59 = vpop.f32.mrb[135].mxu0  ;;  %1230 = vmatmul.mubr.f32.gmra.mrb[240].mxu0 %v7350_v19 }
 0x292   :  { %v8785_v55 = vpop.f32.mrb[140].mxu1  ;;  %1234 = vmatprep.mubr.f32.mxu0 %v7351_v39  ;;  %v7355_v59 = vld [vmem:[#allocation6 + $0x3d8] sm:$0xff] }
 0x293   :  { %v1672_v11 = vadd.f32 %v8548_v47, %v967_v54  ;;  %v8788_v9 = vpop.f32.mrb[141].mxu1  ;;  %6342 = vmatprep.mubr.f32.mxu1 %v2041_v25  ;;  %v7354_v54 = vld [vmem:[#allocation3 + $0x3d0] sm:$0xff] }
 0x294   :  { %v971_v4 = vpop.f32.mrb[136].mxu0 }
 0x295   :  { %v2042_v29 = vmax.f32 %v1672_v11, 0.0  ;;  %v972_v1 = vadd.f32 %v8700_v33, %v971_v4  ;;  %v973_v36 = vpop.f32.mrb[137].mxu0  ;;  %1235 = vmatmul.mubr.f32.gmra.mrb[242].mxu0 %v7352_v26  ;;  %v7357_v26 = vld [vmem:[#allocation6 + $0x3e0] sm:$0xff] }
 0x296   :  { %1239 = vmatprep.mubr.f32.mxu0 %v7353_v31 }
 0x297   :  { %v1677_v19 = vadd.f32 %v8557_v41, %v972_v1  ;;  %6343 = vmatmul.mubr.f32.gmra.mrb[194].mxu1 %v2042_v29  ;;  %v7356_v1 = vld [vmem:[#allocation3 + $0x3d8] sm:$0xff] }
 0x298   :  { %v976_v28 = vpop.f32.mrb[138].mxu0 }
 0x299   :  { %v2043_v57 = vmax.f32 %v1677_v19, 0.0  ;;  %v977_v35 = vadd.f32 %v8700_v33, %v976_v28  ;;  %v978_v47 = vpop.f32.mrb[139].mxu0  ;;  %1240 = vmatmul.mubr.f32.gmra.mrb[244].mxu0 %v7354_v54  ;;  %v7359_v54 = vld [vmem:[#allocation6 + $0x3e8] sm:$0xff] }
 0x29a   :  { %v8793_v25 = vpop.f32.mrb[142].mxu1  ;;  %1244 = vmatprep.mubr.f32.mxu0 %v7355_v59 }
 0x29b   :  { %v1682_v39 = vadd.f32 %v8554_v53, %v977_v35  ;;  %v8796_v11 = vpop.f32.mrb[143].mxu1  ;;  %6345 = vmatprep.mubr.f32.mxu1 %v2043_v57  ;;  %v7358_v35 = vld [vmem:[#allocation3 + $0x3e0] sm:$0xff] }
 0x29c   :  { %v981_v4 = vpop.f32.mrb[140].mxu0 }
 0x29d   :  { %v2044_v36 = vmax.f32 %v1682_v39, 0.0  ;;  %v982_v41 = vadd.f32 %v8700_v33, %v981_v4  ;;  %v983_v29 = vpop.f32.mrb[141].mxu0  ;;  %1245 = vmatmul.mubr.f32.gmra.mrb[246].mxu0 %v7356_v1  ;;  %v7361_v1 = vld [vmem:[#allocation6 + $0x3f0] sm:$0xff] }
 0x29e   :  { %1249 = vmatprep.mubr.f32.mxu0 %v7357_v26 }
 0x29f   :  { %v1687_v31 = vadd.f32 %v8563_v18, %v982_v41  ;;  %6346 = vmatmul.mubr.f32.gmra.mrb[196].mxu1 %v2044_v36  ;;  %v7360_v41 = vld [vmem:[#allocation3 + $0x3e8] sm:$0xff] }
 0x2a0   :  { %v986_v19 = vpop.f32.mrb[142].mxu0 }
 0x2a1   :  { %v2045_v28 = vmax.f32 %v1687_v31, 0.0  ;;  %v987_v47 = vadd.f32 %v8700_v33, %v986_v19  ;;  %v988_v53 = vpop.f32.mrb[143].mxu0  ;;  %1250 = vmatmul.mubr.f32.gmra.mrb[248].mxu0 %v7358_v35  ;;  %v3818_v35 = vld [vmem:[#allocation12 + $0x18] sm:$0xff] }
 0x2a2   :  { %v8801_v57 = vpop.f32.mrb[144].mxu1  ;;  %1254 = vmatprep.mubr.f32.mxu0 %v7359_v54 }
 0x2a3   :  { %v1692_v59 = vadd.f32 %v8560_v60, %v987_v47  ;;  %v8804_v39 = vpop.f32.mrb[145].mxu1  ;;  %6348 = vmatprep.mubr.f32.mxu1 %v2045_v28  ;;  %v7362_v47 = vld [vmem:[#allocation3 + $0x3f0] sm:$0xff] }
 0x2a4   :  { %v991_v4 = vpop.f32.mrb[144].mxu0  ;;  %v3817_v28 = vld [vmem:[#allocation12 + $0x10] sm:$0xff] }
 0x2a5   :  { %v2046_v29 = vmax.f32 %v1692_v59, 0.0  ;;  %v992_v18 = vadd.f32 %v8700_v33, %v991_v4  ;;  %v993_v36 = vpop.f32.mrb[145].mxu0  ;;  %1255 = vmatmul.mubr.f32.gmra.mrb[250].mxu0 %v7360_v41  ;;  %v7363_v59 = vld [vmem:[#allocation6 + $0x3f8] sm:$0xff]  ;;  %v7031_v4 = vpack.c.bf16 %v3818_v35, %v3817_v28 }
 0x2a6   :  { %1259 = vmatprep.mubr.f32.mxu0 %v7361_v1 }
 0x2a7   :  { %v1697_v26 = vadd.f32 %v8569_v13, %v992_v18  ;;  %6349 = vmatmul.mubr.f32.gmra.mrb[198].mxu1 %v2046_v29  ;;  %7032 = vmatprep.subr.bf16.mxu0 %v7031_v4 }
 0x2a8   :  { %v996_v31 = vpop.f32.mrb[146].mxu0  ;;  %7034 = vmatpush3.bf16.msra.mxu0 %v7031_v4 }
 0x2a9   :  { %v2047_v19 = vmax.f32 %v1697_v26, 0.0  ;;  %v997_v53 = vadd.f32 %v8700_v33, %v996_v31  ;;  %v998_v60 = vpop.f32.mrb[147].mxu0  ;;  %1260 = vmatmul.mubr.f32.gmra.mrb[252].mxu0 %v7362_v47  ;;  %v7364_v26 = vld [vmem:[#allocation3 + $0x3f8] sm:$0xff]  ;;  %v2961_v31 = vld [vmem:[#allocation11 + $0x10] sm:$0xff] }
 0x2aa   :  { %v8809_v54 = vpop.f32.mrb[146].mxu1  ;;  %1264 = vmatprep.mubr.f32.mxu0 %v7363_v59  ;;  %v2962_v60 = vld [vmem:[#allocation11 + $0x18] sm:$0xff] }
 0x2ab   :  { %v1702_v36 = vadd.f32 %v8566_v56, %v997_v53  ;;  %v8812_v41 = vpop.f32.mrb[147].mxu1  ;;  %6351 = vmatprep.mubr.f32.mxu1 %v2047_v19  ;;  %v6999_v47 = vpack.c.bf16 %v2962_v60, %v2961_v31 }
 0x2ac   :  { %v1001_v13 = vpop.f32.mrb[148].mxu0 }
 0x2ad   :  { %v2048_v29 = vmax.f32 %v1702_v36, 0.0  ;;  %v1002_v18 = vadd.f32 %v8700_v33, %v1001_v13  ;;  %v1003_v1 = vpop.f32.mrb[149].mxu0  ;;  %1265 = vmatmul.mubr.f32.gmra.mrb[254].mxu0 %v7364_v26  ;;  %7000 = vmatprep.subr.bf16.mxu1 %v6999_v47 }
 0x2ae   :  { %7002 = vmatpush3.bf16.msra.mxu1 %v6999_v47 }
 0x2af   :  { %v1707_v59 = vadd.f32 %v8575_v2, %v1002_v18  ;;  %6352 = vmatmul.mubr.f32.gmra.mrb[200].mxu1 %v2048_v29 }
 0x2b0   :  { %v1006_v28 = vpop.f32.mrb[150].mxu0 }
 0x2b1   :  { %v2049_v56 = vmax.f32 %v1707_v59, 0.0  ;;  %v1007_v19 = vadd.f32 %v8700_v33, %v1006_v28  ;;  %v1008_v53 = vpop.f32.mrb[151].mxu0 }
 0x2b2   :  { %v8817_v35 = vpop.f32.mrb[148].mxu1 }
 0x2b3   :  { %v1712_v36 = vadd.f32 %v8572_v21, %v1007_v19  ;;  %v8820_v13 = vpop.f32.mrb[149].mxu1  ;;  %6354 = vmatprep.mubr.f32.mxu1 %v2049_v56 }
 0x2b4   :  { %v1011_v1 = vpop.f32.mrb[152].mxu0 }
 0x2b5   :  { %v2050_v4 = vmax.f32 %v1712_v36, 0.0  ;;  %v1012_v26 = vadd.f32 %v8700_v33, %v1011_v1  ;;  %v1013_v2 = vpop.f32.mrb[153].mxu0 }
 0x2b7   :  { %v1717_v29 = vadd.f32 %v8581_v14, %v1012_v26  ;;  %6355 = vmatmul.mubr.f32.gmra.mrb[202].mxu1 %v2050_v4 }
 0x2b8   :  { %v1016_v18 = vpop.f32.mrb[154].mxu0 }
 0x2b9   :  { %v2051_v31 = vmax.f32 %v1717_v29, 0.0  ;;  %v1017_v60 = vadd.f32 %v8700_v33, %v1016_v18  ;;  %v1018_v47 = vpop.f32.mrb[155].mxu0 }
 0x2ba   :  { %v8825_v59 = vpop.f32.mrb[150].mxu1 }
 0x2bb   :  { %v1722_v21 = vadd.f32 %v8578_v51, %v1017_v60  ;;  %v8828_v28 = vpop.f32.mrb[151].mxu1  ;;  %6357 = vmatprep.mubr.f32.mxu1 %v2051_v31 }
 0x2bc   :  { %v1021_v56 = vpop.f32.mrb[156].mxu0 }
 0x2bd   :  { %v2052_v19 = vmax.f32 %v1722_v21, 0.0  ;;  %v1022_v53 = vadd.f32 %v8700_v33, %v1021_v56  ;;  %v1023_v36 = vpop.f32.mrb[157].mxu0 }
 0x2bf   :  { %v1727_v14 = vadd.f32 %v8587_v7, %v1022_v53  ;;  %6358 = vmatmul.mubr.f32.gmra.mrb[204].mxu1 %v2052_v19 }
 0x2c0   :  { %v1026_v1 = vpop.f32.mrb[158].mxu0 }
 0x2c1   :  { %v2053_v4 = vmax.f32 %v1727_v14, 0.0  ;;  %v1027_v26 = vadd.f32 %v8700_v33, %v1026_v1  ;;  %v1028_v2 = vpop.f32.mrb[159].mxu0 }
 0x2c2   :  { %v8833_v29 = vpop.f32.mrb[152].mxu1 }
 0x2c3   :  { %v1732_v51 = vadd.f32 %v8584_v8, %v1027_v26  ;;  %v8836_v18 = vpop.f32.mrb[153].mxu1  ;;  %6360 = vmatprep.mubr.f32.mxu1 %v2053_v4 }
 0x2c4   :  { %v1031_v31 = vpop.f32.mrb[160].mxu0 }
 0x2c5   :  { %v2054_v60 = vmax.f32 %v1732_v51, 0.0  ;;  %v1032_v47 = vadd.f32 %v8700_v33, %v1031_v31  ;;  %v1033_v21 = vpop.f32.mrb[161].mxu0  ;;  %v2963_v31 = vld [vmem:[#allocation11 + $0x20] sm:$0xff] }
 0x2c7   :  { %v1737_v7 = vadd.f32 %v8593_v40, %v1032_v47  ;;  %6361 = vmatmul.mubr.f32.gmra.mrb[206].mxu1 %v2054_v60  ;;  %v2964_v40 = vld [vmem:[#allocation11 + $0x28] sm:$0xff] }
 0x2c8   :  { %v1036_v56 = vpop.f32.mrb[162].mxu0  ;;  %v7003_v60 = vpack.c.bf16 %v2964_v40, %v2963_v31 }
 0x2c9   :  { %v2055_v19 = vmax.f32 %v1737_v7, 0.0  ;;  %v1037_v53 = vadd.f32 %v8700_v33, %v1036_v56  ;;  %v1038_v36 = vpop.f32.mrb[163].mxu0 }
 0x2ca   :  { %v8841_v14 = vpop.f32.mrb[154].mxu1  ;;  %7004 = vmatprep.subr.bf16.mxu1 %v7003_v60 }
 0x2cb   :  { %v1742_v8 = vadd.f32 %v8590_v15, %v1037_v53  ;;  %v8844_v1 = vpop.f32.mrb[155].mxu1  ;;  %6363 = vmatprep.mubr.f32.mxu1 %v2055_v19  ;;  %7006 = vmatpush3.bf16.msra.mxu1 %v7003_v60  ;;  %v10034_v19 = vld [vmem:[#allocation21_spill] sm:$0xff] }
 0x2cc   :  { %v1041_v4 = vpop.f32.mrb[164].mxu0 }
 0x2cd   :  { %v2056_v26 = vmax.f32 %v1742_v8, 0.0  ;;  %v1042_v2 = vadd.f32 %v8700_v33, %v1041_v4  ;;  %v1043_v51 = vpop.f32.mrb[165].mxu0 }
 0x2cf   :  { %v1747_v47 = vadd.f32 %v8599_v42, %v1042_v2  ;;  %6364 = vmatmul.mubr.f32.gmra.mrb[208].mxu1 %v2056_v26 }
 0x2d0   :  { %v1046_v21 = vpop.f32.mrb[166].mxu0 }
 0x2d1   :  { %v2057_v7 = vmax.f32 %v1747_v47, 0.0  ;;  %v1047_v56 = vadd.f32 %v8700_v33, %v1046_v21  ;;  %v1048_v15 = vpop.f32.mrb[167].mxu0 }
 0x2d2   :  { %v8849_v53 = vpop.f32.mrb[156].mxu1  ;;  %v10036_v15 = vld [vmem:[#allocation20_spill] sm:$0xff] }
 0x2d3   :  { %v1752_v36 = vadd.f32 %v10034_v19, %v1047_v56  ;;  %v8852_v8 = vpop.f32.mrb[157].mxu1  ;;  %6366 = vmatprep.mubr.f32.mxu1 %v2057_v7 }
 0x2d4   :  { %v1051_v4 = vpop.f32.mrb[168].mxu0 }
 0x2d5   :  { %v2058_v51 = vmax.f32 %v1752_v36, 0.0  ;;  %v1052_v31 = vadd.f32 %v8700_v33, %v1051_v4  ;;  %v1053_v42 = vpop.f32.mrb[169].mxu0 }
 0x2d7   :  { %v1757_v26 = vadd.f32 %v8605_v0, %v1052_v31  ;;  %6367 = vmatmul.mubr.f32.gmra.mrb[210].mxu1 %v2058_v51 }
 0x2d8   :  { %v1056_v2 = vpop.f32.mrb[170].mxu0 }
 0x2d9   :  { %v2059_v40 = vmax.f32 %v1757_v26, 0.0  ;;  %v1057_v47 = vadd.f32 %v8700_v33, %v1056_v2  ;;  %v1058_v60 = vpop.f32.mrb[171].mxu0 }
 0x2da   :  { %v8857_v21 = vpop.f32.mrb[158].mxu1 }
 0x2db   :  { %10035 = vst [vmem:[#allocation48_spill] sm:$0xff] %v8857_v21  ;;  %v1762_v56 = vadd.f32 %v10036_v15, %v1057_v47  ;;  %v8860_v19 = vpop.f32.mrb[159].mxu1  ;;  %6369 = vmatprep.mubr.f32.mxu1 %v2059_v40  ;;  %v10039_v21 = vld [vmem:[#allocation23_spill] sm:$0xff] }
 0x2dc   :  { %10037 = vst [vmem:[#allocation47_spill] sm:$0xff] %v8860_v19  ;;  %v1061_v7 = vpop.f32.mrb[172].mxu0 }
 0x2dd   :  { %v2060_v36 = vmax.f32 %v1762_v56, 0.0  ;;  %v1062_v4 = vadd.f32 %v8700_v33, %v1061_v7  ;;  %v1063_v42 = vpop.f32.mrb[173].mxu0 }
 0x2df   :  { %v1767_v0 = vadd.f32 %v8611_v5, %v1062_v4  ;;  %6370 = vmatmul.mubr.f32.gmra.mrb[212].mxu1 %v2060_v36 }
 0x2e0   :  { %v1066_v51 = vpop.f32.mrb[174].mxu0 }
 0x2e1   :  { %v2061_v31 = vmax.f32 %v1767_v0, 0.0  ;;  %v1067_v26 = vadd.f32 %v8700_v33, %v1066_v51  ;;  %v1068_v2 = vpop.f32.mrb[175].mxu0 }
 0x2e2   :  { %v8865_v60 = vpop.f32.mrb[160].mxu1  ;;  %v3819_v2 = vld [vmem:[#allocation12 + $0x20] sm:$0xff] }
 0x2e3   :  { %10038 = vst [vmem:[#allocation50_spill] sm:$0xff] %v8865_v60  ;;  %v1772_v47 = vadd.f32 %v10039_v21, %v1067_v26  ;;  %v8868_v15 = vpop.f32.mrb[161].mxu1  ;;  %6372 = vmatprep.mubr.f32.mxu1 %v2061_v31  ;;  %v3820_v60 = vld [vmem:[#allocation12 + $0x28] sm:$0xff]  ;;  %v10041_v26 = vld [vmem:[#allocation22_spill] sm:$0xff] }
 0x2e4   :  { %10040 = vst [vmem:[#allocation49_spill] sm:$0xff] %v8868_v15  ;;  %v1071_v40 = vpop.f32.mrb[176].mxu0  ;;  %v7035_v21 = vpack.c.bf16 %v3820_v60, %v3819_v2 }
 0x2e5   :  { %v2062_v56 = vmax.f32 %v1772_v47, 0.0  ;;  %v1072_v7 = vadd.f32 %v8700_v33, %v1071_v40  ;;  %v1073_v42 = vpop.f32.mrb[177].mxu0 }
 0x2e6   :  { %7036 = vmatprep.subr.bf16.mxu0 %v7035_v21  ;;  %v2966_v42 = vld [vmem:[#allocation11 + $0x38] sm:$0xff] }
 0x2e7   :  { %v1777_v5 = vadd.f32 %v8617_v32, %v1072_v7  ;;  %6373 = vmatmul.mubr.f32.gmra.mrb[214].mxu1 %v2062_v56  ;;  %7038 = vmatpush3.bf16.msra.mxu0 %v7035_v21  ;;  %v2965_v7 = vld [vmem:[#allocation11 + $0x30] sm:$0xff] }
 0x2e8   :  { %v1076_v36 = vpop.f32.mrb[178].mxu0 }
 0x2e9   :  { %v2063_v4 = vmax.f32 %v1777_v5, 0.0  ;;  %v1077_v0 = vadd.f32 %v8700_v33, %v1076_v36  ;;  %v1078_v51 = vpop.f32.mrb[179].mxu0  ;;  %v7007_v5 = vpack.c.bf16 %v2966_v42, %v2965_v7 }
 0x2ea   :  { %v8873_v19 = vpop.f32.mrb[162].mxu1 }
 0x2eb   :  { %v1782_v31 = vadd.f32 %v10041_v26, %v1077_v0  ;;  %v8876_v15 = vpop.f32.mrb[163].mxu1  ;;  %6375 = vmatprep.mubr.f32.mxu1 %v2063_v4  ;;  %7008 = vmatprep.subr.bf16.mxu1 %v7007_v5  ;;  %v10043_v26 = vld [vmem:[#allocation25_spill] sm:$0xff] }
 0x2ec   :  { %v1081_v47 = vpop.f32.mrb[180].mxu0  ;;  %7010 = vmatpush3.bf16.msra.mxu1 %v7007_v5 }
 0x2ed   :  { %v2064_v40 = vmax.f32 %v1782_v31, 0.0  ;;  %v1082_v32 = vadd.f32 %v8700_v33, %v1081_v47  ;;  %v1083_v56 = vpop.f32.mrb[181].mxu0 }
 0x2ef   :  { %v1787_v36 = vadd.f32 %v8623_v50, %v1082_v32  ;;  %6376 = vmatmul.mubr.f32.gmra.mrb[216].mxu1 %v2064_v40 }
 0x2f0   :  { %v1086_v51 = vpop.f32.mrb[182].mxu0 }
 0x2f1   :  { %v2065_v60 = vmax.f32 %v1787_v36, 0.0  ;;  %v1087_v0 = vadd.f32 %v8700_v33, %v1086_v51  ;;  %v1088_v2 = vpop.f32.mrb[183].mxu0  ;;  %v2967_v51 = vld [vmem:[#allocation11 + $0x40] sm:$0xff] }
 0x2f2   :  { %v8881_v4 = vpop.f32.mrb[164].mxu1  ;;  %v2968_v2 = vld [vmem:[#allocation11 + $0x48] sm:$0xff] }
 0x2f3   :  { %10042 = vst [vmem:[#allocation52_spill] sm:$0xff] %v8881_v4  ;;  %v1792_v31 = vadd.f32 %v10043_v26, %v1087_v0  ;;  %v8884_v47 = vpop.f32.mrb[165].mxu1  ;;  %6378 = vmatprep.mubr.f32.mxu1 %v2065_v60  ;;  %v7011_v0 = vpack.c.bf16 %v2968_v2, %v2967_v51  ;;  %v10046_v26 = vld [vmem:[#allocation24_spill] sm:$0xff] }
 0x2f4   :  { %10044 = vst [vmem:[#allocation51_spill] sm:$0xff] %v8884_v47  ;;  %v1091_v21 = vpop.f32.mrb[184].mxu0 }
 0x2f5   :  { %v2066_v56 = vmax.f32 %v1792_v31, 0.0  ;;  %v1092_v7 = vadd.f32 %v8700_v33, %v1091_v21  ;;  %v1093_v50 = vpop.f32.mrb[185].mxu0  ;;  %7012 = vmatprep.subr.bf16.mxu1 %v7011_v0 }
 0x2f6   :  { %7014 = vmatpush3.bf16.msra.mxu1 %v7011_v0  ;;  %v2970_v50 = vld [vmem:[#allocation11 + $0x58] sm:$0xff] }
 0x2f7   :  { %v1797_v40 = vadd.f32 %v8629_v43, %v1092_v7  ;;  %6379 = vmatmul.mubr.f32.gmra.mrb[218].mxu1 %v2066_v56  ;;  %v2969_v7 = vld [vmem:[#allocation11 + $0x50] sm:$0xff] }
 0x2f8   :  { %v1096_v32 = vpop.f32.mrb[186].mxu0 }
 0x2f9   :  { %v2067_v42 = vmax.f32 %v1797_v40, 0.0  ;;  %v1097_v36 = vadd.f32 %v8700_v33, %v1096_v32  ;;  %v1098_v5 = vpop.f32.mrb[187].mxu0  ;;  %v7015_v40 = vpack.c.bf16 %v2970_v50, %v2969_v7  ;;  %v2973_v50 = vld [vmem:[#allocation11 + $0x70] sm:$0xff] }
 0x2fa   :  { %v8889_v4 = vpop.f32.mrb[166].mxu1 }
 0x2fb   :  { %10045 = vst [vmem:[#allocation53_spill] sm:$0xff] %v8889_v4  ;;  %v1802_v60 = vadd.f32 %v10046_v26, %v1097_v36  ;;  %v8892_v47 = vpop.f32.mrb[167].mxu1  ;;  %6381 = vmatprep.mubr.f32.mxu1 %v2067_v42  ;;  %7016 = vmatprep.subr.bf16.mxu1 %v7015_v40  ;;  %v2971_v42 = vld [vmem:[#allocation11 + $0x60] sm:$0xff]  ;;  %v2972_v26 = vld [vmem:[#allocation11 + $0x68] sm:$0xff] }
 0x2fc   :  { %v1101_v31 = vpop.f32.mrb[188].mxu0  ;;  %7018 = vmatpush3.bf16.msra.mxu1 %v7015_v40 }
 0x2fd   :  { %v2068_v21 = vmax.f32 %v1802_v60, 0.0  ;;  %v1102_v43 = vadd.f32 %v8700_v33, %v1101_v31  ;;  %v1103_v56 = vpop.f32.mrb[189].mxu0  ;;  %v7019_v31 = vpack.c.bf16 %v2972_v26, %v2971_v42 }
 0x2fe   :  { %v10047_v56 = vld [vmem:[#allocation27_spill] sm:$0xff] }
 0x2ff   :  { %v1807_v32 = vadd.f32 %v8635_v16, %v1102_v43  ;;  %6382 = vmatmul.mubr.f32.gmra.mrb[220].mxu1 %v2068_v21  ;;  %7020 = vmatprep.subr.bf16.mxu1 %v7019_v31 }
 0x300   :  { %v1106_v5 = vpop.f32.mrb[190].mxu0  ;;  %7022 = vmatpush3.bf16.msra.mxu1 %v7019_v31 }
 0x301   :  { %v2069_v51 = vmax.f32 %v1807_v32, 0.0  ;;  %v1107_v36 = vadd.f32 %v8700_v33, %v1106_v5  ;;  %v1108_v2 = vpop.f32.mrb[191].mxu0  ;;  %v2974_v32 = vld [vmem:[#allocation11 + $0x78] sm:$0xff] }
 0x302   :  { %v8897_v60 = vpop.f32.mrb[168].mxu1  ;;  %v7023_v40 = vpack.c.bf16 %v2974_v32, %v2973_v50 }
 0x303   :  { %v1812_v0 = vadd.f32 %v10047_v56, %v1107_v36  ;;  %v8900_v4 = vpop.f32.mrb[169].mxu1  ;;  %6384 = vmatprep.mubr.f32.mxu1 %v2069_v51  ;;  %v10048_v56 = vld [vmem:[#allocation26_spill] sm:$0xff] }
 0x304   :  { %v1111_v7 = vpop.f32.mrb[192].mxu0  ;;  %7024 = vmatprep.subr.bf16.mxu1 %v7023_v40 }
 0x305   :  { %v2070_v16 = vmax.f32 %v1812_v0, 0.0  ;;  %v1112_v21 = vadd.f32 %v8700_v33, %v1111_v7  ;;  %v1113_v43 = vpop.f32.mrb[193].mxu0  ;;  %7026 = vmatpush3.bf16.msra.mxu1 %v7023_v40 }
 0x307   :  { %v1817_v5 = vadd.f32 %v8641_v58, %v1112_v21  ;;  %6385 = vmatmul.mubr.f32.gmra.mrb[222].mxu1 %v2070_v16 }
 0x308   :  { %v1116_v2 = vpop.f32.mrb[194].mxu0 }
 0x309   :  { %v2071_v42 = vmax.f32 %v1817_v5, 0.0  ;;  %v1117_v36 = vadd.f32 %v8700_v33, %v1116_v2  ;;  %v1118_v26 = vpop.f32.mrb[195].mxu0 }
 0x30a   :  { %v8905_v51 = vpop.f32.mrb[170].mxu1  ;;  %v10050_v26 = vld [vmem:[#allocation29_spill] sm:$0xff] }
 0x30b   :  { %v1822_v0 = vadd.f32 %v10048_v56, %v1117_v36  ;;  %v8908_v7 = vpop.f32.mrb[171].mxu1  ;;  %6387 = vmatprep.mubr.f32.mxu1 %v2071_v42 }
 0x30c   :  { %v1121_v31 = vpop.f32.mrb[196].mxu0 }
 0x30d   :  { %v2072_v43 = vmax.f32 %v1822_v0, 0.0  ;;  %v1122_v50 = vadd.f32 %v8700_v33, %v1121_v31  ;;  %v1123_v58 = vpop.f32.mrb[197].mxu0 }
 0x30f   :  { %v1827_v16 = vadd.f32 %v8647_v61, %v1122_v50  ;;  %6388 = vmatmul.mubr.f32.gmra.mrb[224].mxu1 %v2072_v43 }
 0x310   :  { %v1126_v21 = vpop.f32.mrb[198].mxu0 }
 0x311   :  { %v2073_v32 = vmax.f32 %v1827_v16, 0.0  ;;  %v1127_v5 = vadd.f32 %v8700_v33, %v1126_v21  ;;  %v1128_v40 = vpop.f32.mrb[199].mxu0 }
 0x312   :  { %v8913_v2 = vpop.f32.mrb[172].mxu1 }
 0x313   :  { %10049 = vst [vmem:[#allocation55_spill] sm:$0xff] %v8913_v2  ;;  %v1832_v36 = vadd.f32 %v10050_v26, %v1127_v5  ;;  %v8916_v56 = vpop.f32.mrb[173].mxu1  ;;  %6390 = vmatprep.mubr.f32.mxu1 %v2073_v32  ;;  %v10052_v2 = vld [vmem:[#allocation28_spill] sm:$0xff] }
 0x314   :  { %v1131_v42 = vpop.f32.mrb[200].mxu0 }
 0x315   :  { %v2074_v0 = vmax.f32 %v1832_v36, 0.0  ;;  %v1132_v31 = vadd.f32 %v8700_v33, %v1131_v42  ;;  %v1133_v58 = vpop.f32.mrb[201].mxu0 }
 0x317   :  { %v1837_v61 = vadd.f32 %v8653_v46, %v1132_v31  ;;  %6391 = vmatmul.mubr.f32.gmra.mrb[226].mxu1 %v2074_v0 }
 0x318   :  { %v1136_v43 = vpop.f32.mrb[202].mxu0 }
 0x319   :  { %v2075_v50 = vmax.f32 %v1837_v61, 0.0  ;;  %v1137_v16 = vadd.f32 %v8700_v33, %v1136_v43  ;;  %v1138_v21 = vpop.f32.mrb[203].mxu0 }
 0x31a   :  { %v8921_v40 = vpop.f32.mrb[174].mxu1 }
 0x31b   :  { %10051 = vst [vmem:[#allocation54_spill] sm:$0xff] %v8921_v40  ;;  %v1842_v5 = vadd.f32 %v10052_v2, %v1137_v16  ;;  %v8924_v26 = vpop.f32.mrb[175].mxu1  ;;  %6393 = vmatprep.mubr.f32.mxu1 %v2075_v50  ;;  %v10055_v40 = vld [vmem:[#allocation31_spill] sm:$0xff] }
 0x31c   :  { %10053 = vst [vmem:[#allocation57_spill] sm:$0xff] %v8924_v26  ;;  %v1141_v32 = vpop.f32.mrb[204].mxu0  ;;  %v3821_v26 = vld [vmem:[#allocation12 + $0x30] sm:$0xff] }
 0x31d   :  { %v2076_v36 = vmax.f32 %v1842_v5, 0.0  ;;  %v1142_v42 = vadd.f32 %v8700_v33, %v1141_v32  ;;  %v1143_v58 = vpop.f32.mrb[205].mxu0 }
 0x31f   :  { %v1847_v46 = vadd.f32 %v8659_v38, %v1142_v42  ;;  %6394 = vmatmul.mubr.f32.gmra.mrb[228].mxu1 %v2076_v36  ;;  %v3822_v38 = vld [vmem:[#allocation12 + $0x38] sm:$0xff] }
 0x320   :  { %v1146_v0 = vpop.f32.mrb[206].mxu0  ;;  %v7039_v42 = vpack.c.bf16 %v3822_v38, %v3821_v26 }
 0x321   :  { %v2077_v31 = vmax.f32 %v1847_v46, 0.0  ;;  %v1147_v61 = vadd.f32 %v8700_v33, %v1146_v0  ;;  %v1148_v43 = vpop.f32.mrb[207].mxu0 }
 0x322   :  { %v8929_v21 = vpop.f32.mrb[176].mxu1  ;;  %7040 = vmatprep.subr.bf16.mxu0 %v7039_v42 }
 0x323   :  { %10054 = vst [vmem:[#allocation56_spill] sm:$0xff] %v8929_v21  ;;  %v1852_v2 = vadd.f32 %v10055_v40, %v1147_v61  ;;  %v8932_v16 = vpop.f32.mrb[177].mxu1  ;;  %6396 = vmatprep.mubr.f32.mxu1 %v2077_v31  ;;  %7042 = vmatpush3.bf16.msra.mxu0 %v7039_v42  ;;  %v10056_v31 = vld [vmem:[#allocation30_spill] sm:$0xff] }
 0x324   :  { %v1151_v50 = vpop.f32.mrb[208].mxu0 }
 0x325   :  { %v2078_v5 = vmax.f32 %v1852_v2, 0.0  ;;  %v1152_v32 = vadd.f32 %v8700_v33, %v1151_v50  ;;  %v1153_v58 = vpop.f32.mrb[209].mxu0 }
 0x327   :  { %v1857_v36 = vadd.f32 %v8665_v22, %v1152_v32  ;;  %6397 = vmatmul.mubr.f32.gmra.mrb[230].mxu1 %v2078_v5 }
 0x328   :  { %v1156_v46 = vpop.f32.mrb[210].mxu0 }
 0x329   :  { %v2079_v0 = vmax.f32 %v1857_v36, 0.0  ;;  %v1157_v43 = vadd.f32 %v8700_v33, %v1156_v46  ;;  %v1158_v21 = vpop.f32.mrb[211].mxu0 }
 0x32a   :  { %v8937_v40 = vpop.f32.mrb[178].mxu1  ;;  %v8947_v21 = vld [vmem:[%s9859_s3] ss:$0 sm:$0xff] }
 0x32b   :  { %v1862_v61 = vadd.f32 %v10056_v31, %v1157_v43  ;;  %v8940_v2 = vpop.f32.mrb[179].mxu1  ;;  %6399 = vmatprep.mubr.f32.mxu1 %v2079_v0  ;;  %v10058_v0 = vld [vmem:[#allocation32_spill] sm:$0xff] }
 0x32c   :  { %v1161_v50 = vpop.f32.mrb[212].mxu0 }
 0x32d   :  { %v2080_v58 = vmax.f32 %v1862_v61, 0.0  ;;  %v1162_v22 = vadd.f32 %v8700_v33, %v1161_v50  ;;  %v1163_v5 = vpop.f32.mrb[213].mxu0 }
 0x32f   :  { %v1867_v26 = vadd.f32 %v8671_v49, %v1162_v22  ;;  %6400 = vmatmul.mubr.f32.gmra.mrb[232].mxu1 %v2080_v58 }
 0x330   :  { %v1166_v32 = vpop.f32.mrb[214].mxu0 }
 0x331   :  { %v2081_v38 = vmax.f32 %v1867_v26, 0.0  ;;  %v1167_v36 = vadd.f32 %v8947_v21, %v1166_v32  ;;  %v1168_v42 = vpop.f32.mrb[215].mxu0 }
 0x332   :  { %v8950_v46 = vpop.f32.mrb[180].mxu1 }
 0x333   :  { %10057 = vst [vmem:[#allocation58_spill] sm:$0xff] %v8950_v46  ;;  %v1872_v43 = vadd.f32 %v10058_v0, %v1167_v36  ;;  %v8953_v31 = vpop.f32.mrb[181].mxu1  ;;  %6402 = vmatprep.mubr.f32.mxu1 %v2081_v38  ;;  %v10060_v46 = vld [vmem:[#allocation34_spill] sm:$0xff] }
 0x334   :  { %v1171_v33 = vpop.f32.mrb[216].mxu0 }
 0x335   :  { %v2082_v49 = vmax.f32 %v1872_v43, 0.0  ;;  %v1172_v61 = vadd.f32 %v8947_v21, %v1171_v33  ;;  %v1173_v50 = vpop.f32.mrb[217].mxu0 }
 0x337   :  { %v1877_v58 = vadd.f32 %v8677_v44, %v1172_v61  ;;  %6403 = vmatmul.mubr.f32.gmra.mrb[234].mxu1 %v2082_v49 }
 0x338   :  { %v1176_v22 = vpop.f32.mrb[218].mxu0 }
 0x339   :  { %v2083_v5 = vmax.f32 %v1877_v58, 0.0  ;;  %v1177_v26 = vadd.f32 %v8947_v21, %v1176_v22  ;;  %v1178_v32 = vpop.f32.mrb[219].mxu0 }
 0x33a   :  { %v8958_v42 = vpop.f32.mrb[182].mxu1 }
 0x33b   :  { %10059 = vst [vmem:[#allocation60_spill] sm:$0xff] %v8958_v42  ;;  %v1882_v36 = vadd.f32 %v10060_v46, %v1177_v26  ;;  %v8961_v0 = vpop.f32.mrb[183].mxu1  ;;  %6405 = vmatprep.mubr.f32.mxu1 %v2083_v5  ;;  %v10062_v42 = vld [vmem:[#allocation33_spill] sm:$0xff] }
 0x33c   :  { %v1181_v38 = vpop.f32.mrb[220].mxu0 }
 0x33d   :  { %v2084_v43 = vmax.f32 %v1882_v36, 0.0  ;;  %v1182_v33 = vadd.f32 %v8947_v21, %v1181_v38  ;;  %v1183_v50 = vpop.f32.mrb[221].mxu0 }
 0x33f   :  { %v1887_v44 = vadd.f32 %v8683_v12, %v1182_v33  ;;  %6406 = vmatmul.mubr.f32.gmra.mrb[236].mxu1 %v2084_v43 }
 0x340   :  { %v1186_v49 = vpop.f32.mrb[222].mxu0 }
 0x341   :  { %v2085_v61 = vmax.f32 %v1887_v44, 0.0  ;;  %v1187_v58 = vadd.f32 %v8947_v21, %v1186_v49  ;;  %v1188_v22 = vpop.f32.mrb[223].mxu0 }
 0x342   :  { %v8966_v32 = vpop.f32.mrb[184].mxu1 }
 0x343   :  { %10061 = vst [vmem:[#allocation59_spill] sm:$0xff] %v8966_v32  ;;  %v1892_v46 = vadd.f32 %v10062_v42, %v1187_v58  ;;  %v8969_v26 = vpop.f32.mrb[185].mxu1  ;;  %6408 = vmatprep.mubr.f32.mxu1 %v2085_v61  ;;  %v10064_v32 = vld [vmem:[#allocation35_spill] sm:$0xff] }
 0x344   :  { %v1191_v5 = vpop.f32.mrb[224].mxu0 }
 0x345   :  { %v2086_v36 = vmax.f32 %v1892_v46, 0.0  ;;  %v1192_v38 = vadd.f32 %v8947_v21, %v1191_v5  ;;  %v1193_v50 = vpop.f32.mrb[225].mxu0 }
 0x347   :  { %v1897_v12 = vadd.f32 %v8689_v27, %v1192_v38  ;;  %6409 = vmatmul.mubr.f32.gmra.mrb[238].mxu1 %v2086_v36 }
 0x348   :  { %v1196_v43 = vpop.f32.mrb[226].mxu0 }
 0x349   :  { %v2087_v33 = vmax.f32 %v1897_v12, 0.0  ;;  %v1197_v44 = vadd.f32 %v8947_v21, %v1196_v43  ;;  %v1198_v49 = vpop.f32.mrb[227].mxu0 }
 0x34a   :  { %v8974_v22 = vpop.f32.mrb[186].mxu1 }
 0x34b   :  { %10063 = vst [vmem:[#allocation62_spill] sm:$0xff] %v8974_v22  ;;  %v1902_v42 = vadd.f32 %v8686_v10, %v1197_v44  ;;  %v8977_v58 = vpop.f32.mrb[187].mxu1  ;;  %6411 = vmatprep.mubr.f32.mxu1 %v2087_v33  ;;  %v10066_v22 = vld [vmem:[#allocation36_spill] sm:$0xff] }
 0x34c   :  { %v1201_v61 = vpop.f32.mrb[228].mxu0 }
 0x34d   :  { %v2088_v46 = vmax.f32 %v1902_v42, 0.0  ;;  %v1202_v5 = vadd.f32 %v8947_v21, %v1201_v61  ;;  %v1203_v50 = vpop.f32.mrb[229].mxu0 }
 0x34f   :  { %v1907_v27 = vadd.f32 %v10064_v32, %v1202_v5  ;;  %6412 = vmatmul.mubr.f32.gmra.mrb[240].mxu1 %v2088_v46 }
 0x350   :  { %v1206_v36 = vpop.f32.mrb[230].mxu0 }
 0x351   :  { %v2089_v38 = vmax.f32 %v1907_v27, 0.0  ;;  %v1207_v12 = vadd.f32 %v8947_v21, %v1206_v36  ;;  %v1208_v43 = vpop.f32.mrb[231].mxu0 }
 0x352   :  { %v8982_v49 = vpop.f32.mrb[188].mxu1 }
 0x353   :  { %10065 = vst [vmem:[#allocation61_spill] sm:$0xff] %v8982_v49  ;;  %v1912_v10 = vadd.f32 %v10066_v22, %v1207_v12  ;;  %v8985_v44 = vpop.f32.mrb[189].mxu1  ;;  %6414 = vmatprep.mubr.f32.mxu1 %v2089_v38  ;;  %v10068_v49 = vld [vmem:[#allocation38_spill] sm:$0xff] }
 0x354   :  { %v1211_v33 = vpop.f32.mrb[232].mxu0 }
 0x355   :  { %v2090_v42 = vmax.f32 %v1912_v10, 0.0  ;;  %v1212_v61 = vadd.f32 %v8947_v21, %v1211_v33  ;;  %v1213_v50 = vpop.f32.mrb[233].mxu0 }
 0x357   :  { %v1917_v32 = vadd.f32 %v8706_v62, %v1212_v61  ;;  %6415 = vmatmul.mubr.f32.gmra.mrb[242].mxu1 %v2090_v42 }
 0x358   :  { %v1216_v46 = vpop.f32.mrb[234].mxu0 }
 0x359   :  { %v2091_v5 = vmax.f32 %v1917_v32, 0.0  ;;  %v1217_v27 = vadd.f32 %v8947_v21, %v1216_v46  ;;  %v1218_v36 = vpop.f32.mrb[235].mxu0 }
 0x35a   :  { %v8990_v43 = vpop.f32.mrb[190].mxu1 }
 0x35b   :  { %10067 = vst [vmem:[#allocation64_spill] sm:$0xff] %v8990_v43  ;;  %v1922_v22 = vadd.f32 %v10068_v49, %v1217_v27  ;;  %v8993_v12 = vpop.f32.mrb[191].mxu1  ;;  %6417 = vmatprep.mubr.f32.mxu1 %v2091_v5  ;;  %v10071_v43 = vld [vmem:[#allocation37_spill] sm:$0xff] }
 0x35c   :  { %10069 = vst [vmem:[#allocation63_spill] sm:$0xff] %v8993_v12  ;;  %v1221_v38 = vpop.f32.mrb[236].mxu0  ;;  %v3823_v12 = vld [vmem:[#allocation12 + $0x40] sm:$0xff] }
 0x35d   :  { %v2092_v10 = vmax.f32 %v1922_v22, 0.0  ;;  %v1222_v33 = vadd.f32 %v8947_v21, %v1221_v38  ;;  %v1223_v50 = vpop.f32.mrb[237].mxu0 }
 0x35f   :  { %v1927_v62 = vadd.f32 %v8712_v6, %v1222_v33  ;;  %6418 = vmatmul.mubr.f32.gmra.mrb[244].mxu1 %v2092_v10  ;;  %v3824_v6 = vld [vmem:[#allocation12 + $0x48] sm:$0xff] }
 0x360   :  { %v1226_v42 = vpop.f32.mrb[238].mxu0  ;;  %v7043_v33 = vpack.c.bf16 %v3824_v6, %v3823_v12 }
 0x361   :  { %v2093_v61 = vmax.f32 %v1927_v62, 0.0  ;;  %v1227_v32 = vadd.f32 %v8947_v21, %v1226_v42  ;;  %v1228_v46 = vpop.f32.mrb[239].mxu0 }
 0x362   :  { %v8998_v36 = vpop.f32.mrb[192].mxu1  ;;  %7044 = vmatprep.subr.bf16.mxu0 %v7043_v33 }
 0x363   :  { %10070 = vst [vmem:[#allocation65_spill] sm:$0xff] %v8998_v36  ;;  %v1932_v49 = vadd.f32 %v10071_v43, %v1227_v32  ;;  %v9001_v27 = vpop.f32.mrb[193].mxu1  ;;  %6420 = vmatprep.mubr.f32.mxu1 %v2093_v61  ;;  %7046 = vmatpush3.bf16.msra.mxu0 %v7043_v33  ;;  %v10072_v61 = vld [vmem:[#allocation40_spill] sm:$0xff]  ;;  %v10074_v33 = vld [vmem:[#allocation39_spill] sm:$0xff] }
 0x364   :  { %v1231_v5 = vpop.f32.mrb[240].mxu0 }
 0x365   :  { %v2094_v22 = vmax.f32 %v1932_v49, 0.0  ;;  %v1232_v38 = vadd.f32 %v8947_v21, %v1231_v5  ;;  %v1233_v50 = vpop.f32.mrb[241].mxu0 }
 0x367   :  { %v1937_v10 = vadd.f32 %v8718_v20, %v1232_v38  ;;  %6421 = vmatmul.mubr.f32.gmra.mrb[246].mxu1 %v2094_v22 }
 0x368   :  { %v1236_v62 = vpop.f32.mrb[242].mxu0 }
 0x369   :  { %v2095_v42 = vmax.f32 %v1937_v10, 0.0  ;;  %v1237_v46 = vadd.f32 %v8947_v21, %v1236_v62  ;;  %v1238_v36 = vpop.f32.mrb[243].mxu0 }
 0x36a   :  { %v9006_v43 = vpop.f32.mrb[194].mxu1 }
 0x36b   :  { %v1942_v32 = vadd.f32 %v10072_v61, %v1237_v46  ;;  %v9009_v49 = vpop.f32.mrb[195].mxu1  ;;  %6423 = vmatprep.mubr.f32.mxu1 %v2095_v42 }
 0x36c   :  { %v1241_v5 = vpop.f32.mrb[244].mxu0 }
 0x36d   :  { %v2096_v50 = vmax.f32 %v1942_v32, 0.0  ;;  %v1242_v20 = vadd.f32 %v8947_v21, %v1241_v5  ;;  %v1243_v22 = vpop.f32.mrb[245].mxu0 }
 0x36f   :  { %v1947_v12 = vadd.f32 %v8724_v24, %v1242_v20  ;;  %6424 = vmatmul.mubr.f32.gmra.mrb[248].mxu1 %v2096_v50 }
 0x370   :  { %v1246_v38 = vpop.f32.mrb[246].mxu0 }
 0x371   :  { %v2097_v6 = vmax.f32 %v1947_v12, 0.0  ;;  %v1247_v36 = vadd.f32 %v8947_v21, %v1246_v38  ;;  %v1248_v10 = vpop.f32.mrb[247].mxu0 }
 0x372   :  { %v9014_v62 = vpop.f32.mrb[196].mxu1 }
 0x373   :  { %10073 = vst [vmem:[#allocation21_spill] sm:$0xff] %v9014_v62  ;;  %v1952_v46 = vadd.f32 %v10074_v33, %v1247_v36  ;;  %v9017_v61 = vpop.f32.mrb[197].mxu1  ;;  %6426 = vmatprep.mubr.f32.mxu1 %v2097_v6  ;;  %v10076_v62 = vld [vmem:[#allocation42_spill] sm:$0xff] }
 0x374   :  { %v1251_v42 = vpop.f32.mrb[248].mxu0 }
 0x375   :  { %v2098_v32 = vmax.f32 %v1952_v46, 0.0  ;;  %v1252_v5 = vadd.f32 %v8947_v21, %v1251_v42  ;;  %v1253_v22 = vpop.f32.mrb[249].mxu0 }
 0x377   :  { %v1957_v24 = vadd.f32 %v8729_v23, %v1252_v5  ;;  %6427 = vmatmul.mubr.f32.gmra.mrb[250].mxu1 %v2098_v32  ;;  %v9031_v23 = vld [vmem:[%s9861_s5] ss:$0 sm:$0xff]  ;;  %v10078_v32 = vld [vmem:[#allocation44_spill] sm:$0xff] }
 0x378   :  { %v1256_v50 = vpop.f32.mrb[250].mxu0 }
 0x379   :  { %v2099_v20 = vmax.f32 %v1957_v24, 0.0  ;;  %v1257_v12 = vadd.f32 %v8947_v21, %v1256_v50  ;;  %v1258_v38 = vpop.f32.mrb[251].mxu0 }
 0x37a   :  { %v9022_v10 = vpop.f32.mrb[198].mxu1 }
 0x37b   :  { %10075 = vst [vmem:[#allocation20_spill] sm:$0xff] %v9022_v10  ;;  %v1962_v36 = vadd.f32 %v10076_v62, %v1257_v12  ;;  %v9025_v33 = vpop.f32.mrb[199].mxu1  ;;  %6429 = vmatprep.mubr.f32.mxu1 %v2099_v20  ;;  %v2193_v20 = vadd.f32 %v9031_v23, %v8741_v45  ;;  %v10080_v10 = vld [vmem:[#allocation43_spill] sm:$0xff]  ;;  %v10081_v45 = vld [vmem:[#allocation46_spill] sm:$0xff] }
 0x37c   :  { %10077 = vst [vmem:[#allocation23_spill] sm:$0xff] %v9025_v33  ;;  %v1261_v6 = vpop.f32.mrb[252].mxu0  ;;  %v2198_v33 = vadd.f32 %v10080_v10, %v9031_v23 }
 0x37d   :  { %v2100_v46 = vmax.f32 %v1962_v36, 0.0  ;;  %v1262_v42 = vadd.f32 %v8947_v21, %v1261_v6  ;;  %v1263_v22 = vpop.f32.mrb[253].mxu0  ;;  %v10079_v36 = vld [vmem:[#allocation41_spill] sm:$0xff] }
 0x37f   :  { %v1967_v5 = vadd.f32 %v10078_v32, %v1262_v42  ;;  %6430 = vmatmul.mubr.f32.gmra.mrb[252].mxu1 %v2100_v46  ;;  %v2203_v46 = vadd.f32 %v9031_v23, %v8747_v63  ;;  %v2831_v32 = vmax.f32 %v2193_v20, 0.0  ;;  %v2218_v63 = vadd.f32 %v8753_v37, %v9031_v23 }
 0x380   :  { %v1266_v24 = vpop.f32.mrb[254].mxu0 }
 0x381   :  { %v2101_v50 = vmax.f32 %v1967_v5, 0.0  ;;  %v1267_v62 = vadd.f32 %v8947_v21, %v1266_v24  ;;  %v1268_v12 = vpop.f32.mrb[255].mxu0  ;;  %v2832_v21 = vmax.f32 %v2198_v33, 0.0  ;;  %v2208_v5 = vadd.f32 %v10081_v45, %v9031_v23 }
 0x382   :  { %v9037_v38 = vpop.f32.mrb[200].mxu1  ;;  %v2213_v24 = vadd.f32 %v9031_v23, %v8755_v48  ;;  %v2223_v33 = vadd.f32 %v9031_v23, %v8763_v30  ;;  %v2228_v48 = vadd.f32 %v8761_v3, %v9031_v23  ;;  %v2238_v30 = vadd.f32 %v8769_v52, %v9031_v23 }
 0x383   :  { %v1972_v6 = vadd.f32 %v10079_v36, %v1267_v62  ;;  %v9040_v22 = vpop.f32.mrb[201].mxu1  ;;  %6432 = vmatprep.mubr.f32.mxu1 %v2101_v50  ;;  %v2833_v50 = vmax.f32 %v2203_v46, 0.0  ;;  %v2834_v10 = vmax.f32 %v2208_v5, 0.0  ;;  %v2836_v36 = vmax.f32 %v2218_v63, 0.0  ;;  %v10082_v5 = vld [vmem:[#allocation45_spill] sm:$0xff] }
 0x384   :  { %v2835_v20 = vmax.f32 %v2213_v24, 0.0  ;;  %v2838_v37 = vmax.f32 %v2228_v48, 0.0  ;;  %v2243_v45 = vadd.f32 %v9031_v23, %v8779_v34  ;;  %v2840_v3 = vmax.f32 %v2238_v30, 0.0 }
 0x385   :  { %v2102_v42 = vmax.f32 %v1972_v6, 0.0  ;;  %v2837_v6 = vmax.f32 %v2223_v33, 0.0  ;;  %v2258_v34 = vadd.f32 %v8785_v55, %v9031_v23  ;;  %v2263_v33 = vadd.f32 %v9031_v23, %v8796_v11 }
 0x386   :  { %v2841_v24 = vmax.f32 %v2243_v45, 0.0  ;;  %v2278_v11 = vadd.f32 %v8801_v57, %v9031_v23  ;;  %v3825_v45 = vld [vmem:[#allocation12 + $0x50] sm:$0xff] }
 0x387   :  { %6433 = vmatmul.mubr.f32.gmra.mrb[254].mxu1 %v2102_v42  ;;  %v2233_v42 = vadd.f32 %v9031_v23, %v8771_v17  ;;  %v2248_v17 = vadd.f32 %v10082_v5, %v9031_v23  ;;  %v2845_v48 = vmax.f32 %v2263_v33, 0.0  ;;  %v2288_v5 = vadd.f32 %v8809_v54, %v9031_v23 }
 0x388   :  { %6467 = vmatprep.mubr.f32.mxu1 %v2831_v32  ;;  %v2303_v54 = vadd.f32 %v9031_v23, %v8828_v28  ;;  %v2318_v28 = vadd.f32 %v8833_v29, %v9031_v23 }
 0x389   :  { %v2842_v52 = vmax.f32 %v2248_v17, 0.0 }
 0x38a   :  { %v9050_v62 = vpop.f32.mrb[202].mxu1  ;;  %v2853_v33 = vmax.f32 %v2303_v54, 0.0  ;;  %v10086_v54 = vld [vmem:[#allocation50_spill] sm:$0xff] }
 0x38b   :  { %v9052_v12 = vpop.f32.mrb[203].mxu1  ;;  %6468 = vmatmul.mubr.f32.vlgmr.msra.gmra.mrb[0].mxu1 %v2832_v21  ;;  %v2839_v21 = vmax.f32 %v2233_v42, 0.0 }
 0x38c   :  { %6470 = vmatprep.mubr.f32.mxu1 %v2833_v50  ;;  %v2253_v50 = vadd.f32 %v9031_v23, %v8788_v9  ;;  %v2268_v9 = vadd.f32 %v8793_v25, %v9031_v23  ;;  %v3826_v25 = vld [vmem:[#allocation12 + $0x58] sm:$0xff] }
 0x38e   :  { %v2846_v55 = vmax.f32 %v2268_v9, 0.0 }
 0x38f   :  { %6471 = vmatmul.mubr.f32.gmra.mrb[2].mxu1 %v2834_v10 }
 0x390   :  { %6473 = vmatprep.mubr.f32.mxu1 %v2835_v20  ;;  %v2843_v20 = vmax.f32 %v2253_v50, 0.0 }
 0x392   :  { %v9062_v46 = vpop.f32.mrb[204].mxu1 }
 0x393   :  { %v9064_v32 = vpop.f32.mrb[205].mxu1  ;;  %6474 = vmatmul.mubr.f32.gmra.mrb[4].mxu1 %v2836_v36  ;;  %v2844_v36 = vmax.f32 %v2258_v34, 0.0 }
 0x394   :  { %6476 = vmatprep.mubr.f32.mxu1 %v2837_v6  ;;  %v2273_v6 = vadd.f32 %v9031_v23, %v8804_v39  ;;  %v2848_v39 = vmax.f32 %v2278_v11, 0.0 }
 0x396   :  { %v2847_v30 = vmax.f32 %v2273_v6, 0.0 }
 0x397   :  { %6477 = vmatmul.mubr.f32.gmra.mrb[6].mxu1 %v2838_v37 }
 0x398   :  { %6479 = vmatprep.mubr.f32.mxu1 %v2839_v21  ;;  %v2283_v21 = vadd.f32 %v9031_v23, %v8812_v41  ;;  %v2850_v41 = vmax.f32 %v2288_v5, 0.0  ;;  %v10084_v5 = vld [vmem:[#allocation48_spill] sm:$0xff] }
 0x39a   :  { %v9074_v10 = vpop.f32.mrb[206].mxu1  ;;  %v2849_v17 = vmax.f32 %v2283_v21, 0.0 }
 0x39b   :  { %v9076_v63 = vpop.f32.mrb[207].mxu1  ;;  %6480 = vmatmul.mubr.f32.gmra.mrb[8].mxu1 %v2840_v3  ;;  %v7047_v3 = vpack.c.bf16 %v3826_v25, %v3825_v45 }
 0x39c   :  { %6482 = vmatprep.mubr.f32.mxu1 %v2841_v24  ;;  %v2293_v24 = vadd.f32 %v9031_v23, %v8820_v13  ;;  %v2308_v13 = vadd.f32 %v8825_v59, %v9031_v23  ;;  %v2856_v59 = vmax.f32 %v2318_v28, 0.0 }
 0x39d   :  { %7048 = vmatprep.subr.bf16.mxu0 %v7047_v3 }
 0x39e   :  { %7050 = vmatpush3.bf16.msra.mxu0 %v7047_v3  ;;  %v2851_v34 = vmax.f32 %v2293_v24, 0.0  ;;  %v10083_v3 = vld [vmem:[#allocation47_spill] sm:$0xff]  ;;  %v10085_v24 = vld [vmem:[#allocation49_spill] sm:$0xff] }
 0x39f   :  { %6483 = vmatmul.mubr.f32.gmra.mrb[10].mxu1 %v2842_v52  ;;  %v2298_v52 = vadd.f32 %v8817_v35, %v9031_v23  ;;  %v2854_v35 = vmax.f32 %v2308_v13, 0.0 }
 0x3a0   :  { %6485 = vmatprep.mubr.f32.mxu1 %v2843_v20 }
 0x3a1   :  { %v2852_v20 = vmax.f32 %v2298_v52, 0.0 }
 0x3a2   :  { %v9086_v42 = vpop.f32.mrb[208].mxu1 }
 0x3a3   :  { %v9088_v37 = vpop.f32.mrb[209].mxu1  ;;  %6486 = vmatmul.mubr.f32.gmra.mrb[12].mxu1 %v2844_v36  ;;  %v2313_v36 = vadd.f32 %v9031_v23, %v8836_v18  ;;  %v2328_v18 = vadd.f32 %v8841_v14, %v9031_v23 }
 0x3a4   :  { %6488 = vmatprep.mubr.f32.mxu1 %v2845_v48 }
 0x3a5   :  { %v2855_v6 = vmax.f32 %v2313_v36, 0.0  ;;  %v2858_v29 = vmax.f32 %v2328_v18, 0.0 }
 0x3a7   :  { %6489 = vmatmul.mubr.f32.gmra.mrb[14].mxu1 %v2846_v55  ;;  %v2323_v55 = vadd.f32 %v9031_v23, %v8844_v1  ;;  %v2338_v1 = vadd.f32 %v8849_v53, %v9031_v23 }
 0x3a8   :  { %6491 = vmatprep.mubr.f32.mxu1 %v2847_v30  ;;  %v2333_v30 = vadd.f32 %v9031_v23, %v8852_v8  ;;  %v2348_v8 = vadd.f32 %v10084_v5, %v9031_v23 }
 0x3a9   :  { %v2857_v11 = vmax.f32 %v2323_v55, 0.0  ;;  %v2860_v14 = vmax.f32 %v2338_v1, 0.0  ;;  %v2383_v1 = vadd.f32 %v9031_v23, %v8892_v47  ;;  %v2398_v47 = vadd.f32 %v8897_v60, %v9031_v23  ;;  %v3827_v60 = vld [vmem:[#allocation12 + $0x60] sm:$0xff] }
 0x3aa   :  { %v9098_v50 = vpop.f32.mrb[210].mxu1  ;;  %v2859_v25 = vmax.f32 %v2333_v30, 0.0  ;;  %v2862_v53 = vmax.f32 %v2348_v8, 0.0  ;;  %v10088_v30 = vld [vmem:[#allocation52_spill] sm:$0xff] }
 0x3ab   :  { %v9100_v57 = vpop.f32.mrb[211].mxu1  ;;  %6492 = vmatmul.mubr.f32.gmra.mrb[16].mxu1 %v2848_v39  ;;  %v2343_v39 = vadd.f32 %v9031_v23, %v10083_v3 }
 0x3ac   :  { %6494 = vmatprep.mubr.f32.mxu1 %v2849_v17 }
 0x3ad   :  { %v2861_v17 = vmax.f32 %v2343_v39, 0.0  ;;  %v2869_v39 = vmax.f32 %v2383_v1, 0.0  ;;  %v10092_v1 = vld [vmem:[#allocation54_spill] sm:$0xff] }
 0x3af   :  { %6495 = vmatmul.mubr.f32.gmra.mrb[18].mxu1 %v2850_v41  ;;  %v2353_v41 = vadd.f32 %v9031_v23, %v10085_v24 }
 0x3b0   :  { %6497 = vmatprep.mubr.f32.mxu1 %v2851_v34 }
 0x3b1   :  { %v2863_v13 = vmax.f32 %v2353_v41, 0.0  ;;  %v2403_v41 = vadd.f32 %v9031_v23, %v8908_v7 }
 0x3b2   :  { %v9110_v9 = vpop.f32.mrb[212].mxu1 }
 0x3b3   :  { %v9112_v48 = vpop.f32.mrb[213].mxu1  ;;  %6498 = vmatmul.mubr.f32.gmra.mrb[20].mxu1 %v2852_v20  ;;  %v2358_v20 = vadd.f32 %v10086_v54, %v9031_v23  ;;  %v2873_v54 = vmax.f32 %v2403_v41, 0.0 }
 0x3b4   :  { %6500 = vmatprep.mubr.f32.mxu1 %v2853_v33  ;;  %v2363_v33 = vadd.f32 %v9031_v23, %v8876_v15  ;;  %v2378_v15 = vadd.f32 %v10088_v30, %v9031_v23  ;;  %v3830_v30 = vld [vmem:[#allocation12 + $0x78] sm:$0xff] }
 0x3b5   :  { %v2864_v36 = vmax.f32 %v2358_v20, 0.0  ;;  %v2413_v20 = vadd.f32 %v9031_v23, %v8916_v56  ;;  %v3829_v56 = vld [vmem:[#allocation12 + $0x70] sm:$0xff] }
 0x3b6   :  { %v2865_v28 = vmax.f32 %v2363_v33, 0.0 }
 0x3b7   :  { %6501 = vmatmul.mubr.f32.gmra.mrb[22].mxu1 %v2854_v35  ;;  %v2368_v35 = vadd.f32 %v8873_v19, %v9031_v23  ;;  %v2868_v19 = vmax.f32 %v2378_v15, 0.0  ;;  %v7055_v15 = vpack.c.bf16 %v3830_v30, %v3829_v56 }
 0x3b8   :  { %6503 = vmatprep.mubr.f32.mxu1 %v2855_v6  ;;  %v10087_v6 = vld [vmem:[#allocation51_spill] sm:$0xff] }
 0x3b9   :  { %v2373_v55 = vadd.f32 %v9031_v23, %v10087_v6 }
 0x3ba   :  { %v9122_v21 = vpop.f32.mrb[214].mxu1 }
 0x3bb   :  { %v9124_v45 = vpop.f32.mrb[215].mxu1  ;;  %6504 = vmatmul.mubr.f32.gmra.mrb[24].mxu1 %v2856_v59 }
 0x3bc   :  { %6506 = vmatprep.mubr.f32.mxu1 %v2857_v11  ;;  %v2866_v11 = vmax.f32 %v2368_v35, 0.0 }
 0x3bf   :  { %6507 = vmatmul.mubr.f32.gmra.mrb[26].mxu1 %v2858_v29  ;;  %v2867_v29 = vmax.f32 %v2373_v55, 0.0  ;;  %v2875_v55 = vmax.f32 %v2413_v20, 0.0  ;;  %v2453_v20 = vadd.f32 %v9031_v23, %v8953_v31 }
 0x3c0   :  { %6509 = vmatprep.mubr.f32.mxu1 %v2859_v25  ;;  %v10089_v25 = vld [vmem:[#allocation53_spill] sm:$0xff] }
 0x3c1   :  { %v2388_v3 = vadd.f32 %v10089_v25, %v9031_v23 }
 0x3c2   :  { %v9134_v52 = vpop.f32.mrb[216].mxu1 }
 0x3c3   :  { %v9136_v34 = vpop.f32.mrb[217].mxu1  ;;  %6510 = vmatmul.mubr.f32.gmra.mrb[28].mxu1 %v2860_v14  ;;  %v2393_v14 = vadd.f32 %v9031_v23, %v8900_v4  ;;  %v2408_v4 = vadd.f32 %v8905_v51, %v9031_v23 }
 0x3c4   :  { %6512 = vmatprep.mubr.f32.mxu1 %v2861_v17  ;;  %v2870_v17 = vmax.f32 %v2388_v3, 0.0  ;;  %v2433_v3 = vadd.f32 %v9031_v23, %v8932_v16  ;;  %v2448_v16 = vadd.f32 %v8937_v40, %v9031_v23 }
 0x3c5   :  { %v2871_v24 = vmax.f32 %v2393_v14, 0.0  ;;  %v2874_v7 = vmax.f32 %v2408_v4, 0.0 }
 0x3c6   :  { %v2879_v41 = vmax.f32 %v2433_v3, 0.0  ;;  %v10097_v3 = vld [vmem:[#allocation62_spill] sm:$0xff] }
 0x3c7   :  { %6513 = vmatmul.mubr.f32.gmra.mrb[30].mxu1 %v2862_v53  ;;  %v2872_v53 = vmax.f32 %v2398_v47, 0.0  ;;  %v10093_v47 = vld [vmem:[#allocation56_spill] sm:$0xff] }
 0x3c8   :  { %6515 = vmatprep.mubr.f32.mxu1 %v2863_v13 }
 0x3ca   :  { %v9146_v59 = vpop.f32.mrb[218].mxu1 }
 0x3cb   :  { %v9148_v18 = vpop.f32.mrb[219].mxu1  ;;  %6516 = vmatmul.mubr.f32.gmra.mrb[32].mxu1 %v2864_v36  ;;  %v3828_v36 = vld [vmem:[#allocation12 + $0x68] sm:$0xff] }
 0x3cc   :  { %6518 = vmatprep.mubr.f32.mxu1 %v2865_v28  ;;  %v7051_v35 = vpack.c.bf16 %v3828_v36, %v3827_v60  ;;  %v10090_v28 = vld [vmem:[#allocation55_spill] sm:$0xff] }
 0x3cd   :  { %v2418_v6 = vadd.f32 %v10090_v28, %v9031_v23  ;;  %v2883_v28 = vmax.f32 %v2453_v20, 0.0 }
 0x3ce   :  { %7052 = vmatprep.subr.bf16.mxu0 %v7051_v35 }
 0x3cf   :  { %6519 = vmatmul.mubr.f32.gmra.mrb[34].mxu1 %v2866_v11  ;;  %v10091_v11 = vld [vmem:[#allocation57_spill] sm:$0xff]  ;;  %7054 = vmatpush3.bf16.msra.mxu0 %v7051_v35  ;;  %v2882_v35 = vmax.f32 %v2448_v16, 0.0 }
 0x3d0   :  { %6521 = vmatprep.mubr.f32.mxu1 %v2867_v29  ;;  %v2423_v51 = vadd.f32 %v9031_v23, %v10091_v11  ;;  %v2876_v29 = vmax.f32 %v2418_v6, 0.0  ;;  %7056 = vmatprep.subr.bf16.mxu0 %v7055_v15  ;;  %v2463_v6 = vadd.f32 %v9031_v23, %v8961_v0 }
 0x3d2   :  { %v9158_v5 = vpop.f32.mrb[220].mxu1  ;;  %v2877_v25 = vmax.f32 %v2423_v51, 0.0  ;;  %v2885_v11 = vmax.f32 %v2463_v6, 0.0  ;;  %v2473_v51 = vadd.f32 %v9031_v23, %v8969_v26  ;;  %v2488_v26 = vadd.f32 %v10097_v3, %v9031_v23 }
 0x3d3   :  { %v9160_v8 = vpop.f32.mrb[221].mxu1  ;;  %6522 = vmatmul.mubr.f32.gmra.mrb[36].mxu1 %v2868_v19  ;;  %v2428_v19 = vadd.f32 %v10092_v1, %v9031_v23  ;;  %7058 = vmatpush3.bf16.msra.mxu0 %v7055_v15 }
 0x3d4   :  { %6524 = vmatprep.mubr.f32.mxu1 %v2869_v39  ;;  %v2887_v1 = vmax.f32 %v2473_v51, 0.0 }
 0x3d7   :  { %6525 = vmatmul.mubr.f32.gmra.mrb[38].mxu1 %v2870_v17  ;;  %v2878_v17 = vmax.f32 %v2428_v19, 0.0  ;;  %v2483_v19 = vadd.f32 %v9031_v23, %v8977_v58 }
 0x3d8   :  { %6527 = vmatprep.mubr.f32.mxu1 %v2871_v24  ;;  %v2438_v24 = vadd.f32 %v10093_v47, %v9031_v23  ;;  %v2493_v47 = vadd.f32 %v9031_v23, %v8985_v44 }
 0x3da   :  { %v9170_v13 = vpop.f32.mrb[222].mxu1  ;;  %v2880_v4 = vmax.f32 %v2438_v24, 0.0  ;;  %v2891_v16 = vmax.f32 %v2493_v47, 0.0  ;;  %v10103_v47 = vld [vmem:[#allocation23_spill] sm:$0xff] }
 0x3db   :  { %v9172_v33 = vpop.f32.mrb[223].mxu1  ;;  %6528 = vmatmul.mubr.f32.gmra.mrb[40].mxu1 %v2872_v53  ;;  %v2443_v53 = vadd.f32 %v9031_v23, %v8940_v2 }
 0x3dc   :  { %6530 = vmatprep.mubr.f32.mxu1 %v2873_v54 }
 0x3dd   :  { %v2881_v54 = vmax.f32 %v2443_v53, 0.0  ;;  %v2890_v53 = vmax.f32 %v2488_v26, 0.0  ;;  %v10102_v26 = vld [vmem:[#allocation21_spill] sm:$0xff] }
 0x3df   :  { %6531 = vmatmul.mubr.f32.gmra.mrb[42].mxu1 %v2874_v7  ;;  %v10094_v7 = vld [vmem:[#allocation58_spill] sm:$0xff] }
 0x3e0   :  { %6533 = vmatprep.mubr.f32.mxu1 %v2875_v55  ;;  %v2458_v2 = vadd.f32 %v10094_v7, %v9031_v23  ;;  %v10095_v55 = vld [vmem:[#allocation60_spill] sm:$0xff] }
 0x3e1   :  { %v2468_v31 = vadd.f32 %v10095_v55, %v9031_v23  ;;  %v10100_v7 = vld [vmem:[#allocation64_spill] sm:$0xff] }
 0x3e2   :  { %v9182_v39 = vpop.f32.mrb[224].mxu1  ;;  %v2884_v40 = vmax.f32 %v2458_v2, 0.0  ;;  %v2508_v44 = vadd.f32 %v10100_v7, %v9031_v23  ;;  %v2558_v7 = vadd.f32 %v9037_v38, %v9031_v23 }
 0x3e3   :  { %v9184_v14 = vpop.f32.mrb[225].mxu1  ;;  %6534 = vmatmul.mubr.f32.gmra.mrb[44].mxu1 %v2876_v29  ;;  %v2886_v15 = vmax.f32 %v2468_v31, 0.0  ;;  %v10096_v29 = vld [vmem:[#allocation59_spill] sm:$0xff]  ;;  %v10101_v31 = vld [vmem:[#allocation65_spill] sm:$0xff] }
 0x3e4   :  { %6536 = vmatprep.mubr.f32.mxu1 %v2877_v25  ;;  %v2478_v0 = vadd.f32 %v10096_v29, %v9031_v23  ;;  %v2894_v55 = vmax.f32 %v2508_v44, 0.0 }
 0x3e6   :  { %v2888_v25 = vmax.f32 %v2478_v0, 0.0 }
 0x3e7   :  { %6537 = vmatmul.mubr.f32.gmra.mrb[46].mxu1 %v2878_v17  ;;  %v2889_v17 = vmax.f32 %v2483_v19, 0.0 }
 0x3e8   :  { %6539 = vmatprep.mubr.f32.mxu1 %v2879_v41 }
 0x3ea   :  { %v9194_v60 = vpop.f32.mrb[226].mxu1 }
 0x3eb   :  { %v9196_v36 = vpop.f32.mrb[227].mxu1  ;;  %6540 = vmatmul.mubr.f32.gmra.mrb[48].mxu1 %v2880_v4  ;;  %v10098_v4 = vld [vmem:[#allocation61_spill] sm:$0xff] }
 0x3ec   :  { %6542 = vmatprep.mubr.f32.mxu1 %v2881_v54  ;;  %v2498_v58 = vadd.f32 %v10098_v4, %v9031_v23  ;;  %v10099_v54 = vld [vmem:[#allocation63_spill] sm:$0xff]  ;;  %v10104_v4 = vld [vmem:[#allocation20_spill] sm:$0xff] }
 0x3ed   :  { %v2503_v20 = vadd.f32 %v9031_v23, %v10099_v54 }
 0x3ef   :  { %6543 = vmatmul.mubr.f32.gmra.mrb[50].mxu1 %v2882_v35  ;;  %v2892_v35 = vmax.f32 %v2498_v58, 0.0  ;;  %v2893_v2 = vmax.f32 %v2503_v20, 0.0 }
 0x3f0   :  { %6545 = vmatprep.mubr.f32.mxu1 %v2883_v28  ;;  %v2513_v28 = vadd.f32 %v9031_v23, %v9001_v27  ;;  %v2528_v27 = vadd.f32 %v9006_v43, %v9031_v23 }
 0x3f2   :  { %v9206_v56 = vpop.f32.mrb[228].mxu1  ;;  %v2895_v51 = vmax.f32 %v2513_v28, 0.0  ;;  %v2898_v3 = vmax.f32 %v2528_v27, 0.0  ;;  %v2904_v28 = vmax.f32 %v2558_v7, 0.0 }
 0x3f3   :  { %v9208_v30 = vpop.f32.mrb[229].mxu1  ;;  %6546 = vmatmul.mubr.f32.gmra.mrb[52].mxu1 %v2884_v40 }
 0x3f4   :  { %6548 = vmatprep.mubr.f32.mxu1 %v2885_v11  ;;  %v2518_v11 = vadd.f32 %v10101_v31, %v9031_v23  ;;  %v2573_v31 = vadd.f32 %v9031_v23, %v9064_v32  ;;  %v2588_v32 = vadd.f32 %v9074_v10, %v9031_v23 }
 0x3f6   :  { %v2896_v29 = vmax.f32 %v2518_v11, 0.0 }
 0x3f7   :  { %6549 = vmatmul.mubr.f32.gmra.mrb[54].mxu1 %v2886_v15  ;;  %v2523_v15 = vadd.f32 %v9031_v23, %v9009_v49  ;;  %v2538_v49 = vadd.f32 %v10102_v26, %v9031_v23 }
 0x3f8   :  { %6551 = vmatprep.mubr.f32.mxu1 %v2887_v1  ;;  %v2533_v1 = vadd.f32 %v9031_v23, %v9017_v61  ;;  %v2548_v61 = vadd.f32 %v10104_v4, %v9031_v23 }
 0x3f9   :  { %v2897_v0 = vmax.f32 %v2523_v15, 0.0  ;;  %v2900_v43 = vmax.f32 %v2538_v49, 0.0  ;;  %v2907_v15 = vmax.f32 %v2573_v31, 0.0  ;;  %v2603_v49 = vadd.f32 %v9031_v23, %v9100_v57 }
 0x3fa   :  { %v9218_v24 = vpop.f32.mrb[230].mxu1  ;;  %v2618_v57 = vadd.f32 %v9110_v9, %v9031_v23 }
 0x3fb   :  { %v9220_v41 = vpop.f32.mrb[231].mxu1  ;;  %6552 = vmatmul.mubr.f32.gmra.mrb[56].mxu1 %v2888_v25 }
 0x3fc   :  { %6554 = vmatprep.mubr.f32.mxu1 %v2889_v17  ;;  %v2899_v17 = vmax.f32 %v2533_v1, 0.0 }
 0x3ff   :  { %6555 = vmatmul.mubr.f32.gmra.mrb[58].mxu1 %v2890_v53  ;;  %v2543_v53 = vadd.f32 %v9031_v23, %v10103_v47  ;;  %v2613_v47 = vadd.f32 %v9031_v23, %v9112_v48  ;;  %v2628_v48 = vadd.f32 %v9122_v21, %v9031_v23 }
 0x400   :  { %6557 = vmatprep.mubr.f32.mxu1 %v2891_v16  ;;  %v2553_v16 = vadd.f32 %v9031_v23, %v9040_v22  ;;  %v2568_v22 = vadd.f32 %v9050_v62, %v9031_v23 }
 0x401   :  { %v2901_v58 = vmax.f32 %v2543_v53, 0.0  ;;  %v2915_v4 = vmax.f32 %v2613_v47, 0.0  ;;  %v2918_v9 = vmax.f32 %v2628_v48, 0.0 }
 0x402   :  { %v9230_v6 = vpop.f32.mrb[232].mxu1  ;;  %v2903_v44 = vmax.f32 %v2553_v16, 0.0  ;;  %v2906_v38 = vmax.f32 %v2568_v22, 0.0  ;;  %v2633_v16 = vadd.f32 %v9031_v23, %v9136_v34  ;;  %v2648_v34 = vadd.f32 %v9146_v59, %v9031_v23 }
 0x403   :  { %v9232_v40 = vpop.f32.mrb[233].mxu1  ;;  %6558 = vmatmul.mubr.f32.gmra.mrb[60].mxu1 %v2892_v35  ;;  %v2902_v35 = vmax.f32 %v2548_v61, 0.0  ;;  %v2623_v61 = vadd.f32 %v9031_v23, %v9124_v45  ;;  %v2638_v45 = vadd.f32 %v9134_v52, %v9031_v23  ;;  %v2653_v22 = vadd.f32 %v9031_v23, %v9160_v8 }
 0x404   :  { %6560 = vmatprep.mubr.f32.mxu1 %v2893_v2  ;;  %v2563_v2 = vadd.f32 %v9031_v23, %v9052_v12  ;;  %v2578_v12 = vadd.f32 %v9062_v46, %v9031_v23  ;;  %v2910_v46 = vmax.f32 %v2588_v32, 0.0  ;;  %v2922_v52 = vmax.f32 %v2648_v34, 0.0 }
 0x405   :  { %v2920_v21 = vmax.f32 %v2638_v45, 0.0  ;;  %v2668_v8 = vadd.f32 %v9170_v13, %v9031_v23  ;;  %v2713_v47 = vadd.f32 %v9031_v23, %v9232_v40 }
 0x406   :  { %v2908_v62 = vmax.f32 %v2578_v12, 0.0  ;;  %v2663_v12 = vadd.f32 %v9031_v23, %v9172_v33  ;;  %v2678_v33 = vadd.f32 %v9182_v39, %v9031_v23 }
 0x407   :  { %6561 = vmatmul.mubr.f32.gmra.mrb[62].mxu1 %v2894_v55  ;;  %v2905_v55 = vmax.f32 %v2563_v2, 0.0  ;;  %v2643_v2 = vadd.f32 %v9031_v23, %v9148_v18  ;;  %v2658_v18 = vadd.f32 %v9158_v5, %v9031_v23  ;;  %v2926_v5 = vmax.f32 %v2668_v8, 0.0 }
 0x408   :  { %6563 = vmatprep.mubr.f32.mxu1 %v2895_v51  ;;  %v2928_v13 = vmax.f32 %v2678_v33, 0.0 }
 0x409   :  { %v2924_v59 = vmax.f32 %v2658_v18, 0.0 }
 0x40a   :  { %v9242_v19 = vpop.f32.mrb[234].mxu1 }
 0x40b   :  { %v9244_v25 = vpop.f32.mrb[235].mxu1  ;;  %6564 = vmatmul.mubr.f32.gmra.mrb[64].mxu1 %v2896_v29  ;;  %v2583_v29 = vadd.f32 %v9031_v23, %v9076_v63  ;;  %v2598_v63 = vadd.f32 %v9086_v42, %v9031_v23  ;;  %v2728_v40 = vadd.f32 %v9242_v19, %v9031_v23 }
 0x40c   :  { %6566 = vmatprep.mubr.f32.mxu1 %v2897_v0  ;;  %v2593_v0 = vadd.f32 %v9031_v23, %v9088_v37  ;;  %v2608_v37 = vadd.f32 %v9098_v50, %v9031_v23  ;;  %v2916_v50 = vmax.f32 %v2618_v57, 0.0 }
 0x40d   :  { %v2909_v27 = vmax.f32 %v2583_v29, 0.0  ;;  %v2912_v10 = vmax.f32 %v2598_v63, 0.0  ;;  %v2673_v29 = vadd.f32 %v9031_v23, %v9184_v14  ;;  %v2688_v14 = vadd.f32 %v9194_v60, %v9031_v23 }
 0x40e   :  { %v2911_v26 = vmax.f32 %v2593_v0, 0.0  ;;  %v2914_v42 = vmax.f32 %v2608_v37, 0.0  ;;  %v2683_v0 = vadd.f32 %v9031_v23, %v9196_v36  ;;  %v2693_v63 = vadd.f32 %v9031_v23, %v9208_v30 }
 0x40f   :  { %6567 = vmatmul.mubr.f32.gmra.mrb[66].mxu1 %v2898_v3  ;;  %v2930_v39 = vmax.f32 %v2688_v14, 0.0  ;;  %v2698_v36 = vadd.f32 %v9206_v56, %v9031_v23  ;;  %v2703_v37 = vadd.f32 %v9031_v23, %v9220_v41  ;;  %v2708_v30 = vadd.f32 %v9218_v24, %v9031_v23 }
 0x410   :  { %6569 = vmatprep.mubr.f32.mxu1 %v2899_v17  ;;  %v2913_v17 = vmax.f32 %v2603_v49, 0.0  ;;  %v2718_v41 = vadd.f32 %v9230_v6, %v9031_v23  ;;  %v9369_v6 = vld [vmem:[%s9863_s7] ss:$0 sm:$0xff] }
 0x411   :  { %v2932_v60 = vmax.f32 %v2698_v36, 0.0  ;;  %v2934_v56 = vmax.f32 %v2708_v30, 0.0 }
 0x412   :  { %v9254_v54 = vpop.f32.mrb[236].mxu1  ;;  %v2936_v24 = vmax.f32 %v2718_v41, 0.0 }
 0x413   :  { %v9256_v20 = vpop.f32.mrb[237].mxu1  ;;  %6570 = vmatmul.mubr.f32.gmra.mrb[68].mxu1 %v2900_v43 }
 0x414   :  { %6572 = vmatprep.mubr.f32.mxu1 %v2901_v58  ;;  %v2917_v58 = vmax.f32 %v2623_v61, 0.0  ;;  %v2723_v61 = vadd.f32 %v9031_v23, %v9244_v25  ;;  %v2733_v48 = vadd.f32 %v9031_v23, %v9256_v20  ;;  %v2938_v25 = vmax.f32 %v2728_v40, 0.0 }
 0x416   :  { %v2939_v19 = vmax.f32 %v2733_v48, 0.0 }
 0x417   :  { %6573 = vmatmul.mubr.f32.gmra.mrb[70].mxu1 %v2902_v35 }
 0x418   :  { %6575 = vmatprep.mubr.f32.mxu1 %v2903_v44  ;;  %v2919_v44 = vmax.f32 %v2633_v16, 0.0 }
 0x41a   :  { %v9266_v11 = vpop.f32.mrb[238].mxu1 }
 0x41b   :  { %v9268_v51 = vpop.f32.mrb[239].mxu1  ;;  %6576 = vmatmul.mubr.f32.gmra.mrb[72].mxu1 %v2904_v28  ;;  %v2921_v28 = vmax.f32 %v2643_v2, 0.0 }
 0x41c   :  { %6578 = vmatprep.mubr.f32.mxu1 %v2905_v55  ;;  %v2743_v45 = vadd.f32 %v9031_v23, %v9268_v51 }
 0x41f   :  { %6579 = vmatmul.mubr.f32.gmra.mrb[74].mxu1 %v2906_v38  ;;  %v2923_v38 = vmax.f32 %v2653_v22, 0.0  ;;  %v2941_v22 = vmax.f32 %v2743_v45, 0.0 }
 0x420   :  { %6581 = vmatprep.mubr.f32.mxu1 %v2907_v15  ;;  %v2925_v15 = vmax.f32 %v2663_v12, 0.0 }
 0x422   :  { %v9278_v1 = vpop.f32.mrb[240].mxu1 }
 0x423   :  { %v9280_v3 = vpop.f32.mrb[241].mxu1  ;;  %6582 = vmatmul.mubr.f32.gmra.mrb[76].mxu1 %v2908_v62 }
 0x424   :  { %6584 = vmatprep.mubr.f32.mxu1 %v2909_v27  ;;  %v2927_v27 = vmax.f32 %v2673_v29, 0.0 }
 0x427   :  { %6585 = vmatmul.mubr.f32.gmra.mrb[78].mxu1 %v2910_v46  ;;  %v2929_v46 = vmax.f32 %v2683_v0, 0.0 }
 0x428   :  { %6587 = vmatprep.mubr.f32.mxu1 %v2911_v26 }
 0x42a   :  { %v9290_v53 = vpop.f32.mrb[242].mxu1 }
 0x42b   :  { %v9292_v43 = vpop.f32.mrb[243].mxu1  ;;  %6588 = vmatmul.mubr.f32.gmra.mrb[80].mxu1 %v2912_v10  ;;  %v2931_v10 = vmax.f32 %v2693_v63, 0.0 }
 0x42c   :  { %6590 = vmatprep.mubr.f32.mxu1 %v2913_v17  ;;  %v2933_v17 = vmax.f32 %v2703_v37, 0.0 }
 0x42f   :  { %6591 = vmatmul.mubr.f32.gmra.mrb[82].mxu1 %v2914_v42 }
 0x430   :  { %6593 = vmatprep.mubr.f32.mxu1 %v2915_v4  ;;  %v2935_v4 = vmax.f32 %v2713_v47, 0.0 }
 0x432   :  { %v9302_v35 = vpop.f32.mrb[244].mxu1 }
 0x433   :  { %v9304_v7 = vpop.f32.mrb[245].mxu1  ;;  %6594 = vmatmul.mubr.f32.gmra.mrb[84].mxu1 %v2916_v50  ;;  %v2937_v50 = vmax.f32 %v2723_v61, 0.0 }
 0x434   :  { %6596 = vmatprep.mubr.f32.mxu1 %v2917_v58 }
 0x437   :  { %6597 = vmatmul.mubr.f32.gmra.mrb[86].mxu1 %v2918_v9  ;;  %v2738_v9 = vadd.f32 %v9254_v54, %v9031_v23  ;;  %v2753_v54 = vadd.f32 %v9031_v23, %v9280_v3  ;;  %v2763_v3 = vadd.f32 %v9031_v23, %v9292_v43  ;;  %v2773_v43 = vadd.f32 %v9031_v23, %v9304_v7 }
 0x438   :  { %6599 = vmatprep.mubr.f32.mxu1 %v2919_v44 }
 0x439   :  { %v2940_v34 = vmax.f32 %v2738_v9, 0.0 }
 0x43a   :  { %v9314_v55 = vpop.f32.mrb[246].mxu1 }
 0x43b   :  { %v9316_v31 = vpop.f32.mrb[247].mxu1  ;;  %6600 = vmatmul.mubr.f32.gmra.mrb[88].mxu1 %v2920_v21 }
 0x43c   :  { %6602 = vmatprep.mubr.f32.mxu1 %v2921_v28  ;;  %v2748_v28 = vadd.f32 %v9266_v11, %v9031_v23  ;;  %v2943_v11 = vmax.f32 %v2753_v54, 0.0  ;;  %v2783_v7 = vadd.f32 %v9031_v23, %v9316_v31 }
 0x43e   :  { %v2942_v8 = vmax.f32 %v2748_v28, 0.0 }
 0x43f   :  { %6603 = vmatmul.mubr.f32.gmra.mrb[90].mxu1 %v2922_v52 }
 0x440   :  { %6605 = vmatprep.mubr.f32.mxu1 %v2923_v38 }
 0x442   :  { %v9326_v62 = vpop.f32.mrb[248].mxu1 }
 0x443   :  { %v9328_v32 = vpop.f32.mrb[249].mxu1  ;;  %6606 = vmatmul.mubr.f32.gmra.mrb[92].mxu1 %v2924_v59 }
 0x444   :  { %6608 = vmatprep.mubr.f32.mxu1 %v2925_v15  ;;  %v2758_v15 = vadd.f32 %v9278_v1, %v9031_v23  ;;  %v2768_v1 = vadd.f32 %v9290_v53, %v9031_v23  ;;  %v2778_v53 = vadd.f32 %v9302_v35, %v9031_v23  ;;  %v2788_v35 = vadd.f32 %v9314_v55, %v9031_v23 }
 0x445   :  { %v2793_v31 = vadd.f32 %v9031_v23, %v9328_v32  ;;  %v2798_v55 = vadd.f32 %v9326_v62, %v9031_v23 }
 0x446   :  { %v2944_v14 = vmax.f32 %v2758_v15, 0.0  ;;  %v2946_v30 = vmax.f32 %v2768_v1, 0.0  ;;  %v2948_v40 = vmax.f32 %v2778_v53, 0.0 }
 0x447   :  { %6609 = vmatmul.mubr.f32.gmra.mrb[94].mxu1 %v2926_v5 }
 0x448   :  { %6611 = vmatprep.mubr.f32.mxu1 %v2927_v27 }
 0x44a   :  { %v9338_v26 = vpop.f32.mrb[250].mxu1 }
 0x44b   :  { %v9340_v49 = vpop.f32.mrb[251].mxu1  ;;  %6612 = vmatmul.mubr.f32.gmra.mrb[96].mxu1 %v2928_v13  ;;  %v2808_v62 = vadd.f32 %v9338_v26, %v9031_v23  ;;  %v7366_v26 = vld [vmem:[%s9861_s5] ss:$0 sm:$0xff] }
 0x44c   :  { %6614 = vmatprep.mubr.f32.mxu1 %v2929_v46  ;;  %v2945_v46 = vmax.f32 %v2763_v3, 0.0  ;;  %v2803_v32 = vadd.f32 %v9031_v23, %v9340_v49 }
 0x44d   :  { %v2954_v3 = vmax.f32 %v2808_v62, 0.0 }
 0x44f   :  { %6615 = vmatmul.mubr.f32.gmra.mrb[98].mxu1 %v2930_v39 }
 0x450   :  { %6617 = vmatprep.mubr.f32.mxu1 %v2931_v10 }
 0x452   :  { %v9350_v42 = vpop.f32.mrb[252].mxu1 }
 0x453   :  { %v9352_v57 = vpop.f32.mrb[253].mxu1  ;;  %6618 = vmatmul.mubr.f32.gmra.mrb[100].mxu1 %v2932_v60 }
 0x454   :  { %6620 = vmatprep.mubr.f32.mxu1 %v2933_v17  ;;  %v2947_v17 = vmax.f32 %v2773_v43, 0.0  ;;  %v2813_v49 = vadd.f32 %v9031_v23, %v9352_v57 }
 0x456   :  { %v2955_v23 = vmax.f32 %v2813_v49, 0.0 }
 0x457   :  { %6621 = vmatmul.mubr.f32.gmra.mrb[102].mxu1 %v2934_v56 }
 0x458   :  { %6623 = vmatprep.mubr.f32.mxu1 %v2935_v4 }
 0x45a   :  { %v9362_v58 = vpop.f32.mrb[254].mxu1 }
 0x45b   :  { %v9364_v16 = vpop.f32.mrb[255].mxu1  ;;  %6624 = vmatmul.mubr.f32.gmra.mrb[104].mxu1 %v2936_v24 }
 0x45c   :  { %6626 = vmatprep.mubr.f32.mxu1 %v2937_v50  ;;  %v2949_v50 = vmax.f32 %v2783_v7, 0.0  ;;  %v2823_v57 = vadd.f32 %v7366_v26, %v9364_v16 }
 0x45e   :  { %v6469_v20 = vpop.f32.mrb[0].mxu1 }
 0x45f   :  { %v3054_v44 = vadd.f32 %v6469_v20, %v9369_v6  ;;  %v3048_v2 = vpop.f32.mrb[1].mxu1  ;;  %6627 = vmatmul.mubr.f32.gmra.mrb[106].mxu1 %v2938_v25 }
 0x460   :  { %v3049_v21 = vadd.f32 %v9369_v6, %v3048_v2  ;;  %6629 = vmatprep.mubr.f32.mxu1 %v2939_v19  ;;  %v2951_v2 = vmax.f32 %v2793_v31, 0.0 }
 0x461   :  { %v3688_v38 = vmax.f32 %v3054_v44, 0.0  ;;  %v2950_v44 = vmax.f32 %v2788_v35, 0.0 }
 0x462   :  { %v3687_v52 = vmax.f32 %v3049_v21, 0.0  ;;  %v6472_v18 = vpop.f32.mrb[2].mxu1 }
 0x463   :  { %v3064_v51 = vadd.f32 %v6472_v18, %v9369_v6  ;;  %v3058_v12 = vpop.f32.mrb[3].mxu1  ;;  %6630 = vmatmul.mubr.f32.gmra.mrb[108].mxu1 %v2940_v34  ;;  %v2952_v18 = vmax.f32 %v2798_v55, 0.0 }
 0x464   :  { %v3059_v59 = vadd.f32 %v9369_v6, %v3058_v12  ;;  %6632 = vmatprep.mubr.f32.mxu1 %v2941_v22  ;;  %6691 = vmatprep.mubr.f32.mxu0 %v3687_v52 }
 0x465   :  { %6692 = vmatmul.mubr.f32.vlgmr.msra.gmra.mrb[0].mxu0 %v3688_v38  ;;  %v3690_v33 = vmax.f32 %v3064_v51, 0.0  ;;  %v2953_v38 = vmax.f32 %v2803_v32, 0.0 }
 0x466   :  { %v3689_v29 = vmax.f32 %v3059_v59, 0.0  ;;  %v6475_v5 = vpop.f32.mrb[4].mxu1 }
 0x467   :  { %v3074_v27 = vadd.f32 %v6475_v5, %v9369_v6  ;;  %v3068_v0 = vpop.f32.mrb[5].mxu1  ;;  %6633 = vmatmul.mubr.f32.gmra.mrb[110].mxu1 %v2942_v8 }
 0x468   :  { %v3069_v13 = vadd.f32 %v9369_v6, %v3068_v0  ;;  %6635 = vmatprep.mubr.f32.mxu1 %v2943_v11  ;;  %6694 = vmatprep.mubr.f32.mxu0 %v3689_v29  ;;  %v2818_v29 = vadd.f32 %v7366_v26, %v9350_v42  ;;  %v2957_v42 = vmax.f32 %v2823_v57, 0.0 }
 0x469   :  { %6695 = vmatmul.mubr.f32.gmra.mrb[2].mxu0 %v3690_v33  ;;  %v3692_v36 = vmax.f32 %v3074_v27, 0.0 }
 0x46a   :  { %v3691_v63 = vmax.f32 %v3069_v13, 0.0  ;;  %v6478_v39 = vpop.f32.mrb[6].mxu1  ;;  %v2956_v1 = vmax.f32 %v2818_v29, 0.0 }
 0x46b   :  { %v3084_v10 = vadd.f32 %v6478_v39, %v9369_v6  ;;  %v3078_v37 = vpop.f32.mrb[7].mxu1  ;;  %6636 = vmatmul.mubr.f32.gmra.mrb[112].mxu1 %v2944_v14 }
 0x46c   :  { %v3079_v60 = vadd.f32 %v9369_v6, %v3078_v37  ;;  %6638 = vmatprep.mubr.f32.mxu1 %v2945_v46  ;;  %6697 = vmatprep.mubr.f32.mxu0 %v3691_v63  ;;  %v2828_v46 = vadd.f32 %v7366_v26, %v9362_v58 }
 0x46d   :  { %6698 = vmatmul.mubr.f32.gmra.mrb[4].mxu0 %v3692_v36  ;;  %v3694_v41 = vmax.f32 %v3084_v10, 0.0 }
 0x46e   :  { %v3693_v47 = vmax.f32 %v3079_v60, 0.0  ;;  %v6481_v56 = vpop.f32.mrb[8].mxu1  ;;  %v2958_v37 = vmax.f32 %v2828_v46, 0.0 }
 0x46f   :  { %v3094_v4 = vadd.f32 %v6481_v56, %v9369_v6  ;;  %v3088_v61 = vpop.f32.mrb[9].mxu1  ;;  %6639 = vmatmul.mubr.f32.gmra.mrb[114].mxu1 %v2946_v30 }
 0x470   :  { %v3089_v24 = vadd.f32 %v9369_v6, %v3088_v61  ;;  %6641 = vmatprep.mubr.f32.mxu1 %v2947_v17  ;;  %6700 = vmatprep.mubr.f32.mxu0 %v3693_v47 }
 0x471   :  { %6701 = vmatmul.mubr.f32.gmra.mrb[6].mxu0 %v3694_v41  ;;  %v3696_v9 = vmax.f32 %v3094_v4, 0.0 }
 0x472   :  { %v3695_v48 = vmax.f32 %v3089_v24, 0.0  ;;  %v6484_v25 = vpop.f32.mrb[10].mxu1 }
 0x473   :  { %v3104_v19 = vadd.f32 %v6484_v25, %v9369_v6  ;;  %v3098_v45 = vpop.f32.mrb[11].mxu1  ;;  %6642 = vmatmul.mubr.f32.gmra.mrb[116].mxu1 %v2948_v40 }
 0x474   :  { %v3099_v20 = vadd.f32 %v9369_v6, %v3098_v45  ;;  %6644 = vmatprep.mubr.f32.mxu1 %v2949_v50  ;;  %6703 = vmatprep.mubr.f32.mxu0 %v3695_v48 }
 0x475   :  { %6704 = vmatmul.mubr.f32.gmra.mrb[8].mxu0 %v3696_v9  ;;  %v3698_v28 = vmax.f32 %v3104_v19, 0.0 }
 0x476   :  { %v3697_v21 = vmax.f32 %v3099_v20, 0.0  ;;  %v6487_v34 = vpop.f32.mrb[12].mxu1 }
 0x477   :  { %v3114_v22 = vadd.f32 %v6487_v34, %v9369_v6  ;;  %v3108_v54 = vpop.f32.mrb[13].mxu1  ;;  %6645 = vmatmul.mubr.f32.gmra.mrb[118].mxu1 %v2950_v44 }
 0x478   :  { %v3109_v52 = vadd.f32 %v9369_v6, %v3108_v54  ;;  %6647 = vmatprep.mubr.f32.mxu1 %v2951_v2  ;;  %6706 = vmatprep.mubr.f32.mxu0 %v3697_v21 }
 0x479   :  { %6707 = vmatmul.mubr.f32.gmra.mrb[10].mxu0 %v3698_v28  ;;  %v3700_v59 = vmax.f32 %v3114_v22, 0.0 }
 0x47a   :  { %v3699_v51 = vmax.f32 %v3109_v52, 0.0  ;;  %v6490_v12 = vpop.f32.mrb[14].mxu1 }
 0x47b   :  { %v3124_v8 = vadd.f32 %v6490_v12, %v9369_v6  ;;  %v3118_v15 = vpop.f32.mrb[15].mxu1  ;;  %6648 = vmatmul.mubr.f32.gmra.mrb[120].mxu1 %v2952_v18 }
 0x47c   :  { %v3119_v11 = vadd.f32 %v9369_v6, %v3118_v15  ;;  %6650 = vmatprep.mubr.f32.mxu1 %v2953_v38  ;;  %6709 = vmatprep.mubr.f32.mxu0 %v3699_v51 }
 0x47d   :  { %6710 = vmatmul.mubr.f32.gmra.mrb[12].mxu0 %v3700_v59  ;;  %v3702_v27 = vmax.f32 %v3124_v8, 0.0 }
 0x47e   :  { %v3701_v5 = vmax.f32 %v3119_v11, 0.0  ;;  %v6493_v33 = vpop.f32.mrb[16].mxu1 }
 0x47f   :  { %v3134_v0 = vadd.f32 %v6493_v33, %v9369_v6  ;;  %v3128_v13 = vpop.f32.mrb[17].mxu1  ;;  %6651 = vmatmul.mubr.f32.gmra.mrb[122].mxu1 %v2954_v3 }
 0x480   :  { %v3129_v14 = vadd.f32 %v9369_v6, %v3128_v13  ;;  %6653 = vmatprep.mubr.f32.mxu1 %v2955_v23  ;;  %6712 = vmatprep.mubr.f32.mxu0 %v3701_v5 }
 0x481   :  { %6713 = vmatmul.mubr.f32.gmra.mrb[14].mxu0 %v3702_v27  ;;  %v3704_v39 = vmax.f32 %v3134_v0, 0.0 }
 0x482   :  { %v3703_v43 = vmax.f32 %v3129_v14, 0.0  ;;  %v6496_v63 = vpop.f32.mrb[18].mxu1 }
 0x483   :  { %v3144_v16 = vadd.f32 %v6496_v63, %v9369_v6  ;;  %v3138_v36 = vpop.f32.mrb[19].mxu1  ;;  %6654 = vmatmul.mubr.f32.gmra.mrb[124].mxu1 %v2956_v1 }
 0x484   :  { %v3139_v10 = vadd.f32 %v9369_v6, %v3138_v36  ;;  %6656 = vmatprep.mubr.f32.mxu1 %v2957_v42  ;;  %6715 = vmatprep.mubr.f32.mxu0 %v3703_v43 }
 0x485   :  { %6716 = vmatmul.mubr.f32.gmra.mrb[16].mxu0 %v3704_v39  ;;  %v3706_v53 = vmax.f32 %v3144_v16, 0.0 }
 0x486   :  { %v3705_v60 = vmax.f32 %v3139_v10, 0.0  ;;  %v6499_v30 = vpop.f32.mrb[20].mxu1 }
 0x487   :  { %v3154_v58 = vadd.f32 %v6499_v30, %v9369_v6  ;;  %v3148_v17 = vpop.f32.mrb[21].mxu1  ;;  %6657 = vmatmul.mubr.f32.gmra.mrb[126].mxu1 %v2958_v37 }
 0x488   :  { %v3149_v7 = vadd.f32 %v9369_v6, %v3148_v17  ;;  %6718 = vmatprep.mubr.f32.mxu0 %v3705_v60 }
 0x489   :  { %6719 = vmatmul.mubr.f32.gmra.mrb[18].mxu0 %v3706_v53  ;;  %v3708_v41 = vmax.f32 %v3154_v58, 0.0 }
 0x48a   :  { %v3707_v47 = vmax.f32 %v3149_v7, 0.0  ;;  %v6502_v56 = vpop.f32.mrb[22].mxu1 }
 0x48b   :  { %v3164_v4 = vadd.f32 %v6502_v56, %v9369_v6  ;;  %v3158_v61 = vpop.f32.mrb[23].mxu1 }
 0x48c   :  { %v3159_v24 = vadd.f32 %v9369_v6, %v3158_v61  ;;  %6721 = vmatprep.mubr.f32.mxu0 %v3707_v47 }
 0x48d   :  { %6722 = vmatmul.mubr.f32.gmra.mrb[20].mxu0 %v3708_v41  ;;  %v3710_v50 = vmax.f32 %v3164_v4, 0.0 }
 0x48e   :  { %v3709_v40 = vmax.f32 %v3159_v24, 0.0  ;;  %v6505_v35 = vpop.f32.mrb[24].mxu1 }
 0x48f   :  { %v3174_v31 = vadd.f32 %v6505_v35, %v9369_v6  ;;  %v3168_v48 = vpop.f32.mrb[25].mxu1 }
 0x490   :  { %v3169_v25 = vadd.f32 %v9369_v6, %v3168_v48  ;;  %6724 = vmatprep.mubr.f32.mxu0 %v3709_v40 }
 0x491   :  { %6725 = vmatmul.mubr.f32.gmra.mrb[22].mxu0 %v3710_v50  ;;  %v3712_v45 = vmax.f32 %v3174_v31, 0.0 }
 0x492   :  { %v3711_v9 = vmax.f32 %v3169_v25, 0.0  ;;  %v6508_v19 = vpop.f32.mrb[26].mxu1 }
 0x493   :  { %v3184_v20 = vadd.f32 %v6508_v19, %v9369_v6  ;;  %v3178_v44 = vpop.f32.mrb[27].mxu1 }
 0x494   :  { %v3179_v55 = vadd.f32 %v9369_v6, %v3178_v44  ;;  %6727 = vmatprep.mubr.f32.mxu0 %v3711_v9 }
 0x495   :  { %6728 = vmatmul.mubr.f32.gmra.mrb[24].mxu0 %v3712_v45  ;;  %v3714_v21 = vmax.f32 %v3184_v20, 0.0 }
 0x496   :  { %v3713_v2 = vmax.f32 %v3179_v55, 0.0  ;;  %v6511_v32 = vpop.f32.mrb[28].mxu1 }
 0x497   :  { %v3194_v34 = vadd.f32 %v6511_v32, %v9369_v6  ;;  %v3188_v28 = vpop.f32.mrb[29].mxu1 }
 0x498   :  { %v3189_v22 = vadd.f32 %v9369_v6, %v3188_v28  ;;  %6730 = vmatprep.mubr.f32.mxu0 %v3713_v2 }
 0x499   :  { %6731 = vmatmul.mubr.f32.gmra.mrb[26].mxu0 %v3714_v21  ;;  %v3716_v18 = vmax.f32 %v3194_v34, 0.0 }
 0x49a   :  { %v3715_v54 = vmax.f32 %v3189_v22, 0.0  ;;  %v6514_v52 = vpop.f32.mrb[30].mxu1 }
 0x49b   :  { %v3204_v62 = vadd.f32 %v6514_v52, %v9369_v6  ;;  %v3198_v38 = vpop.f32.mrb[31].mxu1 }
 0x49c   :  { %v3199_v49 = vadd.f32 %v9369_v6, %v3198_v38  ;;  %6733 = vmatprep.mubr.f32.mxu0 %v3715_v54 }
 0x49d   :  { %6734 = vmatmul.mubr.f32.gmra.mrb[28].mxu0 %v3716_v18  ;;  %v3718_v59 = vmax.f32 %v3204_v62, 0.0 }
 0x49e   :  { %v3717_v51 = vmax.f32 %v3199_v49, 0.0  ;;  %v6517_v12 = vpop.f32.mrb[32].mxu1 }
 0x49f   :  { %v3214_v8 = vadd.f32 %v6517_v12, %v9369_v6  ;;  %v3208_v15 = vpop.f32.mrb[33].mxu1 }
 0x4a0   :  { %v3209_v11 = vadd.f32 %v9369_v6, %v3208_v15  ;;  %6736 = vmatprep.mubr.f32.mxu0 %v3717_v51 }
 0x4a1   :  { %6737 = vmatmul.mubr.f32.gmra.mrb[30].mxu0 %v3718_v59  ;;  %v3720_v29 = vmax.f32 %v3214_v8, 0.0 }
 0x4a2   :  { %v3719_v3 = vmax.f32 %v3209_v11, 0.0  ;;  %v6520_v26 = vpop.f32.mrb[34].mxu1 }
 0x4a3   :  { %v3224_v23 = vadd.f32 %v6520_v26, %v9369_v6  ;;  %v3218_v57 = vpop.f32.mrb[35].mxu1 }
 0x4a4   :  { %v3219_v5 = vadd.f32 %v9369_v6, %v3218_v57  ;;  %6739 = vmatprep.mubr.f32.mxu0 %v3719_v3 }
 0x4a5   :  { %6740 = vmatmul.mubr.f32.gmra.mrb[32].mxu0 %v3720_v29  ;;  %v3722_v0 = vmax.f32 %v3224_v23, 0.0 }
 0x4a6   :  { %v3721_v33 = vmax.f32 %v3219_v5, 0.0  ;;  %v6523_v27 = vpop.f32.mrb[36].mxu1 }
 0x4a7   :  { %v3234_v13 = vadd.f32 %v6523_v27, %v9369_v6  ;;  %v3228_v14 = vpop.f32.mrb[37].mxu1 }
 0x4a8   :  { %v3229_v1 = vadd.f32 %v9369_v6, %v3228_v14  ;;  %6742 = vmatprep.mubr.f32.mxu0 %v3721_v33 }
 0x4a9   :  { %6743 = vmatmul.mubr.f32.gmra.mrb[34].mxu0 %v3722_v0  ;;  %v3724_v43 = vmax.f32 %v3234_v13, 0.0 }
 0x4aa   :  { %v3723_v46 = vmax.f32 %v3229_v1, 0.0  ;;  %v6526_v42 = vpop.f32.mrb[38].mxu1 }
 0x4ab   :  { %v3244_v63 = vadd.f32 %v6526_v42, %v9369_v6  ;;  %v3238_v39 = vpop.f32.mrb[39].mxu1 }
 0x4ac   :  { %v3239_v16 = vadd.f32 %v9369_v6, %v3238_v39  ;;  %6745 = vmatprep.mubr.f32.mxu0 %v3723_v46 }
 0x4ad   :  { %6746 = vmatmul.mubr.f32.gmra.mrb[36].mxu0 %v3724_v43  ;;  %v3726_v37 = vmax.f32 %v3244_v63, 0.0 }
 0x4ae   :  { %v3725_v36 = vmax.f32 %v3239_v16, 0.0  ;;  %v6529_v10 = vpop.f32.mrb[40].mxu1 }
 0x4af   :  { %v3254_v60 = vadd.f32 %v6529_v10, %v9369_v6  ;;  %v3248_v30 = vpop.f32.mrb[41].mxu1 }
 0x4b0   :  { %v3249_v53 = vadd.f32 %v9369_v6, %v3248_v30  ;;  %6748 = vmatprep.mubr.f32.mxu0 %v3725_v36 }
 0x4b1   :  { %6749 = vmatmul.mubr.f32.gmra.mrb[38].mxu0 %v3726_v37  ;;  %v3728_v7 = vmax.f32 %v3254_v60, 0.0 }
 0x4b2   :  { %v3727_v58 = vmax.f32 %v3249_v53, 0.0  ;;  %v6532_v17 = vpop.f32.mrb[42].mxu1 }
 0x4b3   :  { %v3264_v47 = vadd.f32 %v6532_v17, %v9369_v6  ;;  %v3258_v56 = vpop.f32.mrb[43].mxu1 }
 0x4b4   :  { %v3259_v41 = vadd.f32 %v9369_v6, %v3258_v56  ;;  %6751 = vmatprep.mubr.f32.mxu0 %v3727_v58 }
 0x4b5   :  { %6752 = vmatmul.mubr.f32.gmra.mrb[40].mxu0 %v3728_v7  ;;  %v3730_v24 = vmax.f32 %v3264_v47, 0.0 }
 0x4b6   :  { %v3729_v4 = vmax.f32 %v3259_v41, 0.0  ;;  %v6535_v61 = vpop.f32.mrb[44].mxu1 }
 0x4b7   :  { %v3274_v40 = vadd.f32 %v6535_v61, %v9369_v6  ;;  %v3268_v35 = vpop.f32.mrb[45].mxu1 }
 0x4b8   :  { %v3269_v50 = vadd.f32 %v9369_v6, %v3268_v35  ;;  %6754 = vmatprep.mubr.f32.mxu0 %v3729_v4 }
 0x4b9   :  { %6755 = vmatmul.mubr.f32.gmra.mrb[42].mxu0 %v3730_v24  ;;  %v3732_v25 = vmax.f32 %v3274_v40, 0.0 }
 0x4ba   :  { %v3731_v31 = vmax.f32 %v3269_v50, 0.0  ;;  %v6538_v48 = vpop.f32.mrb[46].mxu1 }
 0x4bb   :  { %v3284_v9 = vadd.f32 %v6538_v48, %v9369_v6  ;;  %v3278_v19 = vpop.f32.mrb[47].mxu1 }
 0x4bc   :  { %v3279_v45 = vadd.f32 %v9369_v6, %v3278_v19  ;;  %6757 = vmatprep.mubr.f32.mxu0 %v3731_v31 }
 0x4bd   :  { %6758 = vmatmul.mubr.f32.gmra.mrb[44].mxu0 %v3732_v25  ;;  %v3734_v55 = vmax.f32 %v3284_v9, 0.0 }
 0x4be   :  { %v3733_v20 = vmax.f32 %v3279_v45, 0.0  ;;  %v6541_v44 = vpop.f32.mrb[48].mxu1 }
 0x4bf   :  { %v3294_v2 = vadd.f32 %v6541_v44, %v9369_v6  ;;  %v3288_v32 = vpop.f32.mrb[49].mxu1 }
 0x4c0   :  { %v3289_v21 = vadd.f32 %v9369_v6, %v3288_v32  ;;  %6760 = vmatprep.mubr.f32.mxu0 %v3733_v20 }
 0x4c1   :  { %6761 = vmatmul.mubr.f32.gmra.mrb[46].mxu0 %v3734_v55  ;;  %v3736_v22 = vmax.f32 %v3294_v2, 0.0 }
 0x4c2   :  { %v3735_v34 = vmax.f32 %v3289_v21, 0.0  ;;  %v6544_v28 = vpop.f32.mrb[50].mxu1 }
 0x4c3   :  { %v3304_v54 = vadd.f32 %v6544_v28, %v9369_v6  ;;  %v3298_v52 = vpop.f32.mrb[51].mxu1 }
 0x4c4   :  { %v3299_v18 = vadd.f32 %v9369_v6, %v3298_v52  ;;  %6763 = vmatprep.mubr.f32.mxu0 %v3735_v34 }
 0x4c5   :  { %6764 = vmatmul.mubr.f32.gmra.mrb[48].mxu0 %v3736_v22  ;;  %v3738_v49 = vmax.f32 %v3304_v54, 0.0 }
 0x4c6   :  { %v3737_v62 = vmax.f32 %v3299_v18, 0.0  ;;  %v6547_v38 = vpop.f32.mrb[52].mxu1 }
 0x4c7   :  { %v3314_v51 = vadd.f32 %v6547_v38, %v9369_v6  ;;  %v3308_v12 = vpop.f32.mrb[53].mxu1 }
 0x4c8   :  { %v3309_v59 = vadd.f32 %v9369_v6, %v3308_v12  ;;  %6766 = vmatprep.mubr.f32.mxu0 %v3737_v62 }
 0x4c9   :  { %6767 = vmatmul.mubr.f32.gmra.mrb[50].mxu0 %v3738_v49  ;;  %v3740_v11 = vmax.f32 %v3314_v51, 0.0 }
 0x4ca   :  { %v3739_v8 = vmax.f32 %v3309_v59, 0.0  ;;  %v6550_v15 = vpop.f32.mrb[54].mxu1 }
 0x4cb   :  { %v3324_v3 = vadd.f32 %v6550_v15, %v9369_v6  ;;  %v3318_v26 = vpop.f32.mrb[55].mxu1 }
 0x4cc   :  { %v3319_v29 = vadd.f32 %v9369_v6, %v3318_v26  ;;  %6769 = vmatprep.mubr.f32.mxu0 %v3739_v8 }
 0x4cd   :  { %6770 = vmatmul.mubr.f32.gmra.mrb[52].mxu0 %v3740_v11  ;;  %v3742_v5 = vmax.f32 %v3324_v3, 0.0 }
 0x4ce   :  { %v3741_v23 = vmax.f32 %v3319_v29, 0.0  ;;  %v6553_v57 = vpop.f32.mrb[56].mxu1 }
 0x4cf   :  { %v3334_v33 = vadd.f32 %v6553_v57, %v9369_v6  ;;  %v3328_v27 = vpop.f32.mrb[57].mxu1 }
 0x4d0   :  { %v3329_v0 = vadd.f32 %v9369_v6, %v3328_v27  ;;  %6772 = vmatprep.mubr.f32.mxu0 %v3741_v23 }
 0x4d1   :  { %6773 = vmatmul.mubr.f32.gmra.mrb[54].mxu0 %v3742_v5  ;;  %v3744_v1 = vmax.f32 %v3334_v33, 0.0 }
 0x4d2   :  { %v3743_v13 = vmax.f32 %v3329_v0, 0.0  ;;  %v6556_v14 = vpop.f32.mrb[58].mxu1 }
 0x4d3   :  { %v3344_v46 = vadd.f32 %v6556_v14, %v9369_v6  ;;  %v3338_v42 = vpop.f32.mrb[59].mxu1 }
 0x4d4   :  { %v3339_v43 = vadd.f32 %v9369_v6, %v3338_v42  ;;  %6775 = vmatprep.mubr.f32.mxu0 %v3743_v13 }
 0x4d5   :  { %6776 = vmatmul.mubr.f32.gmra.mrb[56].mxu0 %v3744_v1  ;;  %v3746_v16 = vmax.f32 %v3344_v46, 0.0 }
 0x4d6   :  { %v3745_v63 = vmax.f32 %v3339_v43, 0.0  ;;  %v6559_v39 = vpop.f32.mrb[60].mxu1 }
 0x4d7   :  { %v3354_v36 = vadd.f32 %v6559_v39, %v9369_v6  ;;  %v3348_v10 = vpop.f32.mrb[61].mxu1 }
 0x4d8   :  { %v3349_v37 = vadd.f32 %v9369_v6, %v3348_v10  ;;  %6778 = vmatprep.mubr.f32.mxu0 %v3745_v63 }
 0x4d9   :  { %6779 = vmatmul.mubr.f32.gmra.mrb[58].mxu0 %v3746_v16  ;;  %v3748_v53 = vmax.f32 %v3354_v36, 0.0 }
 0x4da   :  { %v3747_v60 = vmax.f32 %v3349_v37, 0.0  ;;  %v6562_v30 = vpop.f32.mrb[62].mxu1 }
 0x4db   :  { %v3364_v58 = vadd.f32 %v6562_v30, %v9369_v6  ;;  %v3358_v17 = vpop.f32.mrb[63].mxu1 }
 0x4dc   :  { %v3359_v7 = vadd.f32 %v9369_v6, %v3358_v17  ;;  %6781 = vmatprep.mubr.f32.mxu0 %v3747_v60 }
 0x4dd   :  { %6782 = vmatmul.mubr.f32.gmra.mrb[60].mxu0 %v3748_v53  ;;  %v3750_v41 = vmax.f32 %v3364_v58, 0.0 }
 0x4de   :  { %v3749_v47 = vmax.f32 %v3359_v7, 0.0  ;;  %v6565_v56 = vpop.f32.mrb[64].mxu1 }
 0x4df   :  { %v3374_v4 = vadd.f32 %v6565_v56, %v9369_v6  ;;  %v3368_v61 = vpop.f32.mrb[65].mxu1 }
 0x4e0   :  { %v3369_v24 = vadd.f32 %v9369_v6, %v3368_v61  ;;  %6784 = vmatprep.mubr.f32.mxu0 %v3749_v47 }
 0x4e1   :  { %6785 = vmatmul.mubr.f32.gmra.mrb[62].mxu0 %v3750_v41  ;;  %v3752_v50 = vmax.f32 %v3374_v4, 0.0 }
 0x4e2   :  { %v3751_v40 = vmax.f32 %v3369_v24, 0.0  ;;  %v6568_v35 = vpop.f32.mrb[66].mxu1 }
 0x4e3   :  { %v3384_v31 = vadd.f32 %v6568_v35, %v9369_v6  ;;  %v3378_v48 = vpop.f32.mrb[67].mxu1 }
 0x4e4   :  { %v3379_v25 = vadd.f32 %v9369_v6, %v3378_v48  ;;  %6787 = vmatprep.mubr.f32.mxu0 %v3751_v40 }
 0x4e5   :  { %6788 = vmatmul.mubr.f32.gmra.mrb[64].mxu0 %v3752_v50  ;;  %v3754_v45 = vmax.f32 %v3384_v31, 0.0 }
 0x4e6   :  { %v3753_v9 = vmax.f32 %v3379_v25, 0.0  ;;  %v6571_v19 = vpop.f32.mrb[68].mxu1 }
 0x4e7   :  { %v3394_v20 = vadd.f32 %v6571_v19, %v9369_v6  ;;  %v3388_v44 = vpop.f32.mrb[69].mxu1 }
 0x4e8   :  { %v3389_v55 = vadd.f32 %v9369_v6, %v3388_v44  ;;  %6790 = vmatprep.mubr.f32.mxu0 %v3753_v9 }
 0x4e9   :  { %6791 = vmatmul.mubr.f32.gmra.mrb[66].mxu0 %v3754_v45  ;;  %v3756_v21 = vmax.f32 %v3394_v20, 0.0 }
 0x4ea   :  { %v3755_v2 = vmax.f32 %v3389_v55, 0.0  ;;  %v6574_v32 = vpop.f32.mrb[70].mxu1 }
 0x4eb   :  { %v3404_v34 = vadd.f32 %v6574_v32, %v9369_v6  ;;  %v3398_v28 = vpop.f32.mrb[71].mxu1 }
 0x4ec   :  { %v3399_v22 = vadd.f32 %v9369_v6, %v3398_v28  ;;  %6793 = vmatprep.mubr.f32.mxu0 %v3755_v2 }
 0x4ed   :  { %6794 = vmatmul.mubr.f32.gmra.mrb[68].mxu0 %v3756_v21  ;;  %v3758_v18 = vmax.f32 %v3404_v34, 0.0 }
 0x4ee   :  { %v3757_v54 = vmax.f32 %v3399_v22, 0.0  ;;  %v6577_v52 = vpop.f32.mrb[72].mxu1 }
 0x4ef   :  { %v3414_v62 = vadd.f32 %v6577_v52, %v9369_v6  ;;  %v3408_v38 = vpop.f32.mrb[73].mxu1 }
 0x4f0   :  { %v3409_v49 = vadd.f32 %v9369_v6, %v3408_v38  ;;  %6796 = vmatprep.mubr.f32.mxu0 %v3757_v54 }
 0x4f1   :  { %6797 = vmatmul.mubr.f32.gmra.mrb[70].mxu0 %v3758_v18  ;;  %v3760_v59 = vmax.f32 %v3414_v62, 0.0 }
 0x4f2   :  { %v3759_v51 = vmax.f32 %v3409_v49, 0.0  ;;  %v6580_v12 = vpop.f32.mrb[74].mxu1 }
 0x4f3   :  { %v3424_v8 = vadd.f32 %v6580_v12, %v9369_v6  ;;  %v3418_v15 = vpop.f32.mrb[75].mxu1 }
 0x4f4   :  { %v3419_v11 = vadd.f32 %v9369_v6, %v3418_v15  ;;  %6799 = vmatprep.mubr.f32.mxu0 %v3759_v51 }
 0x4f5   :  { %6800 = vmatmul.mubr.f32.gmra.mrb[72].mxu0 %v3760_v59  ;;  %v3762_v29 = vmax.f32 %v3424_v8, 0.0 }
 0x4f6   :  { %v3761_v3 = vmax.f32 %v3419_v11, 0.0  ;;  %v6583_v26 = vpop.f32.mrb[76].mxu1 }
 0x4f7   :  { %v3434_v23 = vadd.f32 %v6583_v26, %v9369_v6  ;;  %v3428_v57 = vpop.f32.mrb[77].mxu1 }
 0x4f8   :  { %v3429_v5 = vadd.f32 %v9369_v6, %v3428_v57  ;;  %6802 = vmatprep.mubr.f32.mxu0 %v3761_v3 }
 0x4f9   :  { %6803 = vmatmul.mubr.f32.gmra.mrb[74].mxu0 %v3762_v29  ;;  %v3764_v0 = vmax.f32 %v3434_v23, 0.0 }
 0x4fa   :  { %v3763_v33 = vmax.f32 %v3429_v5, 0.0  ;;  %v6586_v27 = vpop.f32.mrb[78].mxu1 }
 0x4fb   :  { %v3444_v13 = vadd.f32 %v6586_v27, %v9369_v6  ;;  %v3438_v14 = vpop.f32.mrb[79].mxu1 }
 0x4fc   :  { %v3439_v1 = vadd.f32 %v9369_v6, %v3438_v14  ;;  %6805 = vmatprep.mubr.f32.mxu0 %v3763_v33 }
 0x4fd   :  { %6806 = vmatmul.mubr.f32.gmra.mrb[76].mxu0 %v3764_v0  ;;  %v3766_v43 = vmax.f32 %v3444_v13, 0.0 }
 0x4fe   :  { %v3765_v46 = vmax.f32 %v3439_v1, 0.0  ;;  %v6589_v42 = vpop.f32.mrb[80].mxu1 }
 0x4ff   :  { %v3454_v63 = vadd.f32 %v6589_v42, %v9369_v6  ;;  %v3448_v39 = vpop.f32.mrb[81].mxu1 }
 0x500   :  { %v3449_v16 = vadd.f32 %v9369_v6, %v3448_v39  ;;  %6808 = vmatprep.mubr.f32.mxu0 %v3765_v46 }
 0x501   :  { %6809 = vmatmul.mubr.f32.gmra.mrb[78].mxu0 %v3766_v43  ;;  %v3768_v37 = vmax.f32 %v3454_v63, 0.0 }
 0x502   :  { %v3767_v36 = vmax.f32 %v3449_v16, 0.0  ;;  %v6592_v10 = vpop.f32.mrb[82].mxu1 }
 0x503   :  { %v3464_v60 = vadd.f32 %v6592_v10, %v9369_v6  ;;  %v3458_v30 = vpop.f32.mrb[83].mxu1 }
 0x504   :  { %v3459_v53 = vadd.f32 %v9369_v6, %v3458_v30  ;;  %6811 = vmatprep.mubr.f32.mxu0 %v3767_v36 }
 0x505   :  { %6812 = vmatmul.mubr.f32.gmra.mrb[80].mxu0 %v3768_v37  ;;  %v3770_v7 = vmax.f32 %v3464_v60, 0.0 }
 0x506   :  { %v3769_v58 = vmax.f32 %v3459_v53, 0.0  ;;  %v6595_v17 = vpop.f32.mrb[84].mxu1 }
 0x507   :  { %v3474_v47 = vadd.f32 %v6595_v17, %v9369_v6  ;;  %v3468_v56 = vpop.f32.mrb[85].mxu1 }
 0x508   :  { %v3469_v41 = vadd.f32 %v9369_v6, %v3468_v56  ;;  %6814 = vmatprep.mubr.f32.mxu0 %v3769_v58 }
 0x509   :  { %6815 = vmatmul.mubr.f32.gmra.mrb[82].mxu0 %v3770_v7  ;;  %v3772_v24 = vmax.f32 %v3474_v47, 0.0 }
 0x50a   :  { %v3771_v4 = vmax.f32 %v3469_v41, 0.0  ;;  %v6598_v61 = vpop.f32.mrb[86].mxu1 }
 0x50b   :  { %v3484_v40 = vadd.f32 %v6598_v61, %v9369_v6  ;;  %v3478_v35 = vpop.f32.mrb[87].mxu1 }
 0x50c   :  { %v3479_v50 = vadd.f32 %v9369_v6, %v3478_v35  ;;  %6817 = vmatprep.mubr.f32.mxu0 %v3771_v4 }
 0x50d   :  { %6818 = vmatmul.mubr.f32.gmra.mrb[84].mxu0 %v3772_v24  ;;  %v3774_v25 = vmax.f32 %v3484_v40, 0.0 }
 0x50e   :  { %v3773_v31 = vmax.f32 %v3479_v50, 0.0  ;;  %v6601_v48 = vpop.f32.mrb[88].mxu1  ;;  %v9520_v50 = vld [vmem:[%s9865_s9] ss:$0 sm:$0xff] }
 0x50f   :  { %v3494_v9 = vadd.f32 %v6601_v48, %v9369_v6  ;;  %v3488_v19 = vpop.f32.mrb[89].mxu1 }
 0x510   :  { %v3489_v45 = vadd.f32 %v9369_v6, %v3488_v19  ;;  %6820 = vmatprep.mubr.f32.mxu0 %v3773_v31 }
 0x511   :  { %6821 = vmatmul.mubr.f32.gmra.mrb[86].mxu0 %v3774_v25  ;;  %v3776_v55 = vmax.f32 %v3494_v9, 0.0 }
 0x512   :  { %v3775_v20 = vmax.f32 %v3489_v45, 0.0  ;;  %v6604_v44 = vpop.f32.mrb[90].mxu1 }
 0x513   :  { %v3504_v2 = vadd.f32 %v6604_v44, %v9369_v6  ;;  %v3498_v32 = vpop.f32.mrb[91].mxu1 }
 0x514   :  { %v3499_v21 = vadd.f32 %v9369_v6, %v3498_v32  ;;  %6823 = vmatprep.mubr.f32.mxu0 %v3775_v20 }
 0x515   :  { %6824 = vmatmul.mubr.f32.gmra.mrb[88].mxu0 %v3776_v55  ;;  %v3778_v22 = vmax.f32 %v3504_v2, 0.0 }
 0x516   :  { %v3777_v34 = vmax.f32 %v3499_v21, 0.0  ;;  %v6607_v28 = vpop.f32.mrb[92].mxu1 }
 0x517   :  { %v3514_v54 = vadd.f32 %v6607_v28, %v9369_v6  ;;  %v3508_v52 = vpop.f32.mrb[93].mxu1 }
 0x518   :  { %v3509_v18 = vadd.f32 %v9369_v6, %v3508_v52  ;;  %6826 = vmatprep.mubr.f32.mxu0 %v3777_v34 }
 0x519   :  { %6827 = vmatmul.mubr.f32.gmra.mrb[90].mxu0 %v3778_v22  ;;  %v3780_v49 = vmax.f32 %v3514_v54, 0.0 }
 0x51a   :  { %v3779_v62 = vmax.f32 %v3509_v18, 0.0  ;;  %v6610_v38 = vpop.f32.mrb[94].mxu1 }
 0x51b   :  { %v3524_v51 = vadd.f32 %v6610_v38, %v9369_v6  ;;  %v3518_v12 = vpop.f32.mrb[95].mxu1 }
 0x51c   :  { %v3519_v59 = vadd.f32 %v9369_v6, %v3518_v12  ;;  %6829 = vmatprep.mubr.f32.mxu0 %v3779_v62 }
 0x51d   :  { %6830 = vmatmul.mubr.f32.gmra.mrb[92].mxu0 %v3780_v49  ;;  %v3782_v11 = vmax.f32 %v3524_v51, 0.0 }
 0x51e   :  { %v3781_v8 = vmax.f32 %v3519_v59, 0.0  ;;  %v6613_v15 = vpop.f32.mrb[96].mxu1 }
 0x51f   :  { %v3534_v3 = vadd.f32 %v6613_v15, %v9369_v6  ;;  %v3528_v26 = vpop.f32.mrb[97].mxu1  ;;  %v9535_v15 = vld [vmem:[%s9863_s7] ss:$0 sm:$0xff] }
 0x520   :  { %v3529_v29 = vadd.f32 %v9369_v6, %v3528_v26  ;;  %6832 = vmatprep.mubr.f32.mxu0 %v3781_v8 }
 0x521   :  { %6833 = vmatmul.mubr.f32.gmra.mrb[94].mxu0 %v3782_v11  ;;  %v3784_v5 = vmax.f32 %v3534_v3, 0.0 }
 0x522   :  { %v3783_v23 = vmax.f32 %v3529_v29, 0.0  ;;  %v6616_v57 = vpop.f32.mrb[98].mxu1 }
 0x523   :  { %v3544_v33 = vadd.f32 %v6616_v57, %v9369_v6  ;;  %v3538_v27 = vpop.f32.mrb[99].mxu1 }
 0x524   :  { %v3539_v0 = vadd.f32 %v9369_v6, %v3538_v27  ;;  %6835 = vmatprep.mubr.f32.mxu0 %v3783_v23 }
 0x525   :  { %6836 = vmatmul.mubr.f32.gmra.mrb[96].mxu0 %v3784_v5  ;;  %v3786_v1 = vmax.f32 %v3544_v33, 0.0 }
 0x526   :  { %v3785_v13 = vmax.f32 %v3539_v0, 0.0  ;;  %v6619_v14 = vpop.f32.mrb[100].mxu1 }
 0x527   :  { %v3554_v46 = vadd.f32 %v6619_v14, %v9369_v6  ;;  %v3548_v42 = vpop.f32.mrb[101].mxu1 }
 0x528   :  { %v3549_v43 = vadd.f32 %v9369_v6, %v3548_v42  ;;  %6838 = vmatprep.mubr.f32.mxu0 %v3785_v13 }
 0x529   :  { %6839 = vmatmul.mubr.f32.gmra.mrb[98].mxu0 %v3786_v1  ;;  %v3788_v16 = vmax.f32 %v3554_v46, 0.0 }
 0x52a   :  { %v3787_v63 = vmax.f32 %v3549_v43, 0.0  ;;  %v6622_v39 = vpop.f32.mrb[102].mxu1 }
 0x52b   :  { %v3564_v36 = vadd.f32 %v6622_v39, %v9369_v6  ;;  %v3558_v10 = vpop.f32.mrb[103].mxu1 }
 0x52c   :  { %v3559_v37 = vadd.f32 %v9369_v6, %v3558_v10  ;;  %6841 = vmatprep.mubr.f32.mxu0 %v3787_v63 }
 0x52d   :  { %6842 = vmatmul.mubr.f32.gmra.mrb[100].mxu0 %v3788_v16  ;;  %v3790_v53 = vmax.f32 %v3564_v36, 0.0 }
 0x52e   :  { %v3789_v60 = vmax.f32 %v3559_v37, 0.0  ;;  %v6625_v30 = vpop.f32.mrb[104].mxu1 }
 0x52f   :  { %v3574_v58 = vadd.f32 %v6625_v30, %v9369_v6  ;;  %v3568_v17 = vpop.f32.mrb[105].mxu1 }
 0x530   :  { %v3569_v7 = vadd.f32 %v9369_v6, %v3568_v17  ;;  %6844 = vmatprep.mubr.f32.mxu0 %v3789_v60 }
 0x531   :  { %6845 = vmatmul.mubr.f32.gmra.mrb[102].mxu0 %v3790_v53  ;;  %v3792_v41 = vmax.f32 %v3574_v58, 0.0 }
 0x532   :  { %v3791_v47 = vmax.f32 %v3569_v7, 0.0  ;;  %v6628_v56 = vpop.f32.mrb[106].mxu1 }
 0x533   :  { %v3584_v4 = vadd.f32 %v6628_v56, %v9369_v6  ;;  %v3578_v61 = vpop.f32.mrb[107].mxu1 }
 0x534   :  { %v3579_v24 = vadd.f32 %v9369_v6, %v3578_v61  ;;  %6847 = vmatprep.mubr.f32.mxu0 %v3791_v47 }
 0x535   :  { %6848 = vmatmul.mubr.f32.gmra.mrb[104].mxu0 %v3792_v41  ;;  %v3794_v31 = vmax.f32 %v3584_v4, 0.0 }
 0x536   :  { %v3793_v40 = vmax.f32 %v3579_v24, 0.0  ;;  %v6631_v35 = vpop.f32.mrb[108].mxu1 }
 0x537   :  { %v3594_v48 = vadd.f32 %v6631_v35, %v9369_v6  ;;  %v3588_v25 = vpop.f32.mrb[109].mxu1 }
 0x538   :  { %v3589_v9 = vadd.f32 %v9369_v6, %v3588_v25  ;;  %v6693_v19 = vpop.f32.mrb[0].mxu0  ;;  %6850 = vmatprep.mubr.f32.mxu0 %v3793_v40 }
 0x539   :  { %v3910_v45 = vadd.f32 %v6693_v19, %v9520_v50  ;;  %v3904_v20 = vpop.f32.mrb[1].mxu0  ;;  %6851 = vmatmul.mubr.f32.gmra.mrb[106].mxu0 %v3794_v31  ;;  %v3796_v32 = vmax.f32 %v3594_v48, 0.0 }
 0x53a   :  { %v3795_v44 = vmax.f32 %v3589_v9, 0.0  ;;  %v3905_v55 = vadd.f32 %v9520_v50, %v3904_v20  ;;  %v6634_v2 = vpop.f32.mrb[110].mxu1 }
 0x53b   :  { %v4544_v21 = vmax.f32 %v3910_v45, 0.0  ;;  %v3604_v34 = vadd.f32 %v6634_v2, %v9369_v6  ;;  %v3598_v28 = vpop.f32.mrb[111].mxu1 }
 0x53c   :  { %v4543_v22 = vmax.f32 %v3905_v55, 0.0  ;;  %v3599_v54 = vadd.f32 %v9369_v6, %v3598_v28  ;;  %v6696_v52 = vpop.f32.mrb[2].mxu0  ;;  %6853 = vmatprep.mubr.f32.mxu0 %v3795_v44 }
 0x53d   :  { %v3920_v18 = vadd.f32 %v6696_v52, %v9520_v50  ;;  %v3914_v62 = vpop.f32.mrb[3].mxu0  ;;  %6854 = vmatmul.mubr.f32.gmra.mrb[108].mxu0 %v3796_v32  ;;  %v3798_v59 = vmax.f32 %v3604_v34, 0.0 }
 0x53e   :  { %v9529_v38 = vpack.c.bf16 %v4544_v21, %v4543_v22  ;;  %v3797_v49 = vmax.f32 %v3599_v54, 0.0  ;;  %v3915_v51 = vadd.f32 %v9520_v50, %v3914_v62  ;;  %v6637_v12 = vpop.f32.mrb[112].mxu1 }
 0x53f   :  { %v4546_v8 = vmax.f32 %v3920_v18, 0.0  ;;  %v3614_v6 = vadd.f32 %v9535_v15, %v6637_v12  ;;  %v3608_v11 = vpop.f32.mrb[113].mxu1 }
 0x540   :  { %v4545_v3 = vmax.f32 %v3915_v51, 0.0  ;;  %v3609_v26 = vadd.f32 %v9535_v15, %v3608_v11  ;;  %v6699_v29 = vpop.f32.mrb[4].mxu0  ;;  %6856 = vmatprep.mubr.f32.mxu0 %v3797_v49 }
 0x541   :  { %v3930_v23 = vadd.f32 %v6699_v29, %v9520_v50  ;;  %v3924_v57 = vpop.f32.mrb[5].mxu0  ;;  %6857 = vmatmul.mubr.f32.gmra.mrb[110].mxu0 %v3798_v59  ;;  %v3800_v13 = vmax.f32 %v3614_v6, 0.0 }
 0x542   :  { %v9540_v5 = vpack.c.bf16 %v4546_v8, %v4545_v3  ;;  %v3799_v33 = vmax.f32 %v3609_v26, 0.0  ;;  %v3925_v27 = vadd.f32 %v9520_v50, %v3924_v57  ;;  %v6640_v0 = vpop.f32.mrb[114].mxu1 }
 0x543   :  { %v4548_v14 = vmax.f32 %v3930_v23, 0.0  ;;  %v3624_v1 = vadd.f32 %v9535_v15, %v6640_v0  ;;  %v3618_v46 = vpop.f32.mrb[115].mxu1 }
 0x544   :  { %v4547_v42 = vmax.f32 %v3925_v27, 0.0  ;;  %v3619_v43 = vadd.f32 %v9535_v15, %v3618_v46  ;;  %v6702_v63 = vpop.f32.mrb[6].mxu0  ;;  %6859 = vmatprep.mubr.f32.mxu0 %v3799_v33 }
 0x545   :  { %v3940_v39 = vadd.f32 %v6702_v63, %v9520_v50  ;;  %v3934_v16 = vpop.f32.mrb[7].mxu0  ;;  %6860 = vmatmul.mubr.f32.gmra.mrb[112].mxu0 %v3800_v13  ;;  %v3802_v30 = vmax.f32 %v3624_v1, 0.0 }
 0x546   :  { %v9546_v36 = vpack.c.bf16 %v4548_v14, %v4547_v42  ;;  %v3801_v10 = vmax.f32 %v3619_v43, 0.0  ;;  %v3935_v37 = vadd.f32 %v9520_v50, %v3934_v16  ;;  %v6643_v60 = vpop.f32.mrb[116].mxu1 }
 0x547   :  { %v4550_v53 = vmax.f32 %v3940_v39, 0.0  ;;  %v3634_v58 = vadd.f32 %v9535_v15, %v6643_v60  ;;  %v3628_v17 = vpop.f32.mrb[117].mxu1 }
 0x548   :  { %v4549_v7 = vmax.f32 %v3935_v37, 0.0  ;;  %v3629_v47 = vadd.f32 %v9535_v15, %v3628_v17  ;;  %v6705_v56 = vpop.f32.mrb[8].mxu0  ;;  %6862 = vmatprep.mubr.f32.mxu0 %v3801_v10 }
 0x549   :  { %v3950_v41 = vadd.f32 %v6705_v56, %v9520_v50  ;;  %v3944_v4 = vpop.f32.mrb[9].mxu0  ;;  %6863 = vmatmul.mubr.f32.gmra.mrb[114].mxu0 %v3802_v30  ;;  %v3804_v31 = vmax.f32 %v3634_v58, 0.0 }
 0x54a   :  { %v9552_v61 = vpack.c.bf16 %v4550_v53, %v4549_v7  ;;  %v3803_v24 = vmax.f32 %v3629_v47, 0.0  ;;  %v3945_v40 = vadd.f32 %v9520_v50, %v3944_v4  ;;  %v6646_v35 = vpop.f32.mrb[118].mxu1 }
 0x54b   :  { %v4552_v48 = vmax.f32 %v3950_v41, 0.0  ;;  %v3644_v25 = vadd.f32 %v9535_v15, %v6646_v35  ;;  %v3638_v9 = vpop.f32.mrb[119].mxu1 }
 0x54c   :  { %v4551_v19 = vmax.f32 %v3945_v40, 0.0  ;;  %v3639_v45 = vadd.f32 %v9535_v15, %v3638_v9  ;;  %v6708_v20 = vpop.f32.mrb[10].mxu0  ;;  %6865 = vmatprep.mubr.f32.mxu0 %v3803_v24 }
 0x54d   :  { %v3960_v44 = vadd.f32 %v6708_v20, %v9520_v50  ;;  %v3954_v55 = vpop.f32.mrb[11].mxu0  ;;  %6866 = vmatmul.mubr.f32.gmra.mrb[116].mxu0 %v3804_v31  ;;  %v3806_v28 = vmax.f32 %v3644_v25, 0.0 }
 0x54e   :  { %v9558_v2 = vpack.c.bf16 %v4552_v48, %v4551_v19  ;;  %v3805_v32 = vmax.f32 %v3639_v45, 0.0  ;;  %v3955_v21 = vadd.f32 %v9520_v50, %v3954_v55  ;;  %v6649_v34 = vpop.f32.mrb[120].mxu1 }
 0x54f   :  { %v4554_v22 = vmax.f32 %v3960_v44, 0.0  ;;  %v3654_v54 = vadd.f32 %v9535_v15, %v6649_v34  ;;  %v3648_v52 = vpop.f32.mrb[121].mxu1 }
 0x550   :  { %v4553_v18 = vmax.f32 %v3955_v21, 0.0  ;;  %v3649_v62 = vadd.f32 %v9535_v15, %v3648_v52  ;;  %v6711_v49 = vpop.f32.mrb[12].mxu0  ;;  %6868 = vmatprep.mubr.f32.mxu0 %v3805_v32 }
 0x551   :  { %v3970_v51 = vadd.f32 %v6711_v49, %v9520_v50  ;;  %v3964_v12 = vpop.f32.mrb[13].mxu0  ;;  %6869 = vmatmul.mubr.f32.gmra.mrb[118].mxu0 %v3806_v28  ;;  %v3808_v3 = vmax.f32 %v3654_v54, 0.0 }
 0x552   :  { %v9564_v59 = vpack.c.bf16 %v4554_v22, %v4553_v18  ;;  %v3807_v8 = vmax.f32 %v3649_v62, 0.0  ;;  %v3965_v6 = vadd.f32 %v9520_v50, %v3964_v12  ;;  %v6652_v11 = vpop.f32.mrb[122].mxu1 }
 0x553   :  { %v4556_v26 = vmax.f32 %v3970_v51, 0.0  ;;  %v3664_v29 = vadd.f32 %v9535_v15, %v6652_v11  ;;  %v3658_v23 = vpop.f32.mrb[123].mxu1 }
 0x554   :  { %v4555_v57 = vmax.f32 %v3965_v6, 0.0  ;;  %v3659_v33 = vadd.f32 %v9535_v15, %v3658_v23  ;;  %v6714_v27 = vpop.f32.mrb[14].mxu0  ;;  %6871 = vmatprep.mubr.f32.mxu0 %v3807_v8 }
 0x555   :  { %v3980_v0 = vadd.f32 %v6714_v27, %v9520_v50  ;;  %v3974_v13 = vpop.f32.mrb[15].mxu0  ;;  %6872 = vmatmul.mubr.f32.gmra.mrb[120].mxu0 %v3808_v3  ;;  %v3810_v43 = vmax.f32 %v3664_v29, 0.0 }
 0x556   :  { %v9570_v14 = vpack.c.bf16 %v4556_v26, %v4555_v57  ;;  %v3809_v1 = vmax.f32 %v3659_v33, 0.0  ;;  %v3975_v46 = vadd.f32 %v9520_v50, %v3974_v13  ;;  %v6655_v42 = vpop.f32.mrb[124].mxu1 }
 0x557   :  { %v4558_v63 = vmax.f32 %v3980_v0, 0.0  ;;  %v3674_v39 = vadd.f32 %v9535_v15, %v6655_v42  ;;  %v3668_v16 = vpop.f32.mrb[125].mxu1 }
 0x558   :  { %v4557_v10 = vmax.f32 %v3975_v46, 0.0  ;;  %v3669_v37 = vadd.f32 %v9535_v15, %v3668_v16  ;;  %v6717_v60 = vpop.f32.mrb[16].mxu0  ;;  %6874 = vmatprep.mubr.f32.mxu0 %v3809_v1 }
 0x559   :  { %v3990_v30 = vadd.f32 %v6717_v60, %v9520_v50  ;;  %v3984_v53 = vpop.f32.mrb[17].mxu0  ;;  %6875 = vmatmul.mubr.f32.gmra.mrb[122].mxu0 %v3810_v43  ;;  %v3812_v56 = vmax.f32 %v3674_v39, 0.0 }
 0x55a   :  { %v9576_v58 = vpack.c.bf16 %v4558_v63, %v4557_v10  ;;  %v3811_v17 = vmax.f32 %v3669_v37, 0.0  ;;  %v3985_v7 = vadd.f32 %v9520_v50, %v3984_v53  ;;  %v6658_v47 = vpop.f32.mrb[126].mxu1 }
 0x55b   :  { %v4560_v41 = vmax.f32 %v3990_v30, 0.0  ;;  %v3684_v4 = vadd.f32 %v9535_v15, %v6658_v47  ;;  %v3678_v24 = vpop.f32.mrb[127].mxu1 }
 0x55c   :  { %v4559_v40 = vmax.f32 %v3985_v7, 0.0  ;;  %v3679_v35 = vadd.f32 %v9535_v15, %v3678_v24  ;;  %v6720_v31 = vpop.f32.mrb[18].mxu0  ;;  %6877 = vmatprep.mubr.f32.mxu0 %v3811_v17  ;;  %v9586_v15 = vld [vmem:[%s9866_s10] sm:$0x1] }
 0x55d   :  { %v4000_v48 = vadd.f32 %v6720_v31, %v9520_v50  ;;  %v3994_v25 = vpop.f32.mrb[19].mxu0  ;;  %6878 = vmatmul.mubr.f32.gmra.mrb[124].mxu0 %v3812_v56  ;;  %v3814_v20 = vmax.f32 %v3684_v4, 0.0  ;;  %5883 = vmatprep.mubr.f32.mxu1 %v9586_v15 }
 0x55e   :  { %v7059_v9 = vpack.c.bf16 %v4560_v41, %v4559_v40  ;;  %v3813_v19 = vmax.f32 %v3679_v35, 0.0  ;;  %v3995_v45 = vadd.f32 %v9520_v50, %v3994_v25 }
 0x55f   :  { %v4562_v44 = vmax.f32 %v4000_v48, 0.0 }
 0x560   :  { %v4561_v55 = vmax.f32 %v3995_v45, 0.0  ;;  %v6723_v32 = vpop.f32.mrb[20].mxu0  ;;  %6880 = vmatprep.mubr.f32.mxu0 %v3813_v19  ;;  %7060 = vmatprep.subr.bf16.mxu1 %v7059_v9 }
 0x561   :  { %v4010_v21 = vadd.f32 %v6723_v32, %v9520_v50  ;;  %v4004_v34 = vpop.f32.mrb[21].mxu0  ;;  %6881 = vmatmul.mubr.f32.gmra.mrb[126].mxu0 %v3814_v20  ;;  %7062 = vmatpush3.bf16.xpose.msra.mxu1 %v9529_v38 }
 0x562   :  { %v7063_v28 = vpack.c.bf16 %v4562_v44, %v4561_v55  ;;  %v4005_v22 = vadd.f32 %v9520_v50, %v4004_v34  ;;  %5917 = vmatprep.mubr.f32.mxu0 %v9586_v15 }
 0x563   :  { %v4564_v54 = vmax.f32 %v4010_v21, 0.0 }
 0x564   :  { %v4563_v52 = vmax.f32 %v4005_v22, 0.0  ;;  %v6726_v18 = vpop.f32.mrb[22].mxu0  ;;  %7064 = vmatprep.subr.bf16.mxu1 %v7063_v28 }
 0x565   :  { %v4020_v62 = vadd.f32 %v6726_v18, %v9520_v50  ;;  %v4014_v49 = vpop.f32.mrb[23].mxu0 }
 0x566   :  { %v7067_v51 = vpack.c.bf16 %v4564_v54, %v4563_v52  ;;  %v4015_v12 = vadd.f32 %v9520_v50, %v4014_v49 }
 0x567   :  { %v4566_v8 = vmax.f32 %v4020_v62, 0.0 }
 0x568   :  { %v4565_v6 = vmax.f32 %v4015_v12, 0.0  ;;  %v6729_v38 = vpop.f32.mrb[24].mxu0 }
 0x569   :  { %v4030_v11 = vadd.f32 %v6729_v38, %v9520_v50  ;;  %v4024_v3 = vpop.f32.mrb[25].mxu0  ;;  %7066 = vmatpush3.bf16.xpose.msra.mxu1 %v9540_v5 }
 0x56a   :  { %v7071_v26 = vpack.c.bf16 %v4566_v8, %v4565_v6  ;;  %v4025_v29 = vadd.f32 %v9520_v50, %v4024_v3  ;;  %7068 = vmatprep.subr.bf16.mxu1 %v7067_v51 }
 0x56b   :  { %v4568_v23 = vmax.f32 %v4030_v11, 0.0 }
 0x56c   :  { %v4567_v57 = vmax.f32 %v4025_v29, 0.0  ;;  %v6732_v33 = vpop.f32.mrb[26].mxu0 }
 0x56d   :  { %v4040_v27 = vadd.f32 %v6732_v33, %v9520_v50  ;;  %v4034_v0 = vpop.f32.mrb[27].mxu0 }
 0x56e   :  { %v7075_v13 = vpack.c.bf16 %v4568_v23, %v4567_v57  ;;  %v4035_v1 = vadd.f32 %v9520_v50, %v4034_v0 }
 0x56f   :  { %v4570_v46 = vmax.f32 %v4040_v27, 0.0 }
 0x570   :  { %v4569_v42 = vmax.f32 %v4035_v1, 0.0  ;;  %v6735_v43 = vpop.f32.mrb[28].mxu0 }
 0x571   :  { %v4050_v63 = vadd.f32 %v6735_v43, %v9520_v50  ;;  %v4044_v39 = vpop.f32.mrb[29].mxu0  ;;  %7070 = vmatpush3.bf16.xpose.msra.mxu1 %v9546_v36 }
 0x572   :  { %v7079_v5 = vpack.c.bf16 %v4570_v46, %v4569_v42  ;;  %v4045_v16 = vadd.f32 %v9520_v50, %v4044_v39  ;;  %7072 = vmatprep.subr.bf16.mxu1 %v7071_v26 }
 0x573   :  { %v4572_v10 = vmax.f32 %v4050_v63, 0.0 }
 0x574   :  { %v4571_v37 = vmax.f32 %v4045_v16, 0.0  ;;  %v6738_v60 = vpop.f32.mrb[30].mxu0 }
 0x575   :  { %v4060_v30 = vadd.f32 %v6738_v60, %v9520_v50  ;;  %v4054_v53 = vpop.f32.mrb[31].mxu0 }
 0x576   :  { %v7083_v17 = vpack.c.bf16 %v4572_v10, %v4571_v37  ;;  %v4055_v7 = vadd.f32 %v9520_v50, %v4054_v53 }
 0x577   :  { %v4574_v47 = vmax.f32 %v4060_v30, 0.0 }
 0x578   :  { %v4573_v56 = vmax.f32 %v4055_v7, 0.0  ;;  %v6741_v41 = vpop.f32.mrb[32].mxu0 }
 0x579   :  { %v4070_v4 = vadd.f32 %v6741_v41, %v9520_v50  ;;  %v4064_v24 = vpop.f32.mrb[33].mxu0  ;;  %7074 = vmatpush3.bf16.xpose.msra.mxu1 %v9552_v61 }
 0x57a   :  { %v7087_v36 = vpack.c.bf16 %v4574_v47, %v4573_v56  ;;  %v4065_v40 = vadd.f32 %v9520_v50, %v4064_v24  ;;  %7076 = vmatprep.subr.bf16.mxu1 %v7075_v13 }
 0x57b   :  { %v4576_v35 = vmax.f32 %v4070_v4, 0.0 }
 0x57c   :  { %v4575_v31 = vmax.f32 %v4065_v40, 0.0  ;;  %v6744_v48 = vpop.f32.mrb[34].mxu0 }
 0x57d   :  { %v4080_v25 = vadd.f32 %v6744_v48, %v9520_v50  ;;  %v4074_v9 = vpop.f32.mrb[35].mxu0 }
 0x57e   :  { %v9609_v19 = vpack.c.bf16 %v4576_v35, %v4575_v31  ;;  %v4075_v45 = vadd.f32 %v9520_v50, %v4074_v9 }
 0x57f   :  { %v4578_v20 = vmax.f32 %v4080_v25, 0.0 }
 0x580   :  { %v4577_v44 = vmax.f32 %v4075_v45, 0.0  ;;  %v6747_v55 = vpop.f32.mrb[36].mxu0 }
 0x581   :  { %v4090_v32 = vadd.f32 %v6747_v55, %v9520_v50  ;;  %v4084_v61 = vpop.f32.mrb[37].mxu0  ;;  %7078 = vmatpush3.bf16.xpose.msra.mxu1 %v9558_v2 }
 0x582   :  { %v9614_v21 = vpack.c.bf16 %v4578_v20, %v4577_v44  ;;  %v4085_v34 = vadd.f32 %v9520_v50, %v4084_v61  ;;  %7080 = vmatprep.subr.bf16.mxu1 %v7079_v5 }
 0x583   :  { %v4580_v28 = vmax.f32 %v4090_v32, 0.0 }
 0x584   :  { %v4579_v22 = vmax.f32 %v4085_v34, 0.0  ;;  %v6750_v54 = vpop.f32.mrb[38].mxu0 }
 0x585   :  { %v4100_v52 = vadd.f32 %v6750_v54, %v9520_v50  ;;  %v4094_v18 = vpop.f32.mrb[39].mxu0 }
 0x586   :  { %v9618_v62 = vpack.c.bf16 %v4580_v28, %v4579_v22  ;;  %v4095_v49 = vadd.f32 %v9520_v50, %v4094_v18 }
 0x587   :  { %v4582_v51 = vmax.f32 %v4100_v52, 0.0 }
 0x588   :  { %v4581_v12 = vmax.f32 %v4095_v49, 0.0  ;;  %v6753_v8 = vpop.f32.mrb[40].mxu0 }
 0x589   :  { %v4110_v2 = vadd.f32 %v6753_v8, %v9520_v50  ;;  %v4104_v6 = vpop.f32.mrb[41].mxu0  ;;  %7082 = vmatpush3.bf16.xpose.msra.mxu1 %v9564_v59 }
 0x58a   :  { %v9623_v38 = vpack.c.bf16 %v4582_v51, %v4581_v12  ;;  %v4105_v11 = vadd.f32 %v9520_v50, %v4104_v6  ;;  %7084 = vmatprep.subr.bf16.mxu1 %v7083_v17 }
 0x58b   :  { %v4584_v3 = vmax.f32 %v4110_v2, 0.0 }
 0x58c   :  { %v4583_v26 = vmax.f32 %v4105_v11, 0.0  ;;  %v6756_v29 = vpop.f32.mrb[42].mxu0 }
 0x58d   :  { %v4120_v23 = vadd.f32 %v6756_v29, %v9520_v50  ;;  %v4114_v57 = vpop.f32.mrb[43].mxu0 }
 0x58e   :  { %v9627_v33 = vpack.c.bf16 %v4584_v3, %v4583_v26  ;;  %v4115_v27 = vadd.f32 %v9520_v50, %v4114_v57 }
 0x58f   :  { %v4586_v0 = vmax.f32 %v4120_v23, 0.0 }
 0x590   :  { %v4585_v13 = vmax.f32 %v4115_v27, 0.0  ;;  %v6759_v1 = vpop.f32.mrb[44].mxu0 }
 0x591   :  { %v4130_v59 = vadd.f32 %v6759_v1, %v9520_v50  ;;  %v4124_v46 = vpop.f32.mrb[45].mxu0  ;;  %7086 = vmatpush3.bf16.xpose.msra.mxu1 %v9570_v14 }
 0x592   :  { %v9632_v42 = vpack.c.bf16 %v4586_v0, %v4585_v13  ;;  %v4125_v43 = vadd.f32 %v9520_v50, %v4124_v46  ;;  %7088 = vmatprep.subr.bf16.mxu1 %v7087_v36 }
 0x593   :  { %v4588_v63 = vmax.f32 %v4130_v59, 0.0 }
 0x594   :  { %v4587_v39 = vmax.f32 %v4125_v43, 0.0  ;;  %v6762_v5 = vpop.f32.mrb[46].mxu0 }
 0x595   :  { %v4140_v16 = vadd.f32 %v6762_v5, %v9520_v50  ;;  %v4134_v10 = vpop.f32.mrb[47].mxu0 }
 0x596   :  { %v9636_v37 = vpack.c.bf16 %v4588_v63, %v4587_v39  ;;  %v4135_v60 = vadd.f32 %v9520_v50, %v4134_v10 }
 0x597   :  { %v4590_v30 = vmax.f32 %v4140_v16, 0.0 }
 0x598   :  { %v4589_v53 = vmax.f32 %v4135_v60, 0.0  ;;  %v6765_v17 = vpop.f32.mrb[48].mxu0 }
 0x599   :  { %v4150_v14 = vadd.f32 %v6765_v17, %v9520_v50  ;;  %v4144_v7 = vpop.f32.mrb[49].mxu0  ;;  %7090 = vmatpush3.bf16.xpose.msra.mxu1 %v9576_v58 }
 0x59a   :  { %v9641_v47 = vpack.c.bf16 %v4590_v30, %v4589_v53  ;;  %v4145_v56 = vadd.f32 %v9520_v50, %v4144_v7 }
 0x59b   :  { %v4592_v41 = vmax.f32 %v4150_v14, 0.0 }
 0x59c   :  { %v4591_v4 = vmax.f32 %v4145_v56, 0.0  ;;  %v6768_v24 = vpop.f32.mrb[50].mxu0 }
 0x59d   :  { %v4160_v36 = vadd.f32 %v6768_v24, %v9520_v50  ;;  %v4154_v40 = vpop.f32.mrb[51].mxu0 }
 0x59e   :  { %v7091_v35 = vpack.c.bf16 %v4592_v41, %v4591_v4  ;;  %v4155_v31 = vadd.f32 %v9520_v50, %v4154_v40 }
 0x59f   :  { %v4594_v48 = vmax.f32 %v4160_v36, 0.0 }
 0x5a0   :  { %v4593_v25 = vmax.f32 %v4155_v31, 0.0  ;;  %v6771_v9 = vpop.f32.mrb[52].mxu0  ;;  %7092 = vmatprep.subr.bf16.mxu0 %v7091_v35  ;;  %5884 = vmatmul.mubr.f32.vlgmr.msra.gmra.mrb[128].mxu1 %v9586_v15 }
 0x5a1   :  { %v4170_v58 = vadd.f32 %v6771_v9, %v9520_v50  ;;  %v4164_v45 = vpop.f32.mrb[53].mxu0  ;;  %7094 = vmatpush3.bf16.xpose.msra.mxu0 %v9609_v19  ;;  %5951 = vmatprep.mubr.f32.mxu1 %v9586_v15 }
 0x5a2   :  { %v7095_v20 = vpack.c.bf16 %v4594_v48, %v4593_v25  ;;  %v4165_v44 = vadd.f32 %v9520_v50, %v4164_v45 }
 0x5a3   :  { %v4596_v55 = vmax.f32 %v4170_v58, 0.0 }
 0x5a4   :  { %v4595_v32 = vmax.f32 %v4165_v44, 0.0  ;;  %v6774_v61 = vpop.f32.mrb[54].mxu0  ;;  %7096 = vmatprep.subr.bf16.mxu0 %v7095_v20 }
 0x5a5   :  { %v4180_v34 = vadd.f32 %v6774_v61, %v9520_v50  ;;  %v4174_v28 = vpop.f32.mrb[55].mxu0 }
 0x5a6   :  { %v7099_v22 = vpack.c.bf16 %v4596_v55, %v4595_v32  ;;  %v4175_v54 = vadd.f32 %v9520_v50, %v4174_v28 }
 0x5a7   :  { %v4598_v52 = vmax.f32 %v4180_v34, 0.0 }
 0x5a8   :  { %v4597_v18 = vmax.f32 %v4175_v54, 0.0  ;;  %v6777_v49 = vpop.f32.mrb[56].mxu0 }
 0x5a9   :  { %v4190_v19 = vadd.f32 %v6777_v49, %v9520_v50  ;;  %v4184_v51 = vpop.f32.mrb[57].mxu0  ;;  %7098 = vmatpush3.bf16.xpose.msra.mxu0 %v9614_v21 }
 0x5aa   :  { %v7103_v12 = vpack.c.bf16 %v4598_v52, %v4597_v18  ;;  %v4185_v8 = vadd.f32 %v9520_v50, %v4184_v51  ;;  %7100 = vmatprep.subr.bf16.mxu0 %v7099_v22 }
 0x5ab   :  { %v4600_v2 = vmax.f32 %v4190_v19, 0.0 }
 0x5ac   :  { %v4599_v6 = vmax.f32 %v4185_v8, 0.0  ;;  %v6780_v11 = vpop.f32.mrb[58].mxu0 }
 0x5ad   :  { %v4200_v3 = vadd.f32 %v6780_v11, %v9520_v50  ;;  %v4194_v26 = vpop.f32.mrb[59].mxu0 }
 0x5ae   :  { %v7107_v29 = vpack.c.bf16 %v4600_v2, %v4599_v6  ;;  %v4195_v23 = vadd.f32 %v9520_v50, %v4194_v26 }
 0x5af   :  { %v4602_v57 = vmax.f32 %v4200_v3, 0.0 }
 0x5b0   :  { %v4601_v27 = vmax.f32 %v4195_v23, 0.0  ;;  %v6783_v0 = vpop.f32.mrb[60].mxu0 }
 0x5b1   :  { %v4210_v13 = vadd.f32 %v6783_v0, %v9520_v50  ;;  %v4204_v1 = vpop.f32.mrb[61].mxu0  ;;  %7102 = vmatpush3.bf16.xpose.msra.mxu0 %v9618_v62 }
 0x5b2   :  { %v7111_v21 = vpack.c.bf16 %v4602_v57, %v4601_v27  ;;  %v4205_v59 = vadd.f32 %v9520_v50, %v4204_v1  ;;  %7104 = vmatprep.subr.bf16.mxu0 %v7103_v12 }
 0x5b3   :  { %v4604_v46 = vmax.f32 %v4210_v13, 0.0 }
 0x5b4   :  { %v4603_v43 = vmax.f32 %v4205_v59, 0.0  ;;  %v6786_v63 = vpop.f32.mrb[62].mxu0 }
 0x5b5   :  { %v4220_v39 = vadd.f32 %v6786_v63, %v9520_v50  ;;  %v4214_v5 = vpop.f32.mrb[63].mxu0  ;;  %v4672_v63 = vld [vmem:[#allocation2] sm:$0x1] }
 0x5b6   :  { %v7115_v16 = vpack.c.bf16 %v4604_v46, %v4603_v43  ;;  %v4215_v10 = vadd.f32 %v9520_v50, %v4214_v5  ;;  %v7542_v43 = vmov 0  }
 0x5b7   :  { %v4606_v60 = vmax.f32 %v4220_v39, 0.0  ;;  %7199 = vset.pattern.permute.xlu0 %v7542_v43 }
 0x5b8   :  { %v4605_v30 = vmax.f32 %v4215_v10, 0.0  ;;  %v6789_v53 = vpop.f32.mrb[64].mxu0  ;;  %4675 = vperm.xlu0 %7199, %v4672_v63  }
 0x5b9   :  { %v4230_v17 = vadd.f32 %v6789_v53, %v9520_v50  ;;  %v4224_v14 = vpop.f32.mrb[65].mxu0  ;;  %7106 = vmatpush3.bf16.xpose.msra.mxu0 %v9623_v38 }
 0x5ba   :  { %v7119_v62 = vpack.c.bf16 %v4606_v60, %v4605_v30  ;;  %v4225_v7 = vadd.f32 %v9520_v50, %v4224_v14  ;;  %7108 = vmatprep.subr.bf16.mxu0 %v7107_v29 }
 0x5bb   :  { %v4608_v56 = vmax.f32 %v4230_v17, 0.0 }
 0x5bc   :  { %v4607_v41 = vmax.f32 %v4225_v7, 0.0  ;;  %v6792_v4 = vpop.f32.mrb[66].mxu0 }
 0x5bd   :  { %v4240_v24 = vadd.f32 %v6792_v4, %v9520_v50  ;;  %v4234_v36 = vpop.f32.mrb[67].mxu0 }
 0x5be   :  { %v9667_v40 = vpack.c.bf16 %v4608_v56, %v4607_v41  ;;  %v4235_v35 = vadd.f32 %v9520_v50, %v4234_v36 }
 0x5bf   :  { %v4610_v31 = vmax.f32 %v4240_v24, 0.0 }
 0x5c0   :  { %v4609_v48 = vmax.f32 %v4235_v35, 0.0  ;;  %v6795_v25 = vpop.f32.mrb[68].mxu0 }
 0x5c1   :  { %v4250_v9 = vadd.f32 %v6795_v25, %v9520_v50  ;;  %v4244_v38 = vpop.f32.mrb[69].mxu0  ;;  %7110 = vmatpush3.bf16.xpose.msra.mxu0 %v9627_v33 }
 0x5c2   :  { %v9672_v58 = vpack.c.bf16 %v4610_v31, %v4609_v48  ;;  %v4245_v45 = vadd.f32 %v9520_v50, %v4244_v38  ;;  %7112 = vmatprep.subr.bf16.mxu0 %v7111_v21 }
 0x5c3   :  { %v4612_v20 = vmax.f32 %v4250_v9, 0.0 }
 0x5c4   :  { %v4611_v44 = vmax.f32 %v4245_v45, 0.0  ;;  %v6798_v55 = vpop.f32.mrb[70].mxu0 }
 0x5c5   :  { %v4260_v32 = vadd.f32 %v6798_v55, %v9520_v50  ;;  %v4254_v61 = vpop.f32.mrb[71].mxu0 }
 0x5c6   :  { %v9676_v34 = vpack.c.bf16 %v4612_v20, %v4611_v44  ;;  %v4255_v28 = vadd.f32 %v9520_v50, %v4254_v61 }
 0x5c7   :  { %v4614_v22 = vmax.f32 %v4260_v32, 0.0 }
 0x5c8   :  { %v4613_v54 = vmax.f32 %v4255_v28, 0.0  ;;  %v6801_v52 = vpop.f32.mrb[72].mxu0 }
 0x5c9   :  { %v4270_v33 = vadd.f32 %v6801_v52, %v9520_v50  ;;  %v4264_v18 = vpop.f32.mrb[73].mxu0  ;;  %7114 = vmatpush3.bf16.xpose.msra.mxu0 %v9632_v42 }
 0x5ca   :  { %v9681_v49 = vpack.c.bf16 %v4614_v22, %v4613_v54  ;;  %v4265_v19 = vadd.f32 %v9520_v50, %v4264_v18  ;;  %7116 = vmatprep.subr.bf16.mxu0 %v7115_v16 }
 0x5cb   :  { %v4616_v51 = vmax.f32 %v4270_v33, 0.0 }
 0x5cc   :  { %v4615_v12 = vmax.f32 %v4265_v19, 0.0  ;;  %v6804_v8 = vpop.f32.mrb[74].mxu0 }
 0x5cd   :  { %v4280_v2 = vadd.f32 %v6804_v8, %v9520_v50  ;;  %v4274_v6 = vpop.f32.mrb[75].mxu0 }
 0x5ce   :  { %v9685_v11 = vpack.c.bf16 %v4616_v51, %v4615_v12  ;;  %v4275_v3 = vadd.f32 %v9520_v50, %v4274_v6 }
 0x5cf   :  { %v4618_v26 = vmax.f32 %v4280_v2, 0.0 }
 0x5d0   :  { %v4617_v29 = vmax.f32 %v4275_v3, 0.0  ;;  %v6807_v23 = vpop.f32.mrb[76].mxu0 }
 0x5d1   :  { %v4290_v42 = vadd.f32 %v6807_v23, %v9520_v50  ;;  %v4284_v57 = vpop.f32.mrb[77].mxu0  ;;  %7118 = vmatpush3.bf16.xpose.msra.mxu0 %v9636_v37 }
 0x5d2   :  { %v9690_v27 = vpack.c.bf16 %v4618_v26, %v4617_v29  ;;  %v4285_v0 = vadd.f32 %v9520_v50, %v4284_v57  ;;  %7120 = vmatprep.subr.bf16.mxu0 %v7119_v62 }
 0x5d3   :  { %v4620_v13 = vmax.f32 %v4290_v42, 0.0 }
 0x5d4   :  { %v4619_v1 = vmax.f32 %v4285_v0, 0.0  ;;  %v6810_v21 = vpop.f32.mrb[78].mxu0 }
 0x5d5   :  { %v4300_v59 = vadd.f32 %v6810_v21, %v9520_v50  ;;  %v4294_v46 = vpop.f32.mrb[79].mxu0 }
 0x5d6   :  { %v9694_v39 = vpack.c.bf16 %v4620_v13, %v4619_v1  ;;  %v4295_v5 = vadd.f32 %v9520_v50, %v4294_v46 }
 0x5d7   :  { %v4622_v37 = vmax.f32 %v4300_v59, 0.0 }
 0x5d8   :  { %v4621_v16 = vmax.f32 %v4295_v5, 0.0  ;;  %v6813_v10 = vpop.f32.mrb[80].mxu0 }
 0x5d9   :  { %v4310_v60 = vadd.f32 %v6813_v10, %v9520_v50  ;;  %v4304_v30 = vpop.f32.mrb[81].mxu0  ;;  %7122 = vmatpush3.bf16.xpose.msra.mxu0 %v9641_v47 }
 0x5da   :  { %v9699_v53 = vpack.c.bf16 %v4622_v37, %v4621_v16  ;;  %v4305_v17 = vadd.f32 %v9520_v50, %v4304_v30 }
 0x5db   :  { %v4624_v14 = vmax.f32 %v4310_v60, 0.0 }
 0x5dc   :  { %v4623_v62 = vmax.f32 %v4305_v17, 0.0  ;;  %v6816_v7 = vpop.f32.mrb[82].mxu0 }
 0x5dd   :  { %v4320_v56 = vadd.f32 %v6816_v7, %v9520_v50  ;;  %v4314_v41 = vpop.f32.mrb[83].mxu0 }
 0x5de   :  { %v7123_v4 = vpack.c.bf16 %v4624_v14, %v4623_v62  ;;  %v4315_v24 = vadd.f32 %v9520_v50, %v4314_v41 }
 0x5df   :  { %v4626_v36 = vmax.f32 %v4320_v56, 0.0 }
 0x5e0   :  { %v4625_v35 = vmax.f32 %v4315_v24, 0.0  ;;  %v6819_v31 = vpop.f32.mrb[84].mxu0  ;;  %7124 = vmatprep.subr.bf16.mxu1 %v7123_v4  ;;  %5918 = vmatmul.mubr.f32.vlgmr.msra.gmra.mrb[128].mxu0 %v9586_v15 }
 0x5e1   :  { %v4330_v47 = vadd.f32 %v6819_v31, %v9520_v50  ;;  %v4324_v48 = vpop.f32.mrb[85].mxu0  ;;  %7126 = vmatpush3.bf16.xpose.msra.mxu1 %v9667_v40  ;;  %5985 = vmatprep.mubr.f32.mxu0 %v9586_v15 }
 0x5e2   :  { %v7127_v25 = vpack.c.bf16 %v4626_v36, %v4625_v35  ;;  %v4325_v9 = vadd.f32 %v9520_v50, %v4324_v48 }
 0x5e3   :  { %v4628_v38 = vmax.f32 %v4330_v47, 0.0 }
 0x5e4   :  { %v4627_v45 = vmax.f32 %v4325_v9, 0.0  ;;  %v6822_v20 = vpop.f32.mrb[86].mxu0  ;;  %7128 = vmatprep.subr.bf16.mxu1 %v7127_v25 }
 0x5e5   :  { %v4340_v44 = vadd.f32 %v6822_v20, %v9520_v50  ;;  %v4334_v55 = vpop.f32.mrb[87].mxu0 }
 0x5e6   :  { %v7131_v32 = vpack.c.bf16 %v4628_v38, %v4627_v45  ;;  %v4335_v61 = vadd.f32 %v9520_v50, %v4334_v55 }
 0x5e7   :  { %v4630_v28 = vmax.f32 %v4340_v44, 0.0 }
 0x5e8   :  { %v4629_v22 = vmax.f32 %v4335_v61, 0.0  ;;  %v6825_v54 = vpop.f32.mrb[88].mxu0 }
 0x5e9   :  { %v4350_v40 = vadd.f32 %v6825_v54, %v9520_v50  ;;  %v4344_v52 = vpop.f32.mrb[89].mxu0  ;;  %7130 = vmatpush3.bf16.xpose.msra.mxu1 %v9672_v58 }
 0x5ea   :  { %v7135_v33 = vpack.c.bf16 %v4630_v28, %v4629_v22  ;;  %v4345_v18 = vadd.f32 %v9520_v50, %v4344_v52  ;;  %7132 = vmatprep.subr.bf16.mxu1 %v7131_v32 }
 0x5eb   :  { %v4632_v19 = vmax.f32 %v4350_v40, 0.0 }
 0x5ec   :  { %v4631_v51 = vmax.f32 %v4345_v18, 0.0  ;;  %v6828_v12 = vpop.f32.mrb[90].mxu0 }
 0x5ed   :  { %v4360_v8 = vadd.f32 %v6828_v12, %v9520_v50  ;;  %v4354_v2 = vpop.f32.mrb[91].mxu0 }
 0x5ee   :  { %v7139_v6 = vpack.c.bf16 %v4632_v19, %v4631_v51  ;;  %v4355_v3 = vadd.f32 %v9520_v50, %v4354_v2 }
 0x5ef   :  { %v4634_v26 = vmax.f32 %v4360_v8, 0.0  ;;  %v9748_v8 = vld [vmem:[%s9865_s9] ss:$0 sm:$0xff]  ;;  %s7544_s9 = smov [#allocation14]  }
 0x5f0   :  { %v4633_v29 = vmax.f32 %v4355_v3, 0.0  ;;  %v6831_v23 = vpop.f32.mrb[92].mxu0  ;;  %s5259_s24 = sshll.u32 %s7544_s9, 4  ;;  %s5260_s24 = int_to_ptr.vmem [resolvable:$true] %s5259_s24 }
 0x5f1   :  { %v4370_v42 = vadd.f32 %v6831_v23, %v9520_v50  ;;  %v4364_v57 = vpop.f32.mrb[93].mxu0  ;;  %7134 = vmatpush3.bf16.xpose.msra.mxu1 %v9676_v34  ;;  %s7501_s30 = scalar_lea.vmem %s5260_s24, 256  ;;  %p7506_p7 = scmp.lt.s32.totalorder %s5260_s24, %s5260_s24 }
 0x5f2   :  { %v7143_v58 = vpack.c.bf16 %v4634_v26, %v4633_v29  ;;  %v4365_v0 = vadd.f32 %v9520_v50, %v4364_v57  ;;  %7136 = vmatprep.subr.bf16.mxu1 %v7135_v33  ;;  %p7502_p6 = scmp.ne.s32.totalorder %s5260_s24, %s7501_s30  ;;  %p7507_p8 = scmp.lt.s32.totalorder %s7501_s30, %s7501_s30 }
 0x5f3   :  { %v4636_v13 = vmax.f32 %v4370_v42, 0.0 }
 0x5f4   :  { %v4635_v1 = vmax.f32 %v4365_v0, 0.0  ;;  %v6834_v21 = vpop.f32.mrb[94].mxu0  ;;  %p7508_p9 = por %p7507_p8, %p7506_p7 }
 0x5f5   :  { %v4380_v59 = vadd.f32 %v6834_v21, %v9520_v50  ;;  %v4374_v46 = vpop.f32.mrb[95].mxu0 }
 0x5f6   :  { %v7147_v43 = vpack.c.bf16 %v4636_v13, %v4635_v1  ;;  %v4375_v63 = vadd.f32 %v9520_v50, %v4374_v46  ;;  %p7509_p10 = pnand %p7508_p9, %p7502_p6 }
 0x5f7   :  { %v4638_v5 = vmax.f32 %v4380_v59, 0.0 }
 0x5f8   :  { %v4637_v37 = vmax.f32 %v4375_v63, 0.0  ;;  %v6837_v16 = vpop.f32.mrb[96].mxu0 }
 0x5f9   :  { %v4390_v10 = vadd.f32 %v6837_v16, %v9520_v50  ;;  %v4384_v60 = vpop.f32.mrb[97].mxu0  ;;  %7138 = vmatpush3.bf16.xpose.msra.mxu1 %v9681_v49 }
 0x5fa   :  { %v7151_v34 = vpack.c.bf16 %v4638_v5, %v4637_v37  ;;  %v4385_v30 = vadd.f32 %v9520_v50, %v4384_v60  ;;  %7140 = vmatprep.subr.bf16.mxu1 %v7139_v6 }
 0x5fb   :  { %v4640_v17 = vmax.f32 %v4390_v10, 0.0 }
 0x5fc   :  { %v4639_v14 = vmax.f32 %v4385_v30, 0.0  ;;  %v6840_v62 = vpop.f32.mrb[98].mxu0 }
 0x5fd   :  { %v4400_v7 = vadd.f32 %v6840_v62, %v9520_v50  ;;  %v4394_v56 = vpop.f32.mrb[99].mxu0 }
 0x5fe   :  { %v9725_v41 = vpack.c.bf16 %v4640_v17, %v4639_v14  ;;  %v4395_v4 = vadd.f32 %v9520_v50, %v4394_v56 }
 0x5ff   :  { %v4642_v24 = vmax.f32 %v4400_v7, 0.0 }
 0x600   :  { %v4641_v36 = vmax.f32 %v4395_v4, 0.0  ;;  %v6843_v35 = vpop.f32.mrb[100].mxu0 }
 0x601   :  { %v4410_v31 = vadd.f32 %v6843_v35, %v9520_v50  ;;  %v4404_v49 = vpop.f32.mrb[101].mxu0  ;;  %7142 = vmatpush3.bf16.xpose.msra.mxu1 %v9685_v11 }
 0x602   :  { %v9730_v47 = vpack.c.bf16 %v4642_v24, %v4641_v36  ;;  %v4405_v48 = vadd.f32 %v9520_v50, %v4404_v49  ;;  %7144 = vmatprep.subr.bf16.mxu1 %v7143_v58 }
 0x603   :  { %v4644_v25 = vmax.f32 %v4410_v31, 0.0 }
 0x604   :  { %v4643_v9 = vmax.f32 %v4405_v48, 0.0  ;;  %v6846_v38 = vpop.f32.mrb[102].mxu0 }
 0x605   :  { %v4420_v45 = vadd.f32 %v6846_v38, %v9520_v50  ;;  %v4414_v20 = vpop.f32.mrb[103].mxu0 }
 0x606   :  { %v9734_v44 = vpack.c.bf16 %v4644_v25, %v4643_v9  ;;  %v4415_v55 = vadd.f32 %v9520_v50, %v4414_v20 }
 0x607   :  { %v4646_v32 = vmax.f32 %v4420_v45, 0.0 }
 0x608   :  { %v4645_v61 = vmax.f32 %v4415_v55, 0.0  ;;  %v6849_v28 = vpop.f32.mrb[104].mxu0 }
 0x609   :  { %v4430_v11 = vadd.f32 %v6849_v28, %v9520_v50  ;;  %v4424_v22 = vpop.f32.mrb[105].mxu0  ;;  %7146 = vmatpush3.bf16.xpose.msra.mxu1 %v9690_v27 }
 0x60a   :  { %v9739_v54 = vpack.c.bf16 %v4646_v32, %v4645_v61  ;;  %v4425_v40 = vadd.f32 %v9520_v50, %v4424_v22  ;;  %7148 = vmatprep.subr.bf16.mxu1 %v7147_v43 }
 0x60b   :  { %v4648_v52 = vmax.f32 %v4430_v11, 0.0 }
 0x60c   :  { %v4647_v33 = vmax.f32 %v4425_v40, 0.0  ;;  %v6852_v18 = vpop.f32.mrb[106].mxu0 }
 0x60d   :  { %v4440_v19 = vadd.f32 %v6852_v18, %v9520_v50  ;;  %v4434_v51 = vpop.f32.mrb[107].mxu0 }
 0x60e   :  { %v9743_v12 = vpack.c.bf16 %v4648_v52, %v4647_v33  ;;  %v4435_v27 = vadd.f32 %v9748_v8, %v4434_v51 }
 0x60f   :  { %v4650_v2 = vmax.f32 %v4440_v19, 0.0 }
 0x610   :  { %v4649_v6 = vmax.f32 %v4435_v27, 0.0  ;;  %v6855_v3 = vpop.f32.mrb[108].mxu0 }
 0x611   :  { %v4450_v26 = vadd.f32 %v9748_v8, %v6855_v3  ;;  %v4444_v29 = vpop.f32.mrb[109].mxu0  ;;  %7150 = vmatpush3.bf16.xpose.msra.mxu1 %v9694_v39 }
 0x612   :  { %v9753_v23 = vpack.c.bf16 %v4650_v2, %v4649_v6  ;;  %v4445_v50 = vadd.f32 %v9748_v8, %v4444_v29  ;;  %7152 = vmatprep.subr.bf16.mxu1 %v7151_v34 }
 0x613   :  { %v4652_v42 = vmax.f32 %v4450_v26, 0.0 }
 0x614   :  { %v4651_v57 = vmax.f32 %v4445_v50, 0.0  ;;  %v6858_v58 = vpop.f32.mrb[110].mxu0 }
 0x615   :  { %v4460_v0 = vadd.f32 %v9748_v8, %v6858_v58  ;;  %v4454_v13 = vpop.f32.mrb[111].mxu0 }
 0x616   :  { %v9757_v1 = vpack.c.bf16 %v4652_v42, %v4651_v57  ;;  %v4455_v21 = vadd.f32 %v9748_v8, %v4454_v13 }
 0x617   :  { %v4654_v59 = vmax.f32 %v4460_v0, 0.0 }
 0x618   :  { %v4653_v46 = vmax.f32 %v4455_v21, 0.0  ;;  %v6861_v43 = vpop.f32.mrb[112].mxu0 }
 0x619   :  { %v4470_v39 = vadd.f32 %v9748_v8, %v6861_v43  ;;  %v4464_v63 = vpop.f32.mrb[113].mxu0  ;;  %7154 = vmatpush3.bf16.xpose.msra.mxu1 %v9699_v53 }
 0x61a   :  { %v9762_v5 = vpack.c.bf16 %v4654_v59, %v4653_v46  ;;  %v4465_v37 = vadd.f32 %v9748_v8, %v4464_v63 }
 0x61b   :  { %v4656_v16 = vmax.f32 %v4470_v39, 0.0 }
 0x61c   :  { %v4655_v10 = vmax.f32 %v4465_v37, 0.0  ;;  %v6864_v60 = vpop.f32.mrb[114].mxu0 }
 0x61d   :  { %v4480_v34 = vadd.f32 %v9748_v8, %v6864_v60  ;;  %v4474_v30 = vpop.f32.mrb[115].mxu0 }
 0x61e   :  { %v7155_v17 = vpack.c.bf16 %v4656_v16, %v4655_v10  ;;  %v4475_v14 = vadd.f32 %v9748_v8, %v4474_v30 }
 0x61f   :  { %v4658_v62 = vmax.f32 %v4480_v34, 0.0 }
 0x620   :  { %v4657_v7 = vmax.f32 %v4475_v14, 0.0  ;;  %v6867_v56 = vpop.f32.mrb[116].mxu0  ;;  %7156 = vmatprep.subr.bf16.mxu0 %v7155_v17  ;;  %5952 = vmatmul.mubr.f32.vlgmr.msra.gmra.mrb[130].mxu1 %v9586_v15 }
 0x621   :  { %v4490_v53 = vadd.f32 %v9748_v8, %v6867_v56  ;;  %v4484_v4 = vpop.f32.mrb[117].mxu0  ;;  %7158 = vmatpush3.bf16.xpose.msra.mxu0 %v9725_v41 }
 0x622   :  { %v7159_v24 = vpack.c.bf16 %v4658_v62, %v4657_v7  ;;  %v4485_v36 = vadd.f32 %v9748_v8, %v4484_v4 }
 0x623   :  { %v4660_v35 = vmax.f32 %v4490_v53, 0.0 }
 0x624   :  { %v4659_v31 = vmax.f32 %v4485_v36, 0.0  ;;  %v6870_v49 = vpop.f32.mrb[118].mxu0  ;;  %7160 = vmatprep.subr.bf16.mxu0 %v7159_v24 }
 0x625   :  { %v4500_v48 = vadd.f32 %v9748_v8, %v6870_v49  ;;  %v4494_v25 = vpop.f32.mrb[119].mxu0 }
 0x626   :  { %v7163_v9 = vpack.c.bf16 %v4660_v35, %v4659_v31  ;;  %v4495_v38 = vadd.f32 %v9748_v8, %v4494_v25 }
 0x627   :  { %v4662_v45 = vmax.f32 %v4500_v48, 0.0 }
 0x628   :  { %v4661_v20 = vmax.f32 %v4495_v38, 0.0  ;;  %v6873_v55 = vpop.f32.mrb[120].mxu0 }
 0x629   :  { %v4510_v32 = vadd.f32 %v9748_v8, %v6873_v55  ;;  %v4504_v61 = vpop.f32.mrb[121].mxu0  ;;  %7162 = vmatpush3.bf16.xpose.msra.mxu0 %v9730_v47 }
 0x62a   :  { %v7167_v41 = vpack.c.bf16 %v4662_v45, %v4661_v20  ;;  %v4505_v28 = vadd.f32 %v9748_v8, %v4504_v61  ;;  %7164 = vmatprep.subr.bf16.mxu0 %v7163_v9 }
 0x62b   :  { %v4664_v11 = vmax.f32 %v4510_v32, 0.0 }
 0x62c   :  { %v4663_v22 = vmax.f32 %v4505_v28, 0.0  ;;  %v6876_v40 = vpop.f32.mrb[122].mxu0 }
 0x62d   :  { %v4520_v52 = vadd.f32 %v9748_v8, %v6876_v40  ;;  %v4514_v33 = vpop.f32.mrb[123].mxu0 }
 0x62e   :  { %v7171_v18 = vpack.c.bf16 %v4664_v11, %v4663_v22  ;;  %v4515_v19 = vadd.f32 %v9748_v8, %v4514_v33 }
 0x62f   :  { %v4666_v51 = vmax.f32 %v4520_v52, 0.0 }
 0x630   :  { %v4665_v27 = vmax.f32 %v4515_v19, 0.0  ;;  %v6879_v2 = vpop.f32.mrb[124].mxu0 }
 0x631   :  { %v4530_v6 = vadd.f32 %v9748_v8, %v6879_v2  ;;  %v4524_v3 = vpop.f32.mrb[125].mxu0  ;;  %7166 = vmatpush3.bf16.xpose.msra.mxu0 %v9734_v44  ;;  %v4678_v44 = vlaneseq }
 0x632   :  { %v7175_v47 = vpack.c.bf16 %v4666_v51, %v4665_v27  ;;  %v4525_v26 = vadd.f32 %v9748_v8, %v4524_v3  ;;  %7168 = vmatprep.subr.bf16.mxu0 %v7167_v41 }
 0x633   :  { %v4668_v29 = vmax.f32 %v4530_v6, 0.0 }
 0x634   :  { %v4667_v50 = vmax.f32 %v4525_v26, 0.0  ;;  %v6882_v42 = vpop.f32.mrb[126].mxu0 }
 0x635   :  { %v4540_v57 = vadd.f32 %v9748_v8, %v6882_v42  ;;  %v4534_v58 = vpop.f32.mrb[127].mxu0 }
 0x636   :  { %v7179_v0 = vpack.c.bf16 %v4668_v29, %v4667_v50  ;;  %v4535_v13 = vadd.f32 %v9748_v8, %v4534_v58  ;;  %v9789_v8 = vshrl.u32 %v4678_v44, 7 }
 0x637   :  { %v4670_v21 = vmax.f32 %v4540_v57, 0.0  ;;  %v4676_v43 = vpop.permute.xlu0 %4675 }
 0x638   :  { %v4669_v59 = vmax.f32 %v4535_v13, 0.0 }
 0x639   :  { %7170 = vmatpush3.bf16.xpose.msra.mxu0 %v9739_v54  ;;  %v4680_v54 = vsub.s32 0, %v9789_v8 }
 0x63a   :  { %v7183_v46 = vpack.c.bf16 %v4670_v21, %v4669_v59  ;;  %7172 = vmatprep.subr.bf16.mxu0 %v7171_v18 }
 0x63b   :  { %v9792_v39 = vrot.slane %v4676_v43, %v4680_v54 }
 0x641   :  { %7174 = vmatpush3.bf16.xpose.msra.mxu0 %v9743_v12 }
 0x642   :  { %7176 = vmatprep.subr.bf16.mxu0 %v7175_v47 }
 0x649   :  { %7178 = vmatpush3.bf16.xpose.msra.mxu0 %v9753_v23 }
 0x64a   :  { %7180 = vmatprep.subr.bf16.mxu0 %v7179_v0 }
 0x651   :  { %7182 = vmatpush3.bf16.xpose.msra.mxu0 %v9757_v1 }
 0x652   :  { %7184 = vmatprep.subr.bf16.mxu0 %v7183_v46 }
 0x659   :  { %7186 = vmatpush3.bf16.xpose.msra.mxu0 %v9762_v5 }
 0x660   :  { %5986 = vmatmul.mubr.f32.vlgmr.msra.gmra.mrb[130].mxu0 %v9586_v15 }
 0x673   :  { %v4748_v12 = vpop.f32.mrb[128].mxu1 }
 0x674   :  { %v4749_v63 = vadd.f32 %v4748_v12, %v9792_v39  ;;  %v4750_v23 = vpop.f32.mrb[129].mxu1 }
 0x675   :  { %v4751_v37 = vadd.f32 %v4750_v23, %v9792_v39 }
 0x676   :  { %v4966_v1 = vsub.f32 0.0, %v4749_v63  ;;  %v5121_v16 = vand.u32 2147483647, %v4749_v63  ;;  %v5113_v9 = vmin.f32 %v4749_v63, 0.0 }
 0x677   :  { %v4967_v10 = vsub.f32 0.0, %v4751_v37  ;;  %v5122_v5 = vand.u32 2147483647, %v4751_v37  ;;  %v5114_v45 = vmin.f32 %v4751_v37, 0.0 }
 0x678   :  { %v4982_v60 = vand.u32 2147483647, %v4966_v1  ;;  %v5129_v15 = vsub.f32 0.0, %v5121_v16  ;;  %v4974_v55 = vmin.f32 %v4966_v1, 0.0 }
 0x679   :  { %v4983_v34 = vand.u32 2147483647, %v4967_v10  ;;  %v5130_v30 = vsub.f32 0.0, %v5122_v5  ;;  %v4975_v41 = vmin.f32 %v4967_v10, 0.0 }
 0x67a   :  { %v4990_v17 = vsub.f32 0.0, %v4982_v60  ;;  %v5137_v14 = vmul.f32 1.442695, %v5129_v15 }
 0x67b   :  { %v4991_v62 = vsub.f32 0.0, %v4983_v34  ;;  %v5139_v7 = vmul.f32 1.442695, %v5130_v30 }
 0x67c   :  { %v4998_v56 = vmul.f32 1.442695, %v4990_v17  ;;  %7200 = vpow2.f32 %v5137_v14  ;;  %v7543_v17 = vmov 1966171168  }
 0x67d   :  { %v5000_v53 = vmul.f32 1.442695, %v4991_v62  ;;  %7202 = vpow2.f32 %v5139_v7  ;;  %v5067_v14 = vunpack.c.l.s4 %v7543_v17 }
 0x67e   :  { %7204 = vpow2.f32 %v4998_v56 }
 0x67f   :  { %7206 = vpow2.f32 %v5000_v53  ;;  %v5068_v56 = vunpack.c.0.s8 %v5067_v14 }
 0x686   :  { %v7201_v4 = vpop.eup %7200 }
 0x687   :  { %v7203_v24 = vpop.eup %7202  ;;  %v5153_v36 = vadd.f32 1.0, %v7201_v4 }
 0x688   :  { %v7205_v35 = vpop.eup %7204  ;;  %v5154_v31 = vadd.f32 1.0, %v7203_v24 }
 0x689   :  { %v7207_v49 = vpop.eup %7206  ;;  %v5014_v48 = vadd.f32 1.0, %v7205_v35  ;;  %7208 = vlog2.f32 %v5153_v36 }
 0x68a   :  { %v5015_v25 = vadd.f32 1.0, %v7207_v49  ;;  %7210 = vlog2.f32 %v5154_v31 }
 0x68b   :  { %7212 = vlog2.f32 %v5014_v48 }
 0x68c   :  { %7214 = vlog2.f32 %v5015_v25 }
 0x693   :  { %v7209_v38 = vpop.eup %7208 }
 0x694   :  { %v7211_v20 = vpop.eup %7210  ;;  %v5162_v32 = vmul.f32 0.6931472, %v7209_v38  ;;  %v9807_v38 = vsub.s32 %v5068_v56, %v9789_v8 }
 0x695   :  { %v7213_v61 = vpop.eup %7212  ;;  %v5164_v28 = vmul.f32 0.6931472, %v7211_v20 }
 0x696   :  { %v7215_v11 = vpop.eup %7214  ;;  %v5023_v22 = vmul.f32 0.6931472, %v7213_v61  ;;  %v5177_v40 = vsub.f32 %v5113_v9, %v5162_v32 }
 0x697   :  { %v5025_v52 = vmul.f32 0.6931472, %v7215_v11  ;;  %v5178_v33 = vsub.f32 %v5114_v45, %v5164_v28 }
 0x698   :  { %v5038_v18 = vsub.f32 %v4974_v55, %v5023_v22  ;;  %v5185_v19 = vmax.f32 %v5177_v40, -23.02585 }
 0x699   :  { %v5039_v51 = vsub.f32 %v4975_v41, %v5025_v52  ;;  %v5186_v27 = vmax.f32 %v5178_v33, -23.02585 }
 0x69a   :  { %v9796_v2 = vmax.f32 %v5038_v18, -23.02585 }
 0x69b   :  { %v9798_v6 = vmax.f32 %v5039_v51, -23.02585  ;;  %v9800_v3 = vcombine.low %v5185_v19, %v5186_v27 }
 0x69d   :  { %v5062_v47 = vcombine.low %v9796_v2, %v9798_v6  ;;  %v5211_v40 = vrot.slane %v9800_v3, %v9807_v38 }
 0x69f   :  { %v9812_v33 = vrot.slane %v5062_v47, %v9807_v38 }
 0x6b3   :  { %v4819_v26 = vpop.f32.mrb[128].mxu0 }
 0x6b4   :  { %v4820_v29 = vadd.f32 %v4819_v26, %v9792_v39  ;;  %v4821_v50 = vpop.f32.mrb[129].mxu0 }
 0x6b5   :  { %v4822_v42 = vadd.f32 %v4821_v50, %v9792_v39 }
 0x6b6   :  { %v4968_v57 = vsub.f32 0.0, %v4820_v29  ;;  %v5123_v58 = vand.u32 2147483647, %v4820_v29  ;;  %v5115_v62 = vmin.f32 %v4820_v29, 0.0 }
 0x6b7   :  { %v4969_v0 = vsub.f32 0.0, %v4822_v42  ;;  %v5124_v13 = vand.u32 2147483647, %v4822_v42  ;;  %v5116_v53 = vmin.f32 %v4822_v42, 0.0 }
 0x6b8   :  { %v4984_v21 = vand.u32 2147483647, %v4968_v57  ;;  %v5131_v59 = vsub.f32 0.0, %v5123_v58  ;;  %v4976_v24 = vmin.f32 %v4968_v57, 0.0 }
 0x6b9   :  { %v4985_v46 = vand.u32 2147483647, %v4969_v0  ;;  %v5132_v44 = vsub.f32 0.0, %v5124_v13  ;;  %v4977_v31 = vmin.f32 %v4969_v0, 0.0 }
 0x6ba   :  { %v4992_v54 = vsub.f32 0.0, %v4984_v21  ;;  %v5141_v43 = vmul.f32 1.442695, %v5131_v59 }
 0x6bb   :  { %v4993_v12 = vsub.f32 0.0, %v4985_v46  ;;  %v5143_v63 = vmul.f32 1.442695, %v5132_v44 }
 0x6bc   :  { %v5002_v23 = vmul.f32 1.442695, %v4992_v54  ;;  %7216 = vpow2.f32 %v5141_v43 }
 0x6bd   :  { %v5004_v37 = vmul.f32 1.442695, %v4993_v12  ;;  %7218 = vpow2.f32 %v5143_v63 }
 0x6be   :  { %7220 = vpow2.f32 %v5002_v23 }
 0x6bf   :  { %7222 = vpow2.f32 %v5004_v37 }
 0x6c6   :  { %v7217_v1 = vpop.eup %7216 }
 0x6c7   :  { %v7219_v16 = vpop.eup %7218  ;;  %v5155_v10 = vadd.f32 1.0, %v7217_v1 }
 0x6c8   :  { %v7221_v5 = vpop.eup %7220  ;;  %v5156_v60 = vadd.f32 1.0, %v7219_v16 }
 0x6c9   :  { %v7223_v15 = vpop.eup %7222  ;;  %v5016_v34 = vadd.f32 1.0, %v7221_v5  ;;  %7224 = vlog2.f32 %v5155_v10 }
 0x6ca   :  { %v5017_v30 = vadd.f32 1.0, %v7223_v15  ;;  %7226 = vlog2.f32 %v5156_v60 }
 0x6cb   :  { %7228 = vlog2.f32 %v5016_v34 }
 0x6cc   :  { %7230 = vlog2.f32 %v5017_v30 }
 0x6d3   :  { %v7225_v7 = vpop.eup %7224 }
 0x6d4   :  { %v7227_v4 = vpop.eup %7226  ;;  %v5166_v36 = vmul.f32 0.6931472, %v7225_v7 }
 0x6d5   :  { %v7229_v35 = vpop.eup %7228  ;;  %v5168_v49 = vmul.f32 0.6931472, %v7227_v4 }
 0x6d6   :  { %v7231_v48 = vpop.eup %7230  ;;  %v5027_v25 = vmul.f32 0.6931472, %v7229_v35  ;;  %v5179_v9 = vsub.f32 %v5115_v62, %v5166_v36 }
 0x6d7   :  { %v5029_v45 = vmul.f32 0.6931472, %v7231_v48  ;;  %v5180_v20 = vsub.f32 %v5116_v53, %v5168_v49 }
 0x6d8   :  { %v5040_v55 = vsub.f32 %v4976_v24, %v5027_v25  ;;  %v5187_v32 = vmax.f32 %v5179_v9, -23.02585 }
 0x6d9   :  { %v5041_v61 = vsub.f32 %v4977_v31, %v5029_v45  ;;  %v5188_v41 = vmax.f32 %v5180_v20, -23.02585 }
 0x6da   :  { %v5048_v28 = vmax.f32 %v5040_v55, -23.02585 }
 0x6db   :  { %v5049_v11 = vmax.f32 %v5041_v61, -23.02585  ;;  %v5202_v22 = vcombine.low %v5187_v32, %v5188_v41 }
 0x6dd   :  { %v5063_v52 = vcombine.low %v5048_v28, %v5049_v11  ;;  %v5218_v18 = vrot.slane %v5202_v22, %v9807_v38 }
 0x6df   :  { %v9816_v8 = vrot.slane %v5063_v52, %v9807_v38  ;;  %v9818_v19 = vcombine.low %v5211_v40, %v5218_v18 }
 0x6e1   :  { %v5094_v51 = vcombine.low %v9812_v33, %v9816_v8 }
 0x6f3   :  { %v4890_v27 = vpop.f32.mrb[130].mxu1 }
 0x6f4   :  { %v4891_v2 = vadd.f32 %v4890_v27, %v9792_v39  ;;  %v4892_v6 = vpop.f32.mrb[131].mxu1 }
 0x6f5   :  { %v4893_v3 = vadd.f32 %v4892_v6, %v9792_v39 }
 0x6f6   :  { %v4970_v26 = vsub.f32 0.0, %v4891_v2  ;;  %v5125_v29 = vand.u32 2147483647, %v4891_v2  ;;  %v5117_v5 = vmin.f32 %v4891_v2, 0.0 }
 0x6f7   :  { %v4971_v47 = vsub.f32 0.0, %v4893_v3  ;;  %v5126_v50 = vand.u32 2147483647, %v4893_v3  ;;  %v5118_v15 = vmin.f32 %v4893_v3, 0.0 }
 0x6f8   :  { %v4986_v42 = vand.u32 2147483647, %v4970_v26  ;;  %v5133_v57 = vsub.f32 0.0, %v5125_v29  ;;  %v4978_v30 = vmin.f32 %v4970_v26, 0.0 }
 0x6f9   :  { %v4987_v58 = vand.u32 2147483647, %v4971_v47  ;;  %v5134_v0 = vsub.f32 0.0, %v5126_v50  ;;  %v4979_v62 = vmin.f32 %v4971_v47, 0.0 }
 0x6fa   :  { %v4994_v13 = vsub.f32 0.0, %v4986_v42  ;;  %v5145_v21 = vmul.f32 1.442695, %v5133_v57 }
 0x6fb   :  { %v4995_v59 = vsub.f32 0.0, %v4987_v58  ;;  %v5147_v46 = vmul.f32 1.442695, %v5134_v0 }
 0x6fc   :  { %v5006_v44 = vmul.f32 1.442695, %v4994_v13  ;;  %7232 = vpow2.f32 %v5145_v21 }
 0x6fd   :  { %v5008_v54 = vmul.f32 1.442695, %v4995_v59  ;;  %7234 = vpow2.f32 %v5147_v46 }
 0x6fe   :  { %7236 = vpow2.f32 %v5006_v44 }
 0x6ff   :  { %7238 = vpow2.f32 %v5008_v54 }
 0x706   :  { %v7233_v43 = vpop.eup %7232 }
 0x707   :  { %v7235_v12 = vpop.eup %7234  ;;  %v5157_v63 = vadd.f32 1.0, %v7233_v43 }
 0x708   :  { %v7237_v23 = vpop.eup %7236  ;;  %v5158_v37 = vadd.f32 1.0, %v7235_v12 }
 0x709   :  { %v7239_v1 = vpop.eup %7238  ;;  %v5018_v16 = vadd.f32 1.0, %v7237_v23  ;;  %7240 = vlog2.f32 %v5157_v63 }
 0x70a   :  { %v5019_v10 = vadd.f32 1.0, %v7239_v1  ;;  %7242 = vlog2.f32 %v5158_v37 }
 0x70b   :  { %7244 = vlog2.f32 %v5018_v16 }
 0x70c   :  { %7246 = vlog2.f32 %v5019_v10 }
 0x713   :  { %v7241_v60 = vpop.eup %7240 }
 0x714   :  { %v7243_v34 = vpop.eup %7242  ;;  %v5170_v17 = vmul.f32 0.6931472, %v7241_v60 }
 0x715   :  { %v7245_v14 = vpop.eup %7244  ;;  %v5172_v7 = vmul.f32 0.6931472, %v7243_v34 }
 0x716   :  { %v7247_v56 = vpop.eup %7246  ;;  %v5031_v53 = vmul.f32 0.6931472, %v7245_v14  ;;  %v5181_v4 = vsub.f32 %v5117_v5, %v5170_v17 }
 0x717   :  { %v5033_v24 = vmul.f32 0.6931472, %v7247_v56  ;;  %v5182_v36 = vsub.f32 %v5118_v15, %v5172_v7 }
 0x718   :  { %v5042_v35 = vsub.f32 %v4978_v30, %v5031_v53  ;;  %v5189_v31 = vmax.f32 %v5181_v4, -23.02585 }
 0x719   :  { %v5043_v49 = vsub.f32 %v4979_v62, %v5033_v24  ;;  %v5190_v48 = vmax.f32 %v5182_v36, -23.02585 }
 0x71a   :  { %v9824_v25 = vmax.f32 %v5042_v35, -23.02585 }
 0x71b   :  { %v5051_v9 = vmax.f32 %v5043_v49, -23.02585  ;;  %v9826_v45 = vcombine.low %v5189_v31, %v5190_v48  ;;  %v5241_v48 = vrot.slane %v9818_v19, %v9807_v38 }
 0x71d   :  { %v5064_v20 = vcombine.low %v9824_v25, %v5051_v9  ;;  %v5225_v4 = vrot.slane %v9826_v45, %v9807_v38  ;;  %v5102_v9 = vrot.slane %v5094_v51, %v9807_v38 }
 0x71f   :  { %v5086_v36 = vrot.slane %v5064_v20, %v9807_v38 }
 0x733   :  { %v4961_v55 = vpop.f32.mrb[130].mxu0 }
 0x734   :  { %v4962_v32 = vadd.f32 %v4961_v55, %v9792_v39  ;;  %v4963_v61 = vpop.f32.mrb[131].mxu0 }
 0x735   :  { %v4964_v41 = vadd.f32 %v4963_v61, %v9792_v39 }
 0x736   :  { %v4972_v28 = vsub.f32 0.0, %v4962_v32  ;;  %v5127_v11 = vand.u32 2147483647, %v4962_v32  ;;  %v5119_v54 = vmin.f32 %v4962_v32, 0.0 }
 0x737   :  { %v4973_v22 = vsub.f32 0.0, %v4964_v41  ;;  %v5128_v40 = vand.u32 2147483647, %v4964_v41  ;;  %v5120_v63 = vmin.f32 %v4964_v41, 0.0 }
 0x738   :  { %v4988_v52 = vand.u32 2147483647, %v4972_v28  ;;  %v5135_v18 = vsub.f32 0.0, %v5127_v11  ;;  %v4980_v1 = vmin.f32 %v4972_v28, 0.0 }
 0x739   :  { %v4989_v27 = vand.u32 2147483647, %v4973_v22  ;;  %v5136_v2 = vsub.f32 0.0, %v5128_v40  ;;  %v4981_v5 = vmin.f32 %v4973_v22, 0.0 }
 0x73a   :  { %v4996_v6 = vsub.f32 0.0, %v4988_v52  ;;  %v5149_v3 = vmul.f32 1.442695, %v5135_v18 }
 0x73b   :  { %v4997_v26 = vsub.f32 0.0, %v4989_v27  ;;  %v5151_v29 = vmul.f32 1.442695, %v5136_v2 }
 0x73c   :  { %v5010_v47 = vmul.f32 1.442695, %v4996_v6  ;;  %7248 = vpow2.f32 %v5149_v3 }
 0x73d   :  { %v5012_v50 = vmul.f32 1.442695, %v4997_v26  ;;  %7250 = vpow2.f32 %v5151_v29 }
 0x73e   :  { %7252 = vpow2.f32 %v5010_v47 }
 0x73f   :  { %7254 = vpow2.f32 %v5012_v50 }
 0x746   :  { %v7249_v42 = vpop.eup %7248 }
 0x747   :  { %v7251_v39 = vpop.eup %7250  ;;  %v5159_v57 = vadd.f32 1.0, %v7249_v42 }
 0x748   :  { %v7253_v58 = vpop.eup %7252  ;;  %v5160_v0 = vadd.f32 1.0, %v7251_v39 }
 0x749   :  { %v7255_v13 = vpop.eup %7254  ;;  %v5020_v21 = vadd.f32 1.0, %v7253_v58  ;;  %7256 = vlog2.f32 %v5159_v57 }
 0x74a   :  { %v5021_v59 = vadd.f32 1.0, %v7255_v13  ;;  %7258 = vlog2.f32 %v5160_v0 }
 0x74b   :  { %7260 = vlog2.f32 %v5020_v21 }
 0x74c   :  { %7262 = vlog2.f32 %v5021_v59 }
 0x753   :  { %v7257_v46 = vpop.eup %7256 }
 0x754   :  { %v7259_v44 = vpop.eup %7258  ;;  %v5174_v43 = vmul.f32 0.6931472, %v7257_v46 }
 0x755   :  { %v7261_v12 = vpop.eup %7260  ;;  %v5176_v23 = vmul.f32 0.6931472, %v7259_v44 }
 0x756   :  { %v7263_v37 = vpop.eup %7262  ;;  %v5035_v16 = vmul.f32 0.6931472, %v7261_v12  ;;  %v5183_v10 = vsub.f32 %v5119_v54, %v5174_v43 }
 0x757   :  { %v5037_v60 = vmul.f32 0.6931472, %v7263_v37  ;;  %v5184_v15 = vsub.f32 %v5120_v63, %v5176_v23 }
 0x758   :  { %v5044_v34 = vsub.f32 %v4980_v1, %v5035_v16  ;;  %v5191_v30 = vmax.f32 %v5183_v10, -23.02585 }
 0x759   :  { %v5045_v17 = vsub.f32 %v4981_v5, %v5037_v60  ;;  %v5192_v14 = vmax.f32 %v5184_v15, -23.02585 }
 0x75a   :  { %v5052_v62 = vmax.f32 %v5044_v34, -23.02585 }
 0x75b   :  { %v5053_v7 = vmax.f32 %v5045_v17, -23.02585  ;;  %v5204_v56 = vcombine.low %v5191_v30, %v5192_v14 }
 0x75d   :  { %v5065_v53 = vcombine.low %v5052_v62, %v5053_v7  ;;  %v5232_v24 = vrot.slane %v5204_v56, %v9807_v38 }
 0x75f   :  { %v5093_v35 = vrot.slane %v5065_v53, %v9807_v38  ;;  %v5234_v31 = vcombine.low %v5225_v4, %v5232_v24 }
 0x761   :  { %v5095_v49 = vcombine.low %v5086_v36, %v5093_v35  ;;  %v5248_v25 = vrot.slane %v5234_v31, %v9807_v38 }
 0x763   :  { %v5109_v45 = vrot.slane %v5095_v49, %v9807_v38  ;;  %v5249_v55 = vcombine.low %v5241_v48, %v5248_v25 }
 0x765   :  { %v5110_v20 = vcombine.low %v5102_v9, %v5109_v45  ;;  %5252 = vst [vmem:[#allocation14 + $0x1] ss:$2 sm:$0xff] %v5249_v55 }
 0x767   :  { %5112 = vst [vmem:[#allocation14] ss:$2 sm:$0xff] %v5110_v20 }
 0x768   :  { %7512 = shalt.err (!%p7509_p10)
}
 0x769   :  { %s7513_s0 = scalar_lea.hbm %s9868_s12, 256 }
 0x76a   :  { %p7514_p11 = scmp.ne.s32.totalorder %s9868_s12, %s7513_s0  ;;  %p7517_p12 = scmp.lt.u32.totalorder %s7513_s0, %s9868_s12 }
 0x76c   :  { %p7519_p13 = pnand %p7517_p12, %p7514_p11 }
 0x76e   :  { %7522 = shalt.err (!%p7519_p13)
}
 0x76f   :  { %5262 = dma.vmem_to_hbm [thread:$0]  %s5260_s24, 256, %s9868_s12, [#allocation5]  }
 0x770   :  { %7531 = dma.done.wait [#allocation5], 256  }
 0x771   :  { %7532 = vsyncadd [#allocation5], 4294967040 }
 0x772   :  { %5266 = vsyncpa [#allocation4], 1 }
 0x773   :  { %5267 = vsyncpa [#allocation7], 1 }
 0x774   :  { %5268 = vsyncpa [#allocation10], 1 }
 0x775   :  { %5269 = vsyncpa [#allocation13], 1 }
 0x776   :  { %5270 = vsyncpa [#allocation5], 1 }

</bundles_post_ra>
